<compile_context>
chip_gen: v6e
topology: v6e:2x2x1
jax: 0.10.0
libtpu: 0.0.40
codegen_flags: <defaults>
</compile_context>

<pallas_src>
import functools

import jax
import jax.numpy as jnp
from jax import lax
from jax.experimental import pallas as pl
from jax.experimental.pallas import tpu as pltpu

PAD_ID = -1
NUM_DISCRETE_COORS = 128
COOR_RANGE = (-1.0, 1.0)
DIM_COOR_EMBED = 64
NUM_DISCRETE_CONF = 128
DIM_CONF_EMBED = 16
DIM_CODEBOOK = 192
ENCODER_DIMS = (64, 128, 256, 256, 576)
NVF = 3  # triangles

# Above the 16 MiB (v5e) / 32 MiB (v6e, v7x) scoped defaults, below v7x's 64 MiB physical.
VMEM_LIMIT = 48 * 1024 * 1024


def _round_up(x, m):
    return -(-x // m) * m


def _lane_pad(d):
    return _round_up(d, 128)


# ----------------------------- Pallas kernels ------------------------------ #

def _linear_kernel(x_ref, w_ref, b_ref, o_ref, *, relu):
    acc = jnp.dot(x_ref[...], w_ref[...], preferred_element_type=jnp.float32)
    acc = acc + b_ref[...]
    if relu:
        acc = jnp.maximum(acc, 0.0)
    o_ref[...] = acc.astype(o_ref.dtype)


def pallas_linear(x, w, b, *, relu=False, tile_m=128, out_dtype=jnp.bfloat16):
    """y = x @ w + b (optionally relu), row-tiled; bf16 in, f32 accumulate."""
    n, k = x.shape
    m = w.shape[1]
    return pl.pallas_call(
        functools.partial(_linear_kernel, relu=relu),
        out_shape=jax.ShapeDtypeStruct((n, m), out_dtype),
        grid=(n // tile_m,),
        in_specs=[
            pl.BlockSpec((tile_m, k), lambda i: (i, 0)),
            pl.BlockSpec((k, m), lambda i: (0, 0)),
            pl.BlockSpec((1, m), lambda i: (0, 0)),
        ],
        out_specs=pl.BlockSpec((tile_m, m), lambda i: (i, 0)),
        compiler_params=pltpu.CompilerParams(
            dimension_semantics=("parallel",),
            vmem_limit_bytes=VMEM_LIMIT,
        ),
    )(x, w, b.reshape(1, m))


def _make_sage_agg_kernel(apply_act_norm: bool, d_real: int):
    """SAGEConv aggregation + output, tiled over (row tile, adjacency K tile).

    adj:  [TM, TK]    bf16 edge counts (dst rows, src cols)
    xp:   [TK, Din]   bf16 relu(lin(x)) of source rows (project=True)
    x:    [TM, Din]   bf16 destination-row features (root/lin_r term)
    invd: [TM, 1]     f32 precomputed 1/max(deg, 1)
    wl:   [Din, Dout] bf16 lin_l weight     bl: [1, Dout] f32 lin_l bias
    wr:   [Din, Dout] bf16 lin_r weight (bias=False in PyG SAGEConv)
    optional lnw/lnb => SiLU + LayerNorm (init encoder layer; stats over d_real cols).
    acc:  [TM, Din]   f32 VMEM scratch accumulator for adj @ xp.
    """

    def kernel(adj_ref, xp_ref, x_ref, invd_ref, wl_ref, wr_ref, bl_ref, *rest):
        if apply_act_norm:
            lnw_ref, lnb_ref, o_ref, acc_ref = rest
        else:
            o_ref, acc_ref = rest

        k = pl.program_id(1)

        @pl.when(k == 0)
        def _():
            acc_ref[...] = jnp.zeros_like(acc_ref)

        acc_ref[...] += jnp.dot(adj_ref[...], xp_ref[...],
                                preferred_element_type=jnp.float32)

        @pl.when(k == pl.num_programs(1) - 1)
        def _():
            neigh = (acc_ref[...] * invd_ref[...]).astype(x_ref.dtype)   # mean aggregation
            out = (jnp.dot(neigh, wl_ref[...], preferred_element_type=jnp.float32)
                   + jnp.dot(x_ref[...], wr_ref[...], preferred_element_type=jnp.float32)
                   + bl_ref[...])
            # normalize=True: F.normalize(out, p=2, dim=-1, eps=1e-12)
            # (padded cols are exactly zero, so sums over the padded width are exact)
            ssq = jnp.sum(out * out, axis=-1, keepdims=True)
            out = out * lax.rsqrt(jnp.maximum(ssq, 1e-24))
            if apply_act_norm:
                out = out * jax.nn.sigmoid(out)                          # SiLU
                s1 = jnp.sum(out, axis=-1, keepdims=True)
                s2 = jnp.sum(out * out, axis=-1, keepdims=True)
                mu = s1 * (1.0 / d_real)
                var = jnp.maximum(s2 * (1.0 / d_real) - mu * mu, 0.0)
                out = (out - mu) * lax.rsqrt(var + 1e-5) * lnw_ref[...] + lnb_ref[...]
            o_ref[...] = out.astype(o_ref.dtype)

    return kernel


def pallas_sage_agg(x, xp, adj, inv_deg, wl, wr, bl, *, ln=None, d_real,
                    tile_m=128, tile_k=128, out_dtype=jnp.bfloat16):
    n, din_p = x.shape
    dout_p = wl.shape[1]
    args = [adj, xp, x, inv_deg, wl, wr, bl.reshape(1, -1)]
    in_specs = [
        pl.BlockSpec((tile_m, tile_k), lambda i, k: (i, k)),
        pl.BlockSpec((tile_k, din_p), lambda i, k: (k, 0)),
        pl.BlockSpec((tile_m, din_p), lambda i, k: (i, 0)),
        pl.BlockSpec((tile_m, 1), lambda i, k: (i, 0)),
        pl.BlockSpec((din_p, dout_p), lambda i, k: (0, 0)),
        pl.BlockSpec((din_p, dout_p), lambda i, k: (0, 0)),
        pl.BlockSpec((1, dout_p), lambda i, k: (0, 0)),
    ]
    if ln is not None:
        args += [ln[0].reshape(1, -1), ln[1].reshape(1, -1)]
        in_specs += [pl.BlockSpec((1, dout_p), lambda i, k: (0, 0)),
                     pl.BlockSpec((1, dout_p), lambda i, k: (0, 0))]
    return pl.pallas_call(
        _make_sage_agg_kernel(ln is not None, d_real),
        out_shape=jax.ShapeDtypeStruct((n, dout_p), out_dtype),
        grid=(n // tile_m, n // tile_k),
        in_specs=in_specs,
        out_specs=pl.BlockSpec((tile_m, dout_p), lambda i, k: (i, 0)),
        scratch_shapes=[pltpu.VMEM((tile_m, din_p), jnp.float32)],
        compiler_params=pltpu.CompilerParams(
            dimension_semantics=("parallel", "arbitrary"),
            vmem_limit_bytes=VMEM_LIMIT,
        ),
    )(*args)


# ------------------------------ plain-JAX glue ------------------------------ #

def discretize(t, lo, hi, num_discrete):
    t = (t - lo) / (hi - lo)
    t = t * num_discrete - 0.5
    return jnp.clip(jnp.round(t).astype(jnp.int32), 0, num_discrete - 1)


def init_params(key):
    keys = iter(jax.random.split(key, 64))

    def nrm(shape, scale=0.02):
        return (scale * jax.random.normal(next(keys), shape)).astype(jnp.float32)

    def pad2(w, r, c):
        return jnp.pad(w, ((0, r - w.shape[0]), (0, c - w.shape[1])))

    def pad1(v, c):
        return jnp.pad(v, (0, c - v.shape[0]))

    init_dim = DIM_COOR_EMBED * (3 * NVF) + DIM_CONF_EMBED * 7   # 688 (matches forward)
    init_dim_p = _lane_pad(init_dim)                             # 768
    cb_p = _lane_pad(DIM_CODEBOOK)                               # 256
    d0_p = _lane_pad(ENCODER_DIMS[0])                            # 128

    params = dict(
        coor_embed=nrm((NUM_DISCRETE_COORS, DIM_COOR_EMBED), 1.0),
        conf_embed=nrm((NUM_DISCRETE_CONF, DIM_CONF_EMBED), 1.0),
        project_in_w=pad2(nrm((init_dim, DIM_CODEBOOK)), init_dim_p, cb_p).astype(jnp.bfloat16),
        project_in_b=pad1(nrm((DIM_CODEBOOK,)), cb_p),
        ln_w=pad1(jnp.ones((ENCODER_DIMS[0],), jnp.float32), d0_p),   # nn.LayerNorm defaults
        ln_b=pad1(jnp.zeros((ENCODER_DIMS[0],), jnp.float32), d0_p),
        sage=[],
    )
    dims = (DIM_CODEBOOK,) + ENCODER_DIMS
    for din, dout in zip(dims[:-1], dims[1:]):
        din_p, dout_p = _lane_pad(din), _lane_pad(dout)
        wp = pad2(nrm((din, din)), din_p, din_p)                 # project (bias=True)
        bp = pad1(nrm((din,)), din_p)
        wl = pad2(nrm((din, dout)), din_p, dout_p)               # lin_l (bias=True)
        bl = pad1(nrm((dout,)), dout_p)
        wr = pad2(nrm((din, dout)), din_p, dout_p)               # lin_r (bias=False)
        params['sage'].append(dict(
            wp=wp.astype(jnp.bfloat16), bp=bp,
            wl=wl.astype(jnp.bfloat16),
            wr=wr.astype(jnp.bfloat16),
            bl=bl,
            dout_real=dout,
        ))
    return params


def mesh_autoencoder_forward(params, vertices, faces, faces_feature, face_edges):
    b, nv, _ = vertices.shape
    _, nf, nvf = faces.shape
    assert nvf == NVF

    face_mask = jnp.all(faces != PAD_ID, axis=-1)               # [b, nf]
    face_edges_mask = jnp.all(face_edges != PAD_ID, axis=-1)    # [b, e]

    faces_np = jnp.where(face_mask[..., None], faces, 0)        # masked_fill(~mask, 0)
    face_coords = jax.vmap(lambda v, f: v[f])(vertices, faces_np)   # [b, nf, 3, 3]

    disc_conf = discretize(faces_feature, 0.0, 1.0, NUM_DISCRETE_CONF)          # [b,nf,7]
    conf_embed = params['conf_embed'][disc_conf].reshape(b, nf, -1)             # [b,nf,112]

    disc_coords = discretize(face_coords, COOR_RANGE[0], COOR_RANGE[1],
                             NUM_DISCRETE_COORS).reshape(b, nf, -1)             # [b,nf,9]
    coor_embed = params['coor_embed'][disc_coords].reshape(b, nf, -1)           # [b,nf,576]

    face_embed = jnp.concatenate([coor_embed, conf_embed], axis=-1)             # [b,nf,688]
    feat_dim = face_embed.shape[-1]
    feat_dim_p = _lane_pad(feat_dim)

    n = b * nf
    n_pad = _round_up(n, 128)
    # 256-wide tiles fill the 256x256 MXU on v6e/v7x; 128 works everywhere (v5e MXU is 128).
    tile = 256 if n_pad % 256 == 0 else 128

    x = face_embed.reshape(n, feat_dim)
    x = jnp.pad(x, ((0, n_pad - n), (0, feat_dim_p - feat_dim))).astype(jnp.bfloat16)

    # project_in (row-tiled Pallas matmul, lane-padded 768 -> 256)
    x = pallas_linear(x, params['project_in_w'], params['project_in_b'],
                      relu=False, tile_m=tile)                                  # [n_pad,256] bf16

    # Dense adjacency in the globally-indexed padded node layout (rows = edge target).
    # Valid edges only reference valid faces, so this equals the compacted-graph result.
    # Edge counts are small integers -> exact in bf16; 1/deg (O(E) scatter-add) is hoisted
    # out of the kernels.
    # TODO(synk): for production-scale meshes replace this dense O(N^2) adjacency with a
    # scalar-prefetch CSR gather + segment-sum kernel (PrefetchScalarGridSpec).
    offs = (jnp.arange(b, dtype=jnp.int32) * nf)[:, None]
    src = jnp.where(face_edges_mask, face_edges[..., 0] + offs, 0).reshape(-1)
    dst = jnp.where(face_edges_mask, face_edges[..., 1] + offs, 0).reshape(-1)
    w = face_edges_mask.astype(jnp.float32).reshape(-1)
    adj = (jnp.zeros((n_pad, n_pad), jnp.float32)
           .at[dst, src].add(w)).astype(jnp.bfloat16)
    deg = jnp.zeros((n_pad,), jnp.float32).at[dst].add(w)                       # O(E) degrees
    inv_deg = (1.0 / jnp.maximum(deg, 1.0)).reshape(n_pad, 1)                   # [n_pad,1] f32

    # SAGEConv stack: per layer, relu(lin(x)) (project=True) then tiled mean-aggregation
    # + lin_l/lin_r matmuls + L2-normalize (+ SiLU/LayerNorm on the first layer).
    # TODO(synk): for tiny meshes all layers could be fused into one pallas_call keeping
    # adj/activations resident in VMEM to avoid per-layer launch + adj re-streaming.
    n_layers = len(params['sage'])
    for idx, lyr in enumerate(params['sage']):
        xp = pallas_linear(x, lyr['wp'], lyr['bp'], relu=True, tile_m=tile)
        ln = (params['ln_w'], params['ln_b']) if idx == 0 else None
        out_dtype = jnp.float32 if idx == n_layers - 1 else jnp.bfloat16
        x = pallas_sage_agg(x, xp, adj, inv_deg, lyr['wl'], lyr['wr'], lyr['bl'],
                            ln=ln, d_real=lyr['dout_real'],
                            tile_m=tile, tile_k=tile, out_dtype=out_dtype)

    out = x[:n, :ENCODER_DIMS[-1]].reshape(b, nf, -1)
    # masked_scatter into zeros == zero out padded faces
    out = out * face_mask[..., None].astype(out.dtype)
    return out, disc_coords


# ---------------------------------- main ----------------------------------- #

if __name__ == "__main__":
    key = jax.random.PRNGKey(0)
    kp, kv, kf, kff, ke = jax.random.split(key, 5)
    params = init_params(kp)

    b, nv, nf, e = 2, 12, 8, 16
    vertices = jax.random.uniform(kv, (b, nv, 3), jnp.float32, -1.0, 1.0)
    faces = jax.random.randint(kf, (b, nf, NVF), 0, nv, dtype=jnp.int32)
    faces = faces.at[1, -2:, :].set(PAD_ID)                 # pad out two faces in batch 1
    faces_feature = jax.random.uniform(kff, (b, nf, 7), jnp.float32, 0.0, 1.0)
    # edges reference only indices < 6 so they are valid faces in both batches
    face_edges = jax.random.randint(ke, (b, e, 2), 0, 6, dtype=jnp.int32)
    face_edges = face_edges.at[:, -3:, :].set(PAD_ID)       # pad out a few edges

    fwd = jax.jit(functools.partial(mesh_autoencoder_forward, params))
    encoded, face_coordinates = fwd(vertices, faces, faces_feature, face_edges)
    jax.block_until_ready((encoded, face_coordinates))

    assert encoded.shape == (b, nf, ENCODER_DIMS[-1])
    assert face_coordinates.shape == (b, nf, 3 * NVF)
    assert encoded.dtype == jnp.float32
    # TODO(synk): derive_face_edges_from_faces is not ported; face_edges are passed in
    # (the forward accepts them explicitly), and discrete coords are int32 (not int64).
    print("KERNEL_OK")
</pallas_src>

<mosaic_0001>
module attributes {stable_mosaic.version = 11 : i64} {
  func.func private @main(%arg0: i32) attributes {dimension_semantics = [#tpu.dimension_semantics<core_parallel>], iteration_bounds = array<i64: 2>, tpu.core_type = #tpu.core_type<sc_scalar_subcore>, window_params = []} {
    return
  }
}

module attributes {stable_mosaic.version = 11 : i64} {
  func.func private @main(%arg0: i32) attributes {dimension_semantics = [#tpu.dimension_semantics<core_parallel>], iteration_bounds = array<i64: 2>, tpu.core_type = #tpu.core_type<sc_scalar_subcore>, window_params = []} {
    return
  }
}

module attributes {stable_mosaic.version = 11 : i64} {
  func.func @_linear_kernel(%arg0: i32, %arg1: memref<128x768xbf16, #tpu.memory_space<vmem>>, %arg2: memref<768x256xbf16, #tpu.memory_space<vmem>>, %arg3: memref<1x256xf32, #tpu.memory_space<vmem>>, %arg4: memref<128x256xbf16, #tpu.memory_space<vmem>>) attributes {dimension_semantics = [#tpu.dimension_semantics<parallel>], iteration_bounds = array<i64: 1>, scalar_prefetch = 0 : i64, scratch_operands = 0 : i64, tpu.core_type = #tpu.core_type<tc>, window_params = [{transform_indices = @transform_0, window_bounds = array<i64: 128, 768>}, {pipeline_mode = #tpu.pipeline_mode<synchronous>, transform_indices = @transform_1, window_bounds = array<i64: 768, 256>}, {pipeline_mode = #tpu.pipeline_mode<synchronous>, transform_indices = @transform_2, window_bounds = array<i64: 1, 256>}, {transform_indices = @transform_3, window_bounds = array<i64: 128, 256>}]} {
    %c0 = arith.constant 0 : index
    %c0_0 = arith.constant 0 : index
    %0 = vector.load %arg1[%c0, %c0_0] : memref<128x768xbf16, #tpu.memory_space<vmem>>, vector<128x768xbf16>
    %c0_1 = arith.constant 0 : index
    %c0_2 = arith.constant 0 : index
    %1 = vector.load %arg2[%c0_1, %c0_2] : memref<768x256xbf16, #tpu.memory_space<vmem>>, vector<768x256xbf16>
    %cst = arith.constant dense<0.000000e+00> : vector<128x256xf32>
    %2 = tpu.matmul %0, %1, %cst {dimension_numbers = #tpu.dot_dimension_numbers<[1], [0], [0], [1], [0, 0, 1, 1], [], []>} : vector<128x768xbf16>, vector<768x256xbf16>, vector<128x256xf32> -> vector<128x256xf32>
    %c0_3 = arith.constant 0 : index
    %c0_4 = arith.constant 0 : index
    %3 = vector.load %arg3[%c0_3, %c0_4] : memref<1x256xf32, #tpu.memory_space<vmem>>, vector<1x256xf32>
    %4 = vector.broadcast %3 : vector<1x256xf32> to vector<128x256xf32>
    %5 = arith.addf %2, %4 : vector<128x256xf32>
    %6 = arith.truncf %5 : vector<128x256xf32> to vector<128x256xbf16>
    %c0_5 = arith.constant 0 : index
    %c0_6 = arith.constant 0 : index
    %7 = vector.load %arg4[%c0_5, %c0_6] : memref<128x256xbf16, #tpu.memory_space<vmem>>, vector<128x256xbf16>
    tpu.vector_store %arg4[%c0_5, %c0_6], %6 {strides = array<i32>} : memref<128x256xbf16, #tpu.memory_space<vmem>>, vector<128x256xbf16>,
    return
  }
  func.func @transform_0(%arg0: i32) -> (i32, i32) {
    %c0_i32 = arith.constant 0 : i32
    %c0_i32_0 = arith.constant 0 : i32
    return %arg0, %c0_i32 : i32, i32
  }
  func.func @transform_1(%arg0: i32) -> (i32, i32) {
    %c0_i32 = arith.constant 0 : i32
    %c0_i32_0 = arith.constant 0 : i32
    %c0_i32_1 = arith.constant 0 : i32
    return %c0_i32, %c0_i32_0 : i32, i32
  }
  func.func @transform_2(%arg0: i32) -> (i32, i32) {
    %c0_i32 = arith.constant 0 : i32
    %c0_i32_0 = arith.constant 0 : i32
    %c0_i32_1 = arith.constant 0 : i32
    return %c0_i32, %c0_i32_0 : i32, i32
  }
  func.func @transform_3(%arg0: i32) -> (i32, i32) {
    %c0_i32 = arith.constant 0 : i32
    %c0_i32_0 = arith.constant 0 : i32
    return %arg0, %c0_i32 : i32, i32
  }
}

module attributes {stable_mosaic.version = 11 : i64} {
  func.func @_linear_kernel(%arg0: i32, %arg1: memref<128x256xbf16, #tpu.memory_space<vmem>>, %arg2: memref<256x256xbf16, #tpu.memory_space<vmem>>, %arg3: memref<1x256xf32, #tpu.memory_space<vmem>>, %arg4: memref<128x256xbf16, #tpu.memory_space<vmem>>) attributes {dimension_semantics = [#tpu.dimension_semantics<parallel>], iteration_bounds = array<i64: 1>, scalar_prefetch = 0 : i64, scratch_operands = 0 : i64, tpu.core_type = #tpu.core_type<tc>, window_params = [{transform_indices = @transform_0, window_bounds = array<i64: 128, 256>}, {pipeline_mode = #tpu.pipeline_mode<synchronous>, transform_indices = @transform_1, window_bounds = array<i64: 256, 256>}, {pipeline_mode = #tpu.pipeline_mode<synchronous>, transform_indices = @transform_2, window_bounds = array<i64: 1, 256>}, {transform_indices = @transform_3, window_bounds = array<i64: 128, 256>}]} {
    %c0 = arith.constant 0 : index
    %c0_0 = arith.constant 0 : index
    %0 = vector.load %arg1[%c0, %c0_0] : memref<128x256xbf16, #tpu.memory_space<vmem>>, vector<128x256xbf16>
    %c0_1 = arith.constant 0 : index
    %c0_2 = arith.constant 0 : index
    %1 = vector.load %arg2[%c0_1, %c0_2] : memref<256x256xbf16, #tpu.memory_space<vmem>>, vector<256x256xbf16>
    %cst = arith.constant dense<0.000000e+00> : vector<128x256xf32>
    %2 = tpu.matmul %0, %1, %cst {dimension_numbers = #tpu.dot_dimension_numbers<[1], [0], [0], [1], [0, 0, 1, 1], [], []>} : vector<128x256xbf16>, vector<256x256xbf16>, vector<128x256xf32> -> vector<128x256xf32>
    %c0_3 = arith.constant 0 : index
    %c0_4 = arith.constant 0 : index
    %3 = vector.load %arg3[%c0_3, %c0_4] : memref<1x256xf32, #tpu.memory_space<vmem>>, vector<1x256xf32>
    %4 = vector.broadcast %3 : vector<1x256xf32> to vector<128x256xf32>
    %5 = arith.addf %2, %4 : vector<128x256xf32>
    %cst_5 = arith.constant 0.000000e+00 : f32
    %6 = vector.broadcast %cst_5 : f32 to vector<128x256xf32>
    %7 = arith.maximumf %5, %6 : vector<128x256xf32>
    %8 = arith.truncf %7 : vector<128x256xf32> to vector<128x256xbf16>
    %c0_6 = arith.constant 0 : index
    %c0_7 = arith.constant 0 : index
    %9 = vector.load %arg4[%c0_6, %c0_7] : memref<128x256xbf16, #tpu.memory_space<vmem>>, vector<128x256xbf16>
    tpu.vector_store %arg4[%c0_6, %c0_7], %8 {strides = array<i32>} : memref<128x256xbf16, #tpu.memory_space<vmem>>, vector<128x256xbf16>,
    return
  }
  func.func @transform_0(%arg0: i32) -> (i32, i32) {
    %c0_i32 = arith.constant 0 : i32
    %c0_i32_0 = arith.constant 0 : i32
    return %arg0, %c0_i32 : i32, i32
  }
  func.func @transform_1(%arg0: i32) -> (i32, i32) {
    %c0_i32 = arith.constant 0 : i32
    %c0_i32_0 = arith.constant 0 : i32
    %c0_i32_1 = arith.constant 0 : i32
    return %c0_i32, %c0_i32_0 : i32, i32
  }
  func.func @transform_2(%arg0: i32) -> (i32, i32) {
    %c0_i32 = arith.constant 0 : i32
    %c0_i32_0 = arith.constant 0 : i32
    %c0_i32_1 = arith.constant 0 : i32
    return %c0_i32, %c0_i32_0 : i32, i32
  }
  func.func @transform_3(%arg0: i32) -> (i32, i32) {
    %c0_i32 = arith.constant 0 : i32
    %c0_i32_0 = arith.constant 0 : i32
    return %arg0, %c0_i32 : i32, i32
  }
}

module attributes {stable_mosaic.version = 11 : i64} {
  func.func @kernel(%arg0: i32, %arg1: i32, %arg2: memref<128x128xbf16, #tpu.memory_space<vmem>>, %arg3: memref<128x256xbf16, #tpu.memory_space<vmem>>, %arg4: memref<128x256xbf16, #tpu.memory_space<vmem>>, %arg5: memref<128x1xf32, #tpu.memory_space<vmem>>, %arg6: memref<256x128xbf16, #tpu.memory_space<vmem>>, %arg7: memref<256x128xbf16, #tpu.memory_space<vmem>>, %arg8: memref<1x128xf32, #tpu.memory_space<vmem>>, %arg9: memref<1x128xf32, #tpu.memory_space<vmem>>, %arg10: memref<1x128xf32, #tpu.memory_space<vmem>>, %arg11: memref<128x128xbf16, #tpu.memory_space<vmem>>, %arg12: memref<128x256xf32, #tpu.memory_space<vmem>>) attributes {dimension_semantics = [#tpu.dimension_semantics<parallel>, #tpu.dimension_semantics<arbitrary>], iteration_bounds = array<i64: 1, 1>, scalar_prefetch = 0 : i64, scratch_operands = 1 : i64, tpu.core_type = #tpu.core_type<tc>, window_params = [{transform_indices = @transform_0, window_bounds = array<i64: 128, 128>}, {transform_indices = @transform_1, window_bounds = array<i64: 128, 256>}, {transform_indices = @transform_2, window_bounds = array<i64: 128, 256>}, {transform_indices = @transform_3, window_bounds = array<i64: 128, 1>}, {pipeline_mode = #tpu.pipeline_mode<synchronous>, transform_indices = @transform_4, window_bounds = array<i64: 256, 128>}, {pipeline_mode = #tpu.pipeline_mode<synchronous>, transform_indices = @transform_5, window_bounds = array<i64: 256, 128>}, {pipeline_mode = #tpu.pipeline_mode<synchronous>, transform_indices = @transform_6, window_bounds = array<i64: 1, 128>}, {pipeline_mode = #tpu.pipeline_mode<synchronous>, transform_indices = @transform_7, window_bounds = array<i64: 1, 128>}, {pipeline_mode = #tpu.pipeline_mode<synchronous>, transform_indices = @transform_8, window_bounds = array<i64: 1, 128>}, {transform_indices = @transform_9, window_bounds = array<i64: 128, 128>}]} {
    %c0_i32 = arith.constant 0 : i32
    %0 = arith.cmpi eq, %arg1, %c0_i32 : i32
    %1 = arith.extui %0 : i1 to i32
    %c0_i32_0 = arith.constant 0 : i32
    %2 = arith.cmpi ne, %1, %c0_i32_0 : i32
    scf.if %2 {
      %cst_10 = arith.constant 0.000000e+00 : f32
      %12 = vector.broadcast %cst_10 : f32 to vector<128x256xf32>
      %c0_11 = arith.constant 0 : index
      %c0_12 = arith.constant 0 : index
      %13 = vector.load %arg12[%c0_11, %c0_12] : memref<128x256xf32, #tpu.memory_space<vmem>>, vector<128x256xf32>
      tpu.vector_store %arg12[%c0_11, %c0_12], %12 {strides = array<i32>} : memref<128x256xf32, #tpu.memory_space<vmem>>, vector<128x256xf32>,
    } else {
    }
    %c0 = arith.constant 0 : index
    %c0_1 = arith.constant 0 : index
    %3 = vector.load %arg12[%c0, %c0_1] : memref<128x256xf32, #tpu.memory_space<vmem>>, vector<128x256xf32>
    %c0_2 = arith.constant 0 : index
    %c0_3 = arith.constant 0 : index
    %4 = vector.load %arg2[%c0_2, %c0_3] : memref<128x128xbf16, #tpu.memory_space<vmem>>, vector<128x128xbf16>
    %c0_4 = arith.constant 0 : index
    %c0_5 = arith.constant 0 : index
    %5 = vector.load %arg3[%c0_4, %c0_5] : memref<128x256xbf16, #tpu.memory_space<vmem>>, vector<128x256xbf16>
    %cst = arith.constant dense<0.000000e+00> : vector<128x256xf32>
    %6 = tpu.matmul %4, %5, %cst {dimension_numbers = #tpu.dot_dimension_numbers<[1], [0], [0], [1], [0, 0, 1, 1], [], []>} : vector<128x128xbf16>, vector<128x256xbf16>, vector<128x256xf32> -> vector<128x256xf32>
    %7 = arith.addf %3, %6 : vector<128x256xf32>
    %c0_6 = arith.constant 0 : index
    %c0_7 = arith.constant 0 : index
    %8 = vector.load %arg12[%c0_6, %c0_7] : memref<128x256xf32, #tpu.memory_space<vmem>>, vector<128x256xf32>
    tpu.vector_store %arg12[%c0_6, %c0_7], %7 {strides = array<i32>} : memref<128x256xf32, #tpu.memory_space<vmem>>, vector<128x256xf32>,
    %c0_i32_8 = arith.constant 0 : i32
    %9 = arith.cmpi eq, %arg1, %c0_i32_8 : i32
    %10 = arith.extui %9 : i1 to i32
    %c0_i32_9 = arith.constant 0 : i32
    %11 = arith.cmpi ne, %10, %c0_i32_9 : i32
    scf.if %11 {
      %c0_10 = arith.constant 0 : index
      %c0_11 = arith.constant 0 : index
      %12 = vector.load %arg12[%c0_10, %c0_11] : memref<128x256xf32, #tpu.memory_space<vmem>>, vector<128x256xf32>
      %c0_12 = arith.constant 0 : index
      %c0_13 = arith.constant 0 : index
      %13 = vector.load %arg5[%c0_12, %c0_13] : memref<128x1xf32, #tpu.memory_space<vmem>>, vector<128x1xf32>
      %14 = vector.broadcast %13 : vector<128x1xf32> to vector<128x256xf32>
      %15 = arith.mulf %12, %14 : vector<128x256xf32>
      %16 = arith.truncf %15 : vector<128x256xf32> to vector<128x256xbf16>
      %c0_14 = arith.constant 0 : index
      %c0_15 = arith.constant 0 : index
      %17 = vector.load %arg6[%c0_14, %c0_15] : memref<256x128xbf16, #tpu.memory_space<vmem>>, vector<256x128xbf16>
      %cst_16 = arith.constant dense<0.000000e+00> : vector<128x128xf32>
      %18 = tpu.matmul %16, %17, %cst_16 {dimension_numbers = #tpu.dot_dimension_numbers<[1], [0], [0], [1], [0, 0, 1, 1], [], []>} : vector<128x256xbf16>, vector<256x128xbf16>, vector<128x128xf32> -> vector<128x128xf32>
      %c0_17 = arith.constant 0 : index
      %c0_18 = arith.constant 0 : index
      %19 = vector.load %arg4[%c0_17, %c0_18] : memref<128x256xbf16, #tpu.memory_space<vmem>>, vector<128x256xbf16>
      %c0_19 = arith.constant 0 : index
      %c0_20 = arith.constant 0 : index
      %20 = vector.load %arg7[%c0_19, %c0_20] : memref<256x128xbf16, #tpu.memory_space<vmem>>, vector<256x128xbf16>
      %cst_21 = arith.constant dense<0.000000e+00> : vector<128x128xf32>
      %21 = tpu.matmul %19, %20, %cst_21 {dimension_numbers = #tpu.dot_dimension_numbers<[1], [0], [0], [1], [0, 0, 1, 1], [], []>} : vector<128x256xbf16>, vector<256x128xbf16>, vector<128x128xf32> -> vector<128x128xf32>
      %22 = arith.addf %18, %21 : vector<128x128xf32>
      %c0_22 = arith.constant 0 : index
      %c0_23 = arith.constant 0 : index
      %23 = vector.load %arg8[%c0_22, %c0_23] : memref<1x128xf32, #tpu.memory_space<vmem>>, vector<1x128xf32>
      %24 = vector.broadcast %23 : vector<1x128xf32> to vector<128x128xf32>
      %25 = arith.addf %22, %24 : vector<128x128xf32>
      %26 = arith.mulf %25, %25 : vector<128x128xf32>
      %cst_24 = arith.constant dense<0.000000e+00> : vector<128xf32>
      %27 = vector.multi_reduction <add>, %26, %cst_24 [1] : vector<128x128xf32> to vector<128xf32>
      %28 = vector.shape_cast %27 : vector<128xf32> to vector<128x1xf32>
      %cst_25 = arith.constant 1.000000e-24 : f32
      %29 = vector.broadcast %cst_25 : f32 to vector<128x1xf32>
      %30 = arith.maximumf %28, %29 : vector<128x1xf32>
      %31 = math.rsqrt %30 : vector<128x1xf32>
      %32 = vector.broadcast %31 : vector<128x1xf32> to vector<128x128xf32>
      %33 = arith.mulf %25, %32 : vector<128x128xf32>
      %34 = arith.negf %33 : vector<128x128xf32>
      %35 = math.exp %34 : vector<128x128xf32>
      %cst_26 = arith.constant 1.000000e+00 : f32
      %36 = vector.broadcast %cst_26 : f32 to vector<128x128xf32>
      %37 = arith.addf %36, %35 : vector<128x128xf32>
      %38 = arith.divf %36, %37 : vector<128x128xf32>
      %39 = arith.mulf %33, %38 : vector<128x128xf32>
      %cst_27 = arith.constant dense<0.000000e+00> : vector<128xf32>
      %40 = vector.multi_reduction <add>, %39, %cst_27 [1] : vector<128x128xf32> to vector<128xf32>
      %41 = vector.shape_cast %40 : vector<128xf32> to vector<128x1xf32>
      %42 = arith.mulf %39, %39 : vector<128x128xf32>
      %cst_28 = arith.constant dense<0.000000e+00> : vector<128xf32>
      %43 = vector.multi_reduction <add>, %42, %cst_28 [1] : vector<128x128xf32> to vector<128xf32>
      %44 = vector.shape_cast %43 : vector<128xf32> to vector<128x1xf32>
      %cst_29 = arith.constant 1.562500e-02 : f32
      %45 = vector.broadcast %cst_29 : f32 to vector<128x1xf32>
      %46 = arith.mulf %41, %45 : vector<128x1xf32>
      %cst_30 = arith.constant 1.562500e-02 : f32
      %47 = vector.broadcast %cst_30 : f32 to vector<128x1xf32>
      %48 = arith.mulf %44, %47 : vector<128x1xf32>
      %49 = arith.mulf %46, %46 : vector<128x1xf32>
      %50 = arith.subf %48, %49 : vector<128x1xf32>
      %cst_31 = arith.constant 0.000000e+00 : f32
      %51 = vector.broadcast %cst_31 : f32 to vector<128x1xf32>
      %52 = arith.maximumf %50, %51 : vector<128x1xf32>
      %53 = vector.broadcast %46 : vector<128x1xf32> to vector<128x128xf32>
      %54 = arith.subf %39, %53 : vector<128x128xf32>
      %cst_32 = arith.constant 9.99999974E-6 : f32
      %55 = vector.broadcast %cst_32 : f32 to vector<128x1xf32>
      %56 = arith.addf %52, %55 : vector<128x1xf32>
      %57 = math.rsqrt %56 : vector<128x1xf32>
      %58 = vector.broadcast %57 : vector<128x1xf32> to vector<128x128xf32>
      %59 = arith.mulf %54, %58 : vector<128x128xf32>
      %c0_33 = arith.constant 0 : index
      %c0_34 = arith.constant 0 : index
      %60 = vector.load %arg9[%c0_33, %c0_34] : memref<1x128xf32, #tpu.memory_space<vmem>>, vector<1x128xf32>
      %61 = vector.broadcast %60 : vector<1x128xf32> to vector<128x128xf32>
      %62 = arith.mulf %59, %61 : vector<128x128xf32>
      %c0_35 = arith.constant 0 : index
      %c0_36 = arith.constant 0 : index
      %63 = vector.load %arg10[%c0_35, %c0_36] : memref<1x128xf32, #tpu.memory_space<vmem>>, vector<1x128xf32>
      %64 = vector.broadcast %63 : vector<1x128xf32> to vector<128x128xf32>
      %65 = arith.addf %62, %64 : vector<128x128xf32>
      %66 = arith.truncf %65 : vector<128x128xf32> to vector<128x128xbf16>
      %c0_37 = arith.constant 0 : index
      %c0_38 = arith.constant 0 : index
      %67 = vector.load %arg11[%c0_37, %c0_38] : memref<128x128xbf16, #tpu.memory_space<vmem>>, vector<128x128xbf16>
      tpu.vector_store %arg11[%c0_37, %c0_38], %66 {strides = array<i32>} : memref<128x128xbf16, #tpu.memory_space<vmem>>, vector<128x128xbf16>,
    } else {
    }
    return
  }
  func.func @transform_0(%arg0: i32, %arg1: i32) -> (i32, i32) {
    %c0_i32 = arith.constant 0 : i32
    return %arg0, %arg1 : i32, i32
  }
  func.func @transform_1(%arg0: i32, %arg1: i32) -> (i32, i32) {
    %c0_i32 = arith.constant 0 : i32
    %c0_i32_0 = arith.constant 0 : i32
    return %arg1, %c0_i32 : i32, i32
  }
  func.func @transform_2(%arg0: i32, %arg1: i32) -> (i32, i32) {
    %c0_i32 = arith.constant 0 : i32
    %c0_i32_0 = arith.constant 0 : i32
    return %arg0, %c0_i32 : i32, i32
  }
  func.func @transform_3(%arg0: i32, %arg1: i32) -> (i32, i32) {
    %c0_i32 = arith.constant 0 : i32
    %c0_i32_0 = arith.constant 0 : i32
    return %arg0, %c0_i32 : i32, i32
  }
  func.func @transform_4(%arg0: i32, %arg1: i32) -> (i32, i32) {
    %c0_i32 = arith.constant 0 : i32
    %c0_i32_0 = arith.constant 0 : i32
    %c0_i32_1 = arith.constant 0 : i32
    return %c0_i32, %c0_i32_0 : i32, i32
  }
  func.func @transform_5(%arg0: i32, %arg1: i32) -> (i32, i32) {
    %c0_i32 = arith.constant 0 : i32
    %c0_i32_0 = arith.constant 0 : i32
    %c0_i32_1 = arith.constant 0 : i32
    return %c0_i32, %c0_i32_0 : i32, i32
  }
  func.func @transform_6(%arg0: i32, %arg1: i32) -> (i32, i32) {
    %c0_i32 = arith.constant 0 : i32
    %c0_i32_0 = arith.constant 0 : i32
    %c0_i32_1 = arith.constant 0 : i32
    return %c0_i32, %c0_i32_0 : i32, i32
  }
  func.func @transform_7(%arg0: i32, %arg1: i32) -> (i32, i32) {
    %c0_i32 = arith.constant 0 : i32
    %c0_i32_0 = arith.constant 0 : i32
    %c0_i32_1 = arith.constant 0 : i32
    return %c0_i32, %c0_i32_0 : i32, i32
  }
  func.func @transform_8(%arg0: i32, %arg1: i32) -> (i32, i32) {
    %c0_i32 = arith.constant 0 : i32
    %c0_i32_0 = arith.constant 0 : i32
    %c0_i32_1 = arith.constant 0 : i32
    return %c0_i32, %c0_i32_0 : i32, i32
  }
  func.func @transform_9(%arg0: i32, %arg1: i32) -> (i32, i32) {
    %c0_i32 = arith.constant 0 : i32
    %c0_i32_0 = arith.constant 0 : i32
    return %arg0, %c0_i32 : i32, i32
  }
}

module attributes {stable_mosaic.version = 11 : i64} {
  func.func @_linear_kernel(%arg0: i32, %arg1: memref<128x128xbf16, #tpu.memory_space<vmem>>, %arg2: memref<128x128xbf16, #tpu.memory_space<vmem>>, %arg3: memref<1x128xf32, #tpu.memory_space<vmem>>, %arg4: memref<128x128xbf16, #tpu.memory_space<vmem>>) attributes {dimension_semantics = [#tpu.dimension_semantics<parallel>], iteration_bounds = array<i64: 1>, scalar_prefetch = 0 : i64, scratch_operands = 0 : i64, tpu.core_type = #tpu.core_type<tc>, window_params = [{transform_indices = @transform_0, window_bounds = array<i64: 128, 128>}, {pipeline_mode = #tpu.pipeline_mode<synchronous>, transform_indices = @transform_1, window_bounds = array<i64: 128, 128>}, {pipeline_mode = #tpu.pipeline_mode<synchronous>, transform_indices = @transform_2, window_bounds = array<i64: 1, 128>}, {transform_indices = @transform_3, window_bounds = array<i64: 128, 128>}]} {
    %c0 = arith.constant 0 : index
    %c0_0 = arith.constant 0 : index
    %0 = vector.load %arg1[%c0, %c0_0] : memref<128x128xbf16, #tpu.memory_space<vmem>>, vector<128x128xbf16>
    %c0_1 = arith.constant 0 : index
    %c0_2 = arith.constant 0 : index
    %1 = vector.load %arg2[%c0_1, %c0_2] : memref<128x128xbf16, #tpu.memory_space<vmem>>, vector<128x128xbf16>
    %cst = arith.constant dense<0.000000e+00> : vector<128x128xf32>
    %2 = tpu.matmul %0, %1, %cst {dimension_numbers = #tpu.dot_dimension_numbers<[1], [0], [0], [1], [0, 0, 1, 1], [], []>} : vector<128x128xbf16>, vector<128x128xbf16>, vector<128x128xf32> -> vector<128x128xf32>
    %c0_3 = arith.constant 0 : index
    %c0_4 = arith.constant 0 : index
    %3 = vector.load %arg3[%c0_3, %c0_4] : memref<1x128xf32, #tpu.memory_space<vmem>>, vector<1x128xf32>
    %4 = vector.broadcast %3 : vector<1x128xf32> to vector<128x128xf32>
    %5 = arith.addf %2, %4 : vector<128x128xf32>
    %cst_5 = arith.constant 0.000000e+00 : f32
    %6 = vector.broadcast %cst_5 : f32 to vector<128x128xf32>
    %7 = arith.maximumf %5, %6 : vector<128x128xf32>
    %8 = arith.truncf %7 : vector<128x128xf32> to vector<128x128xbf16>
    %c0_6 = arith.constant 0 : index
    %c0_7 = arith.constant 0 : index
    %9 = vector.load %arg4[%c0_6, %c0_7] : memref<128x128xbf16, #tpu.memory_space<vmem>>, vector<128x128xbf16>
    tpu.vector_store %arg4[%c0_6, %c0_7], %8 {strides = array<i32>} : memref<128x128xbf16, #tpu.memory_space<vmem>>, vector<128x128xbf16>,
    return
  }
  func.func @transform_0(%arg0: i32) -> (i32, i32) {
    %c0_i32 = arith.constant 0 : i32
    %c0_i32_0 = arith.constant 0 : i32
    return %arg0, %c0_i32 : i32, i32
  }
  func.func @transform_1(%arg0: i32) -> (i32, i32) {
    %c0_i32 = arith.constant 0 : i32
    %c0_i32_0 = arith.constant 0 : i32
    %c0_i32_1 = arith.constant 0 : i32
    return %c0_i32, %c0_i32_0 : i32, i32
  }
  func.func @transform_2(%arg0: i32) -> (i32, i32) {
    %c0_i32 = arith.constant 0 : i32
    %c0_i32_0 = arith.constant 0 : i32
    %c0_i32_1 = arith.constant 0 : i32
    return %c0_i32, %c0_i32_0 : i32, i32
  }
  func.func @transform_3(%arg0: i32) -> (i32, i32) {
    %c0_i32 = arith.constant 0 : i32
    %c0_i32_0 = arith.constant 0 : i32
    return %arg0, %c0_i32 : i32, i32
  }
}

module attributes {stable_mosaic.version = 11 : i64} {
  func.func @kernel(%arg0: i32, %arg1: i32, %arg2: memref<128x128xbf16, #tpu.memory_space<vmem>>, %arg3: memref<128x128xbf16, #tpu.memory_space<vmem>>, %arg4: memref<128x128xbf16, #tpu.memory_space<vmem>>, %arg5: memref<128x1xf32, #tpu.memory_space<vmem>>, %arg6: memref<128x256xbf16, #tpu.memory_space<vmem>>, %arg7: memref<128x256xbf16, #tpu.memory_space<vmem>>, %arg8: memref<1x256xf32, #tpu.memory_space<vmem>>, %arg9: memref<128x256xbf16, #tpu.memory_space<vmem>>, %arg10: memref<128x128xf32, #tpu.memory_space<vmem>>) attributes {dimension_semantics = [#tpu.dimension_semantics<parallel>, #tpu.dimension_semantics<arbitrary>], iteration_bounds = array<i64: 1, 1>, scalar_prefetch = 0 : i64, scratch_operands = 1 : i64, tpu.core_type = #tpu.core_type<tc>, window_params = [{transform_indices = @transform_0, window_bounds = array<i64: 128, 128>}, {transform_indices = @transform_1, window_bounds = array<i64: 128, 128>}, {transform_indices = @transform_2, window_bounds = array<i64: 128, 128>}, {transform_indices = @transform_3, window_bounds = array<i64: 128, 1>}, {pipeline_mode = #tpu.pipeline_mode<synchronous>, transform_indices = @transform_4, window_bounds = array<i64: 128, 256>}, {pipeline_mode = #tpu.pipeline_mode<synchronous>, transform_indices = @transform_5, window_bounds = array<i64: 128, 256>}, {pipeline_mode = #tpu.pipeline_mode<synchronous>, transform_indices = @transform_6, window_bounds = array<i64: 1, 256>}, {transform_indices = @transform_7, window_bounds = array<i64: 128, 256>}]} {
    %c0_i32 = arith.constant 0 : i32
    %0 = arith.cmpi eq, %arg1, %c0_i32 : i32
    %1 = arith.extui %0 : i1 to i32
    %c0_i32_0 = arith.constant 0 : i32
    %2 = arith.cmpi ne, %1, %c0_i32_0 : i32
    scf.if %2 {
      %cst_10 = arith.constant 0.000000e+00 : f32
      %12 = vector.broadcast %cst_10 : f32 to vector<128x128xf32>
      %c0_11 = arith.constant 0 : index
      %c0_12 = arith.constant 0 : index
      %13 = vector.load %arg10[%c0_11, %c0_12] : memref<128x128xf32, #tpu.memory_space<vmem>>, vector<128x128xf32>
      tpu.vector_store %arg10[%c0_11, %c0_12], %12 {strides = array<i32>} : memref<128x128xf32, #tpu.memory_space<vmem>>, vector<128x128xf32>,
    } else {
    }
    %c0 = arith.constant 0 : index
    %c0_1 = arith.constant 0 : index
    %3 = vector.load %arg10[%c0, %c0_1] : memref<128x128xf32, #tpu.memory_space<vmem>>, vector<128x128xf32>
    %c0_2 = arith.constant 0 : index
    %c0_3 = arith.constant 0 : index
    %4 = vector.load %arg2[%c0_2, %c0_3] : memref<128x128xbf16, #tpu.memory_space<vmem>>, vector<128x128xbf16>
    %c0_4 = arith.constant 0 : index
    %c0_5 = arith.constant 0 : index
    %5 = vector.load %arg3[%c0_4, %c0_5] : memref<128x128xbf16, #tpu.memory_space<vmem>>, vector<128x128xbf16>
    %cst = arith.constant dense<0.000000e+00> : vector<128x128xf32>
    %6 = tpu.matmul %4, %5, %cst {dimension_numbers = #tpu.dot_dimension_numbers<[1], [0], [0], [1], [0, 0, 1, 1], [], []>} : vector<128x128xbf16>, vector<128x128xbf16>, vector<128x128xf32> -> vector<128x128xf32>
    %7 = arith.addf %3, %6 : vector<128x128xf32>
    %c0_6 = arith.constant 0 : index
    %c0_7 = arith.constant 0 : index
    %8 = vector.load %arg10[%c0_6, %c0_7] : memref<128x128xf32, #tpu.memory_space<vmem>>, vector<128x128xf32>
    tpu.vector_store %arg10[%c0_6, %c0_7], %7 {strides = array<i32>} : memref<128x128xf32, #tpu.memory_space<vmem>>, vector<128x128xf32>,
    %c0_i32_8 = arith.constant 0 : i32
    %9 = arith.cmpi eq, %arg1, %c0_i32_8 : i32
    %10 = arith.extui %9 : i1 to i32
    %c0_i32_9 = arith.constant 0 : i32
    %11 = arith.cmpi ne, %10, %c0_i32_9 : i32
    scf.if %11 {
      %c0_10 = arith.constant 0 : index
      %c0_11 = arith.constant 0 : index
      %12 = vector.load %arg10[%c0_10, %c0_11] : memref<128x128xf32, #tpu.memory_space<vmem>>, vector<128x128xf32>
      %c0_12 = arith.constant 0 : index
      %c0_13 = arith.constant 0 : index
      %13 = vector.load %arg5[%c0_12, %c0_13] : memref<128x1xf32, #tpu.memory_space<vmem>>, vector<128x1xf32>
      %14 = vector.broadcast %13 : vector<128x1xf32> to vector<128x128xf32>
      %15 = arith.mulf %12, %14 : vector<128x128xf32>
      %16 = arith.truncf %15 : vector<128x128xf32> to vector<128x128xbf16>
      %c0_14 = arith.constant 0 : index
      %c0_15 = arith.constant 0 : index
      %17 = vector.load %arg6[%c0_14, %c0_15] : memref<128x256xbf16, #tpu.memory_space<vmem>>, vector<128x256xbf16>
      %cst_16 = arith.constant dense<0.000000e+00> : vector<128x256xf32>
      %18 = tpu.matmul %16, %17, %cst_16 {dimension_numbers = #tpu.dot_dimension_numbers<[1], [0], [0], [1], [0, 0, 1, 1], [], []>} : vector<128x128xbf16>, vector<128x256xbf16>, vector<128x256xf32> -> vector<128x256xf32>
      %c0_17 = arith.constant 0 : index
      %c0_18 = arith.constant 0 : index
      %19 = vector.load %arg4[%c0_17, %c0_18] : memref<128x128xbf16, #tpu.memory_space<vmem>>, vector<128x128xbf16>
      %c0_19 = arith.constant 0 : index
      %c0_20 = arith.constant 0 : index
      %20 = vector.load %arg7[%c0_19, %c0_20] : memref<128x256xbf16, #tpu.memory_space<vmem>>, vector<128x256xbf16>
      %cst_21 = arith.constant dense<0.000000e+00> : vector<128x256xf32>
      %21 = tpu.matmul %19, %20, %cst_21 {dimension_numbers = #tpu.dot_dimension_numbers<[1], [0], [0], [1], [0, 0, 1, 1], [], []>} : vector<128x128xbf16>, vector<128x256xbf16>, vector<128x256xf32> -> vector<128x256xf32>
      %22 = arith.addf %18, %21 : vector<128x256xf32>
      %c0_22 = arith.constant 0 : index
      %c0_23 = arith.constant 0 : index
      %23 = vector.load %arg8[%c0_22, %c0_23] : memref<1x256xf32, #tpu.memory_space<vmem>>, vector<1x256xf32>
      %24 = vector.broadcast %23 : vector<1x256xf32> to vector<128x256xf32>
      %25 = arith.addf %22, %24 : vector<128x256xf32>
      %26 = arith.mulf %25, %25 : vector<128x256xf32>
      %cst_24 = arith.constant dense<0.000000e+00> : vector<128xf32>
      %27 = vector.multi_reduction <add>, %26, %cst_24 [1] : vector<128x256xf32> to vector<128xf32>
      %28 = vector.shape_cast %27 : vector<128xf32> to vector<128x1xf32>
      %cst_25 = arith.constant 1.000000e-24 : f32
      %29 = vector.broadcast %cst_25 : f32 to vector<128x1xf32>
      %30 = arith.maximumf %28, %29 : vector<128x1xf32>
      %31 = math.rsqrt %30 : vector<128x1xf32>
      %32 = vector.broadcast %31 : vector<128x1xf32> to vector<128x256xf32>
      %33 = arith.mulf %25, %32 : vector<128x256xf32>
      %34 = arith.truncf %33 : vector<128x256xf32> to vector<128x256xbf16>
      %c0_26 = arith.constant 0 : index
      %c0_27 = arith.constant 0 : index
      %35 = vector.load %arg9[%c0_26, %c0_27] : memref<128x256xbf16, #tpu.memory_space<vmem>>, vector<128x256xbf16>
      tpu.vector_store %arg9[%c0_26, %c0_27], %34 {strides = array<i32>} : memref<128x256xbf16, #tpu.memory_space<vmem>>, vector<128x256xbf16>,
    } else {
    }
    return
  }
  func.func @transform_0(%arg0: i32, %arg1: i32) -> (i32, i32) {
    %c0_i32 = arith.constant 0 : i32
    return %arg0, %arg1 : i32, i32
  }
  func.func @transform_1(%arg0: i32, %arg1: i32) -> (i32, i32) {
    %c0_i32 = arith.constant 0 : i32
    %c0_i32_0 = arith.constant 0 : i32
    return %arg1, %c0_i32 : i32, i32
  }
  func.func @transform_2(%arg0: i32, %arg1: i32) -> (i32, i32) {
    %c0_i32 = arith.constant 0 : i32
    %c0_i32_0 = arith.constant 0 : i32
    return %arg0, %c0_i32 : i32, i32
  }
  func.func @transform_3(%arg0: i32, %arg1: i32) -> (i32, i32) {
    %c0_i32 = arith.constant 0 : i32
    %c0_i32_0 = arith.constant 0 : i32
    return %arg0, %c0_i32 : i32, i32
  }
  func.func @transform_4(%arg0: i32, %arg1: i32) -> (i32, i32) {
    %c0_i32 = arith.constant 0 : i32
    %c0_i32_0 = arith.constant 0 : i32
    %c0_i32_1 = arith.constant 0 : i32
    return %c0_i32, %c0_i32_0 : i32, i32
  }
  func.func @transform_5(%arg0: i32, %arg1: i32) -> (i32, i32) {
    %c0_i32 = arith.constant 0 : i32
    %c0_i32_0 = arith.constant 0 : i32
    %c0_i32_1 = arith.constant 0 : i32
    return %c0_i32, %c0_i32_0 : i32, i32
  }
  func.func @transform_6(%arg0: i32, %arg1: i32) -> (i32, i32) {
    %c0_i32 = arith.constant 0 : i32
    %c0_i32_0 = arith.constant 0 : i32
    %c0_i32_1 = arith.constant 0 : i32
    return %c0_i32, %c0_i32_0 : i32, i32
  }
  func.func @transform_7(%arg0: i32, %arg1: i32) -> (i32, i32) {
    %c0_i32 = arith.constant 0 : i32
    %c0_i32_0 = arith.constant 0 : i32
    return %arg0, %c0_i32 : i32, i32
  }
}

module attributes {stable_mosaic.version = 11 : i64} {
  func.func @kernel(%arg0: i32, %arg1: i32, %arg2: memref<128x128xbf16, #tpu.memory_space<vmem>>, %arg3: memref<128x128xbf16, #tpu.memory_space<vmem>>, %arg4: memref<128x128xbf16, #tpu.memory_space<vmem>>, %arg5: memref<128x1xf32, #tpu.memory_space<vmem>>, %arg6: memref<128x128xbf16, #tpu.memory_space<vmem>>, %arg7: memref<128x128xbf16, #tpu.memory_space<vmem>>, %arg8: memref<1x128xf32, #tpu.memory_space<vmem>>, %arg9: memref<128x128xbf16, #tpu.memory_space<vmem>>, %arg10: memref<128x128xf32, #tpu.memory_space<vmem>>) attributes {dimension_semantics = [#tpu.dimension_semantics<parallel>, #tpu.dimension_semantics<arbitrary>], iteration_bounds = array<i64: 1, 1>, scalar_prefetch = 0 : i64, scratch_operands = 1 : i64, tpu.core_type = #tpu.core_type<tc>, window_params = [{transform_indices = @transform_0, window_bounds = array<i64: 128, 128>}, {transform_indices = @transform_1, window_bounds = array<i64: 128, 128>}, {transform_indices = @transform_2, window_bounds = array<i64: 128, 128>}, {transform_indices = @transform_3, window_bounds = array<i64: 128, 1>}, {pipeline_mode = #tpu.pipeline_mode<synchronous>, transform_indices = @transform_4, window_bounds = array<i64: 128, 128>}, {pipeline_mode = #tpu.pipeline_mode<synchronous>, transform_indices = @transform_5, window_bounds = array<i64: 128, 128>}, {pipeline_mode = #tpu.pipeline_mode<synchronous>, transform_indices = @transform_6, window_bounds = array<i64: 1, 128>}, {transform_indices = @transform_7, window_bounds = array<i64: 128, 128>}]} {
    %c0_i32 = arith.constant 0 : i32
    %0 = arith.cmpi eq, %arg1, %c0_i32 : i32
    %1 = arith.extui %0 : i1 to i32
    %c0_i32_0 = arith.constant 0 : i32
    %2 = arith.cmpi ne, %1, %c0_i32_0 : i32
    scf.if %2 {
      %cst_10 = arith.constant 0.000000e+00 : f32
      %12 = vector.broadcast %cst_10 : f32 to vector<128x128xf32>
      %c0_11 = arith.constant 0 : index
      %c0_12 = arith.constant 0 : index
      %13 = vector.load %arg10[%c0_11, %c0_12] : memref<128x128xf32, #tpu.memory_space<vmem>>, vector<128x128xf32>
      tpu.vector_store %arg10[%c0_11, %c0_12], %12 {strides = array<i32>} : memref<128x128xf32, #tpu.memory_space<vmem>>, vector<128x128xf32>,
    } else {
    }
    %c0 = arith.constant 0 : index
    %c0_1 = arith.constant 0 : index
    %3 = vector.load %arg10[%c0, %c0_1] : memref<128x128xf32, #tpu.memory_space<vmem>>, vector<128x128xf32>
    %c0_2 = arith.constant 0 : index
    %c0_3 = arith.constant 0 : index
    %4 = vector.load %arg2[%c0_2, %c0_3] : memref<128x128xbf16, #tpu.memory_space<vmem>>, vector<128x128xbf16>
    %c0_4 = arith.constant 0 : index
    %c0_5 = arith.constant 0 : index
    %5 = vector.load %arg3[%c0_4, %c0_5] : memref<128x128xbf16, #tpu.memory_space<vmem>>, vector<128x128xbf16>
    %cst = arith.constant dense<0.000000e+00> : vector<128x128xf32>
    %6 = tpu.matmul %4, %5, %cst {dimension_numbers = #tpu.dot_dimension_numbers<[1], [0], [0], [1], [0, 0, 1, 1], [], []>} : vector<128x128xbf16>, vector<128x128xbf16>, vector<128x128xf32> -> vector<128x128xf32>
    %7 = arith.addf %3, %6 : vector<128x128xf32>
    %c0_6 = arith.constant 0 : index
    %c0_7 = arith.constant 0 : index
    %8 = vector.load %arg10[%c0_6, %c0_7] : memref<128x128xf32, #tpu.memory_space<vmem>>, vector<128x128xf32>
    tpu.vector_store %arg10[%c0_6, %c0_7], %7 {strides = array<i32>} : memref<128x128xf32, #tpu.memory_space<vmem>>, vector<128x128xf32>,
    %c0_i32_8 = arith.constant 0 : i32
    %9 = arith.cmpi eq, %arg1, %c0_i32_8 : i32
    %10 = arith.extui %9 : i1 to i32
    %c0_i32_9 = arith.constant 0 : i32
    %11 = arith.cmpi ne, %10, %c0_i32_9 : i32
    scf.if %11 {
      %c0_10 = arith.constant 0 : index
      %c0_11 = arith.constant 0 : index
      %12 = vector.load %arg10[%c0_10, %c0_11] : memref<128x128xf32, #tpu.memory_space<vmem>>, vector<128x128xf32>
      %c0_12 = arith.constant 0 : index
      %c0_13 = arith.constant 0 : index
      %13 = vector.load %arg5[%c0_12, %c0_13] : memref<128x1xf32, #tpu.memory_space<vmem>>, vector<128x1xf32>
      %14 = vector.broadcast %13 : vector<128x1xf32> to vector<128x128xf32>
      %15 = arith.mulf %12, %14 : vector<128x128xf32>
      %16 = arith.truncf %15 : vector<128x128xf32> to vector<128x128xbf16>
      %c0_14 = arith.constant 0 : index
      %c0_15 = arith.constant 0 : index
      %17 = vector.load %arg6[%c0_14, %c0_15] : memref<128x128xbf16, #tpu.memory_space<vmem>>, vector<128x128xbf16>
      %cst_16 = arith.constant dense<0.000000e+00> : vector<128x128xf32>
      %18 = tpu.matmul %16, %17, %cst_16 {dimension_numbers = #tpu.dot_dimension_numbers<[1], [0], [0], [1], [0, 0, 1, 1], [], []>} : vector<128x128xbf16>, vector<128x128xbf16>, vector<128x128xf32> -> vector<128x128xf32>
      %c0_17 = arith.constant 0 : index
      %c0_18 = arith.constant 0 : index
      %19 = vector.load %arg4[%c0_17, %c0_18] : memref<128x128xbf16, #tpu.memory_space<vmem>>, vector<128x128xbf16>
      %c0_19 = arith.constant 0 : index
      %c0_20 = arith.constant 0 : index
      %20 = vector.load %arg7[%c0_19, %c0_20] : memref<128x128xbf16, #tpu.memory_space<vmem>>, vector<128x128xbf16>
      %cst_21 = arith.constant dense<0.000000e+00> : vector<128x128xf32>
      %21 = tpu.matmul %19, %20, %cst_21 {dimension_numbers = #tpu.dot_dimension_numbers<[1], [0], [0], [1], [0, 0, 1, 1], [], []>} : vector<128x128xbf16>, vector<128x128xbf16>, vector<128x128xf32> -> vector<128x128xf32>
      %22 = arith.addf %18, %21 : vector<128x128xf32>
      %c0_22 = arith.constant 0 : index
      %c0_23 = arith.constant 0 : index
      %23 = vector.load %arg8[%c0_22, %c0_23] : memref<1x128xf32, #tpu.memory_space<vmem>>, vector<1x128xf32>
      %24 = vector.broadcast %23 : vector<1x128xf32> to vector<128x128xf32>
      %25 = arith.addf %22, %24 : vector<128x128xf32>
      %26 = arith.mulf %25, %25 : vector<128x128xf32>
      %cst_24 = arith.constant dense<0.000000e+00> : vector<128xf32>
      %27 = vector.multi_reduction <add>, %26, %cst_24 [1] : vector<128x128xf32> to vector<128xf32>
      %28 = vector.shape_cast %27 : vector<128xf32> to vector<128x1xf32>
      %cst_25 = arith.constant 1.000000e-24 : f32
      %29 = vector.broadcast %cst_25 : f32 to vector<128x1xf32>
      %30 = arith.maximumf %28, %29 : vector<128x1xf32>
      %31 = math.rsqrt %30 : vector<128x1xf32>
      %32 = vector.broadcast %31 : vector<128x1xf32> to vector<128x128xf32>
      %33 = arith.mulf %25, %32 : vector<128x128xf32>
      %34 = arith.truncf %33 : vector<128x128xf32> to vector<128x128xbf16>
      %c0_26 = arith.constant 0 : index
      %c0_27 = arith.constant 0 : index
      %35 = vector.load %arg9[%c0_26, %c0_27] : memref<128x128xbf16, #tpu.memory_space<vmem>>, vector<128x128xbf16>
      tpu.vector_store %arg9[%c0_26, %c0_27], %34 {strides = array<i32>} : memref<128x128xbf16, #tpu.memory_space<vmem>>, vector<128x128xbf16>,
    } else {
    }
    return
  }
  func.func @transform_0(%arg0: i32, %arg1: i32) -> (i32, i32) {
    %c0_i32 = arith.constant 0 : i32
    return %arg0, %arg1 : i32, i32
  }
  func.func @transform_1(%arg0: i32, %arg1: i32) -> (i32, i32) {
    %c0_i32 = arith.constant 0 : i32
    %c0_i32_0 = arith.constant 0 : i32
    return %arg1, %c0_i32 : i32, i32
  }
  func.func @transform_2(%arg0: i32, %arg1: i32) -> (i32, i32) {
    %c0_i32 = arith.constant 0 : i32
    %c0_i32_0 = arith.constant 0 : i32
    return %arg0, %c0_i32 : i32, i32
  }
  func.func @transform_3(%arg0: i32, %arg1: i32) -> (i32, i32) {
    %c0_i32 = arith.constant 0 : i32
    %c0_i32_0 = arith.constant 0 : i32
    return %arg0, %c0_i32 : i32, i32
  }
  func.func @transform_4(%arg0: i32, %arg1: i32) -> (i32, i32) {
    %c0_i32 = arith.constant 0 : i32
    %c0_i32_0 = arith.constant 0 : i32
    %c0_i32_1 = arith.constant 0 : i32
    return %c0_i32, %c0_i32_0 : i32, i32
  }
  func.func @transform_5(%arg0: i32, %arg1: i32) -> (i32, i32) {
    %c0_i32 = arith.constant 0 : i32
    %c0_i32_0 = arith.constant 0 : i32
    %c0_i32_1 = arith.constant 0 : i32
    return %c0_i32, %c0_i32_0 : i32, i32
  }
  func.func @transform_6(%arg0: i32, %arg1: i32) -> (i32, i32) {
    %c0_i32 = arith.constant 0 : i32
    %c0_i32_0 = arith.constant 0 : i32
    %c0_i32_1 = arith.constant 0 : i32
    return %c0_i32, %c0_i32_0 : i32, i32
  }
  func.func @transform_7(%arg0: i32, %arg1: i32) -> (i32, i32) {
    %c0_i32 = arith.constant 0 : i32
    %c0_i32_0 = arith.constant 0 : i32
    return %arg0, %c0_i32 : i32, i32
  }
}

module attributes {stable_mosaic.version = 11 : i64} {
  func.func @kernel(%arg0: i32, %arg1: i32, %arg2: memref<128x128xbf16, #tpu.memory_space<vmem>>, %arg3: memref<128x256xbf16, #tpu.memory_space<vmem>>, %arg4: memref<128x256xbf16, #tpu.memory_space<vmem>>, %arg5: memref<128x1xf32, #tpu.memory_space<vmem>>, %arg6: memref<256x256xbf16, #tpu.memory_space<vmem>>, %arg7: memref<256x256xbf16, #tpu.memory_space<vmem>>, %arg8: memref<1x256xf32, #tpu.memory_space<vmem>>, %arg9: memref<128x256xbf16, #tpu.memory_space<vmem>>, %arg10: memref<128x256xf32, #tpu.memory_space<vmem>>) attributes {dimension_semantics = [#tpu.dimension_semantics<parallel>, #tpu.dimension_semantics<arbitrary>], iteration_bounds = array<i64: 1, 1>, scalar_prefetch = 0 : i64, scratch_operands = 1 : i64, tpu.core_type = #tpu.core_type<tc>, window_params = [{transform_indices = @transform_0, window_bounds = array<i64: 128, 128>}, {transform_indices = @transform_1, window_bounds = array<i64: 128, 256>}, {transform_indices = @transform_2, window_bounds = array<i64: 128, 256>}, {transform_indices = @transform_3, window_bounds = array<i64: 128, 1>}, {pipeline_mode = #tpu.pipeline_mode<synchronous>, transform_indices = @transform_4, window_bounds = array<i64: 256, 256>}, {pipeline_mode = #tpu.pipeline_mode<synchronous>, transform_indices = @transform_5, window_bounds = array<i64: 256, 256>}, {pipeline_mode = #tpu.pipeline_mode<synchronous>, transform_indices = @transform_6, window_bounds = array<i64: 1, 256>}, {transform_indices = @transform_7, window_bounds = array<i64: 128, 256>}]} {
    %c0_i32 = arith.constant 0 : i32
    %0 = arith.cmpi eq, %arg1, %c0_i32 : i32
    %1 = arith.extui %0 : i1 to i32
    %c0_i32_0 = arith.constant 0 : i32
    %2 = arith.cmpi ne, %1, %c0_i32_0 : i32
    scf.if %2 {
      %cst_10 = arith.constant 0.000000e+00 : f32
      %12 = vector.broadcast %cst_10 : f32 to vector<128x256xf32>
      %c0_11 = arith.constant 0 : index
      %c0_12 = arith.constant 0 : index
      %13 = vector.load %arg10[%c0_11, %c0_12] : memref<128x256xf32, #tpu.memory_space<vmem>>, vector<128x256xf32>
      tpu.vector_store %arg10[%c0_11, %c0_12], %12 {strides = array<i32>} : memref<128x256xf32, #tpu.memory_space<vmem>>, vector<128x256xf32>,
    } else {
    }
    %c0 = arith.constant 0 : index
    %c0_1 = arith.constant 0 : index
    %3 = vector.load %arg10[%c0, %c0_1] : memref<128x256xf32, #tpu.memory_space<vmem>>, vector<128x256xf32>
    %c0_2 = arith.constant 0 : index
    %c0_3 = arith.constant 0 : index
    %4 = vector.load %arg2[%c0_2, %c0_3] : memref<128x128xbf16, #tpu.memory_space<vmem>>, vector<128x128xbf16>
    %c0_4 = arith.constant 0 : index
    %c0_5 = arith.constant 0 : index
    %5 = vector.load %arg3[%c0_4, %c0_5] : memref<128x256xbf16, #tpu.memory_space<vmem>>, vector<128x256xbf16>
    %cst = arith.constant dense<0.000000e+00> : vector<128x256xf32>
    %6 = tpu.matmul %4, %5, %cst {dimension_numbers = #tpu.dot_dimension_numbers<[1], [0], [0], [1], [0, 0, 1, 1], [], []>} : vector<128x128xbf16>, vector<128x256xbf16>, vector<128x256xf32> -> vector<128x256xf32>
    %7 = arith.addf %3, %6 : vector<128x256xf32>
    %c0_6 = arith.constant 0 : index
    %c0_7 = arith.constant 0 : index
    %8 = vector.load %arg10[%c0_6, %c0_7] : memref<128x256xf32, #tpu.memory_space<vmem>>, vector<128x256xf32>
    tpu.vector_store %arg10[%c0_6, %c0_7], %7 {strides = array<i32>} : memref<128x256xf32, #tpu.memory_space<vmem>>, vector<128x256xf32>,
    %c0_i32_8 = arith.constant 0 : i32
    %9 = arith.cmpi eq, %arg1, %c0_i32_8 : i32
    %10 = arith.extui %9 : i1 to i32
    %c0_i32_9 = arith.constant 0 : i32
    %11 = arith.cmpi ne, %10, %c0_i32_9 : i32
    scf.if %11 {
      %c0_10 = arith.constant 0 : index
      %c0_11 = arith.constant 0 : index
      %12 = vector.load %arg10[%c0_10, %c0_11] : memref<128x256xf32, #tpu.memory_space<vmem>>, vector<128x256xf32>
      %c0_12 = arith.constant 0 : index
      %c0_13 = arith.constant 0 : index
      %13 = vector.load %arg5[%c0_12, %c0_13] : memref<128x1xf32, #tpu.memory_space<vmem>>, vector<128x1xf32>
      %14 = vector.broadcast %13 : vector<128x1xf32> to vector<128x256xf32>
      %15 = arith.mulf %12, %14 : vector<128x256xf32>
      %16 = arith.truncf %15 : vector<128x256xf32> to vector<128x256xbf16>
      %c0_14 = arith.constant 0 : index
      %c0_15 = arith.constant 0 : index
      %17 = vector.load %arg6[%c0_14, %c0_15] : memref<256x256xbf16, #tpu.memory_space<vmem>>, vector<256x256xbf16>
      %cst_16 = arith.constant dense<0.000000e+00> : vector<128x256xf32>
      %18 = tpu.matmul %16, %17, %cst_16 {dimension_numbers = #tpu.dot_dimension_numbers<[1], [0], [0], [1], [0, 0, 1, 1], [], []>} : vector<128x256xbf16>, vector<256x256xbf16>, vector<128x256xf32> -> vector<128x256xf32>
      %c0_17 = arith.constant 0 : index
      %c0_18 = arith.constant 0 : index
      %19 = vector.load %arg4[%c0_17, %c0_18] : memref<128x256xbf16, #tpu.memory_space<vmem>>, vector<128x256xbf16>
      %c0_19 = arith.constant 0 : index
      %c0_20 = arith.constant 0 : index
      %20 = vector.load %arg7[%c0_19, %c0_20] : memref<256x256xbf16, #tpu.memory_space<vmem>>, vector<256x256xbf16>
      %cst_21 = arith.constant dense<0.000000e+00> : vector<128x256xf32>
      %21 = tpu.matmul %19, %20, %cst_21 {dimension_numbers = #tpu.dot_dimension_numbers<[1], [0], [0], [1], [0, 0, 1, 1], [], []>} : vector<128x256xbf16>, vector<256x256xbf16>, vector<128x256xf32> -> vector<128x256xf32>
      %22 = arith.addf %18, %21 : vector<128x256xf32>
      %c0_22 = arith.constant 0 : index
      %c0_23 = arith.constant 0 : index
      %23 = vector.load %arg8[%c0_22, %c0_23] : memref<1x256xf32, #tpu.memory_space<vmem>>, vector<1x256xf32>
      %24 = vector.broadcast %23 : vector<1x256xf32> to vector<128x256xf32>
      %25 = arith.addf %22, %24 : vector<128x256xf32>
      %26 = arith.mulf %25, %25 : vector<128x256xf32>
      %cst_24 = arith.constant dense<0.000000e+00> : vector<128xf32>
      %27 = vector.multi_reduction <add>, %26, %cst_24 [1] : vector<128x256xf32> to vector<128xf32>
      %28 = vector.shape_cast %27 : vector<128xf32> to vector<128x1xf32>
      %cst_25 = arith.constant 1.000000e-24 : f32
      %29 = vector.broadcast %cst_25 : f32 to vector<128x1xf32>
      %30 = arith.maximumf %28, %29 : vector<128x1xf32>
      %31 = math.rsqrt %30 : vector<128x1xf32>
      %32 = vector.broadcast %31 : vector<128x1xf32> to vector<128x256xf32>
      %33 = arith.mulf %25, %32 : vector<128x256xf32>
      %34 = arith.truncf %33 : vector<128x256xf32> to vector<128x256xbf16>
      %c0_26 = arith.constant 0 : index
      %c0_27 = arith.constant 0 : index
      %35 = vector.load %arg9[%c0_26, %c0_27] : memref<128x256xbf16, #tpu.memory_space<vmem>>, vector<128x256xbf16>
      tpu.vector_store %arg9[%c0_26, %c0_27], %34 {strides = array<i32>} : memref<128x256xbf16, #tpu.memory_space<vmem>>, vector<128x256xbf16>,
    } else {
    }
    return
  }
  func.func @transform_0(%arg0: i32, %arg1: i32) -> (i32, i32) {
    %c0_i32 = arith.constant 0 : i32
    return %arg0, %arg1 : i32, i32
  }
  func.func @transform_1(%arg0: i32, %arg1: i32) -> (i32, i32) {
    %c0_i32 = arith.constant 0 : i32
    %c0_i32_0 = arith.constant 0 : i32
    return %arg1, %c0_i32 : i32, i32
  }
  func.func @transform_2(%arg0: i32, %arg1: i32) -> (i32, i32) {
    %c0_i32 = arith.constant 0 : i32
    %c0_i32_0 = arith.constant 0 : i32
    return %arg0, %c0_i32 : i32, i32
  }
  func.func @transform_3(%arg0: i32, %arg1: i32) -> (i32, i32) {
    %c0_i32 = arith.constant 0 : i32
    %c0_i32_0 = arith.constant 0 : i32
    return %arg0, %c0_i32 : i32, i32
  }
  func.func @transform_4(%arg0: i32, %arg1: i32) -> (i32, i32) {
    %c0_i32 = arith.constant 0 : i32
    %c0_i32_0 = arith.constant 0 : i32
    %c0_i32_1 = arith.constant 0 : i32
    return %c0_i32, %c0_i32_0 : i32, i32
  }
  func.func @transform_5(%arg0: i32, %arg1: i32) -> (i32, i32) {
    %c0_i32 = arith.constant 0 : i32
    %c0_i32_0 = arith.constant 0 : i32
    %c0_i32_1 = arith.constant 0 : i32
    return %c0_i32, %c0_i32_0 : i32, i32
  }
  func.func @transform_6(%arg0: i32, %arg1: i32) -> (i32, i32) {
    %c0_i32 = arith.constant 0 : i32
    %c0_i32_0 = arith.constant 0 : i32
    %c0_i32_1 = arith.constant 0 : i32
    return %c0_i32, %c0_i32_0 : i32, i32
  }
  func.func @transform_7(%arg0: i32, %arg1: i32) -> (i32, i32) {
    %c0_i32 = arith.constant 0 : i32
    %c0_i32_0 = arith.constant 0 : i32
    return %arg0, %c0_i32 : i32, i32
  }
}

module attributes {stable_mosaic.version = 11 : i64} {
  func.func @kernel(%arg0: i32, %arg1: i32, %arg2: memref<128x128xbf16, #tpu.memory_space<vmem>>, %arg3: memref<128x256xbf16, #tpu.memory_space<vmem>>, %arg4: memref<128x256xbf16, #tpu.memory_space<vmem>>, %arg5: memref<128x1xf32, #tpu.memory_space<vmem>>, %arg6: memref<256x640xbf16, #tpu.memory_space<vmem>>, %arg7: memref<256x640xbf16, #tpu.memory_space<vmem>>, %arg8: memref<1x640xf32, #tpu.memory_space<vmem>>, %arg9: memref<128x640xf32, #tpu.memory_space<vmem>>, %arg10: memref<128x256xf32, #tpu.memory_space<vmem>>) attributes {dimension_semantics = [#tpu.dimension_semantics<parallel>, #tpu.dimension_semantics<arbitrary>], iteration_bounds = array<i64: 1, 1>, scalar_prefetch = 0 : i64, scratch_operands = 1 : i64, tpu.core_type = #tpu.core_type<tc>, window_params = [{transform_indices = @transform_0, window_bounds = array<i64: 128, 128>}, {transform_indices = @transform_1, window_bounds = array<i64: 128, 256>}, {transform_indices = @transform_2, window_bounds = array<i64: 128, 256>}, {transform_indices = @transform_3, window_bounds = array<i64: 128, 1>}, {pipeline_mode = #tpu.pipeline_mode<synchronous>, transform_indices = @transform_4, window_bounds = array<i64: 256, 640>}, {pipeline_mode = #tpu.pipeline_mode<synchronous>, transform_indices = @transform_5, window_bounds = array<i64: 256, 640>}, {pipeline_mode = #tpu.pipeline_mode<synchronous>, transform_indices = @transform_6, window_bounds = array<i64: 1, 640>}, {transform_indices = @transform_7, window_bounds = array<i64: 128, 640>}]} {
    %c0_i32 = arith.constant 0 : i32
    %0 = arith.cmpi eq, %arg1, %c0_i32 : i32
    %1 = arith.extui %0 : i1 to i32
    %c0_i32_0 = arith.constant 0 : i32
    %2 = arith.cmpi ne, %1, %c0_i32_0 : i32
    scf.if %2 {
      %cst_10 = arith.constant 0.000000e+00 : f32
      %12 = vector.broadcast %cst_10 : f32 to vector<128x256xf32>
      %c0_11 = arith.constant 0 : index
      %c0_12 = arith.constant 0 : index
      %13 = vector.load %arg10[%c0_11, %c0_12] : memref<128x256xf32, #tpu.memory_space<vmem>>, vector<128x256xf32>
      tpu.vector_store %arg10[%c0_11, %c0_12], %12 {strides = array<i32>} : memref<128x256xf32, #tpu.memory_space<vmem>>, vector<128x256xf32>,
    } else {
    }
    %c0 = arith.constant 0 : index
    %c0_1 = arith.constant 0 : index
    %3 = vector.load %arg10[%c0, %c0_1] : memref<128x256xf32, #tpu.memory_space<vmem>>, vector<128x256xf32>
    %c0_2 = arith.constant 0 : index
    %c0_3 = arith.constant 0 : index
    %4 = vector.load %arg2[%c0_2, %c0_3] : memref<128x128xbf16, #tpu.memory_space<vmem>>, vector<128x128xbf16>
    %c0_4 = arith.constant 0 : index
    %c0_5 = arith.constant 0 : index
    %5 = vector.load %arg3[%c0_4, %c0_5] : memref<128x256xbf16, #tpu.memory_space<vmem>>, vector<128x256xbf16>
    %cst = arith.constant dense<0.000000e+00> : vector<128x256xf32>
    %6 = tpu.matmul %4, %5, %cst {dimension_numbers = #tpu.dot_dimension_numbers<[1], [0], [0], [1], [0, 0, 1, 1], [], []>} : vector<128x128xbf16>, vector<128x256xbf16>, vector<128x256xf32> -> vector<128x256xf32>
    %7 = arith.addf %3, %6 : vector<128x256xf32>
    %c0_6 = arith.constant 0 : index
    %c0_7 = arith.constant 0 : index
    %8 = vector.load %arg10[%c0_6, %c0_7] : memref<128x256xf32, #tpu.memory_space<vmem>>, vector<128x256xf32>
    tpu.vector_store %arg10[%c0_6, %c0_7], %7 {strides = array<i32>} : memref<128x256xf32, #tpu.memory_space<vmem>>, vector<128x256xf32>,
    %c0_i32_8 = arith.constant 0 : i32
    %9 = arith.cmpi eq, %arg1, %c0_i32_8 : i32
    %10 = arith.extui %9 : i1 to i32
    %c0_i32_9 = arith.constant 0 : i32
    %11 = arith.cmpi ne, %10, %c0_i32_9 : i32
    scf.if %11 {
      %c0_10 = arith.constant 0 : index
      %c0_11 = arith.constant 0 : index
      %12 = vector.load %arg10[%c0_10, %c0_11] : memref<128x256xf32, #tpu.memory_space<vmem>>, vector<128x256xf32>
      %c0_12 = arith.constant 0 : index
      %c0_13 = arith.constant 0 : index
      %13 = vector.load %arg5[%c0_12, %c0_13] : memref<128x1xf32, #tpu.memory_space<vmem>>, vector<128x1xf32>
      %14 = vector.broadcast %13 : vector<128x1xf32> to vector<128x256xf32>
      %15 = arith.mulf %12, %14 : vector<128x256xf32>
      %16 = arith.truncf %15 : vector<128x256xf32> to vector<128x256xbf16>
      %c0_14 = arith.constant 0 : index
      %c0_15 = arith.constant 0 : index
      %17 = vector.load %arg6[%c0_14, %c0_15] : memref<256x640xbf16, #tpu.memory_space<vmem>>, vector<256x640xbf16>
      %cst_16 = arith.constant dense<0.000000e+00> : vector<128x640xf32>
      %18 = tpu.matmul %16, %17, %cst_16 {dimension_numbers = #tpu.dot_dimension_numbers<[1], [0], [0], [1], [0, 0, 1, 1], [], []>} : vector<128x256xbf16>, vector<256x640xbf16>, vector<128x640xf32> -> vector<128x640xf32>
      %c0_17 = arith.constant 0 : index
      %c0_18 = arith.constant 0 : index
      %19 = vector.load %arg4[%c0_17, %c0_18] : memref<128x256xbf16, #tpu.memory_space<vmem>>, vector<128x256xbf16>
      %c0_19 = arith.constant 0 : index
      %c0_20 = arith.constant 0 : index
      %20 = vector.load %arg7[%c0_19, %c0_20] : memref<256x640xbf16, #tpu.memory_space<vmem>>, vector<256x640xbf16>
      %cst_21 = arith.constant dense<0.000000e+00> : vector<128x640xf32>
      %21 = tpu.matmul %19, %20, %cst_21 {dimension_numbers = #tpu.dot_dimension_numbers<[1], [0], [0], [1], [0, 0, 1, 1], [], []>} : vector<128x256xbf16>, vector<256x640xbf16>, vector<128x640xf32> -> vector<128x640xf32>
      %22 = arith.addf %18, %21 : vector<128x640xf32>
      %c0_22 = arith.constant 0 : index
      %c0_23 = arith.constant 0 : index
      %23 = vector.load %arg8[%c0_22, %c0_23] : memref<1x640xf32, #tpu.memory_space<vmem>>, vector<1x640xf32>
      %24 = vector.broadcast %23 : vector<1x640xf32> to vector<128x640xf32>
      %25 = arith.addf %22, %24 : vector<128x640xf32>
      %26 = arith.mulf %25, %25 : vector<128x640xf32>
      %cst_24 = arith.constant dense<0.000000e+00> : vector<128xf32>
      %27 = vector.multi_reduction <add>, %26, %cst_24 [1] : vector<128x640xf32> to vector<128xf32>
      %28 = vector.shape_cast %27 : vector<128xf32> to vector<128x1xf32>
      %cst_25 = arith.constant 1.000000e-24 : f32
      %29 = vector.broadcast %cst_25 : f32 to vector<128x1xf32>
      %30 = arith.maximumf %28, %29 : vector<128x1xf32>
      %31 = math.rsqrt %30 : vector<128x1xf32>
      %32 = vector.broadcast %31 : vector<128x1xf32> to vector<128x640xf32>
      %33 = arith.mulf %25, %32 : vector<128x640xf32>
      %c0_26 = arith.constant 0 : index
      %c0_27 = arith.constant 0 : index
      %34 = vector.load %arg9[%c0_26, %c0_27] : memref<128x640xf32, #tpu.memory_space<vmem>>, vector<128x640xf32>
      tpu.vector_store %arg9[%c0_26, %c0_27], %33 {strides = array<i32>} : memref<128x640xf32, #tpu.memory_space<vmem>>, vector<128x640xf32>,
    } else {
    }
    return
  }
  func.func @transform_0(%arg0: i32, %arg1: i32) -> (i32, i32) {
    %c0_i32 = arith.constant 0 : i32
    return %arg0, %arg1 : i32, i32
  }
  func.func @transform_1(%arg0: i32, %arg1: i32) -> (i32, i32) {
    %c0_i32 = arith.constant 0 : i32
    %c0_i32_0 = arith.constant 0 : i32
    return %arg1, %c0_i32 : i32, i32
  }
  func.func @transform_2(%arg0: i32, %arg1: i32) -> (i32, i32) {
    %c0_i32 = arith.constant 0 : i32
    %c0_i32_0 = arith.constant 0 : i32
    return %arg0, %c0_i32 : i32, i32
  }
  func.func @transform_3(%arg0: i32, %arg1: i32) -> (i32, i32) {
    %c0_i32 = arith.constant 0 : i32
    %c0_i32_0 = arith.constant 0 : i32
    return %arg0, %c0_i32 : i32, i32
  }
  func.func @transform_4(%arg0: i32, %arg1: i32) -> (i32, i32) {
    %c0_i32 = arith.constant 0 : i32
    %c0_i32_0 = arith.constant 0 : i32
    %c0_i32_1 = arith.constant 0 : i32
    return %c0_i32, %c0_i32_0 : i32, i32
  }
  func.func @transform_5(%arg0: i32, %arg1: i32) -> (i32, i32) {
    %c0_i32 = arith.constant 0 : i32
    %c0_i32_0 = arith.constant 0 : i32
    %c0_i32_1 = arith.constant 0 : i32
    return %c0_i32, %c0_i32_0 : i32, i32
  }
  func.func @transform_6(%arg0: i32, %arg1: i32) -> (i32, i32) {
    %c0_i32 = arith.constant 0 : i32
    %c0_i32_0 = arith.constant 0 : i32
    %c0_i32_1 = arith.constant 0 : i32
    return %c0_i32, %c0_i32_0 : i32, i32
  }
  func.func @transform_7(%arg0: i32, %arg1: i32) -> (i32, i32) {
    %c0_i32 = arith.constant 0 : i32
    %c0_i32_0 = arith.constant 0 : i32
    return %arg0, %c0_i32 : i32, i32
  }
}

</mosaic_0001>

<bundles_post_ra>
// kernel: mesh_autoencoder_forward.12
= control target key start
LH: loop header
LB: loop body
LE: loop exit
PB: predicated region body
PF: predicated region fallthrough
CT: control target
= control target key end

     0   :  { %v64_v48 = vlaneseq  ;;  %s1010_s1 = inlined_call_operand.vmem [shape: bf16[256,256], index: 1, kind: input, shape index: {}]   ;;  %s1011_s0 = inlined_call_operand.vmem [shape: bf16[128,256], index: 0, kind: input, shape index: {}]   ;;  %s1012_s2 = inlined_call_operand.vmem [shape: f32[1,256], index: 2, kind: input, shape index: {}]   ;;  %s1013_s3 = inlined_call_operand.vmem [shape: bf16[128,256], index: 3, kind: output, shape index: {}]  }
   0x1   :  { %v687_v0 = vld [vmem:[%s1010_s1 + $0x74] ss:$8 sps:$4 sm:$0xff]   ;;  %v689_v1 = vld [vmem:[%s1010_s1 + $0x70] ss:$8 sps:$4 sm:$0xff]   ;;  %v690_v2 = vld [vmem:[%s1010_s1 + $0x64] ss:$8 sps:$4 sm:$0xff]  }
   0x2   :  { %314 = vmatprep.subr.bf16.mxu0 %v687_v0  ;;  %655 = vmatprep.subr.bf16.mxu1 %v687_v0  ;;  %v692_v3 = vld [vmem:[%s1010_s1 + $0x60] ss:$8 sps:$4 sm:$0xff]   ;;  %v693_v4 = vld [vmem:[%s1010_s1 + $0x54] ss:$8 sps:$4 sm:$0xff]   ;;  %v695_v5 = vld [vmem:[%s1010_s1 + $0x50] ss:$8 sps:$4 sm:$0xff]  }
   0x3   :  { %315 = vmatpush1.bf16.msra.mxu0 %v689_v1  ;;  %671 = vmatpush1.bf16.msra.mxu1 %v689_v1  ;;  %v696_v6 = vld [vmem:[%s1010_s1 + $0x44] ss:$8 sps:$4 sm:$0xff]   ;;  %v698_v7 = vld [vmem:[%s1010_s1 + $0x40] ss:$8 sps:$4 sm:$0xff]   ;;  %v699_v8 = vld [vmem:[%s1010_s1 + $0x34] ss:$8 sps:$4 sm:$0xff]  }
   0x4   :  { %316 = vmatprep.subr.bf16.mxu0 %v690_v2  ;;  %656 = vmatprep.subr.bf16.mxu1 %v690_v2  ;;  %v701_v9 = vld [vmem:[%s1010_s1 + $0x30] ss:$8 sps:$4 sm:$0xff]   ;;  %v702_v10 = vld [vmem:[%s1010_s1 + $0x24] ss:$8 sps:$4 sm:$0xff]   ;;  %v704_v11 = vld [vmem:[%s1010_s1 + $0x20] ss:$8 sps:$4 sm:$0xff]  }
   0x5   :  { %v705_v12 = vld [vmem:[%s1010_s1 + $0x14] ss:$8 sps:$4 sm:$0xff]   ;;  %v737_v13 = vld [vmem:[%s1011_s0 + $0x4] ss:$8 sps:$4 sm:$0xff]   ;;  %v707_v14 = vld [vmem:[%s1010_s1 + $0x10] ss:$8 sps:$4 sm:$0xff]  }
   0x6   :  { %v740_v15 = vld [vmem:[%s1011_s0 + $0x44] ss:$8 sps:$4 sm:$0xff]   ;;  %346 = vmatprep.mubr.bf16.mxu0 %v737_v13  ;;  %v710_v17 = vld [vmem:[%s1010_s1] ss:$8 sps:$4 sm:$0xff]   ;;  %v711_v18 = vld [vmem:[%s1010_s1 + $0xf4] ss:$8 sps:$4 sm:$0xff]  }
   0x7   :  { %317 = vmatpush1.bf16.msra.mxu0 %v692_v3  ;;  %672 = vmatpush1.bf16.msra.mxu1 %v692_v3  ;;  %v708_v16 = vld [vmem:[%s1010_s1 + $0x4] ss:$8 sps:$4 sm:$0xff]   ;;  %v713_v19 = vld [vmem:[%s1010_s1 + $0xf0] ss:$8 sps:$4 sm:$0xff]   ;;  %v716_v21 = vld [vmem:[%s1010_s1 + $0xe0] ss:$8 sps:$4 sm:$0xff]  }
   0x8   :  { %318 = vmatprep.subr.bf16.mxu0 %v693_v4  ;;  %657 = vmatprep.subr.bf16.mxu1 %v693_v4  ;;  %v714_v20 = vld [vmem:[%s1010_s1 + $0xe4] ss:$8 sps:$4 sm:$0xff]   ;;  %v717_v22 = vld [vmem:[%s1010_s1 + $0xd4] ss:$8 sps:$4 sm:$0xff]   ;;  %v719_v23 = vld [vmem:[%s1010_s1 + $0xd0] ss:$8 sps:$4 sm:$0xff]  }
   0x9   :  { %386 = vmatprep.mubr.bf16.mxu1 %v740_v15  ;;  %v720_v24 = vld [vmem:[%s1010_s1 + $0xc4] ss:$8 sps:$4 sm:$0xff]   ;;  %v722_v25 = vld [vmem:[%s1010_s1 + $0xc0] ss:$8 sps:$4 sm:$0xff]   ;;  %v723_v26 = vld [vmem:[%s1010_s1 + $0xb4] ss:$8 sps:$4 sm:$0xff]  }
   0xa   :  { %v725_v27 = vld [vmem:[%s1010_s1 + $0xb0] ss:$8 sps:$4 sm:$0xff]   ;;  %v726_v28 = vld [vmem:[%s1010_s1 + $0xa4] ss:$8 sps:$4 sm:$0xff]   ;;  %v728_v29 = vld [vmem:[%s1010_s1 + $0xa0] ss:$8 sps:$4 sm:$0xff]  }
   0xb   :  { %319 = vmatpush1.bf16.msra.mxu0 %v695_v5  ;;  %673 = vmatpush1.bf16.msra.mxu1 %v695_v5  ;;  %v729_v30 = vld [vmem:[%s1010_s1 + $0x94] ss:$8 sps:$4 sm:$0xff]   ;;  %v731_v31 = vld [vmem:[%s1010_s1 + $0x90] ss:$8 sps:$4 sm:$0xff]   ;;  %v732_v32 = vld [vmem:[%s1010_s1 + $0x84] ss:$8 sps:$4 sm:$0xff]  }
   0xc   :  { %320 = vmatprep.subr.bf16.mxu0 %v696_v6  ;;  %658 = vmatprep.subr.bf16.mxu1 %v696_v6  ;;  %v734_v33 = vld [vmem:[%s1010_s1 + $0x80] ss:$8 sps:$4 sm:$0xff]   ;;  %v741_v36 = vld [vmem:[%s1011_s0 + $0x14] ss:$8 sps:$4 sm:$0xff]   ;;  %v745_v38 = vld [vmem:[%s1011_s0 + $0x10] ss:$8 sps:$4 sm:$0xff]  }
   0xd   :  { %v735_v34 = vld [vmem:[%s1011_s0] ss:$8 sps:$4 sm:$0xff]   ;;  %v743_v37 = vld [vmem:[%s1011_s0 + $0x54] ss:$8 sps:$4 sm:$0xff]   ;;  %v746_v39 = vld [vmem:[%s1011_s0 + $0x50] ss:$8 sps:$4 sm:$0xff]  }
   0xe   :  { %v738_v35 = vld [vmem:[%s1011_s0 + $0x40] ss:$8 sps:$4 sm:$0xff]   ;;  %v747_v40 = vld [vmem:[%s1011_s0 + $0x24] ss:$8 sps:$4 sm:$0xff]   ;;  %v753_v44 = vld [vmem:[%s1011_s0 + $0x34] ss:$8 sps:$4 sm:$0xff]  }
   0xf   :  { %321 = vmatpush1.bf16.msra.mxu0 %v698_v7  ;;  %674 = vmatpush1.bf16.msra.mxu1 %v698_v7  ;;  %v749_v41 = vld [vmem:[%s1011_s0 + $0x64] ss:$8 sps:$4 sm:$0xff]   ;;  %v751_v42 = vld [vmem:[%s1011_s0 + $0x20] ss:$8 sps:$4 sm:$0xff]   ;;  %v755_v45 = vld [vmem:[%s1011_s0 + $0x74] ss:$8 sps:$4 sm:$0xff]  }
  0x10   :  { %322 = vmatprep.subr.bf16.mxu0 %v699_v8  ;;  %659 = vmatprep.subr.bf16.mxu1 %v699_v8  ;;  %v752_v43 = vld [vmem:[%s1011_s0 + $0x60] ss:$8 sps:$4 sm:$0xff]   ;;  %v757_v46 = vld [vmem:[%s1011_s0 + $0x30] ss:$8 sps:$4 sm:$0xff]   ;;  %v65_v49 = vshrl.u32 %v64_v48, 7 }
  0x11   :  { %v758_v47 = vld [vmem:[%s1011_s0 + $0x70] ss:$8 sps:$4 sm:$0xff]   ;;  %v62_v51 = vld [vmem:[%s1012_s2] sm:$0x3] }
  0x12   :  { %v66_v50 = vsub.s32 0, %v65_v49  ;;  %v70_v52 = vsub.s32 1, %v65_v49 }
  0x13   :  { %323 = vmatpush1.bf16.msra.mxu0 %v701_v9  ;;  %675 = vmatpush1.bf16.msra.mxu1 %v701_v9 }
  0x14   :  { %324 = vmatprep.subr.bf16.mxu0 %v702_v10  ;;  %660 = vmatprep.subr.bf16.mxu1 %v702_v10  ;;  %v926_v53 = vrot.slane %v62_v51, %v66_v50  ;;  %v928_v54 = vrot.slane %v62_v51, %v70_v52 }
  0x17   :  { %325 = vmatpush1.bf16.msra.mxu0 %v704_v11  ;;  %676 = vmatpush1.bf16.msra.mxu1 %v704_v11 }
  0x18   :  { %326 = vmatprep.subr.bf16.mxu0 %v705_v12  ;;  %661 = vmatprep.subr.bf16.mxu1 %v705_v12 }
  0x1b   :  { %327 = vmatpush1.bf16.msra.mxu0 %v707_v14  ;;  %677 = vmatpush1.bf16.msra.mxu1 %v707_v14 }
  0x1c   :  { %328 = vmatprep.subr.bf16.mxu0 %v708_v16  ;;  %662 = vmatprep.subr.bf16.mxu1 %v708_v16 }
  0x1f   :  { %329 = vmatpush1.bf16.msra.mxu0 %v710_v17  ;;  %678 = vmatpush1.bf16.msra.mxu1 %v710_v17 }
  0x20   :  { %330 = vmatprep.subr.bf16.mxu0 %v711_v18  ;;  %663 = vmatprep.subr.bf16.mxu1 %v711_v18 }
  0x23   :  { %331 = vmatpush2.bf16.msra.mxu0 %v713_v19  ;;  %679 = vmatpush2.bf16.msra.mxu1 %v713_v19 }
  0x24   :  { %332 = vmatprep.subr.bf16.mxu0 %v714_v20  ;;  %664 = vmatprep.subr.bf16.mxu1 %v714_v20 }
  0x27   :  { %333 = vmatpush2.bf16.msra.mxu0 %v716_v21  ;;  %680 = vmatpush2.bf16.msra.mxu1 %v716_v21 }
  0x28   :  { %334 = vmatprep.subr.bf16.mxu0 %v717_v22  ;;  %665 = vmatprep.subr.bf16.mxu1 %v717_v22 }
  0x2b   :  { %335 = vmatpush2.bf16.msra.mxu0 %v719_v23  ;;  %681 = vmatpush2.bf16.msra.mxu1 %v719_v23 }
  0x2c   :  { %336 = vmatprep.subr.bf16.mxu0 %v720_v24  ;;  %666 = vmatprep.subr.bf16.mxu1 %v720_v24 }
  0x2f   :  { %337 = vmatpush2.bf16.msra.mxu0 %v722_v25  ;;  %682 = vmatpush2.bf16.msra.mxu1 %v722_v25 }
  0x30   :  { %338 = vmatprep.subr.bf16.mxu0 %v723_v26  ;;  %667 = vmatprep.subr.bf16.mxu1 %v723_v26 }
  0x33   :  { %339 = vmatpush2.bf16.msra.mxu0 %v725_v27  ;;  %683 = vmatpush2.bf16.msra.mxu1 %v725_v27 }
  0x34   :  { %340 = vmatprep.subr.bf16.mxu0 %v726_v28  ;;  %668 = vmatprep.subr.bf16.mxu1 %v726_v28 }
  0x37   :  { %341 = vmatpush2.bf16.msra.mxu0 %v728_v29  ;;  %684 = vmatpush2.bf16.msra.mxu1 %v728_v29 }
  0x38   :  { %342 = vmatprep.subr.bf16.mxu0 %v729_v30  ;;  %669 = vmatprep.subr.bf16.mxu1 %v729_v30 }
  0x3b   :  { %343 = vmatpush2.bf16.msra.mxu0 %v731_v31  ;;  %685 = vmatpush2.bf16.msra.mxu1 %v731_v31 }
  0x3c   :  { %344 = vmatprep.subr.bf16.mxu0 %v732_v32  ;;  %670 = vmatprep.subr.bf16.mxu1 %v732_v32 }
  0x3f   :  { %345 = vmatpush2.bf16.msra.mxu0 %v734_v33  ;;  %686 = vmatpush2.bf16.msra.mxu1 %v734_v33 }
  0x42   :  { %347 = vmatmul.mubr.bf16.vlgmr.msra.gmra.mxu0 %v735_v34  ;;  %387 = vmatmul.mubr.bf16.vlgmr.msra.gmra.mxu1 %v738_v35 }
  0x43   :  { %356 = vmatprep.mubr.bf16.mxu0 %v741_v36  ;;  %396 = vmatprep.mubr.bf16.mxu1 %v743_v37 }
  0x4a   :  { %357 = vmatmul.mubr.bf16.gmra.mxu0 %v745_v38  ;;  %397 = vmatmul.mubr.bf16.gmra.mxu1 %v746_v39 }
  0x4b   :  { %366 = vmatprep.mubr.bf16.mxu0 %v747_v40  ;;  %406 = vmatprep.mubr.bf16.mxu1 %v749_v41 }
  0x52   :  { %367 = vmatmul.mubr.bf16.gmra.mxu0 %v751_v42  ;;  %407 = vmatmul.mubr.bf16.gmra.mxu1 %v752_v43 }
  0x53   :  { %376 = vmatprep.mubr.bf16.mxu0 %v753_v44  ;;  %416 = vmatprep.mubr.bf16.mxu1 %v755_v45 }
  0x5a   :  { %377 = vmatmul.mubr.bf16.gmra.mxu0 %v757_v46  ;;  %417 = vmatmul.mubr.bf16.gmra.mxu1 %v758_v47 }
 0x102   :  { %v348_v55 = vpop.f32.mrf.mxu0  ;;  %v388_v56 = vpop.f32.mrf.mxu1 }
 0x103   :  { %v349_v57 = vadd.f32 %v348_v55, %v926_v53  ;;  %v389_v58 = vadd.f32 %v388_v56, %v926_v53 }
 0x104   :  { %v350_v59 = vpop.f32.mrf.mxu0  ;;  %v390_v60 = vpop.f32.mrf.mxu1 }
 0x105   :  { %v351_v61 = vadd.f32 %v350_v59, %v928_v54  ;;  %v391_v62 = vadd.f32 %v390_v60, %v928_v54  ;;  %v427_v1 = vmax.f32 %v349_v57, 0.0  ;;  %v443_v2 = vmax.f32 %v389_v58, 0.0 }
 0x106   :  { %v352_v63 = vpop.f32.mrf.mxu0  ;;  %v392_v0 = vpop.f32.mrf.mxu1 }
 0x107   :  { %v428_v3 = vmax.f32 %v351_v61, 0.0  ;;  %v444_v4 = vmax.f32 %v391_v62, 0.0  ;;  %v353_v5 = vadd.f32 %v352_v63, %v926_v53  ;;  %v393_v6 = vadd.f32 %v392_v0, %v926_v53 }
 0x108   :  { %v354_v7 = vpop.f32.mrf.mxu0  ;;  %v394_v8 = vpop.f32.mrf.mxu1 }
 0x109   :  { %v639_v9 = vpack.c.bf16 %v428_v3, %v427_v1  ;;  %v647_v10 = vpack.c.bf16 %v444_v4, %v443_v2  ;;  %v355_v11 = vadd.f32 %v354_v7, %v928_v54  ;;  %v395_v12 = vadd.f32 %v394_v8, %v928_v54 }
 0x10a   :  { %v358_v13 = vpop.f32.mrf.mxu0  ;;  %v398_v14 = vpop.f32.mrf.mxu1  ;;  %v429_v17 = vmax.f32 %v353_v5, 0.0  ;;  %v445_v18 = vmax.f32 %v393_v6, 0.0 }
 0x10b   :  { %555 = vst [vmem:[%s1013_s3] sm:$0xff] %v639_v9  ;;  %563 = vst [vmem:[%s1013_s3 + $0x40] sm:$0xff] %v647_v10  ;;  %v359_v15 = vadd.f32 %v358_v13, %v926_v53  ;;  %v399_v16 = vadd.f32 %v398_v14, %v926_v53  ;;  %v430_v19 = vmax.f32 %v355_v11, 0.0  ;;  %v446_v20 = vmax.f32 %v395_v12, 0.0 }
 0x10c   :  { %v360_v21 = vpop.f32.mrf.mxu0  ;;  %v400_v22 = vpop.f32.mrf.mxu1 }
 0x10d   :  { %v361_v23 = vadd.f32 %v360_v21, %v928_v54  ;;  %v401_v24 = vadd.f32 %v400_v22, %v928_v54  ;;  %v640_v25 = vpack.c.bf16 %v430_v19, %v429_v17  ;;  %v648_v26 = vpack.c.bf16 %v446_v20, %v445_v18 }
 0x10e   :  { %v362_v27 = vpop.f32.mrf.mxu0  ;;  %v402_v28 = vpop.f32.mrf.mxu1  ;;  %v431_v29 = vmax.f32 %v359_v15, 0.0  ;;  %v447_v30 = vmax.f32 %v399_v16, 0.0 }
 0x10f   :  { %v432_v31 = vmax.f32 %v361_v23, 0.0  ;;  %v448_v32 = vmax.f32 %v401_v24, 0.0  ;;  %556 = vst [vmem:[%s1013_s3 + $0x8] sm:$0xff] %v640_v25  ;;  %564 = vst [vmem:[%s1013_s3 + $0x48] sm:$0xff] %v648_v26  ;;  %v363_v33 = vadd.f32 %v362_v27, %v926_v53  ;;  %v403_v34 = vadd.f32 %v402_v28, %v926_v53 }
 0x110   :  { %v364_v35 = vpop.f32.mrf.mxu0  ;;  %v404_v36 = vpop.f32.mrf.mxu1 }
 0x111   :  { %v641_v37 = vpack.c.bf16 %v432_v31, %v431_v29  ;;  %v649_v38 = vpack.c.bf16 %v448_v32, %v447_v30  ;;  %v365_v39 = vadd.f32 %v364_v35, %v928_v54  ;;  %v405_v40 = vadd.f32 %v404_v36, %v928_v54 }
 0x112   :  { %v368_v41 = vpop.f32.mrf.mxu0  ;;  %v408_v42 = vpop.f32.mrf.mxu1  ;;  %v433_v45 = vmax.f32 %v363_v33, 0.0  ;;  %v449_v46 = vmax.f32 %v403_v34, 0.0 }
 0x113   :  { %557 = vst [vmem:[%s1013_s3 + $0x10] sm:$0xff] %v641_v37  ;;  %565 = vst [vmem:[%s1013_s3 + $0x50] sm:$0xff] %v649_v38  ;;  %v369_v43 = vadd.f32 %v368_v41, %v926_v53  ;;  %v409_v44 = vadd.f32 %v408_v42, %v926_v53  ;;  %v434_v47 = vmax.f32 %v365_v39, 0.0  ;;  %v450_v48 = vmax.f32 %v405_v40, 0.0 }
 0x114   :  { %v370_v49 = vpop.f32.mrf.mxu0  ;;  %v410_v50 = vpop.f32.mrf.mxu1 }
 0x115   :  { %v371_v51 = vadd.f32 %v370_v49, %v928_v54  ;;  %v411_v52 = vadd.f32 %v410_v50, %v928_v54  ;;  %v642_v55 = vpack.c.bf16 %v434_v47, %v433_v45  ;;  %v650_v56 = vpack.c.bf16 %v450_v48, %v449_v46 }
 0x116   :  { %v372_v57 = vpop.f32.mrf.mxu0  ;;  %v412_v58 = vpop.f32.mrf.mxu1  ;;  %v435_v59 = vmax.f32 %v369_v43, 0.0  ;;  %v451_v60 = vmax.f32 %v409_v44, 0.0 }
 0x117   :  { %v436_v61 = vmax.f32 %v371_v51, 0.0  ;;  %v452_v62 = vmax.f32 %v411_v52, 0.0  ;;  %558 = vst [vmem:[%s1013_s3 + $0x18] sm:$0xff] %v642_v55  ;;  %566 = vst [vmem:[%s1013_s3 + $0x58] sm:$0xff] %v650_v56  ;;  %v373_v63 = vadd.f32 %v372_v57, %v926_v53  ;;  %v413_v0 = vadd.f32 %v412_v58, %v926_v53 }
 0x118   :  { %v374_v1 = vpop.f32.mrf.mxu0  ;;  %v414_v2 = vpop.f32.mrf.mxu1 }
 0x119   :  { %v643_v3 = vpack.c.bf16 %v436_v61, %v435_v59  ;;  %v651_v4 = vpack.c.bf16 %v452_v62, %v451_v60  ;;  %v375_v5 = vadd.f32 %v374_v1, %v928_v54  ;;  %v415_v6 = vadd.f32 %v414_v2, %v928_v54 }
 0x11a   :  { %v378_v7 = vpop.f32.mrf.mxu0  ;;  %v418_v8 = vpop.f32.mrf.mxu1  ;;  %v437_v11 = vmax.f32 %v373_v63, 0.0  ;;  %v453_v12 = vmax.f32 %v413_v0, 0.0 }
 0x11b   :  { %559 = vst [vmem:[%s1013_s3 + $0x20] sm:$0xff] %v643_v3  ;;  %567 = vst [vmem:[%s1013_s3 + $0x60] sm:$0xff] %v651_v4  ;;  %v379_v9 = vadd.f32 %v378_v7, %v926_v53  ;;  %v419_v10 = vadd.f32 %v418_v8, %v926_v53  ;;  %v438_v13 = vmax.f32 %v375_v5, 0.0  ;;  %v454_v14 = vmax.f32 %v415_v6, 0.0 }
 0x11c   :  { %v380_v15 = vpop.f32.mrf.mxu0  ;;  %v420_v16 = vpop.f32.mrf.mxu1 }
 0x11d   :  { %v381_v17 = vadd.f32 %v380_v15, %v928_v54  ;;  %v421_v18 = vadd.f32 %v420_v16, %v928_v54  ;;  %v644_v19 = vpack.c.bf16 %v438_v13, %v437_v11  ;;  %v652_v20 = vpack.c.bf16 %v454_v14, %v453_v12 }
 0x11e   :  { %v382_v21 = vpop.f32.mrf.mxu0  ;;  %v422_v22 = vpop.f32.mrf.mxu1  ;;  %v439_v23 = vmax.f32 %v379_v9, 0.0  ;;  %v455_v24 = vmax.f32 %v419_v10, 0.0 }
 0x11f   :  { %v440_v25 = vmax.f32 %v381_v17, 0.0  ;;  %v456_v26 = vmax.f32 %v421_v18, 0.0  ;;  %560 = vst [vmem:[%s1013_s3 + $0x28] sm:$0xff] %v644_v19  ;;  %568 = vst [vmem:[%s1013_s3 + $0x68] sm:$0xff] %v652_v20  ;;  %v383_v27 = vadd.f32 %v382_v21, %v926_v53  ;;  %v423_v28 = vadd.f32 %v422_v22, %v926_v53 }
 0x120   :  { %v384_v29 = vpop.f32.mrf.mxu0  ;;  %v424_v30 = vpop.f32.mrf.mxu1 }
 0x121   :  { %v645_v31 = vpack.c.bf16 %v440_v25, %v439_v23  ;;  %v653_v32 = vpack.c.bf16 %v456_v26, %v455_v24  ;;  %v385_v33 = vadd.f32 %v384_v29, %v928_v54  ;;  %v425_v34 = vadd.f32 %v424_v30, %v928_v54 }
 0x122   :  { %v441_v35 = vmax.f32 %v383_v27, 0.0  ;;  %v457_v36 = vmax.f32 %v423_v28, 0.0 }
 0x123   :  { %561 = vst [vmem:[%s1013_s3 + $0x30] sm:$0xff] %v645_v31  ;;  %569 = vst [vmem:[%s1013_s3 + $0x70] sm:$0xff] %v653_v32  ;;  %v442_v37 = vmax.f32 %v385_v33, 0.0  ;;  %v458_v53 = vmax.f32 %v425_v34, 0.0 }
 0x125   :  { %v646_v38 = vpack.c.bf16 %v442_v37, %v441_v35  ;;  %v654_v39 = vpack.c.bf16 %v458_v53, %v457_v36 }
 0x127   :  { %562 = vst [vmem:[%s1013_s3 + $0x38] sm:$0xff] %v646_v38  ;;  %570 = vst [vmem:[%s1013_s3 + $0x78] sm:$0xff] %v654_v39 }

// kernel: mesh_autoencoder_forward.14
= control target key start
LH: loop header
LB: loop body
LE: loop exit
PB: predicated region body
PF: predicated region fallthrough
CT: control target
= control target key end

     0   :  { %s618_s1 = inlined_call_operand.vmem [shape: bf16[128,128], index: 1, kind: input, shape index: {}]   ;;  %s619_s0 = inlined_call_operand.vmem [shape: bf16[128,128], index: 0, kind: input, shape index: {}]   ;;  %s620_s2 = inlined_call_operand.vmem [shape: f32[1,128], index: 2, kind: input, shape index: {}]   ;;  %s621_s3 = inlined_call_operand.vmem [shape: bf16[128,128], index: 3, kind: output, shape index: {}]  }
   0x1   :  { %v507_v0 = vld [vmem:[%s618_s1 + $0x38] sm:$0xff]   ;;  %v508_v1 = vld [vmem:[%s618_s1 + $0x30] sm:$0xff]   ;;  %v509_v2 = vld [vmem:[%s618_s1 + $0x28] sm:$0xff]  }
   0x2   :  { %459 = vmatprep.subr.bf16.mxu0 %v507_v0  ;;  %491 = vmatprep.subr.bf16.mxu1 %v507_v0  ;;  %v510_v3 = vld [vmem:[%s618_s1 + $0x20] sm:$0xff]   ;;  %v511_v6 = vld [vmem:[%s618_s1 + $0x18] sm:$0xff]   ;;  %v512_v7 = vld [vmem:[%s618_s1 + $0x10] sm:$0xff]  }
   0x3   :  { %460 = vmatpush3.bf16.msra.mxu0 %v507_v0  ;;  %499 = vmatpush3.bf16.msra.mxu1 %v507_v0  ;;  %v515_v4 = vld [vmem:[%s619_s0] sm:$0xff]   ;;  %v513_v8 = vld [vmem:[%s618_s1 + $0x8] sm:$0xff]   ;;  %v519_v12 = vld [vmem:[%s619_s0 + $0x10] sm:$0xff]  }
   0x4   :  { %461 = vmatprep.subr.bf16.mxu0 %v508_v1  ;;  %492 = vmatprep.subr.bf16.mxu1 %v508_v1  ;;  %v516_v5 = vld [vmem:[%s619_s0 + $0x20] sm:$0xff]   ;;  %v517_v10 = vld [vmem:[%s619_s0 + $0x8] sm:$0xff]   ;;  %v520_v13 = vld [vmem:[%s619_s0 + $0x30] sm:$0xff]  }
   0x5   :  { %475 = vmatprep.mubr.bf16.mxu0 %v515_v4  ;;  %483 = vmatprep.mubr.bf16.mxu1 %v516_v5  ;;  %v514_v9 = vld [vmem:[%s618_s1] sm:$0xff]   ;;  %v518_v11 = vld [vmem:[%s619_s0 + $0x28] sm:$0xff]   ;;  %v521_v14 = vld [vmem:[%s619_s0 + $0x18] sm:$0xff]  }
   0x6   :  { %v522_v15 = vld [vmem:[%s619_s0 + $0x38] sm:$0xff]   ;;  %v347_v16 = vld [vmem:[%s620_s2] ss:$0 sm:$0xff] }
   0x7   :  { %462 = vmatpush3.bf16.msra.mxu0 %v508_v1  ;;  %500 = vmatpush3.bf16.msra.mxu1 %v508_v1 }
   0x8   :  { %463 = vmatprep.subr.bf16.mxu0 %v509_v2  ;;  %493 = vmatprep.subr.bf16.mxu1 %v509_v2 }
   0xb   :  { %464 = vmatpush3.bf16.msra.mxu0 %v509_v2  ;;  %501 = vmatpush3.bf16.msra.mxu1 %v509_v2 }
   0xc   :  { %465 = vmatprep.subr.bf16.mxu0 %v510_v3  ;;  %494 = vmatprep.subr.bf16.mxu1 %v510_v3 }
   0xf   :  { %466 = vmatpush3.bf16.msra.mxu0 %v510_v3  ;;  %502 = vmatpush3.bf16.msra.mxu1 %v510_v3 }
  0x10   :  { %467 = vmatprep.subr.bf16.mxu0 %v511_v6  ;;  %495 = vmatprep.subr.bf16.mxu1 %v511_v6 }
  0x13   :  { %468 = vmatpush3.bf16.msra.mxu0 %v511_v6  ;;  %503 = vmatpush3.bf16.msra.mxu1 %v511_v6 }
  0x14   :  { %469 = vmatprep.subr.bf16.mxu0 %v512_v7  ;;  %496 = vmatprep.subr.bf16.mxu1 %v512_v7 }
  0x17   :  { %470 = vmatpush3.bf16.msra.mxu0 %v512_v7  ;;  %504 = vmatpush3.bf16.msra.mxu1 %v512_v7 }
  0x18   :  { %471 = vmatprep.subr.bf16.mxu0 %v513_v8  ;;  %497 = vmatprep.subr.bf16.mxu1 %v513_v8 }
  0x1b   :  { %472 = vmatpush3.bf16.msra.mxu0 %v513_v8  ;;  %505 = vmatpush3.bf16.msra.mxu1 %v513_v8 }
  0x1c   :  { %473 = vmatprep.subr.bf16.mxu0 %v514_v9  ;;  %498 = vmatprep.subr.bf16.mxu1 %v514_v9 }
  0x1f   :  { %474 = vmatpush3.bf16.msra.mxu0 %v514_v9  ;;  %506 = vmatpush3.bf16.msra.mxu1 %v514_v9 }
  0x22   :  { %476 = vmatmul.mubr.bf16.vlgmr.msra.gmra.mxu0 %v517_v10  ;;  %484 = vmatmul.mubr.bf16.vlgmr.msra.gmra.mxu1 %v518_v11 }
  0x23   :  { %479 = vmatprep.mubr.bf16.mxu0 %v519_v12  ;;  %487 = vmatprep.mubr.bf16.mxu1 %v520_v13 }
  0x2a   :  { %480 = vmatmul.mubr.bf16.gmra.mxu0 %v521_v14  ;;  %488 = vmatmul.mubr.bf16.gmra.mxu1 %v522_v15 }
  0xe2   :  { %v477_v17 = vpop.f32.mrf.mxu0  ;;  %v485_v18 = vpop.f32.mrf.mxu1 }
  0xe3   :  { %v193_v19 = vadd.f32 %v477_v17, %v347_v16  ;;  %v225_v20 = vadd.f32 %v485_v18, %v347_v16 }
  0xe4   :  { %v184_v21 = vpop.f32.mrf.mxu0  ;;  %v216_v22 = vpop.f32.mrf.mxu1 }
  0xe5   :  { %v185_v23 = vadd.f32 %v347_v16, %v184_v21  ;;  %v217_v24 = vadd.f32 %v347_v16, %v216_v22  ;;  %v249_v29 = vmax.f32 %v193_v19, 0.0  ;;  %v257_v30 = vmax.f32 %v225_v20, 0.0 }
  0xe6   :  { %v478_v25 = vpop.f32.mrf.mxu0  ;;  %v486_v26 = vpop.f32.mrf.mxu1 }
  0xe7   :  { %v196_v27 = vadd.f32 %v478_v25, %v347_v16  ;;  %v228_v28 = vadd.f32 %v486_v26, %v347_v16  ;;  %v247_v37 = vmax.f32 %v185_v23, 0.0  ;;  %v255_v38 = vmax.f32 %v217_v24, 0.0 }
  0xe8   :  { %v187_v31 = vpop.f32.mrf.mxu0  ;;  %v219_v32 = vpop.f32.mrf.mxu1 }
  0xe9   :  { %v250_v33 = vmax.f32 %v196_v27, 0.0  ;;  %v258_v34 = vmax.f32 %v228_v28, 0.0  ;;  %v188_v35 = vadd.f32 %v347_v16, %v187_v31  ;;  %v220_v36 = vadd.f32 %v347_v16, %v219_v32 }
  0xea   :  { %v481_v39 = vpop.f32.mrf.mxu0  ;;  %v489_v40 = vpop.f32.mrf.mxu1 }
  0xeb   :  { %v404_v41 = vpack.c.bf16 %v250_v33, %v249_v29  ;;  %v424_v42 = vpack.c.bf16 %v258_v34, %v257_v30  ;;  %v248_v43 = vmax.f32 %v188_v35, 0.0  ;;  %v256_v44 = vmax.f32 %v220_v36, 0.0 }
  0xec   :  { %v209_v45 = vadd.f32 %v481_v39, %v347_v16  ;;  %v241_v46 = vadd.f32 %v489_v40, %v347_v16  ;;  %v200_v47 = vpop.f32.mrf.mxu0  ;;  %v232_v48 = vpop.f32.mrf.mxu1 }
  0xed   :  { %436 = vst [vmem:[%s621_s3 + $0x8] sm:$0xff] %v404_v41   ;;  %440 = vst [vmem:[%s621_s3 + $0x28] sm:$0xff] %v424_v42   ;;  %v399_v49 = vpack.c.bf16 %v248_v43, %v247_v37  ;;  %v419_v50 = vpack.c.bf16 %v256_v44, %v255_v38  ;;  %v201_v51 = vadd.f32 %v347_v16, %v200_v47 }
  0xee   :  { %v233_v52 = vadd.f32 %v347_v16, %v232_v48  ;;  %v482_v53 = vpop.f32.mrf.mxu0  ;;  %v490_v54 = vpop.f32.mrf.mxu1  ;;  %v253_v57 = vmax.f32 %v209_v45, 0.0  ;;  %v261_v58 = vmax.f32 %v241_v46, 0.0 }
  0xef   :  { %400 = vst [vmem:[%s621_s3] sm:$0xff] %v399_v49   ;;  %439 = vst [vmem:[%s621_s3 + $0x20] sm:$0xff] %v419_v50   ;;  %v212_v55 = vadd.f32 %v482_v53, %v347_v16  ;;  %v244_v56 = vadd.f32 %v490_v54, %v347_v16  ;;  %v251_v1 = vmax.f32 %v201_v51, 0.0 }
  0xf0   :  { %v203_v59 = vpop.f32.mrf.mxu0  ;;  %v235_v60 = vpop.f32.mrf.mxu1  ;;  %v259_v2 = vmax.f32 %v233_v52, 0.0 }
  0xf1   :  { %v254_v61 = vmax.f32 %v212_v55, 0.0  ;;  %v262_v62 = vmax.f32 %v244_v56, 0.0  ;;  %v204_v63 = vadd.f32 %v347_v16, %v203_v59  ;;  %v236_v0 = vadd.f32 %v347_v16, %v235_v60 }
  0xf3   :  { %v414_v3 = vpack.c.bf16 %v254_v61, %v253_v57  ;;  %v434_v4 = vpack.c.bf16 %v262_v62, %v261_v58  ;;  %v252_v5 = vmax.f32 %v204_v63, 0.0  ;;  %v260_v6 = vmax.f32 %v236_v0, 0.0 }
  0xf5   :  { %438 = vst [vmem:[%s621_s3 + $0x18] sm:$0xff] %v414_v3   ;;  %442 = vst [vmem:[%s621_s3 + $0x38] sm:$0xff] %v434_v4   ;;  %v409_v7 = vpack.c.bf16 %v252_v5, %v251_v1  ;;  %v429_v8 = vpack.c.bf16 %v260_v6, %v259_v2 }
  0xf7   :  { %437 = vst [vmem:[%s621_s3 + $0x10] sm:$0xff] %v409_v7   ;;  %441 = vst [vmem:[%s621_s3 + $0x30] sm:$0xff] %v429_v8  }

// kernel: mesh_autoencoder_forward.11
= control target key start
LH: loop header
LB: loop body
LE: loop exit
PB: predicated region body
PF: predicated region fallthrough
CT: control target
= control target key end

     0   :  { %s2476_s1 = inlined_call_operand.vmem [shape: bf16[768,256], index: 1, kind: input, shape index: {}]   ;;  %s2477_s0 = inlined_call_operand.vmem [shape: bf16[128,768], index: 0, kind: input, shape index: {}]   ;;  %s2478_s2 = inlined_call_operand.vmem [shape: f32[1,256], index: 2, kind: input, shape index: {}]   ;;  %s2479_s3 = inlined_call_operand.vmem [shape: bf16[128,256], index: 3, kind: output, shape index: {}]  }
   0x1   :  { %v1553_v0 = vld [vmem:[%s2476_s1 + $0x74] ss:$8 sps:$4 sm:$0xff]   ;;  %v1557_v2 = vld [vmem:[%s2476_s1 + $0x70] ss:$8 sps:$4 sm:$0xff]   ;;  %v1559_v4 = vld [vmem:[%s2476_s1 + $0x64] ss:$8 sps:$4 sm:$0xff]  }
   0x2   :  { %v1555_v1 = vld [vmem:[%s2476_s1 + $0x174] ss:$8 sps:$4 sm:$0xff]   ;;  %890 = vmatprep.subr.bf16.mxu0 %v1553_v0  ;;  %v1558_v3 = vld [vmem:[%s2476_s1 + $0x170] ss:$8 sps:$4 sm:$0xff]   ;;  %v1561_v5 = vld [vmem:[%s2476_s1 + $0x164] ss:$8 sps:$4 sm:$0xff]  }
   0x3   :  { %1003 = vmatprep.subr.bf16.mxu1 %v1555_v1  ;;  %891 = vmatpush1.bf16.msra.mxu0 %v1557_v2  ;;  %v1563_v6 = vld [vmem:[%s2476_s1 + $0x60] ss:$8 sps:$4 sm:$0xff]   ;;  %v1565_v8 = vld [vmem:[%s2476_s1 + $0x54] ss:$8 sps:$4 sm:$0xff]   ;;  %v1569_v10 = vld [vmem:[%s2476_s1 + $0x50] ss:$8 sps:$4 sm:$0xff]  }
   0x4   :  { %1004 = vmatpush1.bf16.msra.mxu1 %v1558_v3  ;;  %892 = vmatprep.subr.bf16.mxu0 %v1559_v4  ;;  %v1564_v7 = vld [vmem:[%s2476_s1 + $0x160] ss:$8 sps:$4 sm:$0xff]   ;;  %v1567_v9 = vld [vmem:[%s2476_s1 + $0x154] ss:$8 sps:$4 sm:$0xff]   ;;  %v1570_v11 = vld [vmem:[%s2476_s1 + $0x150] ss:$8 sps:$4 sm:$0xff]  }
   0x5   :  { %1005 = vmatprep.subr.bf16.mxu1 %v1561_v5  ;;  %v1571_v12 = vld [vmem:[%s2476_s1 + $0x44] ss:$8 sps:$4 sm:$0xff]   ;;  %v1575_v14 = vld [vmem:[%s2476_s1 + $0x40] ss:$8 sps:$4 sm:$0xff]   ;;  %v1577_v16 = vld [vmem:[%s2476_s1 + $0x34] ss:$8 sps:$4 sm:$0xff]  }
   0x6   :  { %v1573_v13 = vld [vmem:[%s2476_s1 + $0x144] ss:$8 sps:$4 sm:$0xff]   ;;  %v1576_v15 = vld [vmem:[%s2476_s1 + $0x140] ss:$8 sps:$4 sm:$0xff]   ;;  %v1579_v17 = vld [vmem:[%s2476_s1 + $0x134] ss:$8 sps:$4 sm:$0xff]  }
   0x7   :  { %893 = vmatpush1.bf16.msra.mxu0 %v1563_v6  ;;  %v1581_v18 = vld [vmem:[%s2476_s1 + $0x30] ss:$8 sps:$4 sm:$0xff]   ;;  %v1583_v20 = vld [vmem:[%s2476_s1 + $0x24] ss:$8 sps:$4 sm:$0xff]   ;;  %v1587_v22 = vld [vmem:[%s2476_s1 + $0x20] ss:$8 sps:$4 sm:$0xff]  }
   0x8   :  { %1006 = vmatpush1.bf16.msra.mxu1 %v1564_v7  ;;  %894 = vmatprep.subr.bf16.mxu0 %v1565_v8  ;;  %v1582_v19 = vld [vmem:[%s2476_s1 + $0x130] ss:$8 sps:$4 sm:$0xff]   ;;  %v1585_v21 = vld [vmem:[%s2476_s1 + $0x124] ss:$8 sps:$4 sm:$0xff]   ;;  %v1588_v23 = vld [vmem:[%s2476_s1 + $0x120] ss:$8 sps:$4 sm:$0xff]  }
   0x9   :  { %1007 = vmatprep.subr.bf16.mxu1 %v1567_v9  ;;  %v1589_v24 = vld [vmem:[%s2476_s1 + $0x14] ss:$8 sps:$4 sm:$0xff]   ;;  %v1593_v26 = vld [vmem:[%s2476_s1 + $0x10] ss:$8 sps:$4 sm:$0xff]   ;;  %v1595_v28 = vld [vmem:[%s2476_s1 + $0x4] ss:$8 sps:$4 sm:$0xff]  }
   0xa   :  { %v1591_v25 = vld [vmem:[%s2476_s1 + $0x114] ss:$8 sps:$4 sm:$0xff]   ;;  %v1594_v27 = vld [vmem:[%s2476_s1 + $0x110] ss:$8 sps:$4 sm:$0xff]   ;;  %v1597_v29 = vld [vmem:[%s2476_s1 + $0x104] ss:$8 sps:$4 sm:$0xff]  }
   0xb   :  { %895 = vmatpush1.bf16.msra.mxu0 %v1569_v10  ;;  %v1599_v30 = vld [vmem:[%s2476_s1] ss:$8 sps:$4 sm:$0xff]   ;;  %v1601_v32 = vld [vmem:[%s2476_s1 + $0xf4] ss:$8 sps:$4 sm:$0xff]   ;;  %v1605_v34 = vld [vmem:[%s2476_s1 + $0xf0] ss:$8 sps:$4 sm:$0xff]  }
   0xc   :  { %1008 = vmatpush1.bf16.msra.mxu1 %v1570_v11  ;;  %896 = vmatprep.subr.bf16.mxu0 %v1571_v12  ;;  %v1600_v31 = vld [vmem:[%s2476_s1 + $0x100] ss:$8 sps:$4 sm:$0xff]   ;;  %v1603_v33 = vld [vmem:[%s2476_s1 + $0x1f4] ss:$8 sps:$4 sm:$0xff]   ;;  %v1606_v35 = vld [vmem:[%s2476_s1 + $0x1f0] ss:$8 sps:$4 sm:$0xff]  }
   0xd   :  { %1009 = vmatprep.subr.bf16.mxu1 %v1573_v13  ;;  %v1607_v36 = vld [vmem:[%s2476_s1 + $0xe4] ss:$8 sps:$4 sm:$0xff]   ;;  %v1611_v38 = vld [vmem:[%s2476_s1 + $0xe0] ss:$8 sps:$4 sm:$0xff]   ;;  %v1613_v40 = vld [vmem:[%s2476_s1 + $0xd4] ss:$8 sps:$4 sm:$0xff]  }
   0xe   :  { %v1609_v37 = vld [vmem:[%s2476_s1 + $0x1e4] ss:$8 sps:$4 sm:$0xff]   ;;  %v1612_v39 = vld [vmem:[%s2476_s1 + $0x1e0] ss:$8 sps:$4 sm:$0xff]   ;;  %v1615_v41 = vld [vmem:[%s2476_s1 + $0x1d4] ss:$8 sps:$4 sm:$0xff]  }
   0xf   :  { %897 = vmatpush1.bf16.msra.mxu0 %v1575_v14  ;;  %v1617_v42 = vld [vmem:[%s2476_s1 + $0xd0] ss:$8 sps:$4 sm:$0xff]   ;;  %v1619_v44 = vld [vmem:[%s2476_s1 + $0xc4] ss:$8 sps:$4 sm:$0xff]   ;;  %v1623_v46 = vld [vmem:[%s2476_s1 + $0xc0] ss:$8 sps:$4 sm:$0xff]  }
  0x10   :  { %1010 = vmatpush1.bf16.msra.mxu1 %v1576_v15  ;;  %898 = vmatprep.subr.bf16.mxu0 %v1577_v16  ;;  %v1618_v43 = vld [vmem:[%s2476_s1 + $0x1d0] ss:$8 sps:$4 sm:$0xff]   ;;  %v1621_v45 = vld [vmem:[%s2476_s1 + $0x1c4] ss:$8 sps:$4 sm:$0xff]   ;;  %v1624_v47 = vld [vmem:[%s2476_s1 + $0x1c0] ss:$8 sps:$4 sm:$0xff]  }
  0x11   :  { %1011 = vmatprep.subr.bf16.mxu1 %v1579_v17  ;;  %v1625_v48 = vld [vmem:[%s2476_s1 + $0xb4] ss:$8 sps:$4 sm:$0xff]   ;;  %v1654_v51 = vld [vmem:[%s2477_s0 + $0xc] ss:$24 sps:$4 sm:$0xff]   ;;  %v1629_v52 = vld [vmem:[%s2476_s1 + $0xb0] ss:$8 sps:$4 sm:$0xff]  }
  0x12   :  { %v1651_v49 = vld [vmem:[%s2477_s0 + $0x4] ss:$24 sps:$4 sm:$0xff]   ;;  %v1630_v53 = vld [vmem:[%s2476_s1 + $0x1b0] ss:$8 sps:$4 sm:$0xff]   ;;  %1035 = vmatprep.mubr.bf16.mxu1 %v1654_v51  ;;  %v1635_v56 = vld [vmem:[%s2476_s1 + $0xa0] ss:$8 sps:$4 sm:$0xff]  }
  0x13   :  { %899 = vmatpush1.bf16.msra.mxu0 %v1581_v18  ;;  %v1627_v50 = vld [vmem:[%s2476_s1 + $0x1b4] ss:$8 sps:$4 sm:$0xff]   ;;  %922 = vmatprep.mubr.bf16.mxu0 %v1651_v49  ;;  %v1631_v54 = vld [vmem:[%s2476_s1 + $0xa4] ss:$8 sps:$4 sm:$0xff]   ;;  %v1636_v57 = vld [vmem:[%s2476_s1 + $0x1a0] ss:$8 sps:$4 sm:$0xff]  }
  0x14   :  { %1012 = vmatpush1.bf16.msra.mxu1 %v1582_v19  ;;  %900 = vmatprep.subr.bf16.mxu0 %v1583_v20  ;;  %v1633_v55 = vld [vmem:[%s2476_s1 + $0x1a4] ss:$8 sps:$4 sm:$0xff]   ;;  %v1637_v58 = vld [vmem:[%s2476_s1 + $0x94] ss:$8 sps:$4 sm:$0xff]   ;;  %v1641_v60 = vld [vmem:[%s2476_s1 + $0x90] ss:$8 sps:$4 sm:$0xff]  }
  0x15   :  { %1013 = vmatprep.subr.bf16.mxu1 %v1585_v21  ;;  %v1639_v59 = vld [vmem:[%s2476_s1 + $0x194] ss:$8 sps:$4 sm:$0xff]   ;;  %v1642_v61 = vld [vmem:[%s2476_s1 + $0x190] ss:$8 sps:$4 sm:$0xff]   ;;  %v1643_v62 = vld [vmem:[%s2476_s1 + $0x84] ss:$8 sps:$4 sm:$0xff]  }
  0x16   :  { %v1645_v63 = vld [vmem:[%s2476_s1 + $0x184] ss:$8 sps:$4 sm:$0xff]   ;;  %v1647_v0 = vld [vmem:[%s2476_s1 + $0x80] ss:$8 sps:$4 sm:$0xff]   ;;  %v1657_v2 = vld [vmem:[%s2476_s1 + $0x274] ss:$8 sps:$4 sm:$0xff]  }
  0x17   :  { %901 = vmatpush1.bf16.msra.mxu0 %v1587_v22  ;;  %v1648_v1 = vld [vmem:[%s2476_s1 + $0x180] ss:$8 sps:$4 sm:$0xff]   ;;  %v1655_v5 = vld [vmem:[%s2476_s1 + $0x270] ss:$8 sps:$4 sm:$0xff]   ;;  %v1660_v6 = vld [vmem:[%s2476_s1 + $0x264] ss:$8 sps:$4 sm:$0xff]  }
  0x18   :  { %1014 = vmatpush1.bf16.msra.mxu1 %v1588_v23  ;;  %902 = vmatprep.subr.bf16.mxu0 %v1589_v24  ;;  %v1649_v3 = vld [vmem:[%s2477_s0] ss:$24 sps:$4 sm:$0xff]   ;;  %v1661_v7 = vld [vmem:[%s2477_s0 + $0x34] ss:$24 sps:$4 sm:$0xff]   ;;  %v1665_v11 = vld [vmem:[%s2477_s0 + $0x30] ss:$24 sps:$4 sm:$0xff]  }
  0x19   :  { %1015 = vmatprep.subr.bf16.mxu1 %v1591_v25  ;;  %v1652_v4 = vld [vmem:[%s2477_s0 + $0x8] ss:$24 sps:$4 sm:$0xff]   ;;  %v1663_v8 = vld [vmem:[%s2477_s0 + $0x3c] ss:$24 sps:$4 sm:$0xff]   ;;  %v1666_v12 = vld [vmem:[%s2477_s0 + $0x38] ss:$24 sps:$4 sm:$0xff]  }
  0x1a   :  { %v1658_v9 = vld [vmem:[%s2476_s1 + $0x260] ss:$8 sps:$4 sm:$0xff]   ;;  %v1669_v10 = vld [vmem:[%s2476_s1 + $0x254] ss:$8 sps:$4 sm:$0xff]   ;;  %v1667_v13 = vld [vmem:[%s2476_s1 + $0x250] ss:$8 sps:$4 sm:$0xff]  }
  0x1b   :  { %903 = vmatpush1.bf16.msra.mxu0 %v1593_v26  ;;  %v1672_v14 = vld [vmem:[%s2476_s1 + $0x244] ss:$8 sps:$4 sm:$0xff]   ;;  %v1670_v17 = vld [vmem:[%s2476_s1 + $0x240] ss:$8 sps:$4 sm:$0xff]   ;;  %v1681_v18 = vld [vmem:[%s2476_s1 + $0x234] ss:$8 sps:$4 sm:$0xff]  }
  0x1c   :  { %1016 = vmatpush1.bf16.msra.mxu1 %v1594_v27  ;;  %904 = vmatprep.subr.bf16.mxu0 %v1595_v28  ;;  %v1673_v15 = vld [vmem:[%s2477_s0 + $0x64] ss:$24 sps:$4 sm:$0xff]   ;;  %v1677_v19 = vld [vmem:[%s2477_s0 + $0x60] ss:$24 sps:$4 sm:$0xff]   ;;  %v1685_v23 = vld [vmem:[%s2477_s0 + $0x94] ss:$24 sps:$4 sm:$0xff]  }
  0x1d   :  { %1017 = vmatprep.subr.bf16.mxu1 %v1597_v29  ;;  %v1675_v16 = vld [vmem:[%s2477_s0 + $0x6c] ss:$24 sps:$4 sm:$0xff]   ;;  %v1678_v20 = vld [vmem:[%s2477_s0 + $0x68] ss:$24 sps:$4 sm:$0xff]   ;;  %v1679_v21 = vld [vmem:[%s2476_s1 + $0x230] ss:$8 sps:$4 sm:$0xff]  }
  0x1e   :  { %v1684_v22 = vld [vmem:[%s2476_s1 + $0x224] ss:$8 sps:$4 sm:$0xff]   ;;  %v1687_v24 = vld [vmem:[%s2477_s0 + $0x9c] ss:$24 sps:$4 sm:$0xff]   ;;  %v1682_v25 = vld [vmem:[%s2476_s1 + $0x220] ss:$8 sps:$4 sm:$0xff]  }
  0x1f   :  { %905 = vmatpush1.bf16.msra.mxu0 %v1599_v30  ;;  %v1693_v26 = vld [vmem:[%s2476_s1 + $0x214] ss:$8 sps:$4 sm:$0xff]   ;;  %v1689_v27 = vld [vmem:[%s2477_s0 + $0x90] ss:$24 sps:$4 sm:$0xff]   ;;  %v1696_v30 = vld [vmem:[%s2476_s1 + $0x204] ss:$8 sps:$4 sm:$0xff]  }
  0x20   :  { %1018 = vmatpush1.bf16.msra.mxu1 %v1600_v31  ;;  %906 = vmatprep.subr.bf16.mxu0 %v1601_v32  ;;  %v1690_v28 = vld [vmem:[%s2477_s0 + $0x98] ss:$24 sps:$4 sm:$0xff]   ;;  %v1697_v31 = vld [vmem:[%s2477_s0 + $0xc4] ss:$24 sps:$4 sm:$0xff]   ;;  %v1718_v49 = vld [vmem:[%s2476_s1 + $0x2c0] ss:$8 sps:$4 sm:$0xff]  }
  0x21   :  { %1019 = vmatprep.subr.bf16.mxu1 %v1603_v33  ;;  %v1691_v29 = vld [vmem:[%s2476_s1 + $0x210] ss:$8 sps:$4 sm:$0xff]   ;;  %v1699_v32 = vld [vmem:[%s2477_s0 + $0xcc] ss:$24 sps:$4 sm:$0xff]   ;;  %v1694_v33 = vld [vmem:[%s2476_s1 + $0x200] ss:$8 sps:$4 sm:$0xff]  }
  0x22   :  { %v1725_v51 = vld [vmem:[%s2477_s0 + $0x120] ss:$24 sps:$4 sm:$0xff]  }
  0x23   :  { %907 = vmatpush2.bf16.msra.mxu0 %v1605_v34  ;;  %v1705_v34 = vld [vmem:[%s2476_s1 + $0x2f4] ss:$8 sps:$4 sm:$0xff]  }
  0x24   :  { %1020 = vmatpush2.bf16.msra.mxu1 %v1606_v35  ;;  %908 = vmatprep.subr.bf16.mxu0 %v1607_v36  ;;  %v1701_v35 = vld [vmem:[%s2477_s0 + $0xc0] ss:$24 sps:$4 sm:$0xff]  }
  0x25   :  { %1021 = vmatprep.subr.bf16.mxu1 %v1609_v37  ;;  %v1702_v36 = vld [vmem:[%s2477_s0 + $0xc8] ss:$24 sps:$4 sm:$0xff]   ;;  %v1703_v37 = vld [vmem:[%s2476_s1 + $0x2f0] ss:$8 sps:$4 sm:$0xff]  }
  0x27   :  { %909 = vmatpush2.bf16.msra.mxu0 %v1611_v38  ;;  %v1708_v38 = vld [vmem:[%s2476_s1 + $0x2e4] ss:$8 sps:$4 sm:$0xff]  }
  0x28   :  { %1022 = vmatpush2.bf16.msra.mxu1 %v1612_v39  ;;  %910 = vmatprep.subr.bf16.mxu0 %v1613_v40  ;;  %v1709_v39 = vld [vmem:[%s2477_s0 + $0xf4] ss:$24 sps:$4 sm:$0xff]  }
  0x29   :  { %1023 = vmatprep.subr.bf16.mxu1 %v1615_v41  ;;  %v1711_v40 = vld [vmem:[%s2477_s0 + $0xfc] ss:$24 sps:$4 sm:$0xff]   ;;  %v1706_v41 = vld [vmem:[%s2476_s1 + $0x2e0] ss:$8 sps:$4 sm:$0xff]  }
  0x2b   :  { %911 = vmatpush2.bf16.msra.mxu0 %v1617_v42  ;;  %v1717_v42 = vld [vmem:[%s2476_s1 + $0x2d4] ss:$8 sps:$4 sm:$0xff]  }
  0x2c   :  { %1024 = vmatpush2.bf16.msra.mxu1 %v1618_v43  ;;  %912 = vmatprep.subr.bf16.mxu0 %v1619_v44  ;;  %v1713_v43 = vld [vmem:[%s2477_s0 + $0xf0] ss:$24 sps:$4 sm:$0xff]  }
  0x2d   :  { %1025 = vmatprep.subr.bf16.mxu1 %v1621_v45  ;;  %v1714_v44 = vld [vmem:[%s2477_s0 + $0xf8] ss:$24 sps:$4 sm:$0xff]  }
  0x2e   :  { %v1715_v45 = vld [vmem:[%s2476_s1 + $0x2d0] ss:$8 sps:$4 sm:$0xff]  }
  0x2f   :  { %913 = vmatpush2.bf16.msra.mxu0 %v1623_v46  ;;  %v1720_v46 = vld [vmem:[%s2476_s1 + $0x2c4] ss:$8 sps:$4 sm:$0xff]  }
  0x30   :  { %1026 = vmatpush2.bf16.msra.mxu1 %v1624_v47  ;;  %914 = vmatprep.subr.bf16.mxu0 %v1625_v48  ;;  %v1721_v47 = vld [vmem:[%s2477_s0 + $0x124] ss:$24 sps:$4 sm:$0xff]  }
  0x31   :  { %1027 = vmatprep.subr.bf16.mxu1 %v1627_v50  ;;  %v1723_v48 = vld [vmem:[%s2477_s0 + $0x12c] ss:$24 sps:$4 sm:$0xff]   ;;  %v1729_v50 = vld [vmem:[%s2476_s1 + $0x2b4] ss:$8 sps:$4 sm:$0xff]  }
  0x33   :  { %915 = vmatpush2.bf16.msra.mxu0 %v1629_v52  ;;  %v1726_v52 = vld [vmem:[%s2477_s0 + $0x128] ss:$24 sps:$4 sm:$0xff]  }
  0x34   :  { %1028 = vmatpush2.bf16.msra.mxu1 %v1630_v53  ;;  %916 = vmatprep.subr.bf16.mxu0 %v1631_v54  ;;  %v1727_v53 = vld [vmem:[%s2476_s1 + $0x2b0] ss:$8 sps:$4 sm:$0xff]   ;;  %v1732_v54 = vld [vmem:[%s2476_s1 + $0x2a4] ss:$8 sps:$4 sm:$0xff]  }
  0x35   :  { %1029 = vmatprep.subr.bf16.mxu1 %v1633_v55  ;;  %v1733_v55 = vld [vmem:[%s2477_s0 + $0x154] ss:$24 sps:$4 sm:$0xff]  }
  0x37   :  { %917 = vmatpush2.bf16.msra.mxu0 %v1635_v56  ;;  %v1735_v56 = vld [vmem:[%s2477_s0 + $0x15c] ss:$24 sps:$4 sm:$0xff]  }
  0x38   :  { %1030 = vmatpush2.bf16.msra.mxu1 %v1636_v57  ;;  %918 = vmatprep.subr.bf16.mxu0 %v1637_v58  ;;  %v1730_v57 = vld [vmem:[%s2476_s1 + $0x2a0] ss:$8 sps:$4 sm:$0xff]   ;;  %v1741_v58 = vld [vmem:[%s2476_s1 + $0x294] ss:$8 sps:$4 sm:$0xff]  }
  0x39   :  { %1031 = vmatprep.subr.bf16.mxu1 %v1639_v59  ;;  %v1737_v59 = vld [vmem:[%s2477_s0 + $0x150] ss:$24 sps:$4 sm:$0xff]  }
  0x3b   :  { %919 = vmatpush2.bf16.msra.mxu0 %v1641_v60  ;;  %v1738_v60 = vld [vmem:[%s2477_s0 + $0x158] ss:$24 sps:$4 sm:$0xff]  }
  0x3c   :  { %1032 = vmatpush2.bf16.msra.mxu1 %v1642_v61  ;;  %920 = vmatprep.subr.bf16.mxu0 %v1643_v62  ;;  %v1739_v61 = vld [vmem:[%s2476_s1 + $0x290] ss:$8 sps:$4 sm:$0xff]   ;;  %v1744_v62 = vld [vmem:[%s2476_s1 + $0x284] ss:$8 sps:$4 sm:$0xff]  }
  0x3d   :  { %1033 = vmatprep.subr.bf16.mxu1 %v1645_v63  ;;  %v1747_v63 = vld [vmem:[%s2477_s0 + $0x14] ss:$24 sps:$4 sm:$0xff]  }
  0x3f   :  { %921 = vmatpush2.bf16.msra.mxu0 %v1647_v0  ;;  %v1750_v0 = vld [vmem:[%s2477_s0 + $0xd4] ss:$24 sps:$4 sm:$0xff]  }
  0x40   :  { %1034 = vmatpush2.bf16.msra.mxu1 %v1648_v1  ;;  %1116 = vmatprep.subr.bf16.mxu0 %v1657_v2  ;;  %v1742_v1 = vld [vmem:[%s2476_s1 + $0x280] ss:$8 sps:$4 sm:$0xff]  }
  0x41   :  { %1521 = vmatprep.subr.bf16.mxu1 %v1657_v2  ;;  %v1745_v2 = vld [vmem:[%s2477_s0 + $0x10] ss:$24 sps:$4 sm:$0xff]  }
  0x42   :  { %923 = vmatmul.mubr.bf16.vlgmr.msra.gmra.mxu0 %v1649_v3  ;;  %v1748_v3 = vld [vmem:[%s2477_s0 + $0xd0] ss:$24 sps:$4 sm:$0xff]  }
  0x43   :  { %1036 = vmatmul.mubr.bf16.vlgmr.msra.gmra.mxu1 %v1652_v4  ;;  %1117 = vmatpush1.bf16.msra.mxu0 %v1655_v5  ;;  %v1751_v4 = vld [vmem:[%s2477_s0 + $0x44] ss:$24 sps:$4 sm:$0xff]  }
  0x44   :  { %1537 = vmatpush1.bf16.msra.mxu1 %v1655_v5  ;;  %1118 = vmatprep.subr.bf16.mxu0 %v1660_v6  ;;  %v1753_v5 = vld [vmem:[%s2477_s0 + $0x104] ss:$24 sps:$4 sm:$0xff]  }
  0x45   :  { %1522 = vmatprep.subr.bf16.mxu1 %v1660_v6  ;;  %932 = vmatprep.mubr.bf16.mxu0 %v1661_v7  ;;  %v1755_v6 = vld [vmem:[%s2477_s0 + $0x40] ss:$24 sps:$4 sm:$0xff]  }
  0x46   :  { %1045 = vmatprep.mubr.bf16.mxu1 %v1663_v8  ;;  %v1756_v7 = vld [vmem:[%s2477_s0 + $0x100] ss:$24 sps:$4 sm:$0xff]   ;;  %v1757_v8 = vld [vmem:[%s2477_s0 + $0x74] ss:$24 sps:$4 sm:$0xff]  }
  0x47   :  { %1119 = vmatpush1.bf16.msra.mxu0 %v1658_v9 }
  0x48   :  { %1538 = vmatpush1.bf16.msra.mxu1 %v1658_v9  ;;  %1120 = vmatprep.subr.bf16.mxu0 %v1669_v10  ;;  %v1759_v9 = vld [vmem:[%s2477_s0 + $0x134] ss:$24 sps:$4 sm:$0xff]  }
  0x49   :  { %1523 = vmatprep.subr.bf16.mxu1 %v1669_v10  ;;  %v1761_v10 = vld [vmem:[%s2477_s0 + $0x70] ss:$24 sps:$4 sm:$0xff]  }
  0x4a   :  { %933 = vmatmul.mubr.bf16.gmra.mxu0 %v1665_v11  ;;  %v1762_v11 = vld [vmem:[%s2477_s0 + $0x130] ss:$24 sps:$4 sm:$0xff]  }
  0x4b   :  { %1046 = vmatmul.mubr.bf16.gmra.mxu1 %v1666_v12  ;;  %1121 = vmatpush1.bf16.msra.mxu0 %v1667_v13  ;;  %v1763_v12 = vld [vmem:[%s2477_s0 + $0xa4] ss:$24 sps:$4 sm:$0xff]  }
  0x4c   :  { %1539 = vmatpush1.bf16.msra.mxu1 %v1667_v13  ;;  %1122 = vmatprep.subr.bf16.mxu0 %v1672_v14  ;;  %v1765_v13 = vld [vmem:[%s2477_s0 + $0x164] ss:$24 sps:$4 sm:$0xff]  }
  0x4d   :  { %1524 = vmatprep.subr.bf16.mxu1 %v1672_v14  ;;  %942 = vmatprep.mubr.bf16.mxu0 %v1673_v15  ;;  %v1767_v14 = vld [vmem:[%s2477_s0 + $0xa0] ss:$24 sps:$4 sm:$0xff]  }
  0x4e   :  { %1055 = vmatprep.mubr.bf16.mxu1 %v1675_v16  ;;  %v1768_v15 = vld [vmem:[%s2477_s0 + $0x160] ss:$24 sps:$4 sm:$0xff]  }
  0x4f   :  { %1123 = vmatpush1.bf16.msra.mxu0 %v1670_v17 }
  0x50   :  { %1540 = vmatpush1.bf16.msra.mxu1 %v1670_v17  ;;  %1124 = vmatprep.subr.bf16.mxu0 %v1681_v18 }
  0x51   :  { %1525 = vmatprep.subr.bf16.mxu1 %v1681_v18 }
  0x52   :  { %943 = vmatmul.mubr.bf16.gmra.mxu0 %v1677_v19 }
  0x53   :  { %1056 = vmatmul.mubr.bf16.gmra.mxu1 %v1678_v20  ;;  %1125 = vmatpush1.bf16.msra.mxu0 %v1679_v21 }
  0x54   :  { %1541 = vmatpush1.bf16.msra.mxu1 %v1679_v21  ;;  %1126 = vmatprep.subr.bf16.mxu0 %v1684_v22 }
  0x55   :  { %1526 = vmatprep.subr.bf16.mxu1 %v1684_v22  ;;  %952 = vmatprep.mubr.bf16.mxu0 %v1685_v23 }
  0x56   :  { %1065 = vmatprep.mubr.bf16.mxu1 %v1687_v24 }
  0x57   :  { %1127 = vmatpush1.bf16.msra.mxu0 %v1682_v25 }
  0x58   :  { %1542 = vmatpush1.bf16.msra.mxu1 %v1682_v25  ;;  %1128 = vmatprep.subr.bf16.mxu0 %v1693_v26 }
  0x59   :  { %1527 = vmatprep.subr.bf16.mxu1 %v1693_v26 }
  0x5a   :  { %953 = vmatmul.mubr.bf16.gmra.mxu0 %v1689_v27 }
  0x5b   :  { %1066 = vmatmul.mubr.bf16.gmra.mxu1 %v1690_v28  ;;  %1129 = vmatpush1.bf16.msra.mxu0 %v1691_v29 }
  0x5c   :  { %1543 = vmatpush1.bf16.msra.mxu1 %v1691_v29  ;;  %1130 = vmatprep.subr.bf16.mxu0 %v1696_v30 }
  0x5d   :  { %1528 = vmatprep.subr.bf16.mxu1 %v1696_v30  ;;  %962 = vmatprep.mubr.bf16.mxu0 %v1697_v31 }
  0x5e   :  { %1075 = vmatprep.mubr.bf16.mxu1 %v1699_v32 }
  0x5f   :  { %1131 = vmatpush1.bf16.msra.mxu0 %v1694_v33 }
  0x60   :  { %1544 = vmatpush1.bf16.msra.mxu1 %v1694_v33  ;;  %1132 = vmatprep.subr.bf16.mxu0 %v1705_v34 }
  0x61   :  { %1529 = vmatprep.subr.bf16.mxu1 %v1705_v34 }
  0x62   :  { %963 = vmatmul.mubr.bf16.gmra.mxu0 %v1701_v35 }
  0x63   :  { %1076 = vmatmul.mubr.bf16.gmra.mxu1 %v1702_v36  ;;  %1133 = vmatpush2.bf16.msra.mxu0 %v1703_v37 }
  0x64   :  { %1545 = vmatpush2.bf16.msra.mxu1 %v1703_v37  ;;  %1134 = vmatprep.subr.bf16.mxu0 %v1708_v38 }
  0x65   :  { %1530 = vmatprep.subr.bf16.mxu1 %v1708_v38  ;;  %972 = vmatprep.mubr.bf16.mxu0 %v1709_v39 }
  0x66   :  { %1085 = vmatprep.mubr.bf16.mxu1 %v1711_v40 }
  0x67   :  { %1135 = vmatpush2.bf16.msra.mxu0 %v1706_v41 }
  0x68   :  { %1546 = vmatpush2.bf16.msra.mxu1 %v1706_v41  ;;  %1136 = vmatprep.subr.bf16.mxu0 %v1717_v42 }
  0x69   :  { %1531 = vmatprep.subr.bf16.mxu1 %v1717_v42 }
  0x6a   :  { %973 = vmatmul.mubr.bf16.gmra.mxu0 %v1713_v43 }
  0x6b   :  { %1086 = vmatmul.mubr.bf16.gmra.mxu1 %v1714_v44  ;;  %1137 = vmatpush2.bf16.msra.mxu0 %v1715_v45 }
  0x6c   :  { %1547 = vmatpush2.bf16.msra.mxu1 %v1715_v45  ;;  %1138 = vmatprep.subr.bf16.mxu0 %v1720_v46 }
  0x6d   :  { %1532 = vmatprep.subr.bf16.mxu1 %v1720_v46  ;;  %982 = vmatprep.mubr.bf16.mxu0 %v1721_v47 }
  0x6e   :  { %1095 = vmatprep.mubr.bf16.mxu1 %v1723_v48 }
  0x6f   :  { %1139 = vmatpush2.bf16.msra.mxu0 %v1718_v49 }
  0x70   :  { %1548 = vmatpush2.bf16.msra.mxu1 %v1718_v49  ;;  %1140 = vmatprep.subr.bf16.mxu0 %v1729_v50 }
  0x71   :  { %1533 = vmatprep.subr.bf16.mxu1 %v1729_v50 }
  0x72   :  { %983 = vmatmul.mubr.bf16.gmra.mxu0 %v1725_v51 }
  0x73   :  { %1096 = vmatmul.mubr.bf16.gmra.mxu1 %v1726_v52  ;;  %1141 = vmatpush2.bf16.msra.mxu0 %v1727_v53 }
  0x74   :  { %1549 = vmatpush2.bf16.msra.mxu1 %v1727_v53  ;;  %1142 = vmatprep.subr.bf16.mxu0 %v1732_v54 }
  0x75   :  { %1534 = vmatprep.subr.bf16.mxu1 %v1732_v54  ;;  %992 = vmatprep.mubr.bf16.mxu0 %v1733_v55 }
  0x76   :  { %1105 = vmatprep.mubr.bf16.mxu1 %v1735_v56 }
  0x77   :  { %1143 = vmatpush2.bf16.msra.mxu0 %v1730_v57 }
  0x78   :  { %1550 = vmatpush2.bf16.msra.mxu1 %v1730_v57  ;;  %1144 = vmatprep.subr.bf16.mxu0 %v1741_v58 }
  0x79   :  { %1535 = vmatprep.subr.bf16.mxu1 %v1741_v58 }
  0x7a   :  { %993 = vmatmul.mubr.bf16.gmra.mxu0 %v1737_v59 }
  0x7b   :  { %1106 = vmatmul.mubr.bf16.gmra.mxu1 %v1738_v60  ;;  %1145 = vmatpush2.bf16.msra.mxu0 %v1739_v61  ;;  %v160_v60 = vlaneseq }
  0x7c   :  { %1551 = vmatpush2.bf16.msra.mxu1 %v1739_v61  ;;  %1146 = vmatprep.subr.bf16.mxu0 %v1744_v62 }
  0x7d   :  { %1536 = vmatprep.subr.bf16.mxu1 %v1744_v62  ;;  %1148 = vmatprep.mubr.bf16.mxu0 %v1747_v63 }
  0x7e   :  { %1188 = vmatprep.mubr.bf16.mxu1 %v1750_v0 }
  0x7f   :  { %1147 = vmatpush2.bf16.msra.mxu0 %v1742_v1 }
  0x80   :  { %1552 = vmatpush2.bf16.msra.mxu1 %v1742_v1  ;;  %v161_v1 = vshrl.u32 %v160_v60, 7 }
  0x82   :  { %1149 = vmatmul.mubr.bf16.vlgmr.msra.gmra.mxu0 %v1745_v2 }
  0x83   :  { %1189 = vmatmul.mubr.bf16.vlgmr.msra.gmra.mxu1 %v1748_v3  ;;  %1158 = vmatprep.mubr.bf16.mxu0 %v1751_v4 }
  0x84   :  { %1198 = vmatprep.mubr.bf16.mxu1 %v1753_v5 }
  0x8a   :  { %1159 = vmatmul.mubr.bf16.gmra.mxu0 %v1755_v6  ;;  %v162_v6 = vsub.s32 0, %v161_v1 }
  0x8b   :  { %1199 = vmatmul.mubr.bf16.gmra.mxu1 %v1756_v7  ;;  %1168 = vmatprep.mubr.bf16.mxu0 %v1757_v8  ;;  %v166_v7 = vsub.s32 1, %v161_v1 }
  0x8c   :  { %1208 = vmatprep.mubr.bf16.mxu1 %v1759_v9 }
  0x92   :  { %1169 = vmatmul.mubr.bf16.gmra.mxu0 %v1761_v10  ;;  %v158_v10 = vld [vmem:[%s2478_s2] sm:$0x3] }
  0x93   :  { %1209 = vmatmul.mubr.bf16.gmra.mxu1 %v1762_v11  ;;  %1178 = vmatprep.mubr.bf16.mxu0 %v1763_v12 }
  0x94   :  { %1218 = vmatprep.mubr.bf16.mxu1 %v1765_v13  ;;  %v2320_v13 = vrot.slane %v158_v10, %v162_v6 }
  0x9a   :  { %1179 = vmatmul.mubr.bf16.gmra.mxu0 %v1767_v14  ;;  %v2322_v14 = vrot.slane %v158_v10, %v166_v7 }
  0x9b   :  { %1219 = vmatmul.mubr.bf16.gmra.mxu1 %v1768_v15 }
 0x102   :  { %v2221_v16 = vpop.f32.mrf.mxu0 }
 0x103   :  { %v2223_v17 = vpop.f32.mrf.mxu1 }
 0x104   :  { %v2225_v18 = vpop.f32.mrf.mxu0 }
 0x105   :  { %v2227_v19 = vpop.f32.mrf.mxu1 }
 0x106   :  { %v2229_v20 = vpop.f32.mrf.mxu0 }
 0x107   :  { %v2231_v21 = vpop.f32.mrf.mxu1 }
 0x108   :  { %v2233_v22 = vpop.f32.mrf.mxu0 }
 0x109   :  { %v2235_v23 = vpop.f32.mrf.mxu1 }
 0x10a   :  { %v2237_v24 = vpop.f32.mrf.mxu0 }
 0x10b   :  { %v2239_v25 = vpop.f32.mrf.mxu1 }
 0x10c   :  { %v2241_v26 = vpop.f32.mrf.mxu0 }
 0x10d   :  { %v2243_v27 = vpop.f32.mrf.mxu1 }
 0x10e   :  { %v2245_v28 = vpop.f32.mrf.mxu0 }
 0x10f   :  { %v2247_v29 = vpop.f32.mrf.mxu1 }
 0x110   :  { %v2249_v30 = vpop.f32.mrf.mxu0 }
 0x111   :  { %v2251_v31 = vpop.f32.mrf.mxu1 }
 0x112   :  { %v2253_v32 = vpop.f32.mrf.mxu0 }
 0x113   :  { %v2255_v33 = vpop.f32.mrf.mxu1 }
 0x114   :  { %v2257_v34 = vpop.f32.mrf.mxu0 }
 0x115   :  { %v2259_v35 = vpop.f32.mrf.mxu1 }
 0x116   :  { %v2261_v36 = vpop.f32.mrf.mxu0 }
 0x117   :  { %v2263_v37 = vpop.f32.mrf.mxu1 }
 0x118   :  { %v2265_v38 = vpop.f32.mrf.mxu0 }
 0x119   :  { %v2267_v39 = vpop.f32.mrf.mxu1 }
 0x11a   :  { %v2269_v40 = vpop.f32.mrf.mxu0 }
 0x11b   :  { %v2271_v41 = vpop.f32.mrf.mxu1 }
 0x11c   :  { %2480 = vst [vmem:[#allocation2_spill] sm:$0xff] %v2271_v41  ;;  %v2273_v42 = vpop.f32.mrf.mxu0 }
 0x11d   :  { %v2275_v43 = vpop.f32.mrf.mxu1 }
 0x11e   :  { %2481 = vst [vmem:[#allocation3_spill] sm:$0xff] %v2275_v43  ;;  %v2277_v44 = vpop.f32.mrf.mxu0 }
 0x11f   :  { %2482 = vst [vmem:[#allocation4_spill] sm:$0xff] %v2277_v44  ;;  %v2279_v45 = vpop.f32.mrf.mxu1 }
 0x120   :  { %2483 = vst [vmem:[#allocation5_spill] sm:$0xff] %v2279_v45  ;;  %v2281_v46 = vpop.f32.mrf.mxu0  ;;  %v925_v45 = vadd.f32 %v2221_v16, %v2320_v13  ;;  %v929_v16 = vadd.f32 %v2229_v20, %v2320_v13 }
 0x121   :  { %2484 = vst [vmem:[#allocation6_spill] sm:$0xff] %v2281_v46  ;;  %v2283_v47 = vpop.f32.mrf.mxu1  ;;  %v927_v46 = vadd.f32 %v2225_v18, %v2322_v14  ;;  %v931_v18 = vadd.f32 %v2233_v22, %v2322_v14 }
 0x122   :  { %2485 = vst [vmem:[#allocation7_spill] sm:$0xff] %v2283_v47  ;;  %v964_v48 = vpop.f32.mrf.mxu0 }
 0x123   :  { %v1077_v49 = vpop.f32.mrf.mxu1  ;;  %v965_v7 = vadd.f32 %v964_v48, %v2320_v13  ;;  %v1040_v41 = vadd.f32 %v2227_v19, %v927_v46 }
 0x124   :  { %v966_v50 = vpop.f32.mrf.mxu0 }
 0x125   :  { %v1079_v51 = vpop.f32.mrf.mxu1  ;;  %v967_v10 = vadd.f32 %v966_v50, %v2322_v14 }
 0x126   :  { %v968_v52 = vpop.f32.mrf.mxu0 }
 0x127   :  { %v2285_v53 = vpop.f32.mrf.mxu1  ;;  %v1080_v48 = vadd.f32 %v1079_v51, %v967_v10  ;;  %v969_v50 = vadd.f32 %v968_v52, %v2320_v13 }
 0x128   :  { %v970_v54 = vpop.f32.mrf.mxu0 }
 0x129   :  { %v2287_v55 = vpop.f32.mrf.mxu1 }
 0x12a   :  { %v974_v56 = vpop.f32.mrf.mxu0 }
 0x12b   :  { %v2289_v57 = vpop.f32.mrf.mxu1  ;;  %v975_v51 = vadd.f32 %v974_v56, %v2320_v13 }
 0x12c   :  { %v976_v58 = vpop.f32.mrf.mxu0 }
 0x12d   :  { %v2291_v59 = vpop.f32.mrf.mxu1  ;;  %v977_v52 = vadd.f32 %v976_v58, %v2322_v14 }
 0x12e   :  { %v2293_v61 = vpop.f32.mrf.mxu0 }
 0x12f   :  { %v2295_v62 = vpop.f32.mrf.mxu1  ;;  %v1090_v58 = vadd.f32 %v2291_v59, %v977_v52  ;;  %v949_v52 = vadd.f32 %v2261_v36, %v2320_v13  ;;  %v955_v36 = vadd.f32 %v2269_v40, %v2320_v13 }
 0x130   :  { %v2297_v63 = vpop.f32.mrf.mxu0 }
 0x131   :  { %v2299_v0 = vpop.f32.mrf.mxu1 }
 0x132   :  { %v2301_v2 = vpop.f32.mrf.mxu0 }
 0x133   :  { %v2303_v3 = vpop.f32.mrf.mxu1 }
 0x134   :  { %v2305_v4 = vpop.f32.mrf.mxu0 }
 0x135   :  { %v2307_v5 = vpop.f32.mrf.mxu1 }
 0x136   :  { %v2309_v8 = vpop.f32.mrf.mxu0 }
 0x137   :  { %v2311_v9 = vpop.f32.mrf.mxu1 }
 0x138   :  { %2486 = vst [vmem:[#allocation8_spill] sm:$0xff] %v2311_v9  ;;  %v2316_v11 = vpop.f32.mrf.mxu0 }
 0x139   :  { %v2318_v12 = vpop.f32.mrf.mxu1 }
 0x13a   :  { %2487 = vst [vmem:[#allocation9_spill] sm:$0xff] %v2318_v12  ;;  %v2324_v15 = vpop.f32.mrf.mxu0  ;;  %v1078_v12 = vadd.f32 %v1077_v49, %v965_v7  ;;  %v1044_v49 = vadd.f32 %v2235_v23, %v931_v18 }
 0x13b   :  { %2488 = vst [vmem:[#allocation10_spill] sm:$0xff] %v2324_v15  ;;  %v2326_v60 = vpop.f32.mrf.mxu1 }
 0x13c   :  { %2489 = vst [vmem:[#allocation11_spill] sm:$0xff] %v2326_v60  ;;  %v2328_v1 = vpop.f32.mrf.mxu0 }
 0x13d   :  { %2490 = vst [vmem:[#allocation12_spill] sm:$0xff] %v2328_v1  ;;  %v2330_v47 = vpop.f32.mrf.mxu1  ;;  %v1042_v1 = vadd.f32 %v2231_v21, %v929_v16 }
 0x13e   :  { %2491 = vst [vmem:[#allocation13_spill] sm:$0xff] %v2330_v47  ;;  %v2336_v44 = vpop.f32.mrf.mxu0  ;;  %v1038_v47 = vadd.f32 %v2223_v17, %v925_v45  ;;  %v937_v17 = vadd.f32 %v2241_v26, %v2322_v14 }
 0x13f   :  { %2492 = vst [vmem:[#allocation14_spill] sm:$0xff] %v2336_v44  ;;  %v2338_v6 = vpop.f32.mrf.mxu1 }
 0x140   :  { %2493 = vst [vmem:[#allocation15_spill] sm:$0xff] %v2338_v6  ;;  %v2342_v43 = vpop.f32.mrf.mxu0 }
 0x141   :  { %2494 = vst [vmem:[#allocation16_spill] sm:$0xff] %v2342_v43  ;;  %v2344_v60 = vpop.f32.mrf.mxu1  ;;  %v971_v43 = vadd.f32 %v970_v54, %v2322_v14 }
 0x142   :  { %2495 = vst [vmem:[#allocation17_spill] sm:$0xff] %v2344_v60  ;;  %v1150_v44 = vpop.f32.mrf.mxu0  ;;  %v935_v60 = vadd.f32 %v2237_v24, %v2320_v13  ;;  %v1082_v24 = vadd.f32 %v2285_v53, %v969_v50  ;;  %v987_v50 = vadd.f32 %v2305_v4, %v2322_v14 }
 0x143   :  { %v1190_v6 = vpop.f32.mrf.mxu1  ;;  %v1151_v20 = vadd.f32 %v1150_v44, %v1038_v47  ;;  %v1084_v26 = vadd.f32 %v2287_v55, %v971_v43  ;;  %v939_v55 = vadd.f32 %v2245_v28, %v2320_v13  ;;  %v945_v28 = vadd.f32 %v2253_v32, %v2320_v13 }
 0x144   :  { %v1152_v19 = vpop.f32.mrf.mxu0  ;;  %v1191_v46 = vadd.f32 %v1190_v6, %v1078_v12  ;;  %v1048_v44 = vadd.f32 %v2239_v25, %v935_v60  ;;  %v941_v25 = vadd.f32 %v2249_v30, %v2322_v14  ;;  %v979_v60 = vadd.f32 %v2293_v61, %v2320_v13 }
 0x145   :  { %v1192_v45 = vpop.f32.mrf.mxu1  ;;  %v1153_v9 = vadd.f32 %v1152_v19, %v1040_v41  ;;  %v1050_v41 = vadd.f32 %v2243_v27, %v937_v17  ;;  %v1088_v27 = vadd.f32 %v2289_v57, %v975_v51  ;;  %v947_v30 = vadd.f32 %v2257_v34, %v2322_v14 }
 0x146   :  { %v1193_v22 = vadd.f32 %v1192_v45, %v1080_v48  ;;  %v1154_v54 = vpop.f32.mrf.mxu0  ;;  %v1052_v48 = vadd.f32 %v2247_v29, %v939_v55  ;;  %v1054_v32 = vadd.f32 %v2251_v31, %v941_v25  ;;  %v985_v34 = vadd.f32 %v2301_v2, %v2320_v13 }
 0x147   :  { %v1194_v7 = vpop.f32.mrf.mxu1  ;;  %v1505_v10 = vpack.c.bf16 %v1153_v9, %v1151_v20  ;;  %v1155_v23 = vadd.f32 %v1154_v54, %v1042_v1  ;;  %v1092_v45 = vadd.f32 %v2295_v62, %v979_v60  ;;  %v1060_v29 = vadd.f32 %v2259_v35, %v947_v30 }
 0x148   :  { %v1513_v15 = vpack.c.bf16 %v1193_v22, %v1191_v46  ;;  %v1156_v47 = vpop.f32.mrf.mxu0  ;;  %v1195_v53 = vadd.f32 %v1194_v7, %v1082_v24  ;;  %v1098_v35 = vadd.f32 %v2303_v3, %v985_v34  ;;  %v1100_v54 = vadd.f32 %v2307_v5, %v987_v50  ;;  %v2504_v34 = vld [vmem:[#allocation11_spill] sm:$0xff] }
 0x149   :  { %v1196_v21 = vpop.f32.mrf.mxu1  ;;  %1325 = vst [vmem:[%s2479_s3] sm:$0xff] %v1505_v10  ;;  %v1157_v56 = vadd.f32 %v1156_v47, %v1044_v49  ;;  %v1058_v49 = vadd.f32 %v2255_v33, %v945_v28  ;;  %v951_v33 = vadd.f32 %v2265_v38, %v2322_v14  ;;  %v991_v10 = vadd.f32 %v2316_v11, %v2322_v14  ;;  %v2501_v28 = vld [vmem:[#allocation3_spill] sm:$0xff] }
 0x14a   :  { %1333 = vst [vmem:[%s2479_s3 + $0x40] sm:$0xff] %v1513_v15  ;;  %v1197_v43 = vadd.f32 %v1196_v21, %v1084_v26  ;;  %v1160_v9 = vpop.f32.mrf.mxu0  ;;  %v981_v15 = vadd.f32 %v2297_v63, %v2322_v14  ;;  %v989_v26 = vadd.f32 %v2309_v8, %v2320_v13  ;;  %v957_v38 = vadd.f32 %v2273_v42, %v2322_v14  ;;  %v2496_v42 = vld [vmem:[#allocation10_spill] sm:$0xff] }
 0x14b   :  { %v1200_v12 = vpop.f32.mrf.mxu1  ;;  %v1506_v1 = vpack.c.bf16 %v1157_v56, %v1155_v23  ;;  %v1161_v59 = vadd.f32 %v1160_v9, %v1048_v44  ;;  %v1062_v23 = vadd.f32 %v2263_v37, %v949_v52  ;;  %v1064_v40 = vadd.f32 %v2267_v39, %v951_v33  ;;  %v2497_v56 = vld [vmem:[#allocation12_spill] sm:$0xff]  ;;  %v2499_v9 = vld [vmem:[#allocation9_spill] sm:$0xff] }
 0x14c   :  { %v1514_v6 = vpack.c.bf16 %v1197_v43, %v1195_v53  ;;  %v1162_v16 = vpop.f32.mrf.mxu0  ;;  %v1201_v61 = vadd.f32 %v1200_v12, %v1088_v27  ;;  %v1094_v20 = vadd.f32 %v2299_v0, %v981_v15  ;;  %v995_v53 = vadd.f32 %v2496_v42, %v2320_v13  ;;  %v2498_v27 = vld [vmem:[#allocation8_spill] sm:$0xff] }
 0x14d   :  { %v1202_v57 = vpop.f32.mrf.mxu1  ;;  %1326 = vst [vmem:[%s2479_s3 + $0x8] sm:$0xff] %v1506_v1  ;;  %v1163_v63 = vadd.f32 %v1162_v16, %v1050_v41  ;;  %v997_v43 = vadd.f32 %v2497_v56, %v2322_v14  ;;  %v1104_v12 = vadd.f32 %v2499_v9, %v991_v10  ;;  %v2500_v1 = vld [vmem:[#allocation2_spill] sm:$0xff]  ;;  %v1070_v37 = vadd.f32 %v2501_v28, %v957_v38 }
 0x14e   :  { %1334 = vst [vmem:[%s2479_s3 + $0x48] sm:$0xff] %v1514_v6  ;;  %v1203_v18 = vadd.f32 %v1202_v57, %v1090_v58  ;;  %v1164_v17 = vpop.f32.mrf.mxu0  ;;  %v1102_v58 = vadd.f32 %v2498_v27, %v989_v26  ;;  %v1068_v6 = vadd.f32 %v2500_v1, %v955_v36  ;;  %v1108_v50 = vadd.f32 %v2504_v34, %v995_v53  ;;  %v2510_v26 = vld [vmem:[#allocation15_spill] sm:$0xff] }
 0x14f   :  { %v1204_v19 = vpop.f32.mrf.mxu1  ;;  %v1507_v46 = vpack.c.bf16 %v1163_v63, %v1161_v59  ;;  %v1165_v2 = vadd.f32 %v1164_v17, %v1052_v48  ;;  %v2502_v63 = vld [vmem:[#allocation4_spill] sm:$0xff]  ;;  %v2503_v48 = vld [vmem:[#allocation6_spill] sm:$0xff]  ;;  %v2505_v17 = vld [vmem:[#allocation13_spill] sm:$0xff] }
 0x150   :  { %v1515_v22 = vpack.c.bf16 %v1203_v18, %v1201_v61  ;;  %v1166_v51 = vpop.f32.mrf.mxu0  ;;  %v1205_v62 = vadd.f32 %v1204_v19, %v1092_v45  ;;  %v959_v18 = vadd.f32 %v2502_v63, %v2320_v13  ;;  %v1110_v19 = vadd.f32 %v2505_v17, %v997_v43 }
 0x151   :  { %v1206_v31 = vpop.f32.mrf.mxu1  ;;  %1327 = vst [vmem:[%s2479_s3 + $0x10] sm:$0xff] %v1507_v46  ;;  %v1167_v4 = vadd.f32 %v1166_v51, %v1054_v32  ;;  %v961_v32 = vadd.f32 %v2503_v48, %v2322_v14  ;;  %v2506_v46 = vld [vmem:[#allocation14_spill] sm:$0xff] }
 0x152   :  { %1335 = vst [vmem:[%s2479_s3 + $0x50] sm:$0xff] %v1515_v22  ;;  %v1207_v0 = vadd.f32 %v1206_v31, %v1094_v20  ;;  %v1170_v7 = vpop.f32.mrf.mxu0  ;;  %v999_v22 = vadd.f32 %v2506_v46, %v2320_v13  ;;  %v2508_v13 = vld [vmem:[#allocation5_spill] sm:$0xff] }
 0x153   :  { %v1210_v24 = vpop.f32.mrf.mxu1  ;;  %v1508_v44 = vpack.c.bf16 %v1167_v4, %v1165_v2  ;;  %v1171_v5 = vadd.f32 %v1170_v7, %v1058_v49  ;;  %v2507_v49 = vld [vmem:[#allocation16_spill] sm:$0xff] }
 0x154   :  { %v1516_v41 = vpack.c.bf16 %v1207_v0, %v1205_v62  ;;  %v1172_v47 = vpop.f32.mrf.mxu0  ;;  %v1211_v8 = vadd.f32 %v1210_v24, %v1098_v35  ;;  %v1072_v35 = vadd.f32 %v2508_v13, %v959_v18  ;;  %v1112_v10 = vadd.f32 %v2510_v26, %v999_v22 }
 0x155   :  { %v1212_v3 = vpop.f32.mrf.mxu1  ;;  %1328 = vst [vmem:[%s2479_s3 + $0x18] sm:$0xff] %v1508_v44  ;;  %v1173_v11 = vadd.f32 %v1172_v47, %v1060_v29  ;;  %v1001_v29 = vadd.f32 %v2507_v49, %v2322_v14  ;;  %v2511_v44 = vld [vmem:[#allocation17_spill] sm:$0xff] }
 0x156   :  { %1336 = vst [vmem:[%s2479_s3 + $0x58] sm:$0xff] %v1516_v41  ;;  %v1213_v21 = vadd.f32 %v1212_v3, %v1100_v54  ;;  %v1174_v55 = vpop.f32.mrf.mxu0  ;;  %v2509_v54 = vld [vmem:[#allocation7_spill] sm:$0xff] }
 0x157   :  { %v1214_v25 = vpop.f32.mrf.mxu1  ;;  %v1509_v60 = vpack.c.bf16 %v1173_v11, %v1171_v5  ;;  %v1175_v16 = vadd.f32 %v1174_v55, %v1062_v23  ;;  %v1074_v14 = vadd.f32 %v2509_v54, %v961_v32  ;;  %v1114_v41 = vadd.f32 %v2511_v44, %v1001_v29 }
 0x158   :  { %v1517_v15 = vpack.c.bf16 %v1213_v21, %v1211_v8  ;;  %v1176_v30 = vpop.f32.mrf.mxu0  ;;  %v1215_v57 = vadd.f32 %v1214_v25, %v1102_v58 }
 0x159   :  { %v1216_v39 = vpop.f32.mrf.mxu1  ;;  %1329 = vst [vmem:[%s2479_s3 + $0x20] sm:$0xff] %v1509_v60  ;;  %v1177_v59 = vadd.f32 %v1176_v30, %v1064_v40 }
 0x15a   :  { %1337 = vst [vmem:[%s2479_s3 + $0x60] sm:$0xff] %v1517_v15  ;;  %v1217_v61 = vadd.f32 %v1216_v39, %v1104_v12  ;;  %v1180_v45 = vpop.f32.mrf.mxu0 }
 0x15b   :  { %v1220_v20 = vpop.f32.mrf.mxu1  ;;  %v1510_v51 = vpack.c.bf16 %v1177_v59, %v1175_v16  ;;  %v1181_v4 = vadd.f32 %v1180_v45, %v1068_v6 }
 0x15c   :  { %v1518_v31 = vpack.c.bf16 %v1217_v61, %v1215_v57  ;;  %v1182_v2 = vpop.f32.mrf.mxu0  ;;  %v1221_v0 = vadd.f32 %v1220_v20, %v1108_v50 }
 0x15d   :  { %v1222_v62 = vpop.f32.mrf.mxu1  ;;  %1330 = vst [vmem:[%s2479_s3 + $0x28] sm:$0xff] %v1510_v51  ;;  %v1183_v52 = vadd.f32 %v1182_v2, %v1070_v37 }
 0x15e   :  { %1338 = vst [vmem:[%s2479_s3 + $0x68] sm:$0xff] %v1518_v31  ;;  %v1223_v33 = vadd.f32 %v1222_v62, %v1110_v19  ;;  %v1184_v7 = vpop.f32.mrf.mxu0 }
 0x15f   :  { %v1224_v24 = vpop.f32.mrf.mxu1  ;;  %v1511_v36 = vpack.c.bf16 %v1183_v52, %v1181_v4  ;;  %v1185_v5 = vadd.f32 %v1184_v7, %v1072_v35 }
 0x160   :  { %v1519_v38 = vpack.c.bf16 %v1223_v33, %v1221_v0  ;;  %v1186_v47 = vpop.f32.mrf.mxu0  ;;  %v1225_v8 = vadd.f32 %v1224_v24, %v1112_v10 }
 0x161   :  { %v1226_v3 = vpop.f32.mrf.mxu1  ;;  %1331 = vst [vmem:[%s2479_s3 + $0x30] sm:$0xff] %v1511_v36  ;;  %v1187_v11 = vadd.f32 %v1186_v47, %v1074_v14 }
 0x162   :  { %1339 = vst [vmem:[%s2479_s3 + $0x70] sm:$0xff] %v1519_v38  ;;  %v1227_v21 = vadd.f32 %v1226_v3, %v1114_v41 }
 0x163   :  { %v1512_v23 = vpack.c.bf16 %v1187_v11, %v1185_v5 }
 0x164   :  { %v1520_v40 = vpack.c.bf16 %v1227_v21, %v1225_v8 }
 0x165   :  { %1332 = vst [vmem:[%s2479_s3 + $0x38] sm:$0xff] %v1512_v23 }
 0x166   :  { %1340 = vst [vmem:[%s2479_s3 + $0x78] sm:$0xff] %v1520_v40 }

// kernel: mesh_autoencoder_forward.13
= control target key start
LH: loop header
LB: loop body
LE: loop exit
PB: predicated region body
PF: predicated region fallthrough
CT: control target
= control target key end

     0   :  { %v2281_v1 = vmov 0   ;;  %s3018_s1 = inlined_call_operand.vmem [shape: bf16[128,256], index: 1, kind: input, shape index: {}]   ;;  %s3019_s0 = inlined_call_operand.vmem [shape: bf16[128,128], index: 0, kind: input, shape index: {}]   ;;  %s3020_s3 = inlined_call_operand.vmem [shape: f32[128,1], index: 3, kind: input, shape index: {}]   ;;  %s3021_s5 = inlined_call_operand.vmem [shape: bf16[256,128], index: 5, kind: input, shape index: {}]   ;;  %s3022_s4 = inlined_call_operand.vmem [shape: bf16[256,128], index: 4, kind: input, shape index: {}]   ;;  %s3023_s2 = inlined_call_operand.vmem [shape: bf16[128,256], index: 2, kind: input, shape index: {}]   ;;  %s3024_s6 = inlined_call_operand.vmem [shape: f32[1,128], index: 6, kind: input, shape index: {}]   ;;  %s3025_s7 = inlined_call_operand.vmem [shape: f32[1,128], index: 7, kind: input, shape index: {}]   ;;  %s3026_s8 = inlined_call_operand.vmem [shape: f32[1,128], index: 8, kind: input, shape index: {}]   ;;  %s3027_s9 = inlined_call_operand.vmem [shape: bf16[128,128], index: 9, kind: output, shape index: {}]  }
   0x1   :  { %v2065_v0 = vld [vmem:[%s3018_s1 + $0x74] ss:$8 sps:$4 sm:$0xff]   ;;  %293 = vmatprep.mubr.bf16.mxu0 %v2281_v1  ;;  %333 = vmatprep.mubr.bf16.mxu1 %v2281_v1  ;;  %v2067_v2 = vld [vmem:[%s3018_s1 + $0x70] ss:$8 sps:$4 sm:$0xff]   ;;  %v2068_v3 = vld [vmem:[%s3018_s1 + $0x64] ss:$8 sps:$4 sm:$0xff]  }
   0x2   :  { %2063 = vset.pattern.permute.xlu0 %v2281_v1  ;;  %2064 = vset.pattern.permute.xlu1 %v2281_v1  ;;  %v2070_v4 = vld [vmem:[%s3018_s1 + $0x60] ss:$8 sps:$4 sm:$0xff]   ;;  %v2071_v5 = vld [vmem:[%s3018_s1 + $0x54] ss:$8 sps:$4 sm:$0xff]   ;;  %v2073_v6 = vld [vmem:[%s3018_s1 + $0x50] ss:$8 sps:$4 sm:$0xff]  }
   0x3   :  { %261 = vmatprep.subr.bf16.mxu0 %v2065_v0  ;;  %2046 = vmatprep.subr.bf16.mxu1 %v2065_v0  ;;  %v2074_v7 = vld [vmem:[%s3018_s1 + $0x44] ss:$8 sps:$4 sm:$0xff]   ;;  %v2076_v8 = vld [vmem:[%s3018_s1 + $0x40] ss:$8 sps:$4 sm:$0xff]   ;;  %v2077_v9 = vld [vmem:[%s3018_s1 + $0x34] ss:$8 sps:$4 sm:$0xff]  }
   0x4   :  { %262 = vmatpush1.bf16.msra.mxu0 %v2067_v2  ;;  %2054 = vmatpush1.bf16.msra.mxu1 %v2067_v2  ;;  %v2079_v10 = vld [vmem:[%s3018_s1 + $0x30] ss:$8 sps:$4 sm:$0xff]   ;;  %v2080_v11 = vld [vmem:[%s3018_s1 + $0x24] ss:$8 sps:$4 sm:$0xff]   ;;  %v2082_v13 = vld [vmem:[%s3018_s1 + $0x20] ss:$8 sps:$4 sm:$0xff]  }
   0x5   :  { %263 = vmatprep.subr.bf16.mxu0 %v2068_v3  ;;  %2047 = vmatprep.subr.bf16.mxu1 %v2068_v3  ;;  %v473_v12 = vld [vmem:[%s3020_s3] sm:$0xff]  ;;  %v475_v14 = vld [vmem:[%s3020_s3 + $0x10] sm:$0xff]  ;;  %v474_v16 = vld [vmem:[%s3020_s3 + $0x8] sm:$0xff] }
   0x6   :  { %v2083_v15 = vld [vmem:[%s3018_s1 + $0x14] ss:$8 sps:$4 sm:$0xff]   ;;  %491 = vperm.xlu0 %2063, %v473_v12   ;;  %501 = vperm.xlu1 %2064, %v475_v14   ;;  %v2085_v18 = vld [vmem:[%s3018_s1 + $0x10] ss:$8 sps:$4 sm:$0xff]   ;;  %v2086_v19 = vld [vmem:[%s3018_s1 + $0x4] ss:$8 sps:$4 sm:$0xff]  }
   0x7   :  { %v476_v17 = vld [vmem:[%s3020_s3 + $0x18] sm:$0xff]  ;;  %v2088_v20 = vld [vmem:[%s3018_s1] ss:$8 sps:$4 sm:$0xff]   ;;  %v479_v27 = vld [vmem:[%s3020_s3 + $0x30] sm:$0xff] }
   0x8   :  { %264 = vmatpush1.bf16.msra.mxu0 %v2070_v4  ;;  %2055 = vmatpush1.bf16.msra.mxu1 %v2070_v4  ;;  %v477_v21 = vld [vmem:[%s3020_s3 + $0x20] sm:$0xff]  ;;  %v478_v22 = vld [vmem:[%s3020_s3 + $0x28] sm:$0xff]  ;;  %v2097_v23 = vld [vmem:[%s3021_s5 + $0x78] sm:$0xff]  }
   0x9   :  { %265 = vmatprep.subr.bf16.mxu0 %v2071_v5  ;;  %2048 = vmatprep.subr.bf16.mxu1 %v2071_v5  ;;  %v2089_v24 = vld [vmem:[%s3019_s0] sm:$0xff]   ;;  %v2101_v26 = vld [vmem:[%s3022_s4 + $0x78] sm:$0xff]   ;;  %v482_v31 = vld [vmem:[%s3020_s3 + $0x48] sm:$0xff] }
   0xa   :  { %496 = vperm.xlu0 %2063, %v474_v16   ;;  %506 = vperm.xlu1 %2064, %v476_v17   ;;  %v2090_v25 = vld [vmem:[%s3019_s0 + $0x20] sm:$0xff]   ;;  %v480_v28 = vld [vmem:[%s3020_s3 + $0x38] sm:$0xff]  ;;  %v2099_v33 = vld [vmem:[%s3021_s5 + $0x70] sm:$0xff]  }
   0xb   :  { %v2098_v29 = vld [vmem:[%s3021_s5 + $0x38] sm:$0xff]   ;;  %v481_v30 = vld [vmem:[%s3020_s3 + $0x40] sm:$0xff]  ;;  %v2105_v34 = vld [vmem:[%s3022_s4 + $0x70] sm:$0xff]  }
   0xc   :  { %266 = vmatpush1.bf16.msra.mxu0 %v2073_v6  ;;  %2056 = vmatpush1.bf16.msra.mxu1 %v2073_v6  ;;  %v2102_v32 = vld [vmem:[%s3022_s4 + $0x38] sm:$0xff]   ;;  %v2100_v35 = vld [vmem:[%s3021_s5 + $0x30] sm:$0xff]   ;;  %v2091_v36 = vld [vmem:[%s3019_s0 + $0x8] sm:$0xff]  }
   0xd   :  { %267 = vmatprep.subr.bf16.mxu0 %v2074_v7  ;;  %2049 = vmatprep.subr.bf16.mxu1 %v2074_v7  ;;  %v2092_v37 = vld [vmem:[%s3019_s0 + $0x28] sm:$0xff]   ;;  %v2106_v38 = vld [vmem:[%s3022_s4 + $0x30] sm:$0xff]   ;;  %v484_v40 = vld [vmem:[%s3020_s3 + $0x58] sm:$0xff] }
   0xe   :  { %511 = vperm.xlu0 %2063, %v477_v21   ;;  %516 = vperm.xlu1 %2064, %v478_v22   ;;  %v483_v39 = vld [vmem:[%s3020_s3 + $0x50] sm:$0xff]  ;;  %v2103_v41 = vld [vmem:[%s3021_s5 + $0x68] sm:$0xff]   ;;  %v485_v42 = vld [vmem:[%s3020_s3 + $0x60] sm:$0xff] }
   0xf   :  { %v486_v43 = vld [vmem:[%s3020_s3 + $0x68] sm:$0xff]  ;;  %v2107_v46 = vld [vmem:[%s3021_s5 + $0x60] sm:$0xff]   ;;  %v2093_v49 = vld [vmem:[%s3019_s0 + $0x10] sm:$0xff]  }
  0x10   :  { %268 = vmatpush1.bf16.msra.mxu0 %v2076_v8  ;;  %2057 = vmatpush1.bf16.msra.mxu1 %v2076_v8  ;;  %v2104_v44 = vld [vmem:[%s3021_s5 + $0x28] sm:$0xff]   ;;  %v2113_v48 = vld [vmem:[%s3022_s4 + $0x60] sm:$0xff]   ;;  %v2094_v50 = vld [vmem:[%s3019_s0 + $0x30] sm:$0xff]  }
  0x11   :  { %269 = vmatprep.subr.bf16.mxu0 %v2077_v9  ;;  %2050 = vmatprep.subr.bf16.mxu1 %v2077_v9  ;;  %v2109_v45 = vld [vmem:[%s3022_s4 + $0x68] sm:$0xff]   ;;  %v487_v51 = vld [vmem:[%s3020_s3 + $0x70] sm:$0xff]  ;;  %v488_v52 = vld [vmem:[%s3020_s3 + $0x78] sm:$0xff] }
  0x12   :  { %521 = vperm.xlu0 %2063, %v479_v27   ;;  %526 = vperm.xlu1 %2064, %v480_v28   ;;  %v2110_v47 = vld [vmem:[%s3022_s4 + $0x28] sm:$0xff]   ;;  %v2108_v53 = vld [vmem:[%s3021_s5 + $0x20] sm:$0xff]   ;;  %v2111_v54 = vld [vmem:[%s3021_s5 + $0x58] sm:$0xff]  }
  0x13   :  { %v2114_v55 = vld [vmem:[%s3022_s4 + $0x20] sm:$0xff]   ;;  %v2117_v56 = vld [vmem:[%s3022_s4 + $0x58] sm:$0xff]   ;;  %v2115_v59 = vld [vmem:[%s3021_s5 + $0x50] sm:$0xff]  }
  0x14   :  { %270 = vmatpush1.bf16.msra.mxu0 %v2079_v10  ;;  %2058 = vmatpush1.bf16.msra.mxu1 %v2079_v10  ;;  %v2112_v57 = vld [vmem:[%s3021_s5 + $0x18] sm:$0xff]   ;;  %v2121_v60 = vld [vmem:[%s3022_s4 + $0x50] sm:$0xff]   ;;  %v2119_v0 = vld [vmem:[%s3021_s5 + $0x48] sm:$0xff]  }
  0x15   :  { %271 = vmatprep.subr.bf16.mxu0 %v2080_v11  ;;  %2051 = vmatprep.subr.bf16.mxu1 %v2080_v11  ;;  %v2118_v58 = vld [vmem:[%s3022_s4 + $0x18] sm:$0xff]   ;;  %v2116_v63 = vld [vmem:[%s3021_s5 + $0x10] sm:$0xff]   ;;  %v2123_v3 = vld [vmem:[%s3021_s5 + $0x40] sm:$0xff]  }
  0x16   :  { %531 = vperm.xlu0 %2063, %v481_v30   ;;  %536 = vperm.xlu1 %2064, %v482_v31   ;;  %v2095_v61 = vld [vmem:[%s3019_s0 + $0x18] sm:$0xff]   ;;  %v2122_v2 = vld [vmem:[%s3022_s4 + $0x10] sm:$0xff]   ;;  %v2124_v4 = vld [vmem:[%s3021_s5] sm:$0xff]  }
  0x17   :  { %v2096_v62 = vld [vmem:[%s3019_s0 + $0x38] sm:$0xff]   ;;  %v2125_v5 = vld [vmem:[%s3022_s4 + $0x48] sm:$0xff]   ;;  %v2130_v9 = vld [vmem:[%s3022_s4 + $0x40] sm:$0xff]  }
  0x18   :  { %272 = vmatpush1.bf16.msra.mxu0 %v2082_v13  ;;  %2059 = vmatpush1.bf16.msra.mxu1 %v2082_v13  ;;  %v2126_v6 = vld [vmem:[%s3022_s4 + $0x8] sm:$0xff]   ;;  %v2131_v10 = vld [vmem:[%s3022_s4] sm:$0xff]   ;;  %v2132_v11 = vld [vmem:[%s3023_s2 + $0x14] ss:$8 sps:$4 sm:$0xff]  }
  0x19   :  { %273 = vmatprep.subr.bf16.mxu0 %v2083_v15  ;;  %2052 = vmatprep.subr.bf16.mxu1 %v2083_v15  ;;  %v2127_v7 = vld [vmem:[%s3023_s2] ss:$8 sps:$4 sm:$0xff]   ;;  %v2129_v8 = vld [vmem:[%s3023_s2 + $0x4] ss:$8 sps:$4 sm:$0xff]   ;;  %v2134_v12 = vld [vmem:[%s3023_s2 + $0x10] ss:$8 sps:$4 sm:$0xff]  }
  0x1a   :  { %541 = vperm.xlu0 %2063, %v483_v39   ;;  %546 = vperm.xlu1 %2064, %v484_v40   ;;  %v2135_v13 = vld [vmem:[%s3023_s2 + $0x24] ss:$8 sps:$4 sm:$0xff]   ;;  %v2137_v14 = vld [vmem:[%s3023_s2 + $0x20] ss:$8 sps:$4 sm:$0xff]   ;;  %v2138_v15 = vld [vmem:[%s3023_s2 + $0x34] ss:$8 sps:$4 sm:$0xff]  }
  0x1b   :  { %v2140_v16 = vld [vmem:[%s3023_s2 + $0x30] ss:$8 sps:$4 sm:$0xff]   ;;  %v2141_v17 = vld [vmem:[%s3023_s2 + $0x44] ss:$8 sps:$4 sm:$0xff]   ;;  %v2149_v22 = vld [vmem:[%s3023_s2 + $0x60] ss:$8 sps:$4 sm:$0xff]  }
  0x1c   :  { %274 = vmatpush1.bf16.msra.mxu0 %v2085_v18  ;;  %2060 = vmatpush1.bf16.msra.mxu1 %v2085_v18  ;;  %v2143_v18 = vld [vmem:[%s3023_s2 + $0x40] ss:$8 sps:$4 sm:$0xff]   ;;  %v2147_v21 = vld [vmem:[%s3023_s2 + $0x64] ss:$8 sps:$4 sm:$0xff]  }
  0x1d   :  { %275 = vmatprep.subr.bf16.mxu0 %v2086_v19  ;;  %2053 = vmatprep.subr.bf16.mxu1 %v2086_v19  ;;  %v2144_v19 = vld [vmem:[%s3023_s2 + $0x54] ss:$8 sps:$4 sm:$0xff]  }
  0x1e   :  { %551 = vperm.xlu0 %2063, %v485_v42   ;;  %556 = vperm.xlu1 %2064, %v486_v43  }
  0x20   :  { %276 = vmatpush1.bf16.msra.mxu0 %v2088_v20  ;;  %2061 = vmatpush1.bf16.msra.mxu1 %v2088_v20  ;;  %v2146_v20 = vld [vmem:[%s3023_s2 + $0x50] ss:$8 sps:$4 sm:$0xff]  }
  0x21   :  { %1918 = vmatprep.subr.bf16.mxu1 %v2097_v23  ;;  %1982 = vmatprep.subr.bf16.mxu0 %v2101_v26  ;;  %v2150_v23 = vld [vmem:[%s3023_s2 + $0x74] ss:$8 sps:$4 sm:$0xff]  }
  0x22   :  { %561 = vperm.xlu0 %2063, %v487_v51   ;;  %566 = vperm.xlu1 %2064, %v488_v52  }
  0x23   :  { %294 = vmatmul.mubr.bf16.vlgmr.msra.gmra.mxu0 %v2089_v24  ;;  %334 = vmatmul.mubr.bf16.vlgmr.msra.gmra.mxu1 %v2090_v25  ;;  %v2152_v24 = vld [vmem:[%s3023_s2 + $0x70] ss:$8 sps:$4 sm:$0xff]  }
  0x24   :  { %303 = vmatprep.mubr.bf16.mxu0 %v2281_v1  ;;  %343 = vmatprep.mubr.bf16.mxu1 %v2281_v1 }
  0x25   :  { %1919 = vmatpush3.bf16.msra.mxu1 %v2098_v29  ;;  %1983 = vmatpush3.bf16.msra.mxu0 %v2102_v32 }
  0x26   :  { %1920 = vmatprep.subr.bf16.mxu1 %v2099_v33  ;;  %1984 = vmatprep.subr.bf16.mxu0 %v2105_v34 }
  0x29   :  { %1921 = vmatpush3.bf16.msra.mxu1 %v2100_v35  ;;  %1985 = vmatpush3.bf16.msra.mxu0 %v2106_v38 }
  0x2a   :  { %1922 = vmatprep.subr.bf16.mxu1 %v2103_v41  ;;  %1986 = vmatprep.subr.bf16.mxu0 %v2109_v45 }
  0x2b   :  { %304 = vmatmul.mubr.bf16.gmra.mxu0 %v2091_v36  ;;  %344 = vmatmul.mubr.bf16.gmra.mxu1 %v2092_v37 }
  0x2c   :  { %313 = vmatprep.mubr.bf16.mxu0 %v2281_v1  ;;  %353 = vmatprep.mubr.bf16.mxu1 %v2281_v1 }
  0x2d   :  { %1923 = vmatpush3.bf16.msra.mxu1 %v2104_v44  ;;  %1987 = vmatpush3.bf16.msra.mxu0 %v2110_v47 }
  0x2e   :  { %1924 = vmatprep.subr.bf16.mxu1 %v2107_v46  ;;  %1988 = vmatprep.subr.bf16.mxu0 %v2113_v48 }
  0x31   :  { %1925 = vmatpush3.bf16.msra.mxu1 %v2108_v53  ;;  %1989 = vmatpush3.bf16.msra.mxu0 %v2114_v55 }
  0x32   :  { %1926 = vmatprep.subr.bf16.mxu1 %v2111_v54  ;;  %1990 = vmatprep.subr.bf16.mxu0 %v2117_v56 }
  0x33   :  { %314 = vmatmul.mubr.bf16.gmra.mxu0 %v2093_v49  ;;  %354 = vmatmul.mubr.bf16.gmra.mxu1 %v2094_v50 }
  0x34   :  { %323 = vmatprep.mubr.bf16.mxu0 %v2281_v1  ;;  %363 = vmatprep.mubr.bf16.mxu1 %v2281_v1  ;;  %v2120_v1 = vld [vmem:[%s3021_s5 + $0x8] sm:$0xff]  }
  0x35   :  { %1927 = vmatpush3.bf16.msra.mxu1 %v2112_v57  ;;  %1991 = vmatpush3.bf16.msra.mxu0 %v2118_v58 }
  0x36   :  { %1928 = vmatprep.subr.bf16.mxu1 %v2115_v59  ;;  %1992 = vmatprep.subr.bf16.mxu0 %v2121_v60 }
  0x39   :  { %1929 = vmatpush3.bf16.msra.mxu1 %v2116_v63  ;;  %1993 = vmatpush3.bf16.msra.mxu0 %v2122_v2 }
  0x3a   :  { %1930 = vmatprep.subr.bf16.mxu1 %v2119_v0  ;;  %1994 = vmatprep.subr.bf16.mxu0 %v2125_v5 }
  0x3b   :  { %324 = vmatmul.mubr.bf16.gmra.mxu0 %v2095_v61  ;;  %364 = vmatmul.mubr.bf16.gmra.mxu1 %v2096_v62 }
  0x3c   :  { %905 = vmatprep.mubr.bf16.mxu1 %v2129_v8 }
  0x3d   :  { %1931 = vmatpush3.bf16.msra.mxu1 %v2120_v1  ;;  %1995 = vmatpush3.bf16.msra.mxu0 %v2126_v6 }
  0x3e   :  { %1932 = vmatprep.subr.bf16.mxu1 %v2123_v3  ;;  %1996 = vmatprep.subr.bf16.mxu0 %v2130_v9 }
  0x41   :  { %1933 = vmatpush3.bf16.msra.mxu1 %v2124_v4  ;;  %1997 = vmatpush3.bf16.msra.mxu0 %v2131_v10 }
  0x44   :  { %906 = vmatmul.mubr.bf16.vlgmr.msra.gmra.mxu1 %v2127_v7 }
  0x45   :  { %913 = vmatprep.mubr.bf16.mxu1 %v2132_v11 }
  0x4c   :  { %914 = vmatmul.mubr.bf16.gmra.mxu1 %v2134_v12 }
  0x4d   :  { %921 = vmatprep.mubr.bf16.mxu1 %v2135_v13 }
  0x54   :  { %922 = vmatmul.mubr.bf16.gmra.mxu1 %v2137_v14 }
  0x55   :  { %929 = vmatprep.mubr.bf16.mxu1 %v2138_v15 }
  0x5c   :  { %930 = vmatmul.mubr.bf16.gmra.mxu1 %v2140_v16 }
  0x5d   :  { %937 = vmatprep.mubr.bf16.mxu1 %v2141_v17 }
  0x64   :  { %938 = vmatmul.mubr.bf16.gmra.mxu1 %v2143_v18 }
  0x65   :  { %945 = vmatprep.mubr.bf16.mxu1 %v2144_v19 }
  0x6c   :  { %946 = vmatmul.mubr.bf16.gmra.mxu1 %v2146_v20 }
  0x6d   :  { %953 = vmatprep.mubr.bf16.mxu1 %v2147_v21 }
  0x74   :  { %954 = vmatmul.mubr.bf16.gmra.mxu1 %v2149_v22 }
  0x75   :  { %961 = vmatprep.mubr.bf16.mxu1 %v2150_v23 }
  0x7c   :  { %962 = vmatmul.mubr.bf16.gmra.mxu1 %v2152_v24 }
  0x81   :  { %v492_v25 = vpop.permute.xlu0 %491  ;;  %v502_v33 = vpop.permute.xlu1 %501 }
  0x85   :  { %v497_v32 = vpop.permute.xlu0 %496  ;;  %v507_v45 = vpop.permute.xlu1 %506 }
  0x89   :  { %v517_v55 = vpop.permute.xlu1 %516  ;;  %v512_v59 = vpop.permute.xlu0 %511 }
  0x8d   :  { %v527_v0 = vpop.permute.xlu1 %526  ;;  %v522_v7 = vpop.permute.xlu0 %521 }
  0x91   :  { %v537_v12 = vpop.permute.xlu1 %536  ;;  %v532_v18 = vpop.permute.xlu0 %531 }
  0xe3   :  { %v295_v26 = vpop.f32.mrf.mxu0  ;;  %v2606_v27 = vpop.f32.mrf.mxu1 }
  0xe4   :  { %v569_v39 = vmul.f32 %v492_v25, %v295_v26  ;;  %v547_v26 = vpop.permute.xlu1 %546 }
  0xe5   :  { %v297_v28 = vpop.f32.mrf.mxu0  ;;  %v337_v29 = vpop.f32.mrf.mxu1 }
  0xe6   :  { %v570_v37 = vmul.f32 %v492_v25, %v297_v28  ;;  %v586_v21 = vmul.f32 %v532_v18, %v337_v29 }
  0xe7   :  { %v299_v30 = vpop.f32.mrf.mxu0  ;;  %v2608_v31 = vpop.f32.mrf.mxu1 }
  0xe8   :  { %v571_v34 = vmul.f32 %v497_v32, %v299_v30  ;;  %v587_v28 = vmul.f32 %v537_v12, %v2608_v31  ;;  %v557_v29 = vpop.permute.xlu1 %556 }
  0xe9   :  { %v301_v35 = vpop.f32.mrf.mxu0  ;;  %v341_v36 = vpop.f32.mrf.mxu1 }
  0xea   :  { %v572_v38 = vmul.f32 %v497_v32, %v301_v35  ;;  %v601_v43 = vpack.c.bf16 %v571_v34, %v569_v39  ;;  %v588_v15 = vmul.f32 %v537_v12, %v341_v36  ;;  %v542_v32 = vpop.permute.xlu0 %541 }
  0xeb   :  { %v305_v40 = vpop.f32.mrf.mxu0  ;;  %v2610_v41 = vpop.f32.mrf.mxu1 }
  0xec   :  { %v602_v42 = vpack.c.bf16 %v572_v38, %v570_v37  ;;  %v573_v52 = vmul.f32 %v502_v33, %v305_v40  ;;  %v610_v24 = vpack.c.bf16 %v588_v15, %v586_v21  ;;  %v2624_v15 = vld [vmem:[%s3024_s6] ss:$0 sm:$0xff] }
  0xed   :  { %v307_v44 = vpop.f32.mrf.mxu0  ;;  %v347_v46 = vpop.f32.mrf.mxu1 }
  0xee   :  { %1098 = vmatprep.mubr.bf16.mxu0 %v602_v42  ;;  %v574_v50 = vmul.f32 %v502_v33, %v307_v44  ;;  %v585_v33 = vmul.f32 %v532_v18, %v2606_v27  ;;  %v590_v35 = vmul.f32 %v542_v32, %v347_v46  ;;  %v552_v42 = vpop.permute.xlu0 %551  ;;  %v567_v27 = vpop.permute.xlu1 %566 }
  0xef   :  { %v309_v47 = vpop.f32.mrf.mxu0  ;;  %1099 = vmatmul.mubr.bf16.vlgmr.msra.gmra.mxu0 %v601_v43  ;;  %v349_v53 = vpop.f32.mrf.mxu1  ;;  %v589_v43 = vmul.f32 %v542_v32, %v2610_v41 }
  0xf0   :  { %v575_v48 = vmul.f32 %v507_v45, %v309_v47  ;;  %v609_v36 = vpack.c.bf16 %v587_v28, %v585_v33  ;;  %v591_v39 = vmul.f32 %v547_v26, %v349_v53 }
  0xf1   :  { %v311_v49 = vpop.f32.mrf.mxu0  ;;  %v351_v60 = vpop.f32.mrf.mxu1 }
  0xf2   :  { %v576_v51 = vmul.f32 %v507_v45, %v311_v49  ;;  %v603_v57 = vpack.c.bf16 %v575_v48, %v573_v52  ;;  %v592_v30 = vmul.f32 %v547_v26, %v351_v60  ;;  %v611_v31 = vpack.c.bf16 %v591_v39, %v589_v43 }
  0xf3   :  { %v315_v54 = vpop.f32.mrf.mxu0  ;;  %v355_v4 = vpop.f32.mrf.mxu1 }
  0xf4   :  { %v604_v56 = vpack.c.bf16 %v576_v51, %v574_v50  ;;  %v577_v3 = vmul.f32 %v512_v59, %v315_v54  ;;  %v612_v37 = vpack.c.bf16 %v592_v30, %v590_v35  ;;  %v562_v50 = vpop.permute.xlu0 %561  ;;  %v593_v51 = vmul.f32 %v552_v42, %v355_v4 }
  0xf5   :  { %v317_v58 = vpop.f32.mrf.mxu0  ;;  %v357_v10 = vpop.f32.mrf.mxu1 }
  0xf6   :  { %1106 = vmatprep.mubr.bf16.mxu0 %v604_v56  ;;  %v578_v1 = vmul.f32 %v512_v59, %v317_v58  ;;  %v594_v45 = vmul.f32 %v552_v42, %v357_v10 }
  0xf7   :  { %v319_v61 = vpop.f32.mrf.mxu0  ;;  %1107 = vmatmul.mubr.bf16.gmra.mxu0 %v603_v57  ;;  %v359_v19 = vpop.f32.mrf.mxu1 }
  0xf8   :  { %v579_v62 = vmul.f32 %v517_v55, %v319_v61  ;;  %v595_v46 = vmul.f32 %v557_v29, %v359_v19 }
  0xf9   :  { %v321_v63 = vpop.f32.mrf.mxu0  ;;  %v361_v25 = vpop.f32.mrf.mxu1 }
  0xfa   :  { %v580_v2 = vmul.f32 %v517_v55, %v321_v63  ;;  %v605_v8 = vpack.c.bf16 %v579_v62, %v577_v3  ;;  %v596_v40 = vmul.f32 %v557_v29, %v361_v25  ;;  %v613_v54 = vpack.c.bf16 %v595_v46, %v593_v51 }
  0xfb   :  { %v325_v5 = vpop.f32.mrf.mxu0  ;;  %v365_v34 = vpop.f32.mrf.mxu1 }
  0xfc   :  { %v606_v6 = vpack.c.bf16 %v580_v2, %v578_v1  ;;  %v581_v20 = vmul.f32 %v522_v7, %v325_v5  ;;  %v614_v47 = vpack.c.bf16 %v596_v40, %v594_v45  ;;  %v597_v56 = vmul.f32 %v562_v50, %v365_v34 }
  0xfd   :  { %v327_v9 = vpop.f32.mrf.mxu0  ;;  %v367_v38 = vpop.f32.mrf.mxu1 }
  0xfe   :  { %1114 = vmatprep.mubr.bf16.mxu0 %v606_v6  ;;  %v582_v16 = vmul.f32 %v522_v7, %v327_v9  ;;  %v598_v52 = vmul.f32 %v562_v50, %v367_v38 }
  0xff   :  { %v329_v11 = vpop.f32.mrf.mxu0  ;;  %1115 = vmatmul.mubr.bf16.gmra.mxu0 %v605_v8  ;;  %v369_v44 = vpop.f32.mrf.mxu1 }
 0x100   :  { %v583_v13 = vmul.f32 %v527_v0, %v329_v11  ;;  %v599_v53 = vmul.f32 %v567_v27, %v369_v44 }
 0x101   :  { %v331_v14 = vpop.f32.mrf.mxu0  ;;  %v371_v48 = vpop.f32.mrf.mxu1 }
 0x102   :  { %v584_v17 = vmul.f32 %v527_v0, %v331_v14  ;;  %v607_v23 = vpack.c.bf16 %v583_v13, %v581_v20  ;;  %v600_v49 = vmul.f32 %v567_v27, %v371_v48  ;;  %v615_v41 = vpack.c.bf16 %v599_v53, %v597_v56 }
 0x104   :  { %v608_v22 = vpack.c.bf16 %v584_v17, %v582_v16  ;;  %v616_v55 = vpack.c.bf16 %v600_v49, %v598_v52  ;;  %v1934_v57 = vpop.f32.mrf.mxu1 }
 0x106   :  { %1122 = vmatprep.mubr.bf16.mxu0 %v608_v22  ;;  %v1935_v58 = vpop.f32.mrf.mxu1 }
 0x107   :  { %1123 = vmatmul.mubr.bf16.gmra.mxu0 %v607_v23  ;;  %v1936_v12 = vadd.f32 %v1935_v58, %v1934_v57 }
 0x108   :  { %1130 = vmatprep.mubr.bf16.mxu0 %v610_v24  ;;  %v1937_v59 = vpop.f32.mrf.mxu1 }
 0x10a   :  { %v1938_v60 = vpop.f32.mrf.mxu1 }
 0x10b   :  { %v1939_v19 = vadd.f32 %v1938_v60, %v1937_v59 }
 0x10c   :  { %v1940_v61 = vpop.f32.mrf.mxu1 }
 0x10e   :  { %v1941_v62 = vpop.f32.mrf.mxu1 }
 0x10f   :  { %1131 = vmatmul.mubr.bf16.gmra.mxu0 %v609_v36  ;;  %v1942_v28 = vadd.f32 %v1941_v62, %v1940_v61 }
 0x110   :  { %1138 = vmatprep.mubr.bf16.mxu0 %v612_v37  ;;  %v1943_v63 = vpop.f32.mrf.mxu1 }
 0x112   :  { %v1944_v0 = vpop.f32.mrf.mxu1 }
 0x113   :  { %v1945_v38 = vadd.f32 %v1944_v0, %v1943_v63 }
 0x114   :  { %v1946_v1 = vpop.f32.mrf.mxu1 }
 0x116   :  { %v1947_v2 = vpop.f32.mrf.mxu1 }
 0x117   :  { %1139 = vmatmul.mubr.bf16.gmra.mxu0 %v611_v31  ;;  %v1948_v31 = vadd.f32 %v1947_v2, %v1946_v1 }
 0x118   :  { %1146 = vmatprep.mubr.bf16.mxu0 %v614_v47  ;;  %v1949_v3 = vpop.f32.mrf.mxu1 }
 0x11a   :  { %v1950_v4 = vpop.f32.mrf.mxu1 }
 0x11b   :  { %v1951_v52 = vadd.f32 %v1950_v4, %v1949_v3 }
 0x11c   :  { %v1952_v5 = vpop.f32.mrf.mxu1 }
 0x11e   :  { %v1953_v6 = vpop.f32.mrf.mxu1 }
 0x11f   :  { %1147 = vmatmul.mubr.bf16.gmra.mxu0 %v613_v54  ;;  %v1954_v59 = vadd.f32 %v1953_v6, %v1952_v5 }
 0x120   :  { %1154 = vmatprep.mubr.bf16.mxu0 %v616_v55  ;;  %v2615_v7 = vpop.f32.mrf.mxu1 }
 0x122   :  { %v2617_v8 = vpop.f32.mrf.mxu1 }
 0x123   :  { %v1957_v3 = vadd.f32 %v2617_v8, %v2615_v7 }
 0x124   :  { %v2619_v10 = vpop.f32.mrf.mxu1 }
 0x126   :  { %v2626_v16 = vpop.f32.mrf.mxu1 }
 0x127   :  { %1155 = vmatmul.mubr.bf16.gmra.mxu0 %v615_v41 }
 0x128   :  { %v2631_v23 = vpop.f32.mrf.mxu1 }
 0x12a   :  { %v1962_v34 = vpop.f32.mrf.mxu1 }
 0x12c   :  { %v1964_v42 = vpop.f32.mrf.mxu1 }
 0x12e   :  { %v1965_v46 = vpop.f32.mrf.mxu1 }
 0x130   :  { %v1967_v56 = vpop.f32.mrf.mxu1 }
 0x132   :  { %v1968_v63 = vpop.f32.mrf.mxu1 }
 0x134   :  { %v1970_v6 = vpop.f32.mrf.mxu1 }
 0x136   :  { %v1971_v8 = vpop.f32.mrf.mxu1 }
 0x1af   :  { %v1998_v9 = vpop.f32.mrf.mxu0 }
 0x1b1   :  { %v1999_v11 = vpop.f32.mrf.mxu0 }
 0x1b2   :  { %v2000_v13 = vadd.f32 %v1999_v11, %v1998_v9 }
 0x1b3   :  { %v2001_v14 = vpop.f32.mrf.mxu0 }
 0x1b4   :  { %v1101_v17 = vadd.f32 %v2000_v13, %v1936_v12 }
 0x1b5   :  { %v2002_v18 = vpop.f32.mrf.mxu0 }
 0x1b6   :  { %v2003_v20 = vadd.f32 %v2002_v18, %v2001_v14  ;;  %v2629_v21 = vadd.f32 %v2624_v15, %v1101_v17  ;;  %v1960_v14 = vadd.f32 %v2626_v16, %v2619_v10  ;;  %v1973_v16 = vpop.f32.mrf.mxu1 }
 0x1b7   :  { %v2004_v22 = vpop.f32.mrf.mxu0 }
 0x1b8   :  { %v1104_v24 = vadd.f32 %v2003_v20, %v1939_v19  ;;  %v1186_v25 = vmul.f32 %v2629_v21, %v2629_v21 }
 0x1b9   :  { %v2005_v26 = vpop.f32.mrf.mxu0 }
 0x1ba   :  { %v2006_v30 = vadd.f32 %v2005_v26, %v2004_v22  ;;  %1202 = vadd.xlane.f32.xlu0 %v1186_v25  ;;  %v2636_v32 = vadd.f32 %v2624_v15, %v1104_v24  ;;  %v1963_v24 = vadd.f32 %v1962_v34, %v2631_v23  ;;  %v1974_v23 = vpop.f32.mrf.mxu1 }
 0x1bb   :  { %v2007_v33 = vpop.f32.mrf.mxu0 }
 0x1bc   :  { %v1109_v35 = vadd.f32 %v2006_v30, %v1942_v28  ;;  %v1187_v36 = vmul.f32 %v2636_v32, %v2636_v32 }
 0x1bd   :  { %v2008_v37 = vpop.f32.mrf.mxu0 }
 0x1be   :  { %v2009_v29 = vadd.f32 %v2008_v37, %v2007_v33  ;;  %1204 = vadd.xlane.f32.xlu1 %v1187_v36  ;;  %v2641_v39 = vadd.f32 %v2624_v15, %v1109_v35  ;;  %v1966_v35 = vadd.f32 %v1965_v46, %v1964_v42  ;;  %v1976_v42 = vpop.f32.mrf.mxu1 }
 0x1bf   :  { %v2010_v40 = vpop.f32.mrf.mxu0 }
 0x1c0   :  { %v1112_v43 = vadd.f32 %v2009_v29, %v1945_v38  ;;  %v1188_v44 = vmul.f32 %v2641_v39, %v2641_v39 }
 0x1c1   :  { %v2011_v45 = vpop.f32.mrf.mxu0 }
 0x1c2   :  { %v2012_v47 = vadd.f32 %v2011_v45, %v2010_v40  ;;  %1206 = vadd.xlane.f32.xlu0 %v1188_v44  ;;  %v2646_v48 = vadd.f32 %v2624_v15, %v1112_v43  ;;  %v1969_v43 = vadd.f32 %v1968_v63, %v1967_v56 }
 0x1c3   :  { %v2013_v27 = vpop.f32.mrf.mxu0 }
 0x1c4   :  { %v1117_v49 = vadd.f32 %v2012_v47, %v1948_v31  ;;  %v1189_v50 = vmul.f32 %v2646_v48, %v2646_v48 }
 0x1c5   :  { %v2014_v51 = vpop.f32.mrf.mxu0 }
 0x1c6   :  { %v2015_v54 = vadd.f32 %v2014_v51, %v2013_v27  ;;  %1208 = vadd.xlane.f32.xlu0 %v1189_v50  ;;  %v2651_v55 = vadd.f32 %v2624_v15, %v1117_v49  ;;  %v1972_v49 = vadd.f32 %v1971_v8, %v1970_v6 }
 0x1c7   :  { %v2016_v53 = vpop.f32.mrf.mxu0 }
 0x1c8   :  { %v1120_v41 = vadd.f32 %v2015_v54, %v1951_v52  ;;  %v1190_v57 = vmul.f32 %v2651_v55, %v2651_v55  ;;  %v1977_v52 = vpop.f32.mrf.mxu1 }
 0x1c9   :  { %v2017_v58 = vpop.f32.mrf.mxu0 }
 0x1ca   :  { %v2018_v60 = vadd.f32 %v2017_v58, %v2016_v53  ;;  %1210 = vadd.xlane.f32.xlu1 %v1190_v57  ;;  %v2656_v61 = vadd.f32 %v2624_v15, %v1120_v41  ;;  %v1975_v57 = vadd.f32 %v1974_v23, %v1973_v16 }
 0x1cb   :  { %v2019_v62 = vpop.f32.mrf.mxu0 }
 0x1cc   :  { %v1125_v0 = vadd.f32 %v2018_v60, %v1954_v59  ;;  %v1191_v1 = vmul.f32 %v2656_v61, %v2656_v61  ;;  %v1979_v60 = vpop.f32.mrf.mxu1 }
 0x1cd   :  { %v2020_v2 = vpop.f32.mrf.mxu0 }
 0x1ce   :  { %v2021_v4 = vadd.f32 %v2020_v2, %v2019_v62  ;;  %1212 = vadd.xlane.f32.xlu0 %v1191_v1  ;;  %v2663_v9 = vadd.f32 %v2624_v15, %v1125_v0  ;;  %v1978_v2 = vadd.f32 %v1977_v52, %v1976_v42 }
 0x1cf   :  { %v2022_v5 = vpop.f32.mrf.mxu0 }
 0x1d0   :  { %v1128_v11 = vadd.f32 %v2021_v4, %v1957_v3  ;;  %v1192_v12 = vmul.f32 %v2663_v9, %v2663_v9 }
 0x1d1   :  { %v2023_v13 = vpop.f32.mrf.mxu0 }
 0x1d2   :  { %v2024_v17 = vadd.f32 %v2023_v13, %v2022_v5  ;;  %1214 = vadd.xlane.f32.xlu1 %v1192_v12  ;;  %v2670_v18 = vadd.f32 %v2624_v15, %v1128_v11  ;;  %v1980_v5 = vpop.f32.mrf.mxu1 }
 0x1d3   :  { %v2025_v7 = vpop.f32.mrf.mxu0 }
 0x1d4   :  { %v1133_v19 = vadd.f32 %v2024_v17, %v1960_v14  ;;  %v1193_v20 = vmul.f32 %v2670_v18, %v2670_v18  ;;  %v1981_v14 = vadd.f32 %v1980_v5, %v1979_v60 }
 0x1d5   :  { %v2026_v22 = vpop.f32.mrf.mxu0 }
 0x1d6   :  { %v2027_v25 = vadd.f32 %v2026_v22, %v2025_v7  ;;  %1216 = vadd.xlane.f32.xlu0 %v1193_v20  ;;  %v2676_v26 = vadd.f32 %v2624_v15, %v1133_v19 }
 0x1d7   :  { %v2028_v10 = vpop.f32.mrf.mxu0 }
 0x1d8   :  { %v1136_v28 = vadd.f32 %v2027_v25, %v1963_v24  ;;  %v1194_v30 = vmul.f32 %v2676_v26, %v2676_v26 }
 0x1d9   :  { %v2029_v33 = vpop.f32.mrf.mxu0 }
 0x1da   :  { %v2030_v36 = vadd.f32 %v2029_v33, %v2028_v10  ;;  %1218 = vadd.xlane.f32.xlu1 %v1194_v30  ;;  %v2681_v37 = vadd.f32 %v2624_v15, %v1136_v28 }
 0x1db   :  { %v2031_v38 = vpop.f32.mrf.mxu0 }
 0x1dc   :  { %v1141_v34 = vadd.f32 %v2030_v36, %v1966_v35  ;;  %v1195_v29 = vmul.f32 %v2681_v37, %v2681_v37 }
 0x1dd   :  { %v2032_v40 = vpop.f32.mrf.mxu0 }
 0x1de   :  { %v2033_v44 = vadd.f32 %v2032_v40, %v2031_v38  ;;  %1220 = vadd.xlane.f32.xlu0 %v1195_v29  ;;  %v2686_v45 = vadd.f32 %v2624_v15, %v1141_v34 }
 0x1df   :  { %v2034_v31 = vpop.f32.mrf.mxu0 }
 0x1e0   :  { %v1144_v47 = vadd.f32 %v2033_v44, %v1969_v43  ;;  %v1196_v27 = vmul.f32 %v2686_v45, %v2686_v45 }
 0x1e1   :  { %v2035_v46 = vpop.f32.mrf.mxu0 }
 0x1e2   :  { %v2036_v50 = vadd.f32 %v2035_v46, %v2034_v31  ;;  %1222 = vadd.xlane.f32.xlu1 %v1196_v27  ;;  %v2691_v51 = vadd.f32 %v2624_v15, %v1144_v47 }
 0x1e3   :  { %v2037_v54 = vpop.f32.mrf.mxu0 }
 0x1e4   :  { %v1149_v53 = vadd.f32 %v2036_v50, %v1972_v49  ;;  %v1197_v56 = vmul.f32 %v2691_v51, %v2691_v51 }
 0x1e5   :  { %v2038_v41 = vpop.f32.mrf.mxu0 }
 0x1e6   :  { %v2039_v58 = vadd.f32 %v2038_v41, %v2037_v54  ;;  %1224 = vadd.xlane.f32.xlu0 %v1197_v56  ;;  %v2696_v59 = vadd.f32 %v2624_v15, %v1149_v53 }
 0x1e7   :  { %v2040_v62 = vpop.f32.mrf.mxu0 }
 0x1e8   :  { %v1152_v63 = vadd.f32 %v2039_v58, %v1975_v57  ;;  %v1198_v0 = vmul.f32 %v2696_v59, %v2696_v59 }
 0x1e9   :  { %v2041_v1 = vpop.f32.mrf.mxu0 }
 0x1ea   :  { %v2042_v3 = vadd.f32 %v2041_v1, %v2040_v62  ;;  %1226 = vadd.xlane.f32.xlu1 %v1198_v0  ;;  %v2701_v4 = vadd.f32 %v2624_v15, %v1152_v63 }
 0x1eb   :  { %v2043_v6 = vpop.f32.mrf.mxu0 }
 0x1ec   :  { %v1157_v11 = vadd.f32 %v2042_v3, %v1978_v2  ;;  %v1199_v12 = vmul.f32 %v2701_v4, %v2701_v4 }
 0x1ed   :  { %v2044_v13 = vpop.f32.mrf.mxu0 }
 0x1ee   :  { %v2045_v17 = vadd.f32 %v2044_v13, %v2043_v6  ;;  %1228 = vadd.xlane.f32.xlu0 %v1199_v12  ;;  %v2706_v7 = vadd.f32 %v2624_v15, %v1157_v11 }
 0x1f0   :  { %v1160_v8 = vadd.f32 %v2045_v17, %v1981_v14  ;;  %v1200_v19 = vmul.f32 %v2706_v7, %v2706_v7 }
 0x1f2   :  { %1230 = vadd.xlane.f32.xlu1 %v1200_v19  ;;  %v2711_v20 = vadd.f32 %v2624_v15, %v1160_v8 }
 0x1f4   :  { %v1201_v22 = vmul.f32 %v2711_v20, %v2711_v20 }
 0x1f6   :  { %1232 = vadd.xlane.f32.xlu0 %v1201_v22 }
 0x243   :  { %v1203_v24 = vpop.xlane.xlu0 %1202 }
 0x244   :  { %v1234_v25 = vmax.f32 %v1203_v24, 1e-24 }
 0x246   :  { %2153 = vrsqrt.f32 %v1234_v25 }
 0x247   :  { %v1205_v10 = vpop.xlane.xlu1 %1204 }
 0x248   :  { %v1235_v16 = vmax.f32 %v1205_v10, 1e-24 }
 0x24a   :  { %2155 = vrsqrt.f32 %v1235_v16 }
 0x24b   :  { %v1207_v28 = vpop.xlane.xlu0 %1206 }
 0x24c   :  { %v1236_v30 = vmax.f32 %v1207_v28, 1e-24 }
 0x24e   :  { %2157 = vrsqrt.f32 %v1236_v30 }
 0x24f   :  { %v1209_v33 = vpop.xlane.xlu0 %1208 }
 0x250   :  { %v1237_v35 = vmax.f32 %v1209_v33, 1e-24 }
 0x252   :  { %2159 = vrsqrt.f32 %v1237_v35 }
 0x253   :  { %v2154_v36 = vpop.eup %2153  ;;  %v1211_v38 = vpop.xlane.xlu1 %1210 }
 0x254   :  { %v1238_v15 = vmax.f32 %v1211_v38, 1e-24  ;;  %v2716_v23 = vmul.f32 %v2154_v36, %v2629_v21 }
 0x256   :  { %2161 = vrsqrt.f32 %v1238_v15  ;;  %v1821_v34 = vmul.f32 -1.442695, %v2716_v23 }
 0x257   :  { %v2156_v29 = vpop.eup %2155  ;;  %v1213_v40 = vpop.xlane.xlu0 %1212 }
 0x258   :  { %v1239_v43 = vmax.f32 %v1213_v40, 1e-24  ;;  %2163 = vpow2.f32 %v1821_v34  ;;  %v2720_v44 = vmul.f32 %v2156_v29, %v2636_v32 }
 0x25a   :  { %2165 = vrsqrt.f32 %v1239_v43  ;;  %v1822_v31 = vmul.f32 -1.442695, %v2720_v44 }
 0x25b   :  { %v2158_v42 = vpop.eup %2157  ;;  %v1215_v47 = vpop.xlane.xlu1 %1214 }
 0x25c   :  { %v1240_v27 = vmax.f32 %v1215_v47, 1e-24  ;;  %2167 = vpow2.f32 %v1822_v31  ;;  %v2724_v21 = vmul.f32 %v2158_v42, %v2641_v39 }
 0x25e   :  { %2169 = vrsqrt.f32 %v1240_v27  ;;  %v1823_v46 = vmul.f32 -1.442695, %v2724_v21 }
 0x25f   :  { %v2160_v49 = vpop.eup %2159  ;;  %v1217_v50 = vpop.xlane.xlu0 %1216 }
 0x260   :  { %v1241_v52 = vmax.f32 %v1217_v50, 1e-24  ;;  %2171 = vpow2.f32 %v1823_v46  ;;  %v2728_v32 = vmul.f32 %v2160_v49, %v2646_v48 }
 0x262   :  { %2173 = vrsqrt.f32 %v1241_v52  ;;  %v1824_v54 = vmul.f32 -1.442695, %v2728_v32 }
 0x263   :  { %v2162_v53 = vpop.eup %2161  ;;  %v1219_v56 = vpop.xlane.xlu1 %1218 }
 0x264   :  { %v1242_v41 = vmax.f32 %v1219_v56, 1e-24  ;;  %2175 = vpow2.f32 %v1824_v54  ;;  %v2732_v39 = vmul.f32 %v2162_v53, %v2651_v55 }
 0x265   :  { %v2164_v57 = vpop.eup %2163 }
 0x266   :  { %2177 = vrsqrt.f32 %v1242_v41  ;;  %v1330_v58 = vadd.f32 1.0, %v2164_v57  ;;  %v1825_v60 = vmul.f32 -1.442695, %v2732_v39 }
 0x267   :  { %v2166_v62 = vpop.eup %2165  ;;  %v1221_v63 = vpop.xlane.xlu0 %1220 }
 0x268   :  { %v1243_v0 = vmax.f32 %v1221_v63, 1e-24  ;;  %2179 = vrcp.f32 %v1330_v58  ;;  %v2736_v48 = vmul.f32 %v2166_v62, %v2656_v61 }
 0x269   :  { %v2168_v1 = vpop.eup %2167  ;;  %2181 = vpow2.f32 %v1825_v60 }
 0x26a   :  { %2183 = vrsqrt.f32 %v1243_v0  ;;  %v1331_v2 = vadd.f32 1.0, %v2168_v1  ;;  %v1826_v3 = vmul.f32 -1.442695, %v2736_v48 }
 0x26b   :  { %v2170_v55 = vpop.eup %2169  ;;  %v1223_v5 = vpop.xlane.xlu1 %1222 }
 0x26c   :  { %v1244_v6 = vmax.f32 %v1223_v5, 1e-24  ;;  %2185 = vrcp.f32 %v1331_v2  ;;  %v2740_v11 = vmul.f32 %v2170_v55, %v2663_v9 }
 0x26d   :  { %v2172_v12 = vpop.eup %2171  ;;  %2187 = vpow2.f32 %v1826_v3 }
 0x26e   :  { %2189 = vrsqrt.f32 %v1244_v6  ;;  %v1332_v13 = vadd.f32 1.0, %v2172_v12  ;;  %v1827_v61 = vmul.f32 -1.442695, %v2740_v11 }
 0x26f   :  { %v2174_v14 = vpop.eup %2173  ;;  %v1225_v17 = vpop.xlane.xlu0 %1224 }
 0x270   :  { %v1245_v8 = vmax.f32 %v1225_v17, 1e-24  ;;  %2191 = vrcp.f32 %v1332_v13  ;;  %v2744_v19 = vmul.f32 %v2174_v14, %v2670_v18 }
 0x271   :  { %v2176_v22 = vpop.eup %2175  ;;  %2193 = vpow2.f32 %v1827_v61 }
 0x272   :  { %2195 = vrsqrt.f32 %v1245_v8  ;;  %v1333_v24 = vadd.f32 1.0, %v2176_v22  ;;  %v1828_v9 = vmul.f32 -1.442695, %v2744_v19 }
 0x273   :  { %v2178_v25 = vpop.eup %2177  ;;  %v1227_v10 = vpop.xlane.xlu1 %1226 }
 0x274   :  { %v1246_v16 = vmax.f32 %v1227_v10, 1e-24  ;;  %2197 = vrcp.f32 %v1333_v24  ;;  %v2748_v28 = vmul.f32 %v2178_v25, %v2676_v26 }
 0x275   :  { %v2180_v30 = vpop.eup %2179  ;;  %2199 = vpow2.f32 %v1828_v9 }
 0x276   :  { %v2182_v33 = vpop.eup %2181  ;;  %2201 = vrsqrt.f32 %v1246_v16  ;;  %v2751_v18 = vmul.f32 %v2180_v30, %v2716_v23  ;;  %v1829_v35 = vmul.f32 -1.442695, %v2748_v28 }
 0x277   :  { %v2184_v36 = vpop.eup %2183  ;;  %v1229_v38 = vpop.xlane.xlu0 %1228  ;;  %v1334_v15 = vadd.f32 1.0, %v2182_v33 }
 0x278   :  { %v1247_v34 = vmax.f32 %v1229_v38, 1e-24  ;;  %1394 = vadd.xlane.f32.xlu1 %v2751_v18  ;;  %2203 = vpow2.f32 %v1829_v35  ;;  %v2756_v29 = vmul.f32 %v2184_v36, %v2681_v37  ;;  %v1426_v23 = vmul.f32 %v2751_v18, %v2751_v18 }
 0x279   :  { %v2186_v26 = vpop.eup %2185  ;;  %2205 = vrcp.f32 %v1334_v15 }
 0x27a   :  { %v2188_v40 = vpop.eup %2187  ;;  %2207 = vrsqrt.f32 %v1247_v34  ;;  %v2759_v43 = vmul.f32 %v2186_v26, %v2720_v44  ;;  %v1830_v31 = vmul.f32 -1.442695, %v2756_v29 }
 0x27b   :  { %v2190_v42 = vpop.eup %2189  ;;  %v1231_v47 = vpop.xlane.xlu1 %1230  ;;  %v1335_v27 = vadd.f32 1.0, %v2188_v40 }
 0x27c   :  { %v1248_v46 = vmax.f32 %v1231_v47, 1e-24  ;;  %1396 = vadd.xlane.f32.xlu0 %v2759_v43  ;;  %1442 = vadd.xlane.f32.xlu1 %v1426_v23  ;;  %2209 = vpow2.f32 %v1830_v31  ;;  %v2766_v37 = vmul.f32 %v2190_v42, %v2686_v45  ;;  %v1427_v50 = vmul.f32 %v2759_v43, %v2759_v43 }
 0x27d   :  { %v2192_v49 = vpop.eup %2191  ;;  %2211 = vrcp.f32 %v1335_v27 }
 0x27e   :  { %v2194_v44 = vpop.eup %2193  ;;  %2213 = vrsqrt.f32 %v1248_v46  ;;  %v2771_v52 = vmul.f32 %v2192_v49, %v2724_v21  ;;  %v1831_v54 = vmul.f32 -1.442695, %v2766_v37 }
 0x27f   :  { %v2196_v53 = vpop.eup %2195  ;;  %v1233_v56 = vpop.xlane.xlu0 %1232  ;;  %v1336_v41 = vadd.f32 1.0, %v2194_v44 }
 0x280   :  { %v1249_v57 = vmax.f32 %v1233_v56, 1e-24  ;;  %1444 = vadd.xlane.f32.xlu0 %v1427_v50  ;;  %1398 = vadd.xlane.f32.xlu1 %v2771_v52  ;;  %2215 = vpow2.f32 %v1831_v54  ;;  %v2776_v45 = vmul.f32 %v2196_v53, %v2691_v51  ;;  %v1428_v62 = vmul.f32 %v2771_v52, %v2771_v52 }
 0x281   :  { %v2198_v58 = vpop.eup %2197  ;;  %2217 = vrcp.f32 %v1336_v41 }
 0x282   :  { %v2200_v60 = vpop.eup %2199  ;;  %2219 = vrsqrt.f32 %v1249_v57  ;;  %v2779_v21 = vmul.f32 %v2198_v58, %v2728_v32  ;;  %v1832_v63 = vmul.f32 -1.442695, %v2776_v45 }
 0x283   :  { %v2202_v0 = vpop.eup %2201  ;;  %v1337_v1 = vadd.f32 1.0, %v2200_v60 }
 0x284   :  { %1400 = vadd.xlane.f32.xlu0 %v2779_v21  ;;  %1446 = vadd.xlane.f32.xlu1 %v1428_v62  ;;  %2221 = vpow2.f32 %v1832_v63  ;;  %v2786_v51 = vmul.f32 %v2202_v0, %v2696_v59  ;;  %v1429_v32 = vmul.f32 %v2779_v21, %v2779_v21 }
 0x285   :  { %v2204_v2 = vpop.eup %2203  ;;  %2223 = vrcp.f32 %v1337_v1 }
 0x286   :  { %v2206_v3 = vpop.eup %2205  ;;  %v1338_v55 = vadd.f32 1.0, %v2204_v2  ;;  %v1833_v5 = vmul.f32 -1.442695, %v2786_v51 }
 0x287   :  { %v2208_v6 = vpop.eup %2207  ;;  %v2792_v12 = vmul.f32 %v2206_v3, %v2732_v39 }
 0x288   :  { %1448 = vadd.xlane.f32.xlu0 %v1429_v32  ;;  %2225 = vrcp.f32 %v1338_v55  ;;  %v2795_v13 = vmul.f32 %v2208_v6, %v2701_v4 }
 0x289   :  { %v2210_v59 = vpop.eup %2209  ;;  %1402 = vadd.xlane.f32.xlu1 %v2792_v12  ;;  %2227 = vpow2.f32 %v1833_v5  ;;  %v1430_v39 = vmul.f32 %v2792_v12, %v2792_v12 }
 0x28a   :  { %v2212_v61 = vpop.eup %2211  ;;  %v1339_v14 = vadd.f32 1.0, %v2210_v59  ;;  %v1834_v17 = vmul.f32 -1.442695, %v2795_v13 }
 0x28b   :  { %v2214_v8 = vpop.eup %2213  ;;  %v2800_v22 = vmul.f32 %v2212_v61, %v2736_v48 }
 0x28c   :  { %2229 = vrcp.f32 %v1339_v14  ;;  %v2805_v24 = vmul.f32 %v2214_v8, %v2706_v7 }
 0x28d   :  { %v2216_v4 = vpop.eup %2215  ;;  %1404 = vadd.xlane.f32.xlu0 %v2800_v22  ;;  %1450 = vadd.xlane.f32.xlu1 %v1430_v39  ;;  %2231 = vpow2.f32 %v1834_v17  ;;  %v1431_v48 = vmul.f32 %v2800_v22, %v2800_v22 }
 0x28e   :  { %v2218_v9 = vpop.eup %2217  ;;  %v1340_v25 = vadd.f32 1.0, %v2216_v4  ;;  %v1835_v10 = vmul.f32 -1.442695, %v2805_v24 }
 0x28f   :  { %v2220_v16 = vpop.eup %2219  ;;  %v2812_v30 = vmul.f32 %v2218_v9, %v2740_v11 }
 0x290   :  { %2233 = vrcp.f32 %v1340_v25  ;;  %v1281_v7 = vmul.f32 %v2220_v16, %v2711_v20 }
 0x291   :  { %v2222_v33 = vpop.eup %2221  ;;  %1452 = vadd.xlane.f32.xlu0 %v1431_v48  ;;  %1406 = vadd.xlane.f32.xlu1 %v2812_v30  ;;  %2235 = vpow2.f32 %v1835_v10  ;;  %v1432_v34 = vmul.f32 %v2812_v30, %v2812_v30 }
 0x292   :  { %v2224_v35 = vpop.eup %2223  ;;  %v1341_v36 = vadd.f32 1.0, %v2222_v33  ;;  %v1836_v38 = vmul.f32 -1.442695, %v1281_v7 }
 0x293   :  { %v2817_v15 = vmul.f32 %v2224_v35, %v2744_v19 }
 0x294   :  { %2237 = vrcp.f32 %v1341_v36 }
 0x295   :  { %v2226_v11 = vpop.eup %2225  ;;  %1408 = vadd.xlane.f32.xlu0 %v2817_v15  ;;  %1454 = vadd.xlane.f32.xlu1 %v1432_v34  ;;  %2239 = vpow2.f32 %v1836_v38  ;;  %v1433_v40 = vmul.f32 %v2817_v15, %v2817_v15 }
 0x296   :  { %v2228_v20 = vpop.eup %2227  ;;  %v2823_v26 = vmul.f32 %v2226_v11, %v2748_v28 }
 0x297   :  { %v1342_v23 = vadd.f32 1.0, %v2228_v20 }
 0x298   :  { %v1434_v47 = vmul.f32 %v2823_v26, %v2823_v26 }
 0x299   :  { %v2230_v31 = vpop.eup %2229  ;;  %1456 = vadd.xlane.f32.xlu0 %v1433_v40  ;;  %1410 = vadd.xlane.f32.xlu1 %v2823_v26  ;;  %2241 = vrcp.f32 %v1342_v23 }
 0x29a   :  { %v2232_v19 = vpop.eup %2231  ;;  %v2829_v42 = vmul.f32 %v2230_v31, %v2756_v29 }
 0x29b   :  { %v1343_v27 = vadd.f32 1.0, %v2232_v19 }
 0x29c   :  { %v1435_v44 = vmul.f32 %v2829_v42, %v2829_v42 }
 0x29d   :  { %v2234_v46 = vpop.eup %2233  ;;  %1412 = vadd.xlane.f32.xlu0 %v2829_v42  ;;  %1458 = vadd.xlane.f32.xlu1 %v1434_v47  ;;  %2243 = vrcp.f32 %v1343_v27 }
 0x29e   :  { %v2236_v28 = vpop.eup %2235  ;;  %v2835_v49 = vmul.f32 %v2234_v46, %v2766_v37 }
 0x29f   :  { %v1344_v50 = vadd.f32 1.0, %v2236_v28 }
 0x2a0   :  { %v1436_v56 = vmul.f32 %v2835_v49, %v2835_v49 }
 0x2a1   :  { %v2238_v54 = vpop.eup %2237  ;;  %1460 = vadd.xlane.f32.xlu0 %v1435_v44  ;;  %1414 = vadd.xlane.f32.xlu1 %v2835_v49  ;;  %2245 = vrcp.f32 %v1344_v50 }
 0x2a2   :  { %v2240_v29 = vpop.eup %2239  ;;  %v2841_v53 = vmul.f32 %v2238_v54, %v2776_v45 }
 0x2a3   :  { %v1345_v41 = vadd.f32 1.0, %v2240_v29 }
 0x2a4   :  { %v1437_v57 = vmul.f32 %v2841_v53, %v2841_v53 }
 0x2a5   :  { %1416 = vadd.xlane.f32.xlu0 %v2841_v53  ;;  %1462 = vadd.xlane.f32.xlu1 %v1436_v56  ;;  %2247 = vrcp.f32 %v1345_v41 }
 0x2a6   :  { %v2242_v37 = vpop.eup %2241 }
 0x2a7   :  { %v2849_v58 = vmul.f32 %v2242_v37, %v2786_v51 }
 0x2a9   :  { %1464 = vadd.xlane.f32.xlu0 %v1437_v57  ;;  %1418 = vadd.xlane.f32.xlu1 %v2849_v58  ;;  %v1438_v62 = vmul.f32 %v2849_v58, %v2849_v58 }
 0x2aa   :  { %v2244_v45 = vpop.eup %2243 }
 0x2ab   :  { %v2853_v60 = vmul.f32 %v2244_v45, %v2795_v13 }
 0x2ad   :  { %1420 = vadd.xlane.f32.xlu0 %v2853_v60  ;;  %1466 = vadd.xlane.f32.xlu1 %v1438_v62  ;;  %v1439_v0 = vmul.f32 %v2853_v60, %v2853_v60 }
 0x2ae   :  { %v2246_v63 = vpop.eup %2245 }
 0x2af   :  { %v2861_v1 = vmul.f32 %v2246_v63, %v2805_v24 }
 0x2b1   :  { %1468 = vadd.xlane.f32.xlu0 %v1439_v0  ;;  %1422 = vadd.xlane.f32.xlu1 %v2861_v1  ;;  %v1440_v3 = vmul.f32 %v2861_v1, %v2861_v1 }
 0x2b2   :  { %v2248_v51 = vpop.eup %2247 }
 0x2b3   :  { %v2864_v2 = vmul.f32 %v2248_v51, %v1281_v7 }
 0x2b5   :  { %1424 = vadd.xlane.f32.xlu0 %v2864_v2  ;;  %1470 = vadd.xlane.f32.xlu1 %v1440_v3  ;;  %v1441_v32 = vmul.f32 %v2864_v2, %v2864_v2 }
 0x2b9   :  { %1472 = vadd.xlane.f32.xlu0 %v1441_v32 }
 0x301   :  { %v1395_v55 = vpop.xlane.xlu1 %1394 }
 0x302   :  { %v1474_v5 = vmul.f32 0.015625, %v1395_v55 }
 0x304   :  { %v1506_v59 = vmul.f32 %v1474_v5, %v1474_v5  ;;  %v1554_v57 = vsub.f32 %v2751_v18, %v1474_v5 }
 0x305   :  { %v1397_v6 = vpop.xlane.xlu0 %1396  ;;  %v1443_v13 = vpop.xlane.xlu1 %1442 }
 0x306   :  { %v2871_v61 = vmul.f32 0.015625, %v1397_v6  ;;  %v1490_v14 = vmul.f32 0.015625, %v1443_v13  ;;  %v2897_v6 = vld [vmem:[%s3025_s7] ss:$0 sm:$0xff] }
 0x308   :  { %v1522_v17 = vsub.f32 %v1490_v14, %v1506_v59  ;;  %v1507_v24 = vmul.f32 %v2871_v61, %v2871_v61  ;;  %v1555_v18 = vsub.f32 %v2759_v43, %v2871_v61 }
 0x309   :  { %v1445_v8 = vpop.xlane.xlu0 %1444  ;;  %v1399_v39 = vpop.xlane.xlu1 %1398 }
 0x30a   :  { %v1538_v4 = vmax.f32 %v1522_v17, 0.0  ;;  %v1491_v9 = vmul.f32 0.015625, %v1445_v8  ;;  %v2875_v25 = vmul.f32 0.015625, %v1399_v39 }
 0x30c   :  { %v1570_v10 = vadd.f32 1e-05, %v1538_v4  ;;  %v1523_v16 = vsub.f32 %v1491_v9, %v1507_v24  ;;  %v1508_v48 = vmul.f32 %v2875_v25, %v2875_v25 }
 0x30d   :  { %v1401_v7 = vpop.xlane.xlu0 %1400  ;;  %v1447_v33 = vpop.xlane.xlu1 %1446 }
 0x30e   :  { %2249 = vrsqrt.f32 %v1570_v10  ;;  %v1539_v35 = vmax.f32 %v1523_v16, 0.0  ;;  %v2879_v36 = vmul.f32 0.015625, %v1401_v7  ;;  %v1492_v38 = vmul.f32 0.015625, %v1447_v33  ;;  %v2909_v16 = vld [vmem:[%s3026_s8] ss:$0 sm:$0xff] }
 0x30f   :  { %v1556_v7 = vsub.f32 %v2771_v52, %v2875_v25 }
 0x310   :  { %v1571_v34 = vadd.f32 1e-05, %v1539_v35  ;;  %v1524_v11 = vsub.f32 %v1492_v38, %v1508_v48  ;;  %v1509_v40 = vmul.f32 %v2879_v36, %v2879_v36  ;;  %v1557_v52 = vsub.f32 %v2779_v21, %v2879_v36 }
 0x311   :  { %v1449_v20 = vpop.xlane.xlu0 %1448 }
 0x312   :  { %2251 = vrsqrt.f32 %v1571_v34  ;;  %v1540_v23 = vmax.f32 %v1524_v11, 0.0  ;;  %v1493_v31 = vmul.f32 0.015625, %v1449_v20  ;;  %v1403_v19 = vpop.xlane.xlu1 %1402 }
 0x313   :  { %v2883_v47 = vmul.f32 0.015625, %v1403_v19 }
 0x314   :  { %v1572_v27 = vadd.f32 1e-05, %v1540_v23  ;;  %v1525_v46 = vsub.f32 %v1493_v31, %v1509_v40 }
 0x315   :  { %v1510_v54 = vmul.f32 %v2883_v47, %v2883_v47 }
 0x316   :  { %2253 = vrsqrt.f32 %v1572_v27  ;;  %v1541_v28 = vmax.f32 %v1525_v46, 0.0  ;;  %v1405_v44 = vpop.xlane.xlu0 %1404  ;;  %v1451_v50 = vpop.xlane.xlu1 %1450 }
 0x317   :  { %v2887_v29 = vmul.f32 0.015625, %v1405_v44  ;;  %v1494_v56 = vmul.f32 0.015625, %v1451_v50 }
 0x318   :  { %v1573_v41 = vadd.f32 1e-05, %v1541_v28 }
 0x319   :  { %v1526_v37 = vsub.f32 %v1494_v56, %v1510_v54  ;;  %v1511_v0 = vmul.f32 %v2887_v29, %v2887_v29 }
 0x31a   :  { %2255 = vrsqrt.f32 %v1573_v41  ;;  %v1453_v45 = vpop.xlane.xlu0 %1452  ;;  %v1407_v62 = vpop.xlane.xlu1 %1406 }
 0x31b   :  { %v2250_v63 = vpop.eup %2249  ;;  %v1542_v51 = vmax.f32 %v1526_v37, 0.0  ;;  %v1495_v3 = vmul.f32 0.015625, %v1453_v45  ;;  %v2892_v32 = vmul.f32 0.015625, %v1407_v62 }
 0x31c   :  { %v1602_v55 = vmul.f32 %v2250_v63, %v1554_v57  ;;  %v1558_v63 = vsub.f32 %v2792_v12, %v2883_v47 }
 0x31d   :  { %v1574_v13 = vadd.f32 1e-05, %v1542_v51  ;;  %v1527_v59 = vsub.f32 %v1495_v3, %v1511_v0  ;;  %v1512_v5 = vmul.f32 %v2892_v32, %v2892_v32 }
 0x31e   :  { %v1409_v14 = vpop.xlane.xlu0 %1408  ;;  %v1455_v17 = vpop.xlane.xlu1 %1454  ;;  %v1625_v9 = vmul.f32 %v2897_v6, %v1602_v55 }
 0x31f   :  { %v2252_v8 = vpop.eup %2251  ;;  %2257 = vrsqrt.f32 %v1574_v13  ;;  %v1543_v39 = vmax.f32 %v1527_v59, 0.0  ;;  %v2903_v24 = vmul.f32 0.015625, %v1409_v14  ;;  %v1496_v4 = vmul.f32 0.015625, %v1455_v17 }
 0x320   :  { %v1603_v10 = vmul.f32 %v2252_v8, %v1555_v18  ;;  %v1648_v23 = vadd.f32 %v2909_v16, %v1625_v9  ;;  %v1559_v9 = vsub.f32 %v2800_v22, %v2887_v29  ;;  %v1560_v22 = vsub.f32 %v2812_v30, %v2892_v32 }
 0x321   :  { %v1575_v43 = vadd.f32 1e-05, %v1543_v39  ;;  %v1528_v61 = vsub.f32 %v1496_v4, %v1512_v5  ;;  %v1513_v33 = vmul.f32 %v2903_v24, %v2903_v24 }
 0x322   :  { %v1626_v48 = vmul.f32 %v2897_v6, %v1603_v10  ;;  %v1457_v35 = vpop.xlane.xlu0 %1456  ;;  %v1411_v38 = vpop.xlane.xlu1 %1410 }
 0x323   :  { %v2254_v34 = vpop.eup %2253  ;;  %2259 = vrsqrt.f32 %v1575_v43  ;;  %v1544_v11 = vmax.f32 %v1528_v61, 0.0  ;;  %v1497_v20 = vmul.f32 0.015625, %v1457_v35  ;;  %v2916_v40 = vmul.f32 0.015625, %v1411_v38 }
 0x324   :  { %v1649_v31 = vadd.f32 %v2909_v16, %v1626_v48  ;;  %v1604_v19 = vmul.f32 %v2254_v34, %v1556_v7 }
 0x325   :  { %v1576_v27 = vadd.f32 1e-05, %v1544_v11  ;;  %v1529_v46 = vsub.f32 %v1497_v20, %v1513_v33  ;;  %v1514_v25 = vmul.f32 %v2916_v40, %v2916_v40 }
 0x326   :  { %v1874_v28 = vpack.c.bf16 %v1649_v31, %v1648_v23  ;;  %v1413_v44 = vpop.xlane.xlu0 %1412  ;;  %v1459_v50 = vpop.xlane.xlu1 %1458  ;;  %v1627_v57 = vmul.f32 %v2897_v6, %v1604_v19 }
 0x327   :  { %v2256_v54 = vpop.eup %2255  ;;  %2261 = vrsqrt.f32 %v1576_v27  ;;  %v1545_v56 = vmax.f32 %v1529_v46, 0.0  ;;  %v2924_v41 = vmul.f32 0.015625, %v1413_v44  ;;  %v1498_v37 = vmul.f32 0.015625, %v1459_v50 }
 0x328   :  { %1875 = vst [vmem:[%s3027_s9] sm:$0xff] %v1874_v28   ;;  %v1605_v45 = vmul.f32 %v2256_v54, %v1557_v52  ;;  %v1650_v18 = vadd.f32 %v2909_v16, %v1627_v57 }
 0x329   :  { %v1577_v62 = vadd.f32 1e-05, %v1545_v56  ;;  %v1530_v21 = vsub.f32 %v1498_v37, %v1514_v25  ;;  %v1515_v3 = vmul.f32 %v2924_v41, %v2924_v41  ;;  %v1561_v56 = vsub.f32 %v2817_v15, %v2903_v24 }
 0x32a   :  { %v1628_v36 = vmul.f32 %v2897_v6, %v1605_v45  ;;  %v1461_v0 = vpop.xlane.xlu0 %1460  ;;  %v1415_v51 = vpop.xlane.xlu1 %1414  ;;  %v1562_v15 = vsub.f32 %v2823_v26, %v2916_v40 }
 0x32b   :  { %2263 = vrsqrt.f32 %v1577_v62  ;;  %v1546_v55 = vmax.f32 %v1530_v21, 0.0  ;;  %v1499_v13 = vmul.f32 0.015625, %v1461_v0  ;;  %v2937_v14 = vmul.f32 0.015625, %v1415_v51 }
 0x32c   :  { %v2258_v59 = vpop.eup %2257  ;;  %v1651_v5 = vadd.f32 %v2909_v16, %v1628_v36 }
 0x32d   :  { %v1606_v17 = vmul.f32 %v2258_v59, %v1558_v63  ;;  %v1578_v8 = vadd.f32 1e-05, %v1546_v55  ;;  %v1531_v39 = vsub.f32 %v1499_v13, %v1515_v3  ;;  %v1516_v48 = vmul.f32 %v2937_v14, %v2937_v14 }
 0x32e   :  { %v1879_v4 = vpack.c.bf16 %v1651_v5, %v1650_v18  ;;  %v1417_v12 = vpop.xlane.xlu0 %1416  ;;  %v1463_v47 = vpop.xlane.xlu1 %1462 }
 0x32f   :  { %2265 = vrsqrt.f32 %v1578_v8  ;;  %v1547_v10 = vmax.f32 %v1531_v39, 0.0  ;;  %v2941_v43 = vmul.f32 0.015625, %v1417_v12  ;;  %v1500_v7 = vmul.f32 0.015625, %v1463_v47 }
 0x330   :  { %v2260_v61 = vpop.eup %2259  ;;  %1911 = vst [vmem:[%s3027_s9 + $0x8] sm:$0xff] %v1879_v4   ;;  %v1629_v33 = vmul.f32 %v2897_v6, %v1606_v17 }
 0x331   :  { %v1607_v35 = vmul.f32 %v2260_v61, %v1559_v9  ;;  %v1579_v38 = vadd.f32 1e-05, %v1547_v10  ;;  %v1532_v29 = vsub.f32 %v1500_v7, %v1516_v48  ;;  %v1517_v23 = vmul.f32 %v2941_v43, %v2941_v43 }
 0x332   :  { %v1465_v34 = vpop.xlane.xlu0 %1464  ;;  %v1419_v11 = vpop.xlane.xlu1 %1418  ;;  %v1652_v28 = vadd.f32 %v2909_v16, %v1629_v33  ;;  %v1563_v10 = vsub.f32 %v2829_v42, %v2924_v41 }
 0x333   :  { %v1630_v20 = vmul.f32 %v2897_v6, %v1607_v35  ;;  %2267 = vrsqrt.f32 %v1579_v38  ;;  %v1501_v31 = vmul.f32 0.015625, %v1465_v34  ;;  %v1548_v27 = vmax.f32 %v1532_v29, 0.0 }
 0x334   :  { %v2262_v19 = vpop.eup %2261  ;;  %v2954_v46 = vmul.f32 0.015625, %v1419_v11 }
 0x335   :  { %v1653_v52 = vadd.f32 %v2909_v16, %v1630_v20  ;;  %v1608_v25 = vmul.f32 %v2262_v19, %v1560_v22  ;;  %v1533_v30 = vsub.f32 %v1501_v31, %v1517_v23  ;;  %v1580_v32 = vadd.f32 1e-05, %v1548_v27 }
 0x336   :  { %v1421_v44 = vpop.xlane.xlu0 %1420  ;;  %v1467_v50 = vpop.xlane.xlu1 %1466  ;;  %v1518_v62 = vmul.f32 %v2954_v46, %v2954_v46  ;;  %v1564_v23 = vsub.f32 %v2835_v49, %v2937_v14 }
 0x337   :  { %v1884_v54 = vpack.c.bf16 %v1653_v52, %v1652_v28  ;;  %v1549_v37 = vmax.f32 %v1533_v30, 0.0  ;;  %v2960_v57 = vmul.f32 0.015625, %v1421_v44  ;;  %2269 = vrsqrt.f32 %v1580_v32 }
 0x338   :  { %v2264_v45 = vpop.eup %2263  ;;  %v1502_v21 = vmul.f32 0.015625, %v1467_v50  ;;  %v1631_v36 = vmul.f32 %v2897_v6, %v1608_v25  ;;  %v1565_v44 = vsub.f32 %v2841_v53, %v2941_v43 }
 0x339   :  { %1912 = vst [vmem:[%s3027_s9 + $0x10] sm:$0xff] %v1884_v54   ;;  %v1609_v63 = vmul.f32 %v2264_v45, %v1561_v56  ;;  %v1581_v0 = vadd.f32 1e-05, %v1549_v37  ;;  %v1519_v13 = vmul.f32 %v2960_v57, %v2960_v57  ;;  %v1566_v45 = vsub.f32 %v2849_v58, %v2954_v46 }
 0x33a   :  { %v1534_v24 = vsub.f32 %v1502_v21, %v1518_v62  ;;  %v1469_v51 = vpop.xlane.xlu0 %1468  ;;  %v1423_v3 = vpop.xlane.xlu1 %1422  ;;  %v1654_v8 = vadd.f32 %v2909_v16, %v1631_v36 }
 0x33b   :  { %v1632_v55 = vmul.f32 %v2897_v6, %v1609_v63  ;;  %2271 = vrsqrt.f32 %v1581_v0  ;;  %v1503_v59 = vmul.f32 0.015625, %v1469_v51  ;;  %v1488_v17 = vmul.f32 0.015625, %v1423_v3 }
 0x33c   :  { %v2266_v18 = vpop.eup %2265  ;;  %v1550_v5 = vmax.f32 %v1534_v24, 0.0  ;;  %v1567_v63 = vsub.f32 %v2853_v60, %v2960_v57 }
 0x33d   :  { %v1655_v39 = vadd.f32 %v2909_v16, %v1632_v55  ;;  %v1610_v4 = vmul.f32 %v2266_v18, %v1562_v15  ;;  %v1535_v12 = vsub.f32 %v1503_v59, %v1519_v13  ;;  %v1520_v33 = vmul.f32 %v1488_v17, %v1488_v17 }
 0x33e   :  { %v1582_v26 = vadd.f32 1e-05, %v1550_v5  ;;  %v1425_v40 = vpop.xlane.xlu0 %1424  ;;  %v1471_v47 = vpop.xlane.xlu1 %1470  ;;  %v1568_v46 = vsub.f32 %v2861_v1, %v1488_v17 }
 0x33f   :  { %v1889_v9 = vpack.c.bf16 %v1655_v39, %v1654_v8  ;;  %v1551_v61 = vmax.f32 %v1535_v12, 0.0  ;;  %v1489_v48 = vmul.f32 0.015625, %v1425_v40  ;;  %v1504_v35 = vmul.f32 0.015625, %v1471_v47 }
 0x340   :  { %v2268_v7 = vpop.eup %2267  ;;  %2273 = vrsqrt.f32 %v1582_v26  ;;  %v1633_v38 = vmul.f32 %v2897_v6, %v1610_v4 }
 0x341   :  { %1913 = vst [vmem:[%s3027_s9 + $0x18] sm:$0xff] %v1889_v9   ;;  %v1611_v22 = vmul.f32 %v2268_v7, %v1563_v10  ;;  %v1583_v29 = vadd.f32 1e-05, %v1551_v61  ;;  %v1536_v34 = vsub.f32 %v1504_v35, %v1520_v33  ;;  %v1521_v42 = vmul.f32 %v1489_v48, %v1489_v48 }
 0x342   :  { %v1473_v11 = vpop.xlane.xlu0 %1472  ;;  %v1656_v27 = vadd.f32 %v2909_v16, %v1633_v38  ;;  %v1569_v60 = vsub.f32 %v2864_v2, %v1489_v48 }
 0x343   :  { %v1634_v20 = vmul.f32 %v2897_v6, %v1611_v22  ;;  %2275 = vrsqrt.f32 %v1583_v29  ;;  %v1505_v41 = vmul.f32 0.015625, %v1473_v11  ;;  %v1552_v31 = vmax.f32 %v1536_v34, 0.0 }
 0x344   :  { %v2270_v19 = vpop.eup %2269 }
 0x345   :  { %v1657_v28 = vadd.f32 %v2909_v16, %v1634_v20  ;;  %v1537_v52 = vsub.f32 %v1505_v41, %v1521_v42  ;;  %v1612_v25 = vmul.f32 %v2270_v19, %v1564_v23  ;;  %v1584_v30 = vadd.f32 1e-05, %v1552_v31 }
 0x347   :  { %v1894_v32 = vpack.c.bf16 %v1657_v28, %v1656_v27  ;;  %v1553_v50 = vmax.f32 %v1537_v52, 0.0  ;;  %2277 = vrsqrt.f32 %v1584_v30  ;;  %v1635_v49 = vmul.f32 %v2897_v6, %v1612_v25 }
 0x348   :  { %v2272_v54 = vpop.eup %2271 }
 0x349   :  { %1914 = vst [vmem:[%s3027_s9 + $0x20] sm:$0xff] %v1894_v32   ;;  %v1613_v14 = vmul.f32 %v2272_v54, %v1565_v44  ;;  %v1585_v56 = vadd.f32 1e-05, %v1553_v50  ;;  %v1658_v53 = vadd.f32 %v2909_v16, %v1635_v49 }
 0x34b   :  { %v1636_v37 = vmul.f32 %v2897_v6, %v1613_v14  ;;  %2279 = vrsqrt.f32 %v1585_v56 }
 0x34d   :  { %v2274_v62 = vpop.eup %2273  ;;  %v1659_v43 = vadd.f32 %v2909_v16, %v1636_v37 }
 0x34e   :  { %v1614_v21 = vmul.f32 %v2274_v62, %v1566_v45 }
 0x34f   :  { %v1899_v36 = vpack.c.bf16 %v1659_v43, %v1658_v53 }
 0x350   :  { %v2276_v0 = vpop.eup %2275  ;;  %v1637_v15 = vmul.f32 %v2897_v6, %v1614_v21 }
 0x351   :  { %1915 = vst [vmem:[%s3027_s9 + $0x28] sm:$0xff] %v1899_v36   ;;  %v1615_v24 = vmul.f32 %v2276_v0, %v1567_v63 }
 0x352   :  { %v1660_v3 = vadd.f32 %v2909_v16, %v1637_v15 }
 0x353   :  { %v1638_v58 = vmul.f32 %v2897_v6, %v1615_v24 }
 0x354   :  { %v2278_v51 = vpop.eup %2277 }
 0x355   :  { %v1661_v55 = vadd.f32 %v2909_v16, %v1638_v58  ;;  %v1616_v13 = vmul.f32 %v2278_v51, %v1568_v46 }
 0x357   :  { %v1904_v59 = vpack.c.bf16 %v1661_v55, %v1660_v3  ;;  %v1639_v18 = vmul.f32 %v2897_v6, %v1616_v13 }
 0x358   :  { %v2280_v57 = vpop.eup %2279 }
 0x359   :  { %1916 = vst [vmem:[%s3027_s9 + $0x30] sm:$0xff] %v1904_v59   ;;  %v1617_v5 = vmul.f32 %v2280_v57, %v1569_v60  ;;  %v1662_v1 = vadd.f32 %v2909_v16, %v1639_v18 }
 0x35b   :  { %v1640_v8 = vmul.f32 %v2897_v6, %v1617_v5 }
 0x35d   :  { %v1663_v17 = vadd.f32 %v2909_v16, %v1640_v8 }
 0x35f   :  { %v1909_v39 = vpack.c.bf16 %v1663_v17, %v1662_v1 }
 0x361   :  { %1917 = vst [vmem:[%s3027_s9 + $0x38] sm:$0xff] %v1909_v39  }

// kernel: mesh_autoencoder_forward.17
= control target key start
LH: loop header
LB: loop body
LE: loop exit
PB: predicated region body
PF: predicated region fallthrough
CT: control target
= control target key end

     0   :  { %v1504_v1 = vmov 0   ;;  %s2102_s1 = inlined_call_operand.vmem [shape: bf16[128,128], index: 1, kind: input, shape index: {}]   ;;  %s2103_s0 = inlined_call_operand.vmem [shape: bf16[128,128], index: 0, kind: input, shape index: {}]   ;;  %s2104_s3 = inlined_call_operand.vmem [shape: f32[128,1], index: 3, kind: input, shape index: {}]   ;;  %s2105_s5 = inlined_call_operand.vmem [shape: bf16[128,256], index: 5, kind: input, shape index: {}]   ;;  %s2106_s4 = inlined_call_operand.vmem [shape: bf16[128,256], index: 4, kind: input, shape index: {}]   ;;  %s2107_s2 = inlined_call_operand.vmem [shape: bf16[128,128], index: 2, kind: input, shape index: {}]   ;;  %s2108_s6 = inlined_call_operand.vmem [shape: f32[1,256], index: 6, kind: input, shape index: {}]   ;;  %s2109_s7 = inlined_call_operand.vmem [shape: bf16[128,256], index: 7, kind: output, shape index: {}]  }
   0x1   :  { %v1400_v0 = vld [vmem:[%s2102_s1 + $0x38] sm:$0xff]   ;;  %1398 = vset.pattern.permute.xlu0 %v1504_v1  ;;  %1399 = vset.pattern.permute.xlu1 %v1504_v1  ;;  %v1401_v2 = vld [vmem:[%s2102_s1 + $0x30] sm:$0xff]   ;;  %v1402_v3 = vld [vmem:[%s2102_s1 + $0x28] sm:$0xff]  }
   0x2   :  { %667 = vmatprep.mubr.bf16.mxu1 %v1504_v1  ;;  %1349 = vmatprep.subr.bf16.mxu0 %v1400_v0  ;;  %v1403_v4 = vld [vmem:[%s2102_s1 + $0x20] sm:$0xff]   ;;  %v1404_v6 = vld [vmem:[%s2102_s1 + $0x18] sm:$0xff]   ;;  %v1405_v7 = vld [vmem:[%s2102_s1 + $0x10] sm:$0xff]  }
   0x3   :  { %1350 = vmatpush3.bf16.msra.mxu0 %v1400_v0  ;;  %v1408_v5 = vld [vmem:[%s2103_s0] sm:$0xff]   ;;  %v341_v9 = vld [vmem:[%s2104_s3 + $0x10] sm:$0xff]  ;;  %v340_v10 = vld [vmem:[%s2104_s3 + $0x8] sm:$0xff] }
   0x4   :  { %1351 = vmatprep.subr.bf16.mxu0 %v1401_v2  ;;  %1365 = vmatprep.mubr.bf16.mxu0 %v1408_v5  ;;  %v339_v8 = vld [vmem:[%s2104_s3] sm:$0xff]  ;;  %v342_v11 = vld [vmem:[%s2104_s3 + $0x18] sm:$0xff]  ;;  %v1406_v12 = vld [vmem:[%s2102_s1 + $0x8] sm:$0xff]  }
   0x5   :  { %357 = vperm.xlu0 %1398, %v339_v8   ;;  %367 = vperm.xlu1 %1399, %v341_v9   ;;  %v343_v13 = vld [vmem:[%s2104_s3 + $0x20] sm:$0xff]  ;;  %v344_v14 = vld [vmem:[%s2104_s3 + $0x28] sm:$0xff]  ;;  %v1416_v15 = vld [vmem:[%s2105_s5 + $0x74] ss:$8 sps:$4 sm:$0xff]  }
   0x6   :  { %v1418_v16 = vld [vmem:[%s2105_s5 + $0x70] ss:$8 sps:$4 sm:$0xff]   ;;  %v1419_v17 = vld [vmem:[%s2105_s5 + $0x64] ss:$8 sps:$4 sm:$0xff]   ;;  %635 = vmatprep.subr.bf16.mxu1 %v1416_v15  ;;  %v1421_v21 = vld [vmem:[%s2105_s5 + $0x60] ss:$8 sps:$4 sm:$0xff]  }
   0x7   :  { %1352 = vmatpush3.bf16.msra.mxu0 %v1401_v2  ;;  %v1407_v18 = vld [vmem:[%s2102_s1] sm:$0xff]   ;;  %v345_v19 = vld [vmem:[%s2104_s3 + $0x30] sm:$0xff]  ;;  %v346_v20 = vld [vmem:[%s2104_s3 + $0x38] sm:$0xff]  ;;  %636 = vmatpush1.bf16.msra.mxu1 %v1418_v16 }
   0x8   :  { %1353 = vmatprep.subr.bf16.mxu0 %v1402_v3  ;;  %637 = vmatprep.subr.bf16.mxu1 %v1419_v17  ;;  %v1422_v22 = vld [vmem:[%s2105_s5 + $0x54] ss:$8 sps:$4 sm:$0xff]   ;;  %v1409_v23 = vld [vmem:[%s2103_s0 + $0x8] sm:$0xff]   ;;  %v347_v24 = vld [vmem:[%s2104_s3 + $0x40] sm:$0xff] }
   0x9   :  { %362 = vperm.xlu0 %1398, %v340_v10   ;;  %372 = vperm.xlu1 %1399, %v342_v11   ;;  %v348_v25 = vld [vmem:[%s2104_s3 + $0x48] sm:$0xff]  ;;  %v1424_v26 = vld [vmem:[%s2105_s5 + $0x50] ss:$8 sps:$4 sm:$0xff]   ;;  %v351_v29 = vld [vmem:[%s2104_s3 + $0x60] sm:$0xff] }
   0xa   :  { %v1410_v27 = vld [vmem:[%s2103_s0 + $0x10] sm:$0xff]   ;;  %v1425_v28 = vld [vmem:[%s2105_s5 + $0x44] ss:$8 sps:$4 sm:$0xff]   ;;  %v1427_v31 = vld [vmem:[%s2105_s5 + $0x40] ss:$8 sps:$4 sm:$0xff]  }
   0xb   :  { %1354 = vmatpush3.bf16.msra.mxu0 %v1402_v3  ;;  %638 = vmatpush1.bf16.msra.mxu1 %v1421_v21  ;;  %v352_v30 = vld [vmem:[%s2104_s3 + $0x68] sm:$0xff]  ;;  %v1644_v32 = vld [vmem:[%s2106_s4 + $0x70] ss:$8 sps:$4 sm:$0xff]   ;;  %v1443_v33 = vld [vmem:[%s2106_s4 + $0x74] ss:$8 sps:$4 sm:$0xff]  }
   0xc   :  { %1355 = vmatprep.subr.bf16.mxu0 %v1403_v4  ;;  %639 = vmatprep.subr.bf16.mxu1 %v1422_v22  ;;  %v1428_v34 = vld [vmem:[%s2105_s5 + $0x34] ss:$8 sps:$4 sm:$0xff]   ;;  %v1447_v36 = vld [vmem:[%s2106_s4 + $0x64] ss:$8 sps:$4 sm:$0xff]   ;;  %v1430_v40 = vld [vmem:[%s2105_s5 + $0x30] ss:$8 sps:$4 sm:$0xff]  }
   0xd   :  { %377 = vperm.xlu0 %1398, %v343_v13   ;;  %382 = vperm.xlu1 %1399, %v344_v14   ;;  %v1411_v35 = vld [vmem:[%s2103_s0 + $0x18] sm:$0xff]   ;;  %v1412_v37 = vld [vmem:[%s2103_s0 + $0x20] sm:$0xff]   ;;  %v349_v38 = vld [vmem:[%s2104_s3 + $0x50] sm:$0xff] }
   0xe   :  { %v350_v39 = vld [vmem:[%s2104_s3 + $0x58] sm:$0xff]  ;;  %v1431_v41 = vld [vmem:[%s2105_s5 + $0x24] ss:$8 sps:$4 sm:$0xff]   ;;  %v353_v42 = vld [vmem:[%s2104_s3 + $0x70] sm:$0xff] }
   0xf   :  { %1356 = vmatpush3.bf16.msra.mxu0 %v1403_v4  ;;  %640 = vmatpush1.bf16.msra.mxu1 %v1424_v26  ;;  %v354_v43 = vld [vmem:[%s2104_s3 + $0x78] sm:$0xff]  ;;  %v1445_v44 = vld [vmem:[%s2106_s4 + $0x60] ss:$8 sps:$4 sm:$0xff]   ;;  %v1454_v49 = vld [vmem:[%s2106_s4 + $0x44] ss:$8 sps:$4 sm:$0xff]  }
  0x10   :  { %1357 = vmatprep.subr.bf16.mxu0 %v1404_v6  ;;  %641 = vmatprep.subr.bf16.mxu1 %v1425_v28  ;;  %v1433_v45 = vld [vmem:[%s2105_s5 + $0x20] ss:$8 sps:$4 sm:$0xff]   ;;  %v1434_v46 = vld [vmem:[%s2105_s5 + $0x14] ss:$8 sps:$4 sm:$0xff]   ;;  %v1448_v48 = vld [vmem:[%s2106_s4 + $0x50] ss:$8 sps:$4 sm:$0xff]  }
  0x11   :  { %387 = vperm.xlu0 %1398, %v345_v19   ;;  %392 = vperm.xlu1 %1399, %v346_v20   ;;  %v1450_v47 = vld [vmem:[%s2106_s4 + $0x54] ss:$8 sps:$4 sm:$0xff]   ;;  %v1413_v50 = vld [vmem:[%s2103_s0 + $0x28] sm:$0xff]   ;;  %v1436_v51 = vld [vmem:[%s2105_s5 + $0x10] ss:$8 sps:$4 sm:$0xff]  }
  0x12   :  { %v1414_v52 = vld [vmem:[%s2103_s0 + $0x30] sm:$0xff]   ;;  %v1437_v53 = vld [vmem:[%s2105_s5 + $0x4] ss:$8 sps:$4 sm:$0xff]   ;;  %v1452_v54 = vld [vmem:[%s2106_s4 + $0x40] ss:$8 sps:$4 sm:$0xff]  }
  0x13   :  { %1358 = vmatpush3.bf16.msra.mxu0 %v1404_v6  ;;  %642 = vmatpush1.bf16.msra.mxu1 %v1427_v31  ;;  %v1457_v55 = vld [vmem:[%s2106_s4 + $0x34] ss:$8 sps:$4 sm:$0xff]   ;;  %v1439_v56 = vld [vmem:[%s2105_s5] ss:$8 sps:$4 sm:$0xff]   ;;  %v1455_v57 = vld [vmem:[%s2106_s4 + $0x30] ss:$8 sps:$4 sm:$0xff]  }
  0x14   :  { %1359 = vmatprep.subr.bf16.mxu0 %v1405_v7  ;;  %643 = vmatprep.subr.bf16.mxu1 %v1428_v34  ;;  %v1440_v58 = vld [vmem:[%s2107_s2] sm:$0xff]   ;;  %v1415_v60 = vld [vmem:[%s2103_s0 + $0x38] sm:$0xff]   ;;  %v1444_v62 = vld [vmem:[%s2107_s2 + $0x8] sm:$0xff]  }
  0x15   :  { %397 = vperm.xlu0 %1398, %v347_v24   ;;  %402 = vperm.xlu1 %1399, %v348_v25   ;;  %v1461_v59 = vld [vmem:[%s2106_s4 + $0x24] ss:$8 sps:$4 sm:$0xff]   ;;  %v1459_v61 = vld [vmem:[%s2106_s4 + $0x20] ss:$8 sps:$4 sm:$0xff]   ;;  %v1451_v63 = vld [vmem:[%s2107_s2 + $0x10] sm:$0xff]  }
  0x16   :  { %v1458_v0 = vld [vmem:[%s2107_s2 + $0x18] sm:$0xff]   ;;  %v1465_v3 = vld [vmem:[%s2107_s2 + $0x20] sm:$0xff]   ;;  %v1470_v8 = vld [vmem:[%s2107_s2 + $0x30] sm:$0xff]  }
  0x17   :  { %1360 = vmatpush3.bf16.msra.mxu0 %v1405_v7  ;;  %644 = vmatpush1.bf16.msra.mxu1 %v1430_v40  ;;  %v1464_v2 = vld [vmem:[%s2106_s4 + $0x14] ss:$8 sps:$4 sm:$0xff]   ;;  %v1462_v4 = vld [vmem:[%s2106_s4 + $0x10] ss:$8 sps:$4 sm:$0xff]   ;;  %v1468_v5 = vld [vmem:[%s2106_s4 + $0x4] ss:$8 sps:$4 sm:$0xff]  }
  0x18   :  { %1361 = vmatprep.subr.bf16.mxu0 %v1406_v12  ;;  %645 = vmatprep.subr.bf16.mxu1 %v1431_v41  ;;  %v1466_v6 = vld [vmem:[%s2106_s4] ss:$8 sps:$4 sm:$0xff]   ;;  %v1471_v9 = vld [vmem:[%s2107_s2 + $0x38] sm:$0xff]  }
  0x19   :  { %417 = vperm.xlu0 %1398, %v351_v29   ;;  %422 = vperm.xlu1 %1399, %v352_v30   ;;  %v1469_v7 = vld [vmem:[%s2107_s2 + $0x28] sm:$0xff]  }
  0x1b   :  { %1362 = vmatpush3.bf16.msra.mxu0 %v1406_v12  ;;  %646 = vmatpush1.bf16.msra.mxu1 %v1433_v45 }
  0x1c   :  { %1363 = vmatprep.subr.bf16.mxu0 %v1407_v18  ;;  %647 = vmatprep.subr.bf16.mxu1 %v1434_v46 }
  0x1d   :  { %407 = vperm.xlu0 %1398, %v349_v38   ;;  %412 = vperm.xlu1 %1399, %v350_v39  }
  0x1f   :  { %1364 = vmatpush3.bf16.msra.mxu0 %v1407_v18  ;;  %648 = vmatpush1.bf16.msra.mxu1 %v1436_v51 }
  0x20   :  { %828 = vmatprep.subr.bf16.mxu0 %v1443_v33  ;;  %649 = vmatprep.subr.bf16.mxu1 %v1437_v53 }
  0x21   :  { %427 = vperm.xlu0 %1398, %v353_v42   ;;  %432 = vperm.xlu1 %1399, %v354_v43  }
  0x22   :  { %1366 = vmatmul.mubr.bf16.vlgmr.msra.gmra.mxu0 %v1409_v23 }
  0x23   :  { %1369 = vmatprep.mubr.bf16.mxu0 %v1410_v27  ;;  %829 = vmatpush1.bf16.msra.mxu0 %v1644_v32 }
  0x24   :  { %830 = vmatprep.subr.bf16.mxu0 %v1447_v36  ;;  %650 = vmatpush1.bf16.msra.mxu1 %v1439_v56 }
  0x25   :  { %1381 = vmatprep.subr.bf16.mxu1 %v1443_v33 }
  0x27   :  { %831 = vmatpush1.bf16.msra.mxu0 %v1445_v44  ;;  %668 = vmatmul.mubr.bf16.vlgmr.msra.gmra.mxu1 %v1440_v58 }
  0x28   :  { %832 = vmatprep.subr.bf16.mxu0 %v1450_v47  ;;  %677 = vmatprep.mubr.bf16.mxu1 %v1504_v1 }
  0x29   :  { %1389 = vmatpush1.bf16.msra.mxu1 %v1644_v32 }
  0x2a   :  { %1370 = vmatmul.mubr.bf16.gmra.mxu0 %v1411_v35  ;;  %1382 = vmatprep.subr.bf16.mxu1 %v1447_v36 }
  0x2b   :  { %1373 = vmatprep.mubr.bf16.mxu0 %v1412_v37  ;;  %833 = vmatpush1.bf16.msra.mxu0 %v1448_v48 }
  0x2c   :  { %834 = vmatprep.subr.bf16.mxu0 %v1454_v49 }
  0x2d   :  { %1390 = vmatpush1.bf16.msra.mxu1 %v1445_v44 }
  0x2e   :  { %1383 = vmatprep.subr.bf16.mxu1 %v1450_v47 }
  0x2f   :  { %835 = vmatpush1.bf16.msra.mxu0 %v1452_v54  ;;  %678 = vmatmul.mubr.bf16.gmra.mxu1 %v1444_v62 }
  0x30   :  { %836 = vmatprep.subr.bf16.mxu0 %v1457_v55  ;;  %687 = vmatprep.mubr.bf16.mxu1 %v1504_v1 }
  0x31   :  { %1391 = vmatpush1.bf16.msra.mxu1 %v1448_v48 }
  0x32   :  { %1374 = vmatmul.mubr.bf16.gmra.mxu0 %v1413_v50  ;;  %1384 = vmatprep.subr.bf16.mxu1 %v1454_v49 }
  0x33   :  { %1377 = vmatprep.mubr.bf16.mxu0 %v1414_v52  ;;  %837 = vmatpush1.bf16.msra.mxu0 %v1455_v57 }
  0x34   :  { %838 = vmatprep.subr.bf16.mxu0 %v1461_v59 }
  0x35   :  { %1392 = vmatpush1.bf16.msra.mxu1 %v1452_v54 }
  0x36   :  { %1385 = vmatprep.subr.bf16.mxu1 %v1457_v55 }
  0x37   :  { %839 = vmatpush1.bf16.msra.mxu0 %v1459_v61  ;;  %688 = vmatmul.mubr.bf16.gmra.mxu1 %v1451_v63 }
  0x38   :  { %697 = vmatprep.mubr.bf16.mxu1 %v1504_v1  ;;  %840 = vmatprep.subr.bf16.mxu0 %v1464_v2 }
  0x39   :  { %1393 = vmatpush1.bf16.msra.mxu1 %v1455_v57 }
  0x3a   :  { %1378 = vmatmul.mubr.bf16.gmra.mxu0 %v1415_v60  ;;  %1386 = vmatprep.subr.bf16.mxu1 %v1461_v59 }
  0x3b   :  { %860 = vmatprep.mubr.bf16.mxu0 %v1504_v1  ;;  %841 = vmatpush1.bf16.msra.mxu0 %v1462_v4 }
  0x3c   :  { %842 = vmatprep.subr.bf16.mxu0 %v1468_v5 }
  0x3d   :  { %1394 = vmatpush1.bf16.msra.mxu1 %v1459_v61 }
  0x3e   :  { %1387 = vmatprep.subr.bf16.mxu1 %v1464_v2 }
  0x3f   :  { %698 = vmatmul.mubr.bf16.gmra.mxu1 %v1458_v0  ;;  %843 = vmatpush1.bf16.msra.mxu0 %v1466_v6 }
  0x40   :  { %707 = vmatprep.mubr.bf16.mxu1 %v1504_v1 }
  0x41   :  { %1395 = vmatpush1.bf16.msra.mxu1 %v1462_v4 }
  0x42   :  { %1388 = vmatprep.subr.bf16.mxu1 %v1468_v5 }
  0x45   :  { %1396 = vmatpush1.bf16.msra.mxu1 %v1466_v6 }
  0x47   :  { %708 = vmatmul.mubr.bf16.gmra.mxu1 %v1465_v3 }
  0x48   :  { %717 = vmatprep.mubr.bf16.mxu1 %v1504_v1 }
  0x4f   :  { %718 = vmatmul.mubr.bf16.gmra.mxu1 %v1469_v7 }
  0x50   :  { %727 = vmatprep.mubr.bf16.mxu1 %v1504_v1 }
  0x57   :  { %728 = vmatmul.mubr.bf16.gmra.mxu1 %v1470_v8 }
  0x58   :  { %737 = vmatprep.mubr.bf16.mxu1 %v1504_v1 }
  0x5f   :  { %738 = vmatmul.mubr.bf16.gmra.mxu1 %v1471_v9 }
  0x60   :  { %920 = vmatprep.mubr.bf16.mxu1 %v1504_v1 }
  0x80   :  { %v368_v10 = vpop.permute.xlu1 %367  ;;  %v358_v11 = vpop.permute.xlu0 %357 }
  0x84   :  { %v373_v12 = vpop.permute.xlu1 %372  ;;  %v363_v14 = vpop.permute.xlu0 %362 }
  0x88   :  { %v383_v17 = vpop.permute.xlu1 %382  ;;  %v378_v21 = vpop.permute.xlu0 %377 }
  0x8c   :  { %v393_v25 = vpop.permute.xlu1 %392  ;;  %v388_v28 = vpop.permute.xlu0 %387 }
  0x90   :  { %v403_v33 = vpop.permute.xlu1 %402  ;;  %v398_v35 = vpop.permute.xlu0 %397 }
  0x94   :  { %v423_v40 = vpop.permute.xlu1 %422  ;;  %v418_v43 = vpop.permute.xlu0 %417 }
  0x98   :  { %v413_v47 = vpop.permute.xlu1 %412  ;;  %v408_v52 = vpop.permute.xlu0 %407 }
  0x9c   :  { %v433_v55 = vpop.permute.xlu1 %432  ;;  %v428_v58 = vpop.permute.xlu0 %427 }
  0xe2   :  { %v1367_v13 = vpop.f32.mrf.mxu0 }
  0xe3   :  { %v437_v30 = vmul.f32 %v1367_v13, %v368_v10 }
  0xe4   :  { %v225_v15 = vpop.f32.mrf.mxu0 }
  0xe5   :  { %v435_v19 = vmul.f32 %v358_v11, %v225_v15 }
  0xe6   :  { %v1368_v16 = vpop.f32.mrf.mxu0 }
  0xe7   :  { %v438_v27 = vmul.f32 %v1368_v16, %v373_v12  ;;  %v669_v3 = vpop.f32.mrf.mxu1 }
  0xe8   :  { %v228_v18 = vpop.f32.mrf.mxu0 }
  0xe9   :  { %v436_v20 = vmul.f32 %v363_v14, %v228_v18  ;;  %v452_v32 = vpack.c.bf16 %v438_v27, %v437_v30  ;;  %v671_v4 = vpop.f32.mrf.mxu1  ;;  %v941_v30 = vld [vmem:[%s2108_s6] sm:$0x3] }
  0xea   :  { %v1371_v22 = vpop.f32.mrf.mxu0 }
  0xeb   :  { %v451_v23 = vpack.c.bf16 %v436_v20, %v435_v19  ;;  %v441_v49 = vmul.f32 %v1371_v22, %v388_v28  ;;  %v673_v5 = vpop.f32.mrf.mxu1 }
  0xec   :  { %v241_v24 = vpop.f32.mrf.mxu0 }
  0xed   :  { %861 = vmatmul.mubr.bf16.vlgmr.msra.gmra.mxu0 %v451_v23  ;;  %v439_v39 = vmul.f32 %v378_v21, %v241_v24  ;;  %v675_v6 = vpop.f32.mrf.mxu1 }
  0xee   :  { %v1372_v26 = vpop.f32.mrf.mxu0  ;;  %870 = vmatprep.mubr.bf16.mxu0 %v1504_v1 }
  0xef   :  { %v442_v46 = vmul.f32 %v1372_v26, %v393_v25  ;;  %v679_v7 = vpop.f32.mrf.mxu1  ;;  %v943_v25 = vlaneseq }
  0xf0   :  { %v244_v29 = vpop.f32.mrf.mxu0 }
  0xf1   :  { %v440_v37 = vmul.f32 %v383_v17, %v244_v29  ;;  %v454_v53 = vpack.c.bf16 %v442_v46, %v441_v49  ;;  %v681_v8 = vpop.f32.mrf.mxu1  ;;  %v944_v27 = vshrl.u32 %v943_v25, 7 }
  0xf2   :  { %v1375_v31 = vpop.f32.mrf.mxu0 }
  0xf3   :  { %v453_v42 = vpack.c.bf16 %v440_v37, %v439_v39  ;;  %v445_v0 = vmul.f32 %v1375_v31, %v408_v52  ;;  %v683_v9 = vpop.f32.mrf.mxu1  ;;  %v945_v29 = vsub.s32 0, %v944_v27 }
  0xf4   :  { %v257_v34 = vpop.f32.mrf.mxu0 }
  0xf5   :  { %871 = vmatmul.mubr.bf16.gmra.mxu0 %v452_v32  ;;  %v443_v59 = vmul.f32 %v398_v35, %v257_v34  ;;  %v685_v10 = vpop.f32.mrf.mxu1  ;;  %v949_v32 = vsub.s32 1, %v944_v27 }
  0xf6   :  { %v1376_v36 = vpop.f32.mrf.mxu0  ;;  %880 = vmatprep.mubr.bf16.mxu0 %v1504_v1 }
  0xf7   :  { %v446_v63 = vmul.f32 %v1376_v36, %v413_v47  ;;  %v1783_v11 = vpop.f32.mrf.mxu1  ;;  %v1826_v37 = vrot.slane %v941_v30, %v949_v32 }
  0xf8   :  { %v260_v38 = vpop.f32.mrf.mxu0 }
  0xf9   :  { %v444_v56 = vmul.f32 %v403_v33, %v260_v38  ;;  %v456_v2 = vpack.c.bf16 %v446_v63, %v445_v0  ;;  %v1785_v12 = vpop.f32.mrf.mxu1  ;;  %v1822_v33 = vrot.slane %v941_v30, %v945_v29 }
  0xfa   :  { %v1379_v41 = vpop.f32.mrf.mxu0 }
  0xfb   :  { %v449_v60 = vmul.f32 %v1379_v41, %v428_v58  ;;  %v455_v61 = vpack.c.bf16 %v444_v56, %v443_v59  ;;  %v1787_v13 = vpop.f32.mrf.mxu1 }
  0xfc   :  { %v273_v44 = vpop.f32.mrf.mxu0 }
  0xfd   :  { %881 = vmatmul.mubr.bf16.gmra.mxu0 %v453_v42  ;;  %v447_v50 = vmul.f32 %v418_v43, %v273_v44  ;;  %v1789_v14 = vpop.f32.mrf.mxu1 }
  0xfe   :  { %v1380_v45 = vpop.f32.mrf.mxu0  ;;  %890 = vmatprep.mubr.bf16.mxu0 %v1504_v1 }
  0xff   :  { %v450_v57 = vmul.f32 %v1380_v45, %v433_v55 }
 0x100   :  { %v276_v48 = vpop.f32.mrf.mxu0 }
 0x101   :  { %v448_v51 = vmul.f32 %v423_v40, %v276_v48  ;;  %v458_v62 = vpack.c.bf16 %v450_v57, %v449_v60 }
 0x103   :  { %v457_v54 = vpack.c.bf16 %v448_v51, %v447_v50 }
 0x105   :  { %891 = vmatmul.mubr.bf16.gmra.mxu0 %v454_v53  ;;  %921 = vmatmul.mubr.bf16.vlgmr.msra.gmra.mxu1 %v457_v54 }
 0x106   :  { %900 = vmatprep.mubr.bf16.mxu0 %v1504_v1  ;;  %930 = vmatprep.mubr.bf16.mxu1 %v1504_v1 }
 0x10d   :  { %901 = vmatmul.mubr.bf16.gmra.mxu0 %v455_v61  ;;  %931 = vmatmul.mubr.bf16.gmra.mxu1 %v458_v62 }
 0x10e   :  { %910 = vmatprep.mubr.bf16.mxu0 %v1504_v1  ;;  %v1791_v1 = vpop.f32.mrf.mxu1 }
 0x110   :  { %v1793_v15 = vpop.f32.mrf.mxu1 }
 0x112   :  { %v1795_v16 = vpop.f32.mrf.mxu1 }
 0x114   :  { %v1797_v17 = vpop.f32.mrf.mxu1 }
 0x115   :  { %911 = vmatmul.mubr.bf16.gmra.mxu0 %v456_v2 }
 0x116   :  { %v1799_v18 = vpop.f32.mrf.mxu1 }
 0x118   :  { %v1801_v19 = vpop.f32.mrf.mxu1 }
 0x11a   :  { %v1803_v20 = vpop.f32.mrf.mxu1 }
 0x11c   :  { %v1805_v21 = vpop.f32.mrf.mxu1 }
 0x11e   :  { %v1807_v22 = vpop.f32.mrf.mxu1 }
 0x120   :  { %v1809_v23 = vpop.f32.mrf.mxu1 }
 0x122   :  { %v1811_v24 = vpop.f32.mrf.mxu1 }
 0x124   :  { %v1813_v26 = vpop.f32.mrf.mxu1 }
 0x126   :  { %v1815_v28 = vpop.f32.mrf.mxu1 }
 0x128   :  { %v1820_v31 = vpop.f32.mrf.mxu1 }
 0x12a   :  { %v1824_v35 = vpop.f32.mrf.mxu1 }
 0x12c   :  { %v1831_v42 = vpop.f32.mrf.mxu1 }
 0x12e   :  { %v1843_v51 = vpop.f32.mrf.mxu1 }
 0x130   :  { %v1855_v61 = vpop.f32.mrf.mxu1 }
 0x1ad   :  { %v862_v34 = vpop.f32.mrf.mxu0 }
 0x1ae   :  { %v863_v36 = vadd.f32 %v862_v34, %v669_v3 }
 0x1af   :  { %v864_v38 = vpop.f32.mrf.mxu0 }
 0x1b0   :  { %v1829_v39 = vadd.f32 %v1822_v33, %v863_v36  ;;  %v865_v40 = vadd.f32 %v864_v38, %v671_v4 }
 0x1b1   :  { %v866_v41 = vpop.f32.mrf.mxu0 }
 0x1b2   :  { %v1834_v43 = vadd.f32 %v1826_v37, %v865_v40  ;;  %v867_v44 = vadd.f32 %v866_v41, %v673_v5  ;;  %v985_v48 = vmul.f32 %v1829_v39, %v1829_v39 }
 0x1b3   :  { %v868_v45 = vpop.f32.mrf.mxu0 }
 0x1b4   :  { %v1837_v46 = vadd.f32 %v1822_v33, %v867_v44  ;;  %v869_v47 = vadd.f32 %v868_v45, %v675_v6  ;;  %v986_v49 = vmul.f32 %v1834_v43, %v1834_v43 }
 0x1b5   :  { %v872_v50 = vpop.f32.mrf.mxu0 }
 0x1b6   :  { %v1846_v52 = vadd.f32 %v1826_v37, %v869_v47  ;;  %v873_v53 = vadd.f32 %v872_v50, %v679_v7  ;;  %v1017_v54 = vadd.f32 %v986_v49, %v985_v48  ;;  %v987_v58 = vmul.f32 %v1837_v46, %v1837_v46 }
 0x1b7   :  { %v874_v55 = vpop.f32.mrf.mxu0 }
 0x1b8   :  { %v1849_v56 = vadd.f32 %v1822_v33, %v873_v53  ;;  %v875_v57 = vadd.f32 %v874_v55, %v681_v8  ;;  %1018 = vadd.xlane.f32.xlu0 %v1017_v54  ;;  %v988_v59 = vmul.f32 %v1846_v52, %v1846_v52  ;;  %v1867_v8 = vpop.f32.mrf.mxu1 }
 0x1b9   :  { %v876_v60 = vpop.f32.mrf.mxu0 }
 0x1ba   :  { %v1858_v62 = vadd.f32 %v1826_v37, %v875_v57  ;;  %v877_v63 = vadd.f32 %v876_v60, %v683_v9  ;;  %v1020_v0 = vadd.f32 %v988_v59, %v987_v58  ;;  %v989_v5 = vmul.f32 %v1849_v56, %v1849_v56  ;;  %v1881_v38 = vpop.f32.mrf.mxu1 }
 0x1bb   :  { %v878_v2 = vpop.f32.mrf.mxu0 }
 0x1bc   :  { %v1861_v3 = vadd.f32 %v1822_v33, %v877_v63  ;;  %v879_v4 = vadd.f32 %v878_v2, %v685_v10  ;;  %1021 = vadd.xlane.f32.xlu1 %v1020_v0  ;;  %v990_v6 = vmul.f32 %v1858_v62, %v1858_v62 }
 0x1bd   :  { %v882_v7 = vpop.f32.mrf.mxu0 }
 0x1be   :  { %v1870_v25 = vadd.f32 %v1826_v37, %v879_v4  ;;  %v883_v9 = vadd.f32 %v882_v7, %v1783_v11  ;;  %v1023_v27 = vadd.f32 %v990_v6, %v989_v5  ;;  %v991_v32 = vmul.f32 %v1861_v3, %v1861_v3 }
 0x1bf   :  { %v884_v29 = vpop.f32.mrf.mxu0 }
 0x1c0   :  { %v1874_v30 = vadd.f32 %v1822_v33, %v883_v9  ;;  %v885_v10 = vadd.f32 %v884_v29, %v1785_v12  ;;  %1024 = vadd.xlane.f32.xlu0 %v1023_v27  ;;  %v992_v34 = vmul.f32 %v1870_v25, %v1870_v25 }
 0x1c1   :  { %v886_v36 = vpop.f32.mrf.mxu0 }
 0x1c2   :  { %v1884_v40 = vadd.f32 %v1826_v37, %v885_v10  ;;  %v887_v11 = vadd.f32 %v886_v36, %v1787_v13  ;;  %v1026_v41 = vadd.f32 %v992_v34, %v991_v32  ;;  %v993_v12 = vmul.f32 %v1874_v30, %v1874_v30 }
 0x1c3   :  { %v888_v44 = vpop.f32.mrf.mxu0 }
 0x1c4   :  { %v889_v45 = vadd.f32 %v888_v44, %v1789_v14  ;;  %1027 = vadd.xlane.f32.xlu0 %v1026_v41  ;;  %v994_v47 = vmul.f32 %v1884_v40, %v1884_v40  ;;  %v1893_v48 = vadd.f32 %v1822_v33, %v887_v11 }
 0x1c5   :  { %v892_v49 = vpop.f32.mrf.mxu0  ;;  %v922_v50 = vpop.f32.mrf.mxu1 }
 0x1c6   :  { %v1896_v53 = vadd.f32 %v1826_v37, %v889_v45  ;;  %v893_v13 = vadd.f32 %v892_v49, %v1791_v1  ;;  %v1029_v54 = vadd.f32 %v994_v47, %v993_v12  ;;  %v923_v60 = vadd.f32 %v922_v50, %v1815_v28 }
 0x1c7   :  { %v894_v55 = vpop.f32.mrf.mxu0  ;;  %v924_v14 = vpop.f32.mrf.mxu1  ;;  %v995_v2 = vmul.f32 %v1893_v48, %v1893_v48 }
 0x1c8   :  { %v895_v57 = vadd.f32 %v894_v55, %v1793_v15  ;;  %v925_v58 = vadd.f32 %v924_v14, %v1820_v31  ;;  %1030 = vadd.xlane.f32.xlu1 %v1029_v54  ;;  %v1902_v59 = vadd.f32 %v1822_v33, %v893_v13  ;;  %v996_v1 = vmul.f32 %v1896_v53, %v1896_v53 }
 0x1c9   :  { %v896_v63 = vpop.f32.mrf.mxu0  ;;  %v926_v0 = vpop.f32.mrf.mxu1  ;;  %v1920_v29 = vadd.f32 %v1822_v33, %v923_v60 }
 0x1ca   :  { %v1910_v4 = vadd.f32 %v1826_v37, %v895_v57  ;;  %v897_v15 = vadd.f32 %v896_v63, %v1795_v16  ;;  %v1914_v31 = vadd.f32 %v1826_v37, %v925_v58  ;;  %v1032_v7 = vadd.f32 %v996_v1, %v995_v2 }
 0x1cb   :  { %v898_v5 = vpop.f32.mrf.mxu0  ;;  %v928_v6 = vpop.f32.mrf.mxu1  ;;  %v927_v28 = vadd.f32 %v926_v0, %v1824_v35  ;;  %v997_v34 = vmul.f32 %v1902_v59, %v1902_v59  ;;  %v1009_v54 = vmul.f32 %v1920_v29, %v1920_v29 }
 0x1cc   :  { %v899_v9 = vadd.f32 %v898_v5, %v1797_v17  ;;  %v929_v27 = vadd.f32 %v928_v6, %v1831_v42  ;;  %v1923_v10 = vadd.f32 %v1822_v33, %v897_v15  ;;  %1033 = vadd.xlane.f32.xlu0 %v1032_v7  ;;  %v998_v36 = vmul.f32 %v1910_v4, %v1910_v4 }
 0x1cd   :  { %v902_v16 = vpop.f32.mrf.mxu0  ;;  %v932_v32 = vpop.f32.mrf.mxu1  ;;  %v1010_v45 = vmul.f32 %v1914_v31, %v1914_v31  ;;  %v1939_v12 = vadd.f32 %v1822_v33, %v927_v28 }
 0x1ce   :  { %v1930_v35 = vadd.f32 %v1826_v37, %v899_v9  ;;  %v903_v17 = vadd.f32 %v902_v16, %v1799_v18  ;;  %v1934_v42 = vadd.f32 %v1826_v37, %v929_v27  ;;  %v1035_v44 = vadd.f32 %v998_v36, %v997_v34 }
 0x1cf   :  { %v904_v11 = vpop.f32.mrf.mxu0  ;;  %v934_v41 = vpop.f32.mrf.mxu1  ;;  %v999_v18 = vmul.f32 %v1923_v10, %v1923_v10  ;;  %v1053_v60 = vadd.f32 %v1010_v45, %v1009_v54  ;;  %v1011_v1 = vmul.f32 %v1939_v12, %v1939_v12 }
 0x1d0   :  { %v905_v47 = vadd.f32 %v904_v11, %v1801_v19  ;;  %v1943_v49 = vadd.f32 %v1822_v33, %v903_v17  ;;  %1036 = vadd.xlane.f32.xlu1 %v1035_v44  ;;  %v1000_v13 = vmul.f32 %v1930_v35, %v1930_v35  ;;  %v1012_v63 = vmul.f32 %v1934_v42, %v1934_v42 }
 0x1d1   :  { %v906_v50 = vpop.f32.mrf.mxu0  ;;  %v936_v19 = vpop.f32.mrf.mxu1  ;;  %v935_v15 = vadd.f32 %v934_v41, %v1855_v61 }
 0x1d2   :  { %v1952_v55 = vadd.f32 %v1826_v37, %v905_v47  ;;  %v907_v14 = vadd.f32 %v906_v50, %v1803_v20  ;;  %v1038_v58 = vadd.f32 %v1000_v13, %v999_v18  ;;  %v1001_v5 = vmul.f32 %v1943_v49, %v1943_v49 }
 0x1d3   :  { %v908_v57 = vpop.f32.mrf.mxu0  ;;  %v938_v9 = vpop.f32.mrf.mxu1  ;;  %v1056_v16 = vadd.f32 %v1012_v63, %v1011_v1  ;;  %v1982_v41 = vadd.f32 %v1826_v37, %v935_v15  ;;  %v937_v47 = vadd.f32 %v936_v19, %v1867_v8 }
 0x1d4   :  { %v1958_v0 = vadd.f32 %v1822_v33, %v907_v14  ;;  %v909_v2 = vadd.f32 %v908_v57, %v1805_v21  ;;  %1039 = vadd.xlane.f32.xlu0 %v1038_v58  ;;  %1054 = vadd.xlane.f32.xlu1 %v1053_v60  ;;  %v1002_v6 = vmul.f32 %v1952_v55, %v1952_v55 }
 0x1d5   :  { %v912_v20 = vpop.f32.mrf.mxu0  ;;  %v933_v21 = vadd.f32 %v932_v32, %v1843_v51  ;;  %v939_v51 = vadd.f32 %v938_v9, %v1881_v38  ;;  %v1014_v19 = vmul.f32 %v1982_v41, %v1982_v41  ;;  %v2010_v57 = vadd.f32 %v1822_v33, %v937_v47 }
 0x1d6   :  { %v1969_v7 = vadd.f32 %v1826_v37, %v909_v2  ;;  %v913_v28 = vadd.f32 %v912_v20, %v1807_v22  ;;  %v1041_v61 = vadd.f32 %v1002_v6, %v1001_v5  ;;  %v1003_v17 = vmul.f32 %v1958_v0, %v1958_v0 }
 0x1d7   :  { %v914_v27 = vpop.f32.mrf.mxu0  ;;  %v1990_v45 = vadd.f32 %v1822_v33, %v933_v21 }
 0x1d8   :  { %v1974_v34 = vadd.f32 %v1822_v33, %v913_v28  ;;  %v915_v36 = vadd.f32 %v914_v27, %v1809_v23  ;;  %v1004_v11 = vmul.f32 %v1969_v7, %v1969_v7  ;;  %1057 = vadd.xlane.f32.xlu0 %v1056_v16  ;;  %1042 = vadd.xlane.f32.xlu1 %v1041_v61 }
 0x1d9   :  { %v916_v22 = vpop.f32.mrf.mxu0  ;;  %v1013_v60 = vmul.f32 %v1990_v45, %v1990_v45 }
 0x1da   :  { %v1986_v32 = vadd.f32 %v1826_v37, %v915_v36  ;;  %v917_v44 = vadd.f32 %v916_v22, %v1811_v24  ;;  %v1044_v23 = vadd.f32 %v1004_v11, %v1003_v17  ;;  %v1005_v38 = vmul.f32 %v1974_v34, %v1974_v34 }
 0x1db   :  { %v918_v50 = vpop.f32.mrf.mxu0  ;;  %v2002_v24 = vadd.f32 %v1826_v37, %v939_v51 }
 0x1dc   :  { %v1994_v18 = vadd.f32 %v1822_v33, %v917_v44  ;;  %v919_v13 = vadd.f32 %v918_v50, %v1813_v26  ;;  %v1006_v54 = vmul.f32 %v1986_v32, %v1986_v32  ;;  %1045 = vadd.xlane.f32.xlu0 %v1044_v23  ;;  %v1015_v33 = vmul.f32 %v2010_v57, %v2010_v57 }
 0x1dd   :  { %v1016_v2 = vmul.f32 %v2002_v24, %v2002_v24 }
 0x1de   :  { %v2005_v14 = vadd.f32 %v1826_v37, %v919_v13  ;;  %v1047_v8 = vadd.f32 %v1006_v54, %v1005_v38  ;;  %v1007_v26 = vmul.f32 %v1994_v18, %v1994_v18  ;;  %v1059_v37 = vadd.f32 %v1014_v19, %v1013_v60 }
 0x1df   :  { %v1062_v1 = vadd.f32 %v1016_v2, %v1015_v33 }
 0x1e0   :  { %1048 = vadd.xlane.f32.xlu1 %v1047_v8  ;;  %v1008_v58 = vmul.f32 %v2005_v14, %v2005_v14 }
 0x1e2   :  { %v1050_v63 = vadd.f32 %v1008_v58, %v1007_v26 }
 0x1e4   :  { %1051 = vadd.xlane.f32.xlu0 %v1050_v63  ;;  %1060 = vadd.xlane.f32.xlu1 %v1059_v37 }
 0x1e8   :  { %1063 = vadd.xlane.f32.xlu0 %v1062_v1 }
 0x241   :  { %v1019_v15 = vpop.xlane.xlu0 %1018 }
 0x242   :  { %v1065_v20 = vmax.f32 %v1019_v15, 1e-24 }
 0x244   :  { %1472 = vrsqrt.f32 %v1065_v20 }
 0x245   :  { %v1022_v5 = vpop.xlane.xlu1 %1021 }
 0x246   :  { %v1066_v6 = vmax.f32 %v1022_v5, 1e-24 }
 0x248   :  { %1474 = vrsqrt.f32 %v1066_v6 }
 0x249   :  { %v1025_v28 = vpop.xlane.xlu0 %1024 }
 0x24a   :  { %v1067_v21 = vmax.f32 %v1025_v28, 1e-24 }
 0x24c   :  { %1476 = vrsqrt.f32 %v1067_v21 }
 0x24d   :  { %v1028_v9 = vpop.xlane.xlu0 %1027 }
 0x24e   :  { %v1068_v27 = vmax.f32 %v1028_v9, 1e-24 }
 0x250   :  { %1478 = vrsqrt.f32 %v1068_v27 }
 0x251   :  { %v1473_v16 = vpop.eup %1472  ;;  %v1031_v61 = vpop.xlane.xlu1 %1030 }
 0x252   :  { %v1097_v36 = vmul.f32 %v1473_v16, %v1829_v39  ;;  %v1098_v17 = vmul.f32 %v1473_v16, %v1834_v43  ;;  %v1069_v11 = vmax.f32 %v1031_v61, 1e-24 }
 0x254   :  { %v1317_v22 = vpack.c.bf16 %v1098_v17, %v1097_v36  ;;  %1480 = vrsqrt.f32 %v1069_v11 }
 0x255   :  { %v1475_v51 = vpop.eup %1474  ;;  %v1034_v47 = vpop.xlane.xlu0 %1033 }
 0x256   :  { %1225 = vst [vmem:[%s2109_s7] sm:$0xff] %v1317_v22  ;;  %v1099_v44 = vmul.f32 %v1475_v51, %v1837_v46  ;;  %v1100_v23 = vmul.f32 %v1475_v51, %v1846_v52  ;;  %v1070_v50 = vmax.f32 %v1034_v47, 1e-24 }
 0x258   :  { %v1318_v13 = vpack.c.bf16 %v1100_v23, %v1099_v44  ;;  %1482 = vrsqrt.f32 %v1070_v50 }
 0x259   :  { %v1477_v38 = vpop.eup %1476  ;;  %v1037_v54 = vpop.xlane.xlu1 %1036 }
 0x25a   :  { %1226 = vst [vmem:[%s2109_s7 + $0x8] sm:$0xff] %v1318_v13  ;;  %v1101_v39 = vmul.f32 %v1477_v38, %v1849_v56  ;;  %v1102_v43 = vmul.f32 %v1477_v38, %v1858_v62  ;;  %v1071_v8 = vmax.f32 %v1037_v54, 1e-24 }
 0x25c   :  { %v1319_v19 = vpack.c.bf16 %v1102_v43, %v1101_v39  ;;  %1484 = vrsqrt.f32 %v1071_v8 }
 0x25d   :  { %v1479_v26 = vpop.eup %1478  ;;  %v1040_v58 = vpop.xlane.xlu0 %1039 }
 0x25e   :  { %1227 = vst [vmem:[%s2109_s7 + $0x10] sm:$0xff] %v1319_v19  ;;  %v1103_v46 = vmul.f32 %v1479_v26, %v1861_v3  ;;  %v1104_v52 = vmul.f32 %v1479_v26, %v1870_v25  ;;  %v1055_v60 = vpop.xlane.xlu1 %1054  ;;  %v1072_v63 = vmax.f32 %v1040_v58, 1e-24 }
 0x25f   :  { %v1077_v37 = vmax.f32 %v1055_v60, 1e-24 }
 0x260   :  { %v1320_v56 = vpack.c.bf16 %v1104_v52, %v1103_v46  ;;  %1486 = vrsqrt.f32 %v1072_v63 }
 0x261   :  { %v1481_v2 = vpop.eup %1480  ;;  %1488 = vrsqrt.f32 %v1077_v37  ;;  %v1058_v1 = vpop.xlane.xlu0 %1057 }
 0x262   :  { %1228 = vst [vmem:[%s2109_s7 + $0x18] sm:$0xff] %v1320_v56  ;;  %v1105_v62 = vmul.f32 %v1481_v2, %v1874_v30  ;;  %v1106_v33 = vmul.f32 %v1481_v2, %v1884_v40  ;;  %v1043_v3 = vpop.xlane.xlu1 %1042  ;;  %v1078_v15 = vmax.f32 %v1058_v1, 1e-24 }
 0x263   :  { %v1073_v25 = vmax.f32 %v1043_v3, 1e-24 }
 0x264   :  { %v1321_v20 = vpack.c.bf16 %v1106_v33, %v1105_v62  ;;  %1490 = vrsqrt.f32 %v1078_v15 }
 0x265   :  { %v1483_v5 = vpop.eup %1482  ;;  %1492 = vrsqrt.f32 %v1073_v25  ;;  %v1046_v6 = vpop.xlane.xlu0 %1045 }
 0x266   :  { %1229 = vst [vmem:[%s2109_s7 + $0x20] sm:$0xff] %v1321_v20  ;;  %v1107_v28 = vmul.f32 %v1483_v5, %v1893_v48  ;;  %v1108_v30 = vmul.f32 %v1483_v5, %v1896_v53  ;;  %v1074_v21 = vmax.f32 %v1046_v6, 1e-24 }
 0x268   :  { %v1322_v40 = vpack.c.bf16 %v1108_v30, %v1107_v28  ;;  %1494 = vrsqrt.f32 %v1074_v21 }
 0x269   :  { %v1049_v9 = vpop.xlane.xlu1 %1048  ;;  %v1485_v27 = vpop.eup %1484 }
 0x26a   :  { %v1075_v16 = vmax.f32 %v1049_v9, 1e-24  ;;  %1230 = vst [vmem:[%s2109_s7 + $0x28] sm:$0xff] %v1322_v40  ;;  %v1109_v61 = vmul.f32 %v1485_v27, %v1902_v59  ;;  %v1110_v36 = vmul.f32 %v1485_v27, %v1910_v4 }
 0x26c   :  { %1496 = vrsqrt.f32 %v1075_v16  ;;  %v1323_v17 = vpack.c.bf16 %v1110_v36, %v1109_v61 }
 0x26d   :  { %v1052_v11 = vpop.xlane.xlu0 %1051  ;;  %v1061_v48 = vpop.xlane.xlu1 %1060 }
 0x26e   :  { %v1487_v22 = vpop.eup %1486  ;;  %v1076_v53 = vmax.f32 %v1052_v11, 1e-24  ;;  %v1079_v51 = vmax.f32 %v1061_v48, 1e-24  ;;  %1231 = vst [vmem:[%s2109_s7 + $0x30] sm:$0xff] %v1323_v17 }
 0x26f   :  { %v1489_v44 = vpop.eup %1488  ;;  %v1111_v23 = vmul.f32 %v1487_v22, %v1923_v10  ;;  %v1112_v47 = vmul.f32 %v1487_v22, %v1930_v35 }
 0x270   :  { %v1121_v59 = vmul.f32 %v1489_v44, %v1920_v29  ;;  %v1122_v4 = vmul.f32 %v1489_v44, %v1914_v31  ;;  %1498 = vrsqrt.f32 %v1076_v53 }
 0x271   :  { %v1324_v50 = vpack.c.bf16 %v1112_v47, %v1111_v23  ;;  %1500 = vrsqrt.f32 %v1079_v51  ;;  %v1064_v13 = vpop.xlane.xlu0 %1063  ;;  %v1491_v38 = vpop.eup %1490 }
 0x272   :  { %v1329_v39 = vpack.c.bf16 %v1122_v4, %v1121_v59  ;;  %v1080_v43 = vmax.f32 %v1064_v13, 1e-24  ;;  %v1493_v54 = vpop.eup %1492  ;;  %v1123_v10 = vmul.f32 %v1491_v38, %v1939_v12  ;;  %v1124_v35 = vmul.f32 %v1491_v38, %v1934_v42 }
 0x273   :  { %1232 = vst [vmem:[%s2109_s7 + $0x38] sm:$0xff] %v1324_v50  ;;  %v1113_v31 = vmul.f32 %v1493_v54, %v1943_v49  ;;  %v1114_v29 = vmul.f32 %v1493_v54, %v1952_v55 }
 0x274   :  { %1237 = vst [vmem:[%s2109_s7 + $0x60] sm:$0xff] %v1329_v39  ;;  %1502 = vrsqrt.f32 %v1080_v43  ;;  %v1330_v8 = vpack.c.bf16 %v1124_v35, %v1123_v10 }
 0x275   :  { %v1495_v19 = vpop.eup %1494  ;;  %v1325_v26 = vpack.c.bf16 %v1114_v29, %v1113_v31 }
 0x276   :  { %1238 = vst [vmem:[%s2109_s7 + $0x68] sm:$0xff] %v1330_v8  ;;  %v1115_v12 = vmul.f32 %v1495_v19, %v1958_v0  ;;  %v1116_v42 = vmul.f32 %v1495_v19, %v1969_v7 }
 0x277   :  { %1233 = vst [vmem:[%s2109_s7 + $0x40] sm:$0xff] %v1325_v26 }
 0x278   :  { %v1326_v49 = vpack.c.bf16 %v1116_v42, %v1115_v12 }
 0x279   :  { %v1497_v46 = vpop.eup %1496 }
 0x27a   :  { %v1117_v55 = vmul.f32 %v1497_v46, %v1974_v34  ;;  %v1118_v52 = vmul.f32 %v1497_v46, %v1986_v32  ;;  %1234 = vst [vmem:[%s2109_s7 + $0x48] sm:$0xff] %v1326_v49 }
 0x27c   :  { %v1327_v58 = vpack.c.bf16 %v1118_v52, %v1117_v55 }
 0x27d   :  { %v1499_v60 = vpop.eup %1498 }
 0x27e   :  { %v1501_v63 = vpop.eup %1500  ;;  %1235 = vst [vmem:[%s2109_s7 + $0x50] sm:$0xff] %v1327_v58  ;;  %v1119_v0 = vmul.f32 %v1499_v60, %v1994_v18  ;;  %v1120_v7 = vmul.f32 %v1499_v60, %v2005_v14 }
 0x27f   :  { %v1125_v37 = vmul.f32 %v1501_v63, %v1990_v45  ;;  %v1126_v34 = vmul.f32 %v1501_v63, %v1982_v41 }
 0x280   :  { %v1328_v32 = vpack.c.bf16 %v1120_v7, %v1119_v0 }
 0x281   :  { %v1503_v56 = vpop.eup %1502  ;;  %v1331_v2 = vpack.c.bf16 %v1126_v34, %v1125_v37 }
 0x282   :  { %1236 = vst [vmem:[%s2109_s7 + $0x58] sm:$0xff] %v1328_v32  ;;  %v1127_v62 = vmul.f32 %v1503_v56, %v2010_v57  ;;  %v1128_v33 = vmul.f32 %v1503_v56, %v2002_v24 }
 0x283   :  { %1239 = vst [vmem:[%s2109_s7 + $0x70] sm:$0xff] %v1331_v2 }
 0x284   :  { %v1332_v18 = vpack.c.bf16 %v1128_v33, %v1127_v62 }
 0x286   :  { %1240 = vst [vmem:[%s2109_s7 + $0x78] sm:$0xff] %v1332_v18 }

// kernel: mesh_autoencoder_forward.15
= control target key start
LH: loop header
LB: loop body
LE: loop exit
PB: predicated region body
PF: predicated region fallthrough
CT: control target
= control target key end

     0   :  { %v1403_v1 = vmov 0   ;;  %s1743_s1 = inlined_call_operand.vmem [shape: bf16[128,128], index: 1, kind: input, shape index: {}]   ;;  %s1744_s0 = inlined_call_operand.vmem [shape: bf16[128,128], index: 0, kind: input, shape index: {}]   ;;  %s1745_s3 = inlined_call_operand.vmem [shape: f32[128,1], index: 3, kind: input, shape index: {}]   ;;  %s1746_s5 = inlined_call_operand.vmem [shape: bf16[128,128], index: 5, kind: input, shape index: {}]   ;;  %s1747_s4 = inlined_call_operand.vmem [shape: bf16[128,128], index: 4, kind: input, shape index: {}]   ;;  %s1748_s2 = inlined_call_operand.vmem [shape: bf16[128,128], index: 2, kind: input, shape index: {}]   ;;  %s1749_s6 = inlined_call_operand.vmem [shape: f32[1,128], index: 6, kind: input, shape index: {}]   ;;  %s1750_s7 = inlined_call_operand.vmem [shape: bf16[128,128], index: 7, kind: output, shape index: {}]  }
   0x1   :  { %v1331_v0 = vld [vmem:[%s1743_s1 + $0x38] sm:$0xff]   ;;  %1330 = vset.pattern.permute.xlu1 %v1403_v1  ;;  %1329 = vset.pattern.permute.xlu0 %v1403_v1  ;;  %v1332_v2 = vld [vmem:[%s1743_s1 + $0x30] sm:$0xff]   ;;  %v1333_v3 = vld [vmem:[%s1743_s1 + $0x28] sm:$0xff]  }
   0x2   :  { %1216 = vmatprep.subr.bf16.mxu0 %v1331_v0  ;;  %v1334_v4 = vld [vmem:[%s1743_s1 + $0x20] sm:$0xff]   ;;  %v1335_v6 = vld [vmem:[%s1743_s1 + $0x18] sm:$0xff]   ;;  %v1336_v7 = vld [vmem:[%s1743_s1 + $0x10] sm:$0xff]  }
   0x3   :  { %1217 = vmatpush3.bf16.msra.mxu0 %v1331_v0  ;;  %v1339_v5 = vld [vmem:[%s1744_s0] sm:$0xff]   ;;  %v348_v10 = vld [vmem:[%s1745_s3 + $0x48] sm:$0xff]  ;;  %v342_v13 = vld [vmem:[%s1745_s3 + $0x18] sm:$0xff] }
   0x4   :  { %1218 = vmatprep.subr.bf16.mxu0 %v1332_v2  ;;  %1232 = vmatprep.mubr.bf16.mxu0 %v1339_v5  ;;  %v347_v8 = vld [vmem:[%s1745_s3 + $0x40] sm:$0xff]  ;;  %v340_v11 = vld [vmem:[%s1745_s3 + $0x8] sm:$0xff]  ;;  %v341_v14 = vld [vmem:[%s1745_s3 + $0x10] sm:$0xff] }
   0x5   :  { %v339_v9 = vld [vmem:[%s1745_s3] sm:$0xff]  ;;  %397 = vperm.xlu1 %1330, %v347_v8   ;;  %v1337_v12 = vld [vmem:[%s1743_s1 + $0x8] sm:$0xff]   ;;  %v1347_v15 = vld [vmem:[%s1746_s5 + $0x38] sm:$0xff]  }
   0x6   :  { %357 = vperm.xlu0 %1329, %v339_v9   ;;  %v1348_v16 = vld [vmem:[%s1746_s5 + $0x30] sm:$0xff]   ;;  %v1338_v17 = vld [vmem:[%s1743_s1] sm:$0xff]   ;;  %1248 = vmatprep.subr.bf16.mxu1 %v1347_v15  ;;  %v350_v18 = vld [vmem:[%s1745_s3 + $0x58] sm:$0xff] }
   0x7   :  { %1219 = vmatpush3.bf16.msra.mxu0 %v1332_v2  ;;  %v349_v19 = vld [vmem:[%s1745_s3 + $0x50] sm:$0xff]  ;;  %1249 = vmatpush3.bf16.msra.mxu1 %v1347_v15  ;;  %v1349_v20 = vld [vmem:[%s1746_s5 + $0x28] sm:$0xff]   ;;  %v1513_v23 = vld [vmem:[%s1747_s4 + $0x38] sm:$0xff]  }
   0x8   :  { %1220 = vmatprep.subr.bf16.mxu0 %v1333_v3  ;;  %1250 = vmatprep.subr.bf16.mxu1 %v1348_v16  ;;  %v1340_v21 = vld [vmem:[%s1744_s0 + $0x8] sm:$0xff]   ;;  %v1341_v24 = vld [vmem:[%s1744_s0 + $0x10] sm:$0xff]   ;;  %v343_v25 = vld [vmem:[%s1745_s3 + $0x20] sm:$0xff] }
   0x9   :  { %402 = vperm.xlu1 %1330, %v348_v10   ;;  %v344_v22 = vld [vmem:[%s1745_s3 + $0x28] sm:$0xff]  ;;  %v1350_v26 = vld [vmem:[%s1746_s5 + $0x20] sm:$0xff]   ;;  %v1355_v29 = vld [vmem:[%s1747_s4 + $0x30] sm:$0xff]  }
   0xa   :  { %362 = vperm.xlu0 %1329, %v340_v11   ;;  %v352_v27 = vld [vmem:[%s1745_s3 + $0x68] sm:$0xff]  ;;  %v351_v28 = vld [vmem:[%s1745_s3 + $0x60] sm:$0xff]  ;;  %v1351_v30 = vld [vmem:[%s1746_s5 + $0x18] sm:$0xff]  }
   0xb   :  { %1221 = vmatpush3.bf16.msra.mxu0 %v1333_v3  ;;  %1251 = vmatpush3.bf16.msra.mxu1 %v1348_v16  ;;  %v1342_v31 = vld [vmem:[%s1744_s0 + $0x18] sm:$0xff]   ;;  %v345_v33 = vld [vmem:[%s1745_s3 + $0x30] sm:$0xff]  ;;  %v1343_v34 = vld [vmem:[%s1744_s0 + $0x20] sm:$0xff]  }
   0xc   :  { %1222 = vmatprep.subr.bf16.mxu0 %v1334_v4  ;;  %1252 = vmatprep.subr.bf16.mxu1 %v1349_v20  ;;  %v346_v32 = vld [vmem:[%s1745_s3 + $0x38] sm:$0xff]  ;;  %v1358_v35 = vld [vmem:[%s1748_s2] sm:$0xff]   ;;  %v1352_v36 = vld [vmem:[%s1746_s5 + $0x10] sm:$0xff]  }
   0xd   :  { %372 = vperm.xlu1 %1330, %v342_v13   ;;  %1264 = vmatprep.mubr.bf16.mxu1 %v1358_v35  ;;  %v354_v37 = vld [vmem:[%s1745_s3 + $0x78] sm:$0xff]  ;;  %v353_v38 = vld [vmem:[%s1745_s3 + $0x70] sm:$0xff]  ;;  %v1357_v39 = vld [vmem:[%s1747_s4 + $0x28] sm:$0xff]  }
   0xe   :  { %367 = vperm.xlu0 %1329, %v341_v14   ;;  %v1354_v40 = vld [vmem:[%s1746_s5 + $0x8] sm:$0xff]   ;;  %v1360_v41 = vld [vmem:[%s1747_s4 + $0x20] sm:$0xff]   ;;  %v1345_v43 = vld [vmem:[%s1744_s0 + $0x30] sm:$0xff]  }
   0xf   :  { %1223 = vmatpush3.bf16.msra.mxu0 %v1334_v4  ;;  %1253 = vmatpush3.bf16.msra.mxu1 %v1349_v20  ;;  %v1344_v42 = vld [vmem:[%s1744_s0 + $0x28] sm:$0xff]   ;;  %v1356_v44 = vld [vmem:[%s1746_s5] sm:$0xff]   ;;  %v1361_v45 = vld [vmem:[%s1747_s4 + $0x18] sm:$0xff]  }
  0x10   :  { %1224 = vmatprep.subr.bf16.mxu0 %v1335_v6  ;;  %1254 = vmatprep.subr.bf16.mxu1 %v1350_v26  ;;  %v1359_v46 = vld [vmem:[%s1748_s2 + $0x8] sm:$0xff]   ;;  %v1346_v47 = vld [vmem:[%s1744_s0 + $0x38] sm:$0xff]   ;;  %v1362_v48 = vld [vmem:[%s1748_s2 + $0x10] sm:$0xff]  }
  0x11   :  { %412 = vperm.xlu1 %1330, %v350_v18   ;;  %v1363_v49 = vld [vmem:[%s1748_s2 + $0x18] sm:$0xff]   ;;  %v1364_v50 = vld [vmem:[%s1747_s4 + $0x10] sm:$0xff]   ;;  %v1365_v51 = vld [vmem:[%s1747_s4 + $0x8] sm:$0xff]  }
  0x12   :  { %407 = vperm.xlu0 %1329, %v349_v19   ;;  %v1366_v52 = vld [vmem:[%s1748_s2 + $0x20] sm:$0xff]   ;;  %v1367_v53 = vld [vmem:[%s1748_s2 + $0x28] sm:$0xff]   ;;  %v1369_v55 = vld [vmem:[%s1748_s2 + $0x30] sm:$0xff]  }
  0x13   :  { %1225 = vmatpush3.bf16.msra.mxu0 %v1335_v6  ;;  %1255 = vmatpush3.bf16.msra.mxu1 %v1350_v26  ;;  %v1368_v54 = vld [vmem:[%s1747_s4] sm:$0xff]   ;;  %v1370_v56 = vld [vmem:[%s1748_s2 + $0x38] sm:$0xff]  }
  0x14   :  { %1226 = vmatprep.subr.bf16.mxu0 %v1336_v7  ;;  %1256 = vmatprep.subr.bf16.mxu1 %v1351_v30 }
  0x15   :  { %382 = vperm.xlu1 %1330, %v344_v22  }
  0x16   :  { %377 = vperm.xlu0 %1329, %v343_v25  }
  0x17   :  { %1227 = vmatpush3.bf16.msra.mxu0 %v1336_v7  ;;  %1257 = vmatpush3.bf16.msra.mxu1 %v1351_v30 }
  0x18   :  { %1228 = vmatprep.subr.bf16.mxu0 %v1337_v12  ;;  %1258 = vmatprep.subr.bf16.mxu1 %v1352_v36 }
  0x19   :  { %422 = vperm.xlu1 %1330, %v352_v27  }
  0x1a   :  { %417 = vperm.xlu0 %1329, %v351_v28  }
  0x1b   :  { %1229 = vmatpush3.bf16.msra.mxu0 %v1337_v12  ;;  %1259 = vmatpush3.bf16.msra.mxu1 %v1352_v36 }
  0x1c   :  { %1230 = vmatprep.subr.bf16.mxu0 %v1338_v17  ;;  %1260 = vmatprep.subr.bf16.mxu1 %v1354_v40 }
  0x1d   :  { %392 = vperm.xlu1 %1330, %v346_v32  }
  0x1e   :  { %387 = vperm.xlu0 %1329, %v345_v33  }
  0x1f   :  { %1231 = vmatpush3.bf16.msra.mxu0 %v1338_v17  ;;  %1261 = vmatpush3.bf16.msra.mxu1 %v1354_v40 }
  0x20   :  { %1280 = vmatprep.subr.bf16.mxu0 %v1513_v23  ;;  %1262 = vmatprep.subr.bf16.mxu1 %v1356_v44 }
  0x21   :  { %432 = vperm.xlu1 %1330, %v354_v37  }
  0x22   :  { %1233 = vmatmul.mubr.bf16.vlgmr.msra.gmra.mxu0 %v1340_v21  ;;  %427 = vperm.xlu0 %1329, %v353_v38  }
  0x23   :  { %1236 = vmatprep.mubr.bf16.mxu0 %v1341_v24  ;;  %1281 = vmatpush3.bf16.msra.mxu0 %v1513_v23 }
  0x24   :  { %1282 = vmatprep.subr.bf16.mxu0 %v1355_v29  ;;  %1263 = vmatpush3.bf16.msra.mxu1 %v1356_v44 }
  0x25   :  { %1312 = vmatprep.subr.bf16.mxu1 %v1513_v23 }
  0x27   :  { %1283 = vmatpush3.bf16.msra.mxu0 %v1355_v29  ;;  %1265 = vmatmul.mubr.bf16.vlgmr.msra.gmra.mxu1 %v1359_v46 }
  0x28   :  { %1284 = vmatprep.subr.bf16.mxu0 %v1357_v39  ;;  %1320 = vmatpush3.bf16.msra.mxu1 %v1513_v23 }
  0x29   :  { %1268 = vmatprep.mubr.bf16.mxu1 %v1362_v48  ;;  %1313 = vmatprep.subr.bf16.mxu1 %v1355_v29 }
  0x2a   :  { %1237 = vmatmul.mubr.bf16.gmra.mxu0 %v1342_v31 }
  0x2b   :  { %1240 = vmatprep.mubr.bf16.mxu0 %v1343_v34  ;;  %1285 = vmatpush3.bf16.msra.mxu0 %v1357_v39 }
  0x2c   :  { %1286 = vmatprep.subr.bf16.mxu0 %v1360_v41  ;;  %1321 = vmatpush3.bf16.msra.mxu1 %v1355_v29 }
  0x2d   :  { %1314 = vmatprep.subr.bf16.mxu1 %v1357_v39 }
  0x2f   :  { %1287 = vmatpush3.bf16.msra.mxu0 %v1360_v41  ;;  %1269 = vmatmul.mubr.bf16.gmra.mxu1 %v1363_v49 }
  0x30   :  { %1288 = vmatprep.subr.bf16.mxu0 %v1361_v45  ;;  %1322 = vmatpush3.bf16.msra.mxu1 %v1357_v39 }
  0x31   :  { %1315 = vmatprep.subr.bf16.mxu1 %v1360_v41  ;;  %1272 = vmatprep.mubr.bf16.mxu1 %v1366_v52 }
  0x32   :  { %1241 = vmatmul.mubr.bf16.gmra.mxu0 %v1344_v42 }
  0x33   :  { %1244 = vmatprep.mubr.bf16.mxu0 %v1345_v43  ;;  %1289 = vmatpush3.bf16.msra.mxu0 %v1361_v45 }
  0x34   :  { %1323 = vmatpush3.bf16.msra.mxu1 %v1360_v41  ;;  %1290 = vmatprep.subr.bf16.mxu0 %v1364_v50 }
  0x35   :  { %1316 = vmatprep.subr.bf16.mxu1 %v1361_v45 }
  0x37   :  { %1291 = vmatpush3.bf16.msra.mxu0 %v1364_v50  ;;  %1273 = vmatmul.mubr.bf16.gmra.mxu1 %v1367_v53 }
  0x38   :  { %1324 = vmatpush3.bf16.msra.mxu1 %v1361_v45  ;;  %1292 = vmatprep.subr.bf16.mxu0 %v1365_v51 }
  0x39   :  { %1317 = vmatprep.subr.bf16.mxu1 %v1364_v50  ;;  %1276 = vmatprep.mubr.bf16.mxu1 %v1369_v55 }
  0x3a   :  { %1245 = vmatmul.mubr.bf16.gmra.mxu0 %v1346_v47 }
  0x3b   :  { %1293 = vmatpush3.bf16.msra.mxu0 %v1365_v51 }
  0x3c   :  { %1325 = vmatpush3.bf16.msra.mxu1 %v1364_v50  ;;  %1294 = vmatprep.subr.bf16.mxu0 %v1368_v54 }
  0x3d   :  { %1318 = vmatprep.subr.bf16.mxu1 %v1365_v51 }
  0x3f   :  { %1295 = vmatpush3.bf16.msra.mxu0 %v1368_v54  ;;  %1277 = vmatmul.mubr.bf16.gmra.mxu1 %v1370_v56 }
  0x40   :  { %1326 = vmatpush3.bf16.msra.mxu1 %v1365_v51 }
  0x41   :  { %1319 = vmatprep.subr.bf16.mxu1 %v1368_v54 }
  0x44   :  { %1327 = vmatpush3.bf16.msra.mxu1 %v1368_v54 }
  0x80   :  { %v398_v57 = vpop.permute.xlu1 %397 }
  0x81   :  { %v358_v58 = vpop.permute.xlu0 %357 }
  0x84   :  { %v403_v59 = vpop.permute.xlu1 %402 }
  0x85   :  { %v363_v60 = vpop.permute.xlu0 %362 }
  0x88   :  { %v373_v61 = vpop.permute.xlu1 %372 }
  0x89   :  { %v368_v62 = vpop.permute.xlu0 %367 }
  0x8c   :  { %v413_v63 = vpop.permute.xlu1 %412 }
  0x8d   :  { %v408_v0 = vpop.permute.xlu0 %407 }
  0x90   :  { %v383_v2 = vpop.permute.xlu1 %382 }
  0x91   :  { %v378_v4 = vpop.permute.xlu0 %377 }
  0x94   :  { %v423_v8 = vpop.permute.xlu1 %422 }
  0x95   :  { %v418_v13 = vpop.permute.xlu0 %417 }
  0x98   :  { %v393_v18 = vpop.permute.xlu1 %392 }
  0x99   :  { %v388_v21 = vpop.permute.xlu0 %387 }
  0x9c   :  { %v433_v40 = vpop.permute.xlu1 %432 }
  0x9d   :  { %v428_v43 = vpop.permute.xlu0 %427 }
  0xe2   :  { %v1234_v1 = vpop.f32.mrf.mxu0 }
  0xe3   :  { %v437_v11 = vmul.f32 %v1234_v1, %v368_v62  ;;  %v1621_v62 = vld [vmem:[%s1749_s6] ss:$0 sm:$0xff] }
  0xe4   :  { %v225_v3 = vpop.f32.mrf.mxu0 }
  0xe5   :  { %v435_v9 = vmul.f32 %v358_v58, %v225_v3 }
  0xe6   :  { %v1235_v5 = vpop.f32.mrf.mxu0 }
  0xe7   :  { %v438_v6 = vmul.f32 %v1235_v5, %v373_v61  ;;  %v1266_v49 = vpop.f32.mrf.mxu1 }
  0xe8   :  { %v228_v7 = vpop.f32.mrf.mxu0 }
  0xe9   :  { %v436_v10 = vmul.f32 %v363_v60, %v228_v7  ;;  %v452_v15 = vpack.c.bf16 %v438_v6, %v437_v11  ;;  %v637_v50 = vpop.f32.mrf.mxu1 }
  0xea   :  { %v1238_v12 = vpop.f32.mrf.mxu0 }
  0xeb   :  { %v451_v14 = vpack.c.bf16 %v436_v10, %v435_v9  ;;  %v441_v24 = vmul.f32 %v1238_v12, %v388_v21  ;;  %v1267_v51 = vpop.f32.mrf.mxu1 }
  0xec   :  { %v241_v16 = vpop.f32.mrf.mxu0 }
  0xed   :  { %1296 = vmatprep.mubr.bf16.mxu0 %v451_v14  ;;  %v439_v22 = vmul.f32 %v378_v4, %v241_v16  ;;  %v640_v52 = vpop.f32.mrf.mxu1 }
  0xee   :  { %v1239_v17 = vpop.f32.mrf.mxu0  ;;  %1297 = vmatmul.mubr.bf16.vlgmr.msra.gmra.mxu0 %v452_v15 }
  0xef   :  { %v442_v19 = vmul.f32 %v1239_v17, %v393_v18  ;;  %v1270_v53 = vpop.f32.mrf.mxu1 }
  0xf0   :  { %v244_v20 = vpop.f32.mrf.mxu0 }
  0xf1   :  { %v440_v23 = vmul.f32 %v383_v2, %v244_v20  ;;  %v454_v27 = vpack.c.bf16 %v442_v19, %v441_v24  ;;  %v653_v54 = vpop.f32.mrf.mxu1 }
  0xf2   :  { %v1242_v25 = vpop.f32.mrf.mxu0 }
  0xf3   :  { %v453_v26 = vpack.c.bf16 %v440_v23, %v439_v22  ;;  %v445_v34 = vmul.f32 %v1242_v25, %v408_v0  ;;  %v1271_v55 = vpop.f32.mrf.mxu1 }
  0xf4   :  { %v257_v28 = vpop.f32.mrf.mxu0 }
  0xf5   :  { %1300 = vmatprep.mubr.bf16.mxu0 %v453_v26  ;;  %v443_v32 = vmul.f32 %v398_v57, %v257_v28  ;;  %v656_v56 = vpop.f32.mrf.mxu1 }
  0xf6   :  { %v1243_v29 = vpop.f32.mrf.mxu0  ;;  %1301 = vmatmul.mubr.bf16.gmra.mxu0 %v454_v27 }
  0xf7   :  { %v446_v30 = vmul.f32 %v1243_v29, %v413_v63  ;;  %v1274_v57 = vpop.f32.mrf.mxu1 }
  0xf8   :  { %v260_v31 = vpop.f32.mrf.mxu0 }
  0xf9   :  { %v444_v33 = vmul.f32 %v403_v59, %v260_v31  ;;  %v456_v37 = vpack.c.bf16 %v446_v30, %v445_v34  ;;  %v669_v58 = vpop.f32.mrf.mxu1 }
  0xfa   :  { %v1246_v35 = vpop.f32.mrf.mxu0 }
  0xfb   :  { %v455_v36 = vpack.c.bf16 %v444_v33, %v443_v32  ;;  %v449_v46 = vmul.f32 %v1246_v35, %v428_v43  ;;  %v1275_v59 = vpop.f32.mrf.mxu1 }
  0xfc   :  { %v273_v38 = vpop.f32.mrf.mxu0 }
  0xfd   :  { %1304 = vmatprep.mubr.bf16.mxu1 %v455_v36  ;;  %v447_v44 = vmul.f32 %v418_v13, %v273_v38  ;;  %v672_v60 = vpop.f32.mrf.mxu1 }
  0xfe   :  { %v1247_v39 = vpop.f32.mrf.mxu0  ;;  %1305 = vmatmul.mubr.bf16.vlgmr.msra.gmra.mxu1 %v456_v37 }
  0xff   :  { %v450_v41 = vmul.f32 %v1247_v39, %v433_v40  ;;  %v1278_v0 = vpop.f32.mrf.mxu1 }
 0x100   :  { %v276_v42 = vpop.f32.mrf.mxu0 }
 0x101   :  { %v448_v45 = vmul.f32 %v423_v8, %v276_v42  ;;  %v458_v48 = vpack.c.bf16 %v450_v41, %v449_v46  ;;  %v685_v8 = vpop.f32.mrf.mxu1 }
 0x103   :  { %v457_v47 = vpack.c.bf16 %v448_v45, %v447_v44  ;;  %v1279_v16 = vpop.f32.mrf.mxu1 }
 0x105   :  { %1308 = vmatprep.mubr.bf16.mxu1 %v457_v47  ;;  %v688_v24 = vpop.f32.mrf.mxu1 }
 0x106   :  { %1309 = vmatmul.mubr.bf16.gmra.mxu1 %v458_v48 }
 0x1ae   :  { %v1298_v61 = vpop.f32.mrf.mxu0 }
 0x1af   :  { %v791_v63 = vadd.f32 %v1298_v61, %v1266_v49 }
 0x1b0   :  { %v782_v1 = vpop.f32.mrf.mxu0 }
 0x1b1   :  { %v1624_v2 = vadd.f32 %v1621_v62, %v791_v63  ;;  %v783_v3 = vadd.f32 %v782_v1, %v637_v50 }
 0x1b2   :  { %v1299_v4 = vpop.f32.mrf.mxu0 }
 0x1b3   :  { %v1627_v5 = vadd.f32 %v1621_v62, %v783_v3  ;;  %v794_v6 = vadd.f32 %v1299_v4, %v1267_v51  ;;  %v870_v7 = vmul.f32 %v1624_v2, %v1624_v2 }
 0x1b4   :  { %v785_v9 = vpop.f32.mrf.mxu0 }
 0x1b5   :  { %v786_v10 = vadd.f32 %v785_v9, %v640_v52  ;;  %888 = vadd.xlane.f32.xlu0 %v870_v7  ;;  %v1632_v12 = vadd.f32 %v1621_v62, %v794_v6  ;;  %v868_v15 = vmul.f32 %v1627_v5, %v1627_v5 }
 0x1b6   :  { %v1302_v11 = vpop.f32.mrf.mxu0 }
 0x1b7   :  { %v1635_v13 = vadd.f32 %v1621_v62, %v786_v10  ;;  %v807_v14 = vadd.f32 %v1302_v11, %v1270_v53  ;;  %v871_v23 = vmul.f32 %v1632_v12, %v1632_v12 }
 0x1b8   :  { %v798_v17 = vpop.f32.mrf.mxu0 }
 0x1b9   :  { %v1640_v18 = vadd.f32 %v1621_v62, %v807_v14  ;;  %v799_v19 = vadd.f32 %v798_v17, %v653_v54  ;;  %884 = vadd.xlane.f32.xlu0 %v868_v15  ;;  %v869_v20 = vmul.f32 %v1635_v13, %v1635_v13 }
 0x1ba   :  { %v1303_v21 = vpop.f32.mrf.mxu0 }
 0x1bb   :  { %v810_v22 = vadd.f32 %v1303_v21, %v1271_v55  ;;  %886 = vadd.xlane.f32.xlu1 %v869_v20  ;;  %v1647_v26 = vadd.f32 %v1621_v62, %v799_v19  ;;  %v874_v29 = vmul.f32 %v1640_v18, %v1640_v18 }
 0x1bc   :  { %v801_v25 = vpop.f32.mrf.mxu0 }
 0x1bd   :  { %v1650_v27 = vadd.f32 %v1621_v62, %v810_v22  ;;  %v802_v28 = vadd.f32 %v801_v25, %v656_v56  ;;  %890 = vadd.xlane.f32.xlu0 %v871_v23  ;;  %v872_v37 = vmul.f32 %v1647_v26, %v1647_v26 }
 0x1be   :  { %v1306_v30 = vpop.f32.mrf.mxu1 }
 0x1bf   :  { %v1655_v31 = vadd.f32 %v1621_v62, %v802_v28  ;;  %v823_v32 = vadd.f32 %v1306_v30, %v1274_v57  ;;  %896 = vadd.xlane.f32.xlu1 %v874_v29  ;;  %v875_v33 = vmul.f32 %v1650_v27, %v1650_v27 }
 0x1c0   :  { %v814_v34 = vpop.f32.mrf.mxu1 }
 0x1c1   :  { %v1660_v35 = vadd.f32 %v1621_v62, %v823_v32  ;;  %v815_v36 = vadd.f32 %v814_v34, %v669_v58  ;;  %898 = vadd.xlane.f32.xlu0 %v875_v33  ;;  %v873_v40 = vmul.f32 %v1655_v31, %v1655_v31 }
 0x1c2   :  { %v1307_v38 = vpop.f32.mrf.mxu1 }
 0x1c3   :  { %v826_v39 = vadd.f32 %v1307_v38, %v1275_v59  ;;  %892 = vadd.xlane.f32.xlu1 %v872_v37  ;;  %v1667_v42 = vadd.f32 %v1621_v62, %v815_v36  ;;  %v878_v45 = vmul.f32 %v1660_v35, %v1660_v35 }
 0x1c4   :  { %v817_v41 = vpop.f32.mrf.mxu1 }
 0x1c5   :  { %v1670_v43 = vadd.f32 %v1621_v62, %v826_v39  ;;  %v818_v44 = vadd.f32 %v817_v41, %v672_v60  ;;  %894 = vadd.xlane.f32.xlu0 %v873_v40  ;;  %v876_v52 = vmul.f32 %v1667_v42, %v1667_v42 }
 0x1c6   :  { %v1310_v46 = vpop.f32.mrf.mxu1 }
 0x1c7   :  { %v1675_v47 = vadd.f32 %v1621_v62, %v818_v44  ;;  %904 = vadd.xlane.f32.xlu1 %v878_v45  ;;  %v879_v48 = vmul.f32 %v1670_v43, %v1670_v43  ;;  %v839_v50 = vadd.f32 %v1310_v46, %v1278_v0 }
 0x1c8   :  { %v830_v49 = vpop.f32.mrf.mxu1 }
 0x1c9   :  { %v831_v51 = vadd.f32 %v830_v49, %v685_v8  ;;  %906 = vadd.xlane.f32.xlu0 %v879_v48  ;;  %v877_v55 = vmul.f32 %v1675_v47, %v1675_v47  ;;  %v1687_v57 = vadd.f32 %v1621_v62, %v839_v50 }
 0x1ca   :  { %v1311_v53 = vpop.f32.mrf.mxu1 }
 0x1cb   :  { %v1682_v54 = vadd.f32 %v1621_v62, %v831_v51  ;;  %900 = vadd.xlane.f32.xlu1 %v876_v52  ;;  %v842_v58 = vadd.f32 %v1311_v53, %v1279_v16  ;;  %v882_v1 = vmul.f32 %v1687_v57, %v1687_v57 }
 0x1cc   :  { %v833_v56 = vpop.f32.mrf.mxu1 }
 0x1cd   :  { %v834_v59 = vadd.f32 %v833_v56, %v688_v24  ;;  %902 = vadd.xlane.f32.xlu0 %v877_v55  ;;  %v880_v60 = vmul.f32 %v1682_v54, %v1682_v54  ;;  %v1695_v63 = vadd.f32 %v1621_v62, %v842_v58 }
 0x1cf   :  { %v1692_v61 = vadd.f32 %v1621_v62, %v834_v59  ;;  %908 = vadd.xlane.f32.xlu1 %v880_v60  ;;  %v883_v3 = vmul.f32 %v1695_v63, %v1695_v63 }
 0x1d1   :  { %v881_v0 = vmul.f32 %v1692_v61, %v1692_v61 }
 0x1d3   :  { %910 = vadd.xlane.f32.xlu0 %v881_v0  ;;  %912 = vadd.xlane.f32.xlu1 %v882_v1 }
 0x1d7   :  { %914 = vadd.xlane.f32.xlu0 %v883_v3 }
 0x23e   :  { %v889_v4 = vpop.xlane.xlu0 %888 }
 0x23f   :  { %v918_v6 = vmax.f32 %v889_v4, 1e-24 }
 0x242   :  { %v885_v7 = vpop.xlane.xlu0 %884 }
 0x243   :  { %v916_v8 = vmax.f32 %v885_v7, 1e-24 }
 0x244   :  { %v887_v9 = vpop.xlane.xlu1 %886 }
 0x245   :  { %1371 = vrsqrt.f32 %v916_v8  ;;  %v917_v62 = vmax.f32 %v887_v9, 1e-24 }
 0x246   :  { %1373 = vrsqrt.f32 %v918_v6  ;;  %v891_v10 = vpop.xlane.xlu0 %890 }
 0x247   :  { %1375 = vrsqrt.f32 %v917_v62  ;;  %v919_v11 = vmax.f32 %v891_v10, 1e-24 }
 0x248   :  { %v897_v14 = vpop.xlane.xlu1 %896 }
 0x249   :  { %1377 = vrsqrt.f32 %v919_v11  ;;  %v922_v15 = vmax.f32 %v897_v14, 1e-24 }
 0x24a   :  { %v899_v16 = vpop.xlane.xlu0 %898 }
 0x24b   :  { %1379 = vrsqrt.f32 %v922_v15  ;;  %v923_v17 = vmax.f32 %v899_v16, 1e-24 }
 0x24c   :  { %v893_v19 = vpop.xlane.xlu1 %892 }
 0x24d   :  { %1381 = vrsqrt.f32 %v923_v17  ;;  %v920_v20 = vmax.f32 %v893_v19, 1e-24 }
 0x24e   :  { %v895_v21 = vpop.xlane.xlu0 %894 }
 0x24f   :  { %1383 = vrsqrt.f32 %v920_v20  ;;  %v921_v22 = vmax.f32 %v895_v21, 1e-24 }
 0x250   :  { %v905_v23 = vpop.xlane.xlu1 %904 }
 0x251   :  { %1385 = vrsqrt.f32 %v921_v22  ;;  %v926_v24 = vmax.f32 %v905_v23, 1e-24 }
 0x252   :  { %v1372_v25 = vpop.eup %1371  ;;  %v907_v28 = vpop.xlane.xlu0 %906 }
 0x253   :  { %v1374_v29 = vpop.eup %1373  ;;  %1387 = vrsqrt.f32 %v926_v24  ;;  %v927_v30 = vmax.f32 %v907_v28, 1e-24  ;;  %v948_v34 = vmul.f32 %v1372_v25, %v1627_v5 }
 0x254   :  { %v1376_v32 = vpop.eup %1375  ;;  %v901_v33 = vpop.xlane.xlu1 %900  ;;  %v950_v39 = vmul.f32 %v1374_v29, %v1624_v2 }
 0x255   :  { %v949_v36 = vmul.f32 %v1376_v32, %v1635_v13  ;;  %1389 = vrsqrt.f32 %v927_v30  ;;  %v924_v37 = vmax.f32 %v901_v33, 1e-24 }
 0x256   :  { %v1378_v38 = vpop.eup %1377  ;;  %v903_v40 = vpop.xlane.xlu0 %902 }
 0x257   :  { %v1124_v41 = vpack.c.bf16 %v949_v36, %v948_v34  ;;  %v951_v44 = vmul.f32 %v1378_v38, %v1632_v12  ;;  %1391 = vrsqrt.f32 %v924_v37  ;;  %v925_v45 = vmax.f32 %v903_v40, 1e-24 }
 0x258   :  { %v1380_v46 = vpop.eup %1379  ;;  %v909_v48 = vpop.xlane.xlu1 %908 }
 0x259   :  { %1125 = vst [vmem:[%s1750_s7] sm:$0xff] %v1124_v41   ;;  %v1129_v5 = vpack.c.bf16 %v951_v44, %v950_v39  ;;  %1393 = vrsqrt.f32 %v925_v45  ;;  %v928_v13 = vmax.f32 %v909_v48, 1e-24  ;;  %v954_v2 = vmul.f32 %v1380_v46, %v1640_v18 }
 0x25a   :  { %v1382_v49 = vpop.eup %1381 }
 0x25b   :  { %1161 = vst [vmem:[%s1750_s7 + $0x8] sm:$0xff] %v1129_v5   ;;  %v955_v12 = vmul.f32 %v1382_v49, %v1650_v27  ;;  %1395 = vrsqrt.f32 %v928_v13 }
 0x25c   :  { %v1384_v50 = vpop.eup %1383  ;;  %v911_v51 = vpop.xlane.xlu0 %910 }
 0x25d   :  { %v913_v52 = vpop.xlane.xlu1 %912  ;;  %v1139_v53 = vpack.c.bf16 %v955_v12, %v954_v2  ;;  %v929_v55 = vmax.f32 %v911_v51, 1e-24  ;;  %v952_v59 = vmul.f32 %v1384_v50, %v1647_v26 }
 0x25e   :  { %v930_v56 = vmax.f32 %v913_v52, 1e-24  ;;  %v1386_v58 = vpop.eup %1385 }
 0x25f   :  { %1163 = vst [vmem:[%s1750_s7 + $0x18] sm:$0xff] %v1139_v53   ;;  %v953_v60 = vmul.f32 %v1386_v58, %v1655_v31  ;;  %1397 = vrsqrt.f32 %v929_v55 }
 0x260   :  { %v1388_v18 = vpop.eup %1387  ;;  %v915_v0 = vpop.xlane.xlu0 %914  ;;  %1399 = vrsqrt.f32 %v930_v56 }
 0x261   :  { %v1134_v27 = vpack.c.bf16 %v953_v60, %v952_v59  ;;  %v931_v1 = vmax.f32 %v915_v0, 1e-24  ;;  %v958_v4 = vmul.f32 %v1388_v18, %v1660_v35 }
 0x262   :  { %v1390_v3 = vpop.eup %1389 }
 0x263   :  { %1162 = vst [vmem:[%s1750_s7 + $0x10] sm:$0xff] %v1134_v27   ;;  %v959_v6 = vmul.f32 %v1390_v3, %v1670_v43  ;;  %1401 = vrsqrt.f32 %v931_v1 }
 0x264   :  { %v1392_v7 = vpop.eup %1391 }
 0x265   :  { %v1149_v26 = vpack.c.bf16 %v959_v6, %v958_v4  ;;  %v956_v31 = vmul.f32 %v1392_v7, %v1667_v42 }
 0x266   :  { %v1394_v8 = vpop.eup %1393 }
 0x267   :  { %1165 = vst [vmem:[%s1750_s7 + $0x28] sm:$0xff] %v1149_v26   ;;  %v957_v9 = vmul.f32 %v1394_v8, %v1675_v47 }
 0x268   :  { %v1396_v10 = vpop.eup %1395 }
 0x269   :  { %v1144_v62 = vpack.c.bf16 %v957_v9, %v956_v31  ;;  %v960_v43 = vmul.f32 %v1396_v10, %v1682_v54 }
 0x26b   :  { %1164 = vst [vmem:[%s1750_s7 + $0x20] sm:$0xff] %v1144_v62  }
 0x26c   :  { %v1398_v35 = vpop.eup %1397 }
 0x26d   :  { %v961_v11 = vmul.f32 %v1398_v35, %v1692_v61  ;;  %v1400_v14 = vpop.eup %1399 }
 0x26e   :  { %v962_v42 = vmul.f32 %v1400_v14, %v1687_v57 }
 0x26f   :  { %v1154_v15 = vpack.c.bf16 %v961_v11, %v960_v43 }
 0x270   :  { %v1402_v16 = vpop.eup %1401 }
 0x271   :  { %1166 = vst [vmem:[%s1750_s7 + $0x30] sm:$0xff] %v1154_v15   ;;  %v963_v47 = vmul.f32 %v1402_v16, %v1695_v63 }
 0x273   :  { %v1159_v17 = vpack.c.bf16 %v963_v47, %v962_v42 }
 0x275   :  { %1167 = vst [vmem:[%s1750_s7 + $0x38] sm:$0xff] %v1159_v17  }

// kernel: mesh_autoencoder_forward.19
= control target key start
LH: loop header
LB: loop body
LE: loop exit
PB: predicated region body
PF: predicated region fallthrough
CT: control target
= control target key end

     0   :  { %v1976_v1 = vmov 0   ;;  %s2795_s1 = inlined_call_operand.vmem [shape: bf16[128,256], index: 1, kind: input, shape index: {}]   ;;  %s2796_s0 = inlined_call_operand.vmem [shape: bf16[128,128], index: 0, kind: input, shape index: {}]   ;;  %s2797_s3 = inlined_call_operand.vmem [shape: f32[128,1], index: 3, kind: input, shape index: {}]   ;;  %s2798_s5 = inlined_call_operand.vmem [shape: bf16[256,256], index: 5, kind: input, shape index: {}]   ;;  %s2799_s4 = inlined_call_operand.vmem [shape: bf16[256,256], index: 4, kind: input, shape index: {}]   ;;  %s2800_s2 = inlined_call_operand.vmem [shape: bf16[128,256], index: 2, kind: input, shape index: {}]   ;;  %s2801_s6 = inlined_call_operand.vmem [shape: f32[1,256], index: 6, kind: input, shape index: {}]   ;;  %s2802_s7 = inlined_call_operand.vmem [shape: bf16[128,256], index: 7, kind: output, shape index: {}]  }
   0x1   :  { %v1792_v0 = vld [vmem:[%s2795_s1 + $0x74] ss:$8 sps:$4 sm:$0xff]   ;;  %287 = vmatprep.mubr.bf16.mxu0 %v1976_v1  ;;  %1790 = vset.pattern.permute.xlu0 %v1976_v1  ;;  %v1794_v2 = vld [vmem:[%s2795_s1 + $0x70] ss:$8 sps:$4 sm:$0xff]   ;;  %v1795_v3 = vld [vmem:[%s2795_s1 + $0x64] ss:$8 sps:$4 sm:$0xff]  }
   0x2   :  { %1791 = vset.pattern.permute.xlu1 %v1976_v1  ;;  %255 = vmatprep.subr.bf16.mxu0 %v1792_v0  ;;  %v1797_v4 = vld [vmem:[%s2795_s1 + $0x60] ss:$8 sps:$4 sm:$0xff]   ;;  %v1798_v5 = vld [vmem:[%s2795_s1 + $0x54] ss:$8 sps:$4 sm:$0xff]   ;;  %v1800_v6 = vld [vmem:[%s2795_s1 + $0x50] ss:$8 sps:$4 sm:$0xff]  }
   0x3   :  { %256 = vmatpush1.bf16.msra.mxu0 %v1794_v2  ;;  %v1801_v7 = vld [vmem:[%s2795_s1 + $0x44] ss:$8 sps:$4 sm:$0xff]   ;;  %v1803_v8 = vld [vmem:[%s2795_s1 + $0x40] ss:$8 sps:$4 sm:$0xff]   ;;  %v1804_v9 = vld [vmem:[%s2795_s1 + $0x34] ss:$8 sps:$4 sm:$0xff]  }
   0x4   :  { %257 = vmatprep.subr.bf16.mxu0 %v1795_v3  ;;  %v1806_v10 = vld [vmem:[%s2795_s1 + $0x30] ss:$8 sps:$4 sm:$0xff]   ;;  %v1807_v11 = vld [vmem:[%s2795_s1 + $0x24] ss:$8 sps:$4 sm:$0xff]   ;;  %v1809_v13 = vld [vmem:[%s2795_s1 + $0x20] ss:$8 sps:$4 sm:$0xff]  }
   0x5   :  { %v467_v12 = vld [vmem:[%s2797_s3] sm:$0xff]  ;;  %v468_v14 = vld [vmem:[%s2797_s3 + $0x8] sm:$0xff]  ;;  %v469_v15 = vld [vmem:[%s2797_s3 + $0x10] sm:$0xff] }
   0x6   :  { %485 = vperm.xlu0 %1790, %v467_v12   ;;  %v1810_v16 = vld [vmem:[%s2795_s1 + $0x14] ss:$8 sps:$4 sm:$0xff]   ;;  %495 = vperm.xlu1 %1791, %v469_v15   ;;  %v1812_v18 = vld [vmem:[%s2795_s1 + $0x10] ss:$8 sps:$4 sm:$0xff]   ;;  %v1813_v19 = vld [vmem:[%s2795_s1 + $0x4] ss:$8 sps:$4 sm:$0xff]  }
   0x7   :  { %258 = vmatpush1.bf16.msra.mxu0 %v1797_v4  ;;  %v470_v17 = vld [vmem:[%s2797_s3 + $0x18] sm:$0xff]  ;;  %v471_v20 = vld [vmem:[%s2797_s3 + $0x20] sm:$0xff]  ;;  %v472_v21 = vld [vmem:[%s2797_s3 + $0x28] sm:$0xff] }
   0x8   :  { %259 = vmatprep.subr.bf16.mxu0 %v1798_v5  ;;  %v1824_v22 = vld [vmem:[%s2798_s5 + $0x74] ss:$8 sps:$4 sm:$0xff]   ;;  %v1826_v23 = vld [vmem:[%s2798_s5 + $0x70] ss:$8 sps:$4 sm:$0xff]   ;;  %v1815_v24 = vld [vmem:[%s2795_s1] ss:$8 sps:$4 sm:$0xff]  }
   0x9   :  { %931 = vmatprep.subr.bf16.mxu1 %v1824_v22  ;;  %v1827_v25 = vld [vmem:[%s2798_s5 + $0x64] ss:$8 sps:$4 sm:$0xff]   ;;  %v473_v26 = vld [vmem:[%s2797_s3 + $0x30] sm:$0xff]  ;;  %v1829_v27 = vld [vmem:[%s2798_s5 + $0x60] ss:$8 sps:$4 sm:$0xff]  }
   0xa   :  { %490 = vperm.xlu0 %1790, %v468_v14   ;;  %500 = vperm.xlu1 %1791, %v470_v17   ;;  %v1830_v28 = vld [vmem:[%s2798_s5 + $0x54] ss:$8 sps:$4 sm:$0xff]   ;;  %v1816_v30 = vld [vmem:[%s2796_s0] sm:$0xff]   ;;  %v476_v32 = vld [vmem:[%s2797_s3 + $0x48] sm:$0xff] }
   0xb   :  { %260 = vmatpush1.bf16.msra.mxu0 %v1800_v6  ;;  %932 = vmatpush1.bf16.msra.mxu1 %v1826_v23  ;;  %v474_v29 = vld [vmem:[%s2797_s3 + $0x38] sm:$0xff]  ;;  %v475_v31 = vld [vmem:[%s2797_s3 + $0x40] sm:$0xff]  ;;  %v480_v41 = vld [vmem:[%s2797_s3 + $0x68] sm:$0xff] }
   0xc   :  { %261 = vmatprep.subr.bf16.mxu0 %v1801_v7  ;;  %933 = vmatprep.subr.bf16.mxu1 %v1827_v25  ;;  %v1832_v33 = vld [vmem:[%s2798_s5 + $0x50] ss:$8 sps:$4 sm:$0xff]   ;;  %v1833_v34 = vld [vmem:[%s2798_s5 + $0x44] ss:$8 sps:$4 sm:$0xff]   ;;  %v2125_v35 = vld [vmem:[%s2799_s4 + $0x74] ss:$8 sps:$4 sm:$0xff]  }
   0xd   :  { %v479_v36 = vld [vmem:[%s2797_s3 + $0x60] sm:$0xff]  ;;  %v2133_v37 = vld [vmem:[%s2799_s4 + $0x70] ss:$8 sps:$4 sm:$0xff]   ;;  %v1836_v40 = vld [vmem:[%s2798_s5 + $0x34] ss:$8 sps:$4 sm:$0xff]  }
   0xe   :  { %505 = vperm.xlu0 %1790, %v471_v20   ;;  %510 = vperm.xlu1 %1791, %v472_v21   ;;  %v1835_v38 = vld [vmem:[%s2798_s5 + $0x40] ss:$8 sps:$4 sm:$0xff]   ;;  %v2142_v39 = vld [vmem:[%s2799_s4 + $0x64] ss:$8 sps:$4 sm:$0xff]   ;;  %v477_v43 = vld [vmem:[%s2797_s3 + $0x50] sm:$0xff] }
   0xf   :  { %262 = vmatpush1.bf16.msra.mxu0 %v1803_v8  ;;  %934 = vmatpush1.bf16.msra.mxu1 %v1829_v27  ;;  %v1817_v42 = vld [vmem:[%s2796_s0 + $0x8] sm:$0xff]   ;;  %v478_v44 = vld [vmem:[%s2797_s3 + $0x58] sm:$0xff]  ;;  %v481_v48 = vld [vmem:[%s2797_s3 + $0x70] sm:$0xff] }
  0x10   :  { %263 = vmatprep.subr.bf16.mxu0 %v1804_v9  ;;  %935 = vmatprep.subr.bf16.mxu1 %v1830_v28  ;;  %v1838_v45 = vld [vmem:[%s2798_s5 + $0x30] ss:$8 sps:$4 sm:$0xff]   ;;  %v1839_v46 = vld [vmem:[%s2798_s5 + $0x24] ss:$8 sps:$4 sm:$0xff]   ;;  %v2171_v47 = vld [vmem:[%s2799_s4 + $0x60] ss:$8 sps:$4 sm:$0xff]  }
  0x11   :  { %v2179_v49 = vld [vmem:[%s2799_s4 + $0x54] ss:$8 sps:$4 sm:$0xff]   ;;  %v1841_v51 = vld [vmem:[%s2798_s5 + $0x20] ss:$8 sps:$4 sm:$0xff]   ;;  %v2195_v53 = vld [vmem:[%s2799_s4 + $0x50] ss:$8 sps:$4 sm:$0xff]  }
  0x12   :  { %515 = vperm.xlu0 %1790, %v473_v26   ;;  %520 = vperm.xlu1 %1791, %v474_v29   ;;  %v482_v50 = vld [vmem:[%s2797_s3 + $0x78] sm:$0xff]  ;;  %v1818_v54 = vld [vmem:[%s2796_s0 + $0x10] sm:$0xff]   ;;  %v2204_v55 = vld [vmem:[%s2799_s4 + $0x44] ss:$8 sps:$4 sm:$0xff]  }
  0x13   :  { %264 = vmatpush1.bf16.msra.mxu0 %v1806_v10  ;;  %936 = vmatpush1.bf16.msra.mxu1 %v1832_v33  ;;  %v1845_v52 = vld [vmem:[%s2798_s5 + $0x14] ss:$8 sps:$4 sm:$0xff]   ;;  %v1847_v56 = vld [vmem:[%s2798_s5 + $0x10] ss:$8 sps:$4 sm:$0xff]   ;;  %v1851_v57 = vld [vmem:[%s2798_s5 + $0x4] ss:$8 sps:$4 sm:$0xff]  }
  0x14   :  { %265 = vmatprep.subr.bf16.mxu0 %v1807_v11  ;;  %937 = vmatprep.subr.bf16.mxu1 %v1833_v34  ;;  %v2216_v58 = vld [vmem:[%s2799_s4 + $0x40] ss:$8 sps:$4 sm:$0xff]   ;;  %v2222_v59 = vld [vmem:[%s2799_s4 + $0x34] ss:$8 sps:$4 sm:$0xff]   ;;  %v2235_v62 = vld [vmem:[%s2799_s4 + $0x30] ss:$8 sps:$4 sm:$0xff]  }
  0x15   :  { %v1853_v60 = vld [vmem:[%s2798_s5] ss:$8 sps:$4 sm:$0xff]   ;;  %v1857_v61 = vld [vmem:[%s2798_s5 + $0xf4] ss:$8 sps:$4 sm:$0xff]   ;;  %v2244_v0 = vld [vmem:[%s2799_s4 + $0x24] ss:$8 sps:$4 sm:$0xff]  }
  0x16   :  { %525 = vperm.xlu0 %1790, %v475_v31   ;;  %530 = vperm.xlu1 %1791, %v476_v32   ;;  %v1819_v63 = vld [vmem:[%s2796_s0 + $0x18] sm:$0xff]   ;;  %v1863_v3 = vld [vmem:[%s2798_s5 + $0xe4] ss:$8 sps:$4 sm:$0xff]   ;;  %v2256_v4 = vld [vmem:[%s2799_s4 + $0x20] ss:$8 sps:$4 sm:$0xff]  }
  0x17   :  { %266 = vmatpush1.bf16.msra.mxu0 %v1809_v13  ;;  %938 = vmatpush1.bf16.msra.mxu1 %v1835_v38  ;;  %v1859_v2 = vld [vmem:[%s2798_s5 + $0xf0] ss:$8 sps:$4 sm:$0xff]   ;;  %v2262_v5 = vld [vmem:[%s2799_s4 + $0x14] ss:$8 sps:$4 sm:$0xff]   ;;  %v1865_v6 = vld [vmem:[%s2798_s5 + $0xe0] ss:$8 sps:$4 sm:$0xff]  }
  0x18   :  { %267 = vmatprep.subr.bf16.mxu0 %v1810_v16  ;;  %939 = vmatprep.subr.bf16.mxu1 %v1836_v40  ;;  %v1869_v7 = vld [vmem:[%s2798_s5 + $0xd4] ss:$8 sps:$4 sm:$0xff]   ;;  %v2274_v8 = vld [vmem:[%s2799_s4 + $0x10] ss:$8 sps:$4 sm:$0xff]   ;;  %v1907_v9 = vld [vmem:[%s2800_s2 + $0x4] ss:$8 sps:$4 sm:$0xff]  }
  0x19   :  { %v1820_v10 = vld [vmem:[%s2796_s0 + $0x20] sm:$0xff]   ;;  %v1871_v12 = vld [vmem:[%s2798_s5 + $0xd0] ss:$8 sps:$4 sm:$0xff]   ;;  %963 = vmatprep.mubr.bf16.mxu1 %v1907_v9  ;;  %v2307_v16 = vld [vmem:[%s2799_s4 + $0xf4] ss:$8 sps:$4 sm:$0xff]  }
  0x1a   :  { %545 = vperm.xlu0 %1790, %v479_v36   ;;  %550 = vperm.xlu1 %1791, %v480_v41   ;;  %v2287_v11 = vld [vmem:[%s2799_s4 + $0x4] ss:$8 sps:$4 sm:$0xff]   ;;  %v2298_v14 = vld [vmem:[%s2799_s4] ss:$8 sps:$4 sm:$0xff]   ;;  %v1881_v17 = vld [vmem:[%s2798_s5 + $0xb4] ss:$8 sps:$4 sm:$0xff]  }
  0x1b   :  { %268 = vmatpush1.bf16.msra.mxu0 %v1812_v18  ;;  %940 = vmatpush1.bf16.msra.mxu1 %v1838_v45  ;;  %v1875_v13 = vld [vmem:[%s2798_s5 + $0xc4] ss:$8 sps:$4 sm:$0xff]   ;;  %v1877_v15 = vld [vmem:[%s2798_s5 + $0xc0] ss:$8 sps:$4 sm:$0xff]   ;;  %v2317_v18 = vld [vmem:[%s2799_s4 + $0xf0] ss:$8 sps:$4 sm:$0xff]  }
  0x1c   :  { %269 = vmatprep.subr.bf16.mxu0 %v1813_v19  ;;  %941 = vmatprep.subr.bf16.mxu1 %v1839_v46  ;;  %v1821_v19 = vld [vmem:[%s2796_s0 + $0x28] sm:$0xff]   ;;  %v1883_v21 = vld [vmem:[%s2798_s5 + $0xb0] ss:$8 sps:$4 sm:$0xff]   ;;  %v1893_v26 = vld [vmem:[%s2798_s5 + $0x94] ss:$8 sps:$4 sm:$0xff]  }
  0x1d   :  { %v2325_v20 = vld [vmem:[%s2799_s4 + $0xe4] ss:$8 sps:$4 sm:$0xff]   ;;  %v2339_v23 = vld [vmem:[%s2799_s4 + $0xe0] ss:$8 sps:$4 sm:$0xff]   ;;  %v2358_v27 = vld [vmem:[%s2799_s4 + $0xd0] ss:$8 sps:$4 sm:$0xff]  }
  0x1e   :  { %535 = vperm.xlu0 %1790, %v477_v43   ;;  %540 = vperm.xlu1 %1791, %v478_v44   ;;  %v1887_v22 = vld [vmem:[%s2798_s5 + $0xa4] ss:$8 sps:$4 sm:$0xff]   ;;  %v1889_v25 = vld [vmem:[%s2798_s5 + $0xa0] ss:$8 sps:$4 sm:$0xff]   ;;  %v1822_v28 = vld [vmem:[%s2796_s0 + $0x30] sm:$0xff]  }
  0x1f   :  { %270 = vmatpush1.bf16.msra.mxu0 %v1815_v24  ;;  %942 = vmatpush1.bf16.msra.mxu1 %v1841_v51  ;;  %v2345_v24 = vld [vmem:[%s2799_s4 + $0xd4] ss:$8 sps:$4 sm:$0xff]   ;;  %v2367_v29 = vld [vmem:[%s2799_s4 + $0xc4] ss:$8 sps:$4 sm:$0xff]   ;;  %v2379_v32 = vld [vmem:[%s2799_s4 + $0xc0] ss:$8 sps:$4 sm:$0xff]  }
  0x20   :  { %1204 = vmatprep.subr.bf16.mxu0 %v2125_v35  ;;  %943 = vmatprep.subr.bf16.mxu1 %v1845_v52  ;;  %v1899_v31 = vld [vmem:[%s2798_s5 + $0x84] ss:$8 sps:$4 sm:$0xff]   ;;  %v2385_v33 = vld [vmem:[%s2799_s4 + $0xb4] ss:$8 sps:$4 sm:$0xff]   ;;  %v1901_v34 = vld [vmem:[%s2798_s5 + $0x80] ss:$8 sps:$4 sm:$0xff]  }
  0x21   :  { %v2395_v36 = vld [vmem:[%s2799_s4 + $0xb0] ss:$8 sps:$4 sm:$0xff]   ;;  %v1914_v40 = vld [vmem:[%s2800_s2 + $0x14] ss:$8 sps:$4 sm:$0xff]   ;;  %v1923_v43 = vld [vmem:[%s2800_s2 + $0x24] ss:$8 sps:$4 sm:$0xff]  }
  0x22   :  { %288 = vmatmul.mubr.bf16.vlgmr.msra.gmra.mxu0 %v1816_v30  ;;  %555 = vperm.xlu0 %1790, %v481_v48   ;;  %v1895_v30 = vld [vmem:[%s2798_s5 + $0x90] ss:$8 sps:$4 sm:$0xff]   ;;  %v1925_v44 = vld [vmem:[%s2800_s2 + $0x20] ss:$8 sps:$4 sm:$0xff]   ;;  %v1928_v45 = vld [vmem:[%s2799_s4 + $0x84] ss:$8 sps:$4 sm:$0xff]  }
  0x23   :  { %297 = vmatprep.mubr.bf16.mxu0 %v1976_v1  ;;  %1205 = vmatpush1.bf16.msra.mxu0 %v2133_v37  ;;  %v1823_v38 = vld [vmem:[%s2796_s0 + $0x38] sm:$0xff]   ;;  %v1926_v46 = vld [vmem:[%s2799_s4 + $0x80] ss:$8 sps:$4 sm:$0xff]  }
  0x24   :  { %1206 = vmatprep.subr.bf16.mxu0 %v2142_v39  ;;  %560 = vperm.xlu1 %1791, %v482_v50   ;;  %v1916_v41 = vld [vmem:[%s2800_s2 + $0x10] ss:$8 sps:$4 sm:$0xff]   ;;  %v1934_v50 = vld [vmem:[%s2800_s2 + $0x40] ss:$8 sps:$4 sm:$0xff]   ;;  %v1935_v51 = vld [vmem:[%s2800_s2 + $0x54] ss:$8 sps:$4 sm:$0xff]  }
  0x25   :  { %944 = vmatpush1.bf16.msra.mxu1 %v1847_v56  ;;  %v1931_v48 = vld [vmem:[%s2800_s2 + $0x30] ss:$8 sps:$4 sm:$0xff]  }
  0x26   :  { %945 = vmatprep.subr.bf16.mxu1 %v1851_v57  ;;  %v1937_v52 = vld [vmem:[%s2800_s2 + $0x50] ss:$8 sps:$4 sm:$0xff]  }
  0x27   :  { %1207 = vmatpush1.bf16.msra.mxu0 %v2171_v47  ;;  %v1943_v56 = vld [vmem:[%s2800_s2 + $0x70] ss:$8 sps:$4 sm:$0xff]  }
  0x28   :  { %1208 = vmatprep.subr.bf16.mxu0 %v2179_v49 }
  0x29   :  { %946 = vmatpush1.bf16.msra.mxu1 %v1853_v60 }
  0x2a   :  { %298 = vmatmul.mubr.bf16.gmra.mxu0 %v1817_v42  ;;  %947 = vmatprep.subr.bf16.mxu1 %v1857_v61  ;;  %v1919_v42 = vld [vmem:[%s2799_s4 + $0xa4] ss:$8 sps:$4 sm:$0xff]  }
  0x2b   :  { %307 = vmatprep.mubr.bf16.mxu0 %v1976_v1  ;;  %1209 = vmatpush1.bf16.msra.mxu0 %v2195_v53 }
  0x2c   :  { %1210 = vmatprep.subr.bf16.mxu0 %v2204_v55 }
  0x2d   :  { %948 = vmatpush2.bf16.msra.mxu1 %v1859_v2 }
  0x2e   :  { %949 = vmatprep.subr.bf16.mxu1 %v1863_v3 }
  0x2f   :  { %1211 = vmatpush1.bf16.msra.mxu0 %v2216_v58 }
  0x30   :  { %1212 = vmatprep.subr.bf16.mxu0 %v2222_v59 }
  0x31   :  { %950 = vmatpush2.bf16.msra.mxu1 %v1865_v6 }
  0x32   :  { %308 = vmatmul.mubr.bf16.gmra.mxu0 %v1818_v54  ;;  %951 = vmatprep.subr.bf16.mxu1 %v1869_v7  ;;  %v1940_v54 = vld [vmem:[%s2800_s2 + $0x60] ss:$8 sps:$4 sm:$0xff]  }
  0x33   :  { %317 = vmatprep.mubr.bf16.mxu0 %v1976_v1  ;;  %1213 = vmatpush1.bf16.msra.mxu0 %v2235_v62 }
  0x34   :  { %1214 = vmatprep.subr.bf16.mxu0 %v2244_v0 }
  0x35   :  { %952 = vmatpush2.bf16.msra.mxu1 %v1871_v12 }
  0x36   :  { %953 = vmatprep.subr.bf16.mxu1 %v1875_v13 }
  0x37   :  { %1215 = vmatpush1.bf16.msra.mxu0 %v2256_v4 }
  0x38   :  { %1216 = vmatprep.subr.bf16.mxu0 %v2262_v5 }
  0x39   :  { %954 = vmatpush2.bf16.msra.mxu1 %v1877_v15 }
  0x3a   :  { %318 = vmatmul.mubr.bf16.gmra.mxu0 %v1819_v63  ;;  %955 = vmatprep.subr.bf16.mxu1 %v1881_v17 }
  0x3b   :  { %327 = vmatprep.mubr.bf16.mxu0 %v1976_v1  ;;  %1217 = vmatpush1.bf16.msra.mxu0 %v2274_v8 }
  0x3c   :  { %1218 = vmatprep.subr.bf16.mxu0 %v2287_v11 }
  0x3d   :  { %956 = vmatpush2.bf16.msra.mxu1 %v1883_v21 }
  0x3e   :  { %957 = vmatprep.subr.bf16.mxu1 %v1887_v22 }
  0x3f   :  { %1219 = vmatpush1.bf16.msra.mxu0 %v2298_v14 }
  0x40   :  { %1220 = vmatprep.subr.bf16.mxu0 %v2307_v16 }
  0x41   :  { %958 = vmatpush2.bf16.msra.mxu1 %v1889_v25 }
  0x42   :  { %328 = vmatmul.mubr.bf16.gmra.mxu0 %v1820_v10  ;;  %959 = vmatprep.subr.bf16.mxu1 %v1893_v26 }
  0x43   :  { %337 = vmatprep.mubr.bf16.mxu0 %v1976_v1  ;;  %1221 = vmatpush2.bf16.msra.mxu0 %v2317_v18 }
  0x44   :  { %1222 = vmatprep.subr.bf16.mxu0 %v2325_v20 }
  0x45   :  { %960 = vmatpush2.bf16.msra.mxu1 %v1895_v30 }
  0x46   :  { %961 = vmatprep.subr.bf16.mxu1 %v1899_v31 }
  0x47   :  { %1223 = vmatpush2.bf16.msra.mxu0 %v2339_v23 }
  0x48   :  { %1224 = vmatprep.subr.bf16.mxu0 %v2345_v24 }
  0x49   :  { %962 = vmatpush2.bf16.msra.mxu1 %v1901_v34 }
  0x4a   :  { %338 = vmatmul.mubr.bf16.gmra.mxu0 %v1821_v19  ;;  %1757 = vmatprep.subr.bf16.mxu1 %v2125_v35  ;;  %v1917_v35 = vld [vmem:[%s2799_s4 + $0xa0] ss:$8 sps:$4 sm:$0xff]  }
  0x4b   :  { %347 = vmatprep.mubr.bf16.mxu0 %v1976_v1  ;;  %1225 = vmatpush2.bf16.msra.mxu0 %v2358_v27 }
  0x4c   :  { %1226 = vmatprep.subr.bf16.mxu0 %v2367_v29 }
  0x4f   :  { %1227 = vmatpush2.bf16.msra.mxu0 %v2379_v32 }
  0x50   :  { %1228 = vmatprep.subr.bf16.mxu0 %v2385_v33 }
  0x52   :  { %348 = vmatmul.mubr.bf16.gmra.mxu0 %v1822_v28 }
  0x53   :  { %357 = vmatprep.mubr.bf16.mxu0 %v1976_v1  ;;  %v1905_v1 = vld [vmem:[%s2800_s2] ss:$8 sps:$4 sm:$0xff]   ;;  %1229 = vmatpush2.bf16.msra.mxu0 %v2395_v36 }
  0x54   :  { %964 = vmatmul.mubr.bf16.vlgmr.msra.gmra.mxu1 %v1905_v1  ;;  %1230 = vmatprep.subr.bf16.mxu0 %v1919_v42 }
  0x55   :  { %1773 = vmatpush1.bf16.msra.mxu1 %v2133_v37  ;;  %973 = vmatprep.mubr.bf16.mxu1 %v1914_v40  ;;  %v1922_v37 = vld [vmem:[%s2799_s4 + $0x94] ss:$8 sps:$4 sm:$0xff]  }
  0x56   :  { %1758 = vmatprep.subr.bf16.mxu1 %v2142_v39  ;;  %v1920_v39 = vld [vmem:[%s2799_s4 + $0x90] ss:$8 sps:$4 sm:$0xff]  }
  0x57   :  { %1231 = vmatpush2.bf16.msra.mxu0 %v1917_v35 }
  0x58   :  { %1232 = vmatprep.subr.bf16.mxu0 %v1922_v37 }
  0x59   :  { %1774 = vmatpush1.bf16.msra.mxu1 %v2171_v47  ;;  %v1929_v47 = vld [vmem:[%s2800_s2 + $0x34] ss:$8 sps:$4 sm:$0xff]  }
  0x5a   :  { %358 = vmatmul.mubr.bf16.gmra.mxu0 %v1823_v38  ;;  %1759 = vmatprep.subr.bf16.mxu1 %v2179_v49  ;;  %v1932_v49 = vld [vmem:[%s2800_s2 + $0x44] ss:$8 sps:$4 sm:$0xff]  }
  0x5b   :  { %1233 = vmatpush2.bf16.msra.mxu0 %v1920_v39 }
  0x5c   :  { %974 = vmatmul.mubr.bf16.gmra.mxu1 %v1916_v41  ;;  %1234 = vmatprep.subr.bf16.mxu0 %v1928_v45 }
  0x5d   :  { %1775 = vmatpush1.bf16.msra.mxu1 %v2195_v53  ;;  %983 = vmatprep.mubr.bf16.mxu1 %v1923_v43  ;;  %v1938_v53 = vld [vmem:[%s2800_s2 + $0x64] ss:$8 sps:$4 sm:$0xff]  }
  0x5e   :  { %1760 = vmatprep.subr.bf16.mxu1 %v2204_v55  ;;  %v1941_v55 = vld [vmem:[%s2800_s2 + $0x74] ss:$8 sps:$4 sm:$0xff]  }
  0x5f   :  { %1235 = vmatpush2.bf16.msra.mxu0 %v1926_v46 }
  0x61   :  { %1776 = vmatpush1.bf16.msra.mxu1 %v2216_v58 }
  0x62   :  { %1761 = vmatprep.subr.bf16.mxu1 %v2222_v59 }
  0x64   :  { %984 = vmatmul.mubr.bf16.gmra.mxu1 %v1925_v44 }
  0x65   :  { %1777 = vmatpush1.bf16.msra.mxu1 %v2235_v62  ;;  %993 = vmatprep.mubr.bf16.mxu1 %v1929_v47 }
  0x66   :  { %1762 = vmatprep.subr.bf16.mxu1 %v2244_v0 }
  0x69   :  { %1778 = vmatpush1.bf16.msra.mxu1 %v2256_v4 }
  0x6a   :  { %1763 = vmatprep.subr.bf16.mxu1 %v2262_v5 }
  0x6c   :  { %994 = vmatmul.mubr.bf16.gmra.mxu1 %v1931_v48 }
  0x6d   :  { %1779 = vmatpush1.bf16.msra.mxu1 %v2274_v8  ;;  %1003 = vmatprep.mubr.bf16.mxu1 %v1932_v49 }
  0x6e   :  { %1764 = vmatprep.subr.bf16.mxu1 %v2287_v11 }
  0x71   :  { %1780 = vmatpush1.bf16.msra.mxu1 %v2298_v14 }
  0x72   :  { %1765 = vmatprep.subr.bf16.mxu1 %v2307_v16 }
  0x74   :  { %1004 = vmatmul.mubr.bf16.gmra.mxu1 %v1934_v50 }
  0x75   :  { %1781 = vmatpush2.bf16.msra.mxu1 %v2317_v18  ;;  %1013 = vmatprep.mubr.bf16.mxu1 %v1935_v51 }
  0x76   :  { %1766 = vmatprep.subr.bf16.mxu1 %v2325_v20 }
  0x79   :  { %1782 = vmatpush2.bf16.msra.mxu1 %v2339_v23 }
  0x7a   :  { %1767 = vmatprep.subr.bf16.mxu1 %v2345_v24 }
  0x7c   :  { %1014 = vmatmul.mubr.bf16.gmra.mxu1 %v1937_v52 }
  0x7d   :  { %1783 = vmatpush2.bf16.msra.mxu1 %v2358_v27  ;;  %1023 = vmatprep.mubr.bf16.mxu1 %v1938_v53 }
  0x7e   :  { %1768 = vmatprep.subr.bf16.mxu1 %v2367_v29 }
  0x81   :  { %1784 = vmatpush2.bf16.msra.mxu1 %v2379_v32  ;;  %v486_v57 = vpop.permute.xlu0 %485  ;;  %v496_v0 = vpop.permute.xlu1 %495 }
  0x82   :  { %1769 = vmatprep.subr.bf16.mxu1 %v2385_v33 }
  0x84   :  { %1024 = vmatmul.mubr.bf16.gmra.mxu1 %v1940_v54 }
  0x85   :  { %1785 = vmatpush2.bf16.msra.mxu1 %v2395_v36  ;;  %1033 = vmatprep.mubr.bf16.mxu1 %v1941_v55  ;;  %v491_v61 = vpop.permute.xlu0 %490  ;;  %v501_v10 = vpop.permute.xlu1 %500 }
  0x86   :  { %1770 = vmatprep.subr.bf16.mxu1 %v1919_v42 }
  0x89   :  { %1786 = vmatpush2.bf16.msra.mxu1 %v1917_v35  ;;  %v511_v21 = vpop.permute.xlu1 %510  ;;  %v506_v22 = vpop.permute.xlu0 %505 }
  0x8a   :  { %1771 = vmatprep.subr.bf16.mxu1 %v1922_v37 }
  0x8c   :  { %1034 = vmatmul.mubr.bf16.gmra.mxu1 %v1943_v56 }
  0x8d   :  { %1787 = vmatpush2.bf16.msra.mxu1 %v1920_v39  ;;  %v521_v32 = vpop.permute.xlu1 %520  ;;  %v516_v33 = vpop.permute.xlu0 %515 }
  0x8e   :  { %1772 = vmatprep.subr.bf16.mxu1 %v1928_v45 }
  0x91   :  { %1788 = vmatpush2.bf16.msra.mxu1 %v1926_v46  ;;  %v531_v35 = vpop.permute.xlu1 %530  ;;  %v526_v39 = vpop.permute.xlu0 %525 }
  0x95   :  { %v551_v48 = vpop.permute.xlu1 %550  ;;  %v546_v51 = vpop.permute.xlu0 %545 }
  0xe2   :  { %v289_v58 = vpop.f32.mrf.mxu0 }
  0xe3   :  { %v563_v4 = vmul.f32 %v486_v57, %v289_v58  ;;  %v541_v58 = vpop.permute.xlu1 %540 }
  0xe4   :  { %v291_v59 = vpop.f32.mrf.mxu0 }
  0xe5   :  { %v564_v2 = vmul.f32 %v486_v57, %v291_v59  ;;  %v536_v59 = vpop.permute.xlu0 %535 }
  0xe6   :  { %v293_v60 = vpop.f32.mrf.mxu0 }
  0xe7   :  { %v565_v62 = vmul.f32 %v491_v61, %v293_v60 }
  0xe8   :  { %v295_v63 = vpop.f32.mrf.mxu0 }
  0xe9   :  { %v566_v3 = vmul.f32 %v491_v61, %v295_v63  ;;  %v595_v7 = vpack.c.bf16 %v565_v62, %v563_v4 }
  0xea   :  { %v299_v5 = vpop.f32.mrf.mxu0 }
  0xeb   :  { %v596_v6 = vpack.c.bf16 %v566_v3, %v564_v2  ;;  %v567_v15 = vmul.f32 %v496_v0, %v299_v5 }
  0xec   :  { %v301_v8 = vpop.f32.mrf.mxu0 }
  0xed   :  { %1236 = vmatprep.mubr.bf16.mxu0 %v596_v6  ;;  %v568_v13 = vmul.f32 %v496_v0, %v301_v8 }
  0xee   :  { %v303_v9 = vpop.f32.mrf.mxu0  ;;  %1237 = vmatmul.mubr.bf16.vlgmr.msra.gmra.mxu0 %v595_v7 }
  0xef   :  { %v569_v11 = vmul.f32 %v501_v10, %v303_v9 }
  0xf0   :  { %v305_v12 = vpop.f32.mrf.mxu0 }
  0xf1   :  { %v570_v14 = vmul.f32 %v501_v10, %v305_v12  ;;  %v597_v18 = vpack.c.bf16 %v569_v11, %v567_v15 }
  0xf2   :  { %v309_v16 = vpop.f32.mrf.mxu0 }
  0xf3   :  { %v598_v17 = vpack.c.bf16 %v570_v14, %v568_v13  ;;  %v571_v27 = vmul.f32 %v506_v22, %v309_v16 }
  0xf4   :  { %v311_v19 = vpop.f32.mrf.mxu0 }
  0xf5   :  { %1246 = vmatprep.mubr.bf16.mxu0 %v598_v17  ;;  %v572_v25 = vmul.f32 %v506_v22, %v311_v19  ;;  %v561_v17 = vpop.permute.xlu1 %560 }
  0xf6   :  { %v313_v20 = vpop.f32.mrf.mxu0  ;;  %1247 = vmatmul.mubr.bf16.gmra.mxu0 %v597_v18  ;;  %v556_v18 = vpop.permute.xlu0 %555 }
  0xf7   :  { %v573_v23 = vmul.f32 %v511_v21, %v313_v20 }
  0xf8   :  { %v315_v24 = vpop.f32.mrf.mxu0 }
  0xf9   :  { %v574_v26 = vmul.f32 %v511_v21, %v315_v24  ;;  %v599_v30 = vpack.c.bf16 %v573_v23, %v571_v27 }
  0xfa   :  { %v319_v28 = vpop.f32.mrf.mxu0 }
  0xfb   :  { %v600_v29 = vpack.c.bf16 %v574_v26, %v572_v25  ;;  %v575_v41 = vmul.f32 %v516_v33, %v319_v28 }
  0xfc   :  { %v321_v31 = vpop.f32.mrf.mxu0 }
  0xfd   :  { %1256 = vmatprep.mubr.bf16.mxu0 %v600_v29  ;;  %v576_v1 = vmul.f32 %v516_v33, %v321_v31 }
  0xfe   :  { %v323_v34 = vpop.f32.mrf.mxu0  ;;  %1257 = vmatmul.mubr.bf16.gmra.mxu0 %v599_v30 }
  0xff   :  { %v577_v36 = vmul.f32 %v521_v32, %v323_v34 }
 0x100   :  { %v325_v38 = vpop.f32.mrf.mxu0 }
 0x101   :  { %v578_v40 = vmul.f32 %v521_v32, %v325_v38  ;;  %v601_v43 = vpack.c.bf16 %v577_v36, %v575_v41 }
 0x102   :  { %v329_v42 = vpop.f32.mrf.mxu0 }
 0x103   :  { %v602_v37 = vpack.c.bf16 %v578_v40, %v576_v1  ;;  %v579_v52 = vmul.f32 %v526_v39, %v329_v42 }
 0x104   :  { %v331_v44 = vpop.f32.mrf.mxu0 }
 0x105   :  { %1266 = vmatprep.mubr.bf16.mxu0 %v602_v37  ;;  %v580_v49 = vmul.f32 %v526_v39, %v331_v44  ;;  %v1319_v39 = vlaneseq }
 0x106   :  { %v333_v45 = vpop.f32.mrf.mxu0  ;;  %1267 = vmatmul.mubr.bf16.gmra.mxu0 %v601_v43 }
 0x107   :  { %v581_v46 = vmul.f32 %v531_v35, %v333_v45  ;;  %v1320_v44 = vshrl.u32 %v1319_v39, 7 }
 0x108   :  { %v335_v47 = vpop.f32.mrf.mxu0 }
 0x109   :  { %v582_v50 = vmul.f32 %v531_v35, %v335_v47  ;;  %v603_v55 = vpack.c.bf16 %v581_v46, %v579_v52  ;;  %v1321_v46 = vsub.s32 0, %v1320_v44  ;;  %v1317_v47 = vld [vmem:[%s2801_s6] sm:$0x3] }
 0x10a   :  { %v339_v53 = vpop.f32.mrf.mxu0 }
 0x10b   :  { %v604_v54 = vpack.c.bf16 %v582_v50, %v580_v49  ;;  %v583_v0 = vmul.f32 %v536_v59, %v339_v53  ;;  %v2516_v50 = vrot.slane %v1317_v47, %v1321_v46 }
 0x10c   :  { %v341_v56 = vpop.f32.mrf.mxu0 }
 0x10d   :  { %1276 = vmatprep.mubr.bf16.mxu0 %v604_v54  ;;  %v584_v62 = vmul.f32 %v536_v59, %v341_v56 }
 0x10e   :  { %v343_v57 = vpop.f32.mrf.mxu0  ;;  %1277 = vmatmul.mubr.bf16.gmra.mxu0 %v603_v55 }
 0x10f   :  { %v585_v60 = vmul.f32 %v541_v58, %v343_v57 }
 0x110   :  { %v345_v61 = vpop.f32.mrf.mxu0 }
 0x111   :  { %v586_v63 = vmul.f32 %v541_v58, %v345_v61  ;;  %v605_v4 = vpack.c.bf16 %v585_v60, %v583_v0 }
 0x112   :  { %v349_v2 = vpop.f32.mrf.mxu0 }
 0x113   :  { %v606_v3 = vpack.c.bf16 %v586_v63, %v584_v62  ;;  %v587_v11 = vmul.f32 %v546_v51, %v349_v2 }
 0x114   :  { %v351_v5 = vpop.f32.mrf.mxu0  ;;  %v965_v26 = vpop.f32.mrf.mxu1 }
 0x115   :  { %1286 = vmatprep.mubr.bf16.mxu0 %v606_v3  ;;  %v588_v9 = vmul.f32 %v546_v51, %v351_v5 }
 0x116   :  { %v353_v6 = vpop.f32.mrf.mxu0  ;;  %1287 = vmatmul.mubr.bf16.gmra.mxu0 %v605_v4  ;;  %v967_v27 = vpop.f32.mrf.mxu1 }
 0x117   :  { %v589_v7 = vmul.f32 %v551_v48, %v353_v6 }
 0x118   :  { %v355_v8 = vpop.f32.mrf.mxu0  ;;  %v969_v28 = vpop.f32.mrf.mxu1 }
 0x119   :  { %v590_v10 = vmul.f32 %v551_v48, %v355_v8  ;;  %v607_v14 = vpack.c.bf16 %v589_v7, %v587_v11  ;;  %v1325_v48 = vsub.s32 1, %v1320_v44 }
 0x11a   :  { %v359_v12 = vpop.f32.mrf.mxu0  ;;  %v971_v29 = vpop.f32.mrf.mxu1 }
 0x11b   :  { %v608_v13 = vpack.c.bf16 %v590_v10, %v588_v9  ;;  %v591_v23 = vmul.f32 %v556_v18, %v359_v12  ;;  %v2518_v53 = vrot.slane %v1317_v47, %v1325_v48 }
 0x11c   :  { %v361_v15 = vpop.f32.mrf.mxu0  ;;  %v975_v30 = vpop.f32.mrf.mxu1 }
 0x11d   :  { %1296 = vmatprep.mubr.bf16.mxu1 %v608_v13  ;;  %v592_v21 = vmul.f32 %v556_v18, %v361_v15 }
 0x11e   :  { %v363_v16 = vpop.f32.mrf.mxu0  ;;  %1297 = vmatmul.mubr.bf16.vlgmr.msra.gmra.mxu1 %v607_v14  ;;  %v977_v31 = vpop.f32.mrf.mxu1 }
 0x11f   :  { %v593_v19 = vmul.f32 %v561_v17, %v363_v16 }
 0x120   :  { %v365_v20 = vpop.f32.mrf.mxu0  ;;  %v979_v32 = vpop.f32.mrf.mxu1 }
 0x121   :  { %v594_v22 = vmul.f32 %v561_v17, %v365_v20  ;;  %v609_v25 = vpack.c.bf16 %v593_v19, %v591_v23 }
 0x122   :  { %v981_v33 = vpop.f32.mrf.mxu1 }
 0x123   :  { %v610_v24 = vpack.c.bf16 %v594_v22, %v592_v21 }
 0x124   :  { %v985_v34 = vpop.f32.mrf.mxu1 }
 0x125   :  { %1306 = vmatprep.mubr.bf16.mxu1 %v610_v24 }
 0x126   :  { %1307 = vmatmul.mubr.bf16.gmra.mxu1 %v609_v25  ;;  %v2491_v36 = vpop.f32.mrf.mxu1 }
 0x128   :  { %v2493_v38 = vpop.f32.mrf.mxu1 }
 0x12a   :  { %v2495_v1 = vpop.f32.mrf.mxu1 }
 0x12c   :  { %v2497_v40 = vpop.f32.mrf.mxu1 }
 0x12e   :  { %v2499_v41 = vpop.f32.mrf.mxu1 }
 0x130   :  { %v2501_v42 = vpop.f32.mrf.mxu1 }
 0x132   :  { %v2503_v35 = vpop.f32.mrf.mxu1 }
 0x134   :  { %v2505_v37 = vpop.f32.mrf.mxu1 }
 0x136   :  { %v2507_v43 = vpop.f32.mrf.mxu1 }
 0x138   :  { %v2509_v45 = vpop.f32.mrf.mxu1 }
 0x13a   :  { %v2514_v49 = vpop.f32.mrf.mxu1 }
 0x13c   :  { %v2520_v55 = vpop.f32.mrf.mxu1 }
 0x13e   :  { %v2528_v62 = vpop.f32.mrf.mxu1 }
 0x140   :  { %v2540_v9 = vpop.f32.mrf.mxu1 }
 0x142   :  { %v2552_v19 = vpop.f32.mrf.mxu1 }
 0x1ae   :  { %v1238_v51 = vpop.f32.mrf.mxu0 }
 0x1af   :  { %v1239_v52 = vadd.f32 %v1238_v51, %v965_v26 }
 0x1b0   :  { %v1240_v54 = vpop.f32.mrf.mxu0 }
 0x1b1   :  { %v2523_v56 = vadd.f32 %v2516_v50, %v1239_v52  ;;  %v1241_v57 = vadd.f32 %v1240_v54, %v967_v27 }
 0x1b2   :  { %v1242_v58 = vpop.f32.mrf.mxu0 }
 0x1b3   :  { %v2526_v59 = vadd.f32 %v2518_v53, %v1241_v57  ;;  %v1243_v60 = vadd.f32 %v1242_v58, %v969_v28  ;;  %v1361_v2 = vmul.f32 %v2523_v56, %v2523_v56 }
 0x1b4   :  { %v1244_v61 = vpop.f32.mrf.mxu0 }
 0x1b5   :  { %v2531_v63 = vadd.f32 %v2516_v50, %v1243_v60  ;;  %v1245_v0 = vadd.f32 %v1244_v61, %v971_v29  ;;  %v1362_v3 = vmul.f32 %v2526_v59, %v2526_v59  ;;  %v2564_v29 = vpop.f32.mrf.mxu1 }
 0x1b6   :  { %v1248_v4 = vpop.f32.mrf.mxu0 }
 0x1b7   :  { %v2538_v5 = vadd.f32 %v2518_v53, %v1245_v0  ;;  %v1249_v6 = vadd.f32 %v1248_v4, %v975_v30  ;;  %v1393_v7 = vadd.f32 %v1362_v3, %v1361_v2  ;;  %v1363_v12 = vmul.f32 %v2531_v63, %v2531_v63  ;;  %v2578_v48 = vpop.f32.mrf.mxu1 }
 0x1b8   :  { %v1250_v8 = vpop.f32.mrf.mxu0 }
 0x1b9   :  { %v2543_v10 = vadd.f32 %v2516_v50, %v1249_v6  ;;  %v1251_v11 = vadd.f32 %v1250_v8, %v977_v31  ;;  %1394 = vadd.xlane.f32.xlu0 %v1393_v7  ;;  %v1364_v13 = vmul.f32 %v2538_v5, %v2538_v5  ;;  %v2592_v0 = vpop.f32.mrf.mxu1 }
 0x1ba   :  { %v1252_v14 = vpop.f32.mrf.mxu0 }
 0x1bb   :  { %v2550_v15 = vadd.f32 %v2518_v53, %v1251_v11  ;;  %v1253_v16 = vadd.f32 %v1252_v14, %v979_v32  ;;  %v1396_v17 = vadd.f32 %v1364_v13, %v1363_v12  ;;  %v1365_v22 = vmul.f32 %v2543_v10, %v2543_v10  ;;  %v2606_v12 = vpop.f32.mrf.mxu1 }
 0x1bc   :  { %v1254_v18 = vpop.f32.mrf.mxu0 }
 0x1bd   :  { %v2555_v20 = vadd.f32 %v2516_v50, %v1253_v16  ;;  %v1255_v21 = vadd.f32 %v1254_v18, %v981_v33  ;;  %1397 = vadd.xlane.f32.xlu1 %v1396_v17  ;;  %v1366_v23 = vmul.f32 %v2550_v15, %v2550_v15 }
 0x1be   :  { %v1258_v24 = vpop.f32.mrf.mxu0 }
 0x1bf   :  { %v2562_v25 = vadd.f32 %v2518_v53, %v1255_v21  ;;  %v1259_v26 = vadd.f32 %v1258_v24, %v985_v34  ;;  %v1399_v27 = vadd.f32 %v1366_v23, %v1365_v22  ;;  %v1367_v32 = vmul.f32 %v2555_v20, %v2555_v20  ;;  %v1035_v22 = vpop.f32.mrf.mxu1 }
 0x1c0   :  { %v1260_v28 = vpop.f32.mrf.mxu0 }
 0x1c1   :  { %v2567_v30 = vadd.f32 %v2516_v50, %v1259_v26  ;;  %v1261_v31 = vadd.f32 %v1260_v28, %v2491_v36  ;;  %1400 = vadd.xlane.f32.xlu0 %v1399_v27  ;;  %v1368_v33 = vmul.f32 %v2562_v25, %v2562_v25 }
 0x1c2   :  { %v1262_v39 = vpop.f32.mrf.mxu0 }
 0x1c3   :  { %v2575_v44 = vadd.f32 %v2518_v53, %v1261_v31  ;;  %v1263_v34 = vadd.f32 %v1262_v39, %v2493_v38  ;;  %v1402_v46 = vadd.f32 %v1368_v33, %v1367_v32  ;;  %v1369_v52 = vmul.f32 %v2567_v30, %v2567_v30  ;;  %v1037_v33 = vpop.f32.mrf.mxu1 }
 0x1c4   :  { %v1264_v47 = vpop.f32.mrf.mxu0 }
 0x1c5   :  { %v2581_v51 = vadd.f32 %v2516_v50, %v1263_v34  ;;  %v1265_v36 = vadd.f32 %v1264_v47, %v2495_v1  ;;  %1403 = vadd.xlane.f32.xlu0 %v1402_v46  ;;  %v1370_v54 = vmul.f32 %v2575_v44, %v2575_v44 }
 0x1c6   :  { %v1268_v57 = vpop.f32.mrf.mxu0 }
 0x1c7   :  { %v2589_v58 = vadd.f32 %v2518_v53, %v1265_v36  ;;  %v1269_v38 = vadd.f32 %v1268_v57, %v2497_v40  ;;  %v1405_v60 = vadd.f32 %v1370_v54, %v1369_v52  ;;  %v1371_v3 = vmul.f32 %v2581_v51, %v2581_v51  ;;  %v1039_v57 = vpop.f32.mrf.mxu1 }
 0x1c8   :  { %v1270_v61 = vpop.f32.mrf.mxu0 }
 0x1c9   :  { %v2595_v2 = vadd.f32 %v2516_v50, %v1269_v38  ;;  %v1271_v1 = vadd.f32 %v1270_v61, %v2499_v41  ;;  %1406 = vadd.xlane.f32.xlu1 %v1405_v60  ;;  %v1372_v4 = vmul.f32 %v2589_v58, %v2589_v58 }
 0x1ca   :  { %v1272_v6 = vpop.f32.mrf.mxu0 }
 0x1cb   :  { %v2603_v7 = vadd.f32 %v2518_v53, %v1271_v1  ;;  %v1273_v40 = vadd.f32 %v1272_v6, %v2501_v42  ;;  %v1408_v8 = vadd.f32 %v1372_v4, %v1371_v3  ;;  %v1373_v14 = vmul.f32 %v2595_v2, %v2595_v2 }
 0x1cc   :  { %v1274_v11 = vpop.f32.mrf.mxu0 }
 0x1cd   :  { %v2609_v13 = vadd.f32 %v2516_v50, %v1273_v40  ;;  %v1275_v41 = vadd.f32 %v1274_v11, %v2503_v35  ;;  %1409 = vadd.xlane.f32.xlu0 %v1408_v8  ;;  %v1374_v16 = vmul.f32 %v2603_v7, %v2603_v7  ;;  %v1041_v40 = vpop.f32.mrf.mxu1 }
 0x1ce   :  { %v1278_v17 = vpop.f32.mrf.mxu0 }
 0x1cf   :  { %v2617_v18 = vadd.f32 %v2518_v53, %v1275_v41  ;;  %v1279_v42 = vadd.f32 %v1278_v17, %v2505_v37  ;;  %v1411_v21 = vadd.f32 %v1374_v16, %v1373_v14  ;;  %v1375_v26 = vmul.f32 %v2609_v13, %v2609_v13 }
 0x1d0   :  { %v1280_v23 = vpop.f32.mrf.mxu0 }
 0x1d1   :  { %v2621_v24 = vadd.f32 %v2516_v50, %v1279_v42  ;;  %v1281_v35 = vadd.f32 %v1280_v23, %v2507_v43  ;;  %1412 = vadd.xlane.f32.xlu1 %v1411_v21  ;;  %v1376_v27 = vmul.f32 %v2617_v18, %v2617_v18 }
 0x1d2   :  { %v1282_v28 = vpop.f32.mrf.mxu0 }
 0x1d3   :  { %v2629_v31 = vadd.f32 %v2518_v53, %v1281_v35  ;;  %v1283_v37 = vadd.f32 %v1282_v28, %v2509_v45  ;;  %v1414_v32 = vadd.f32 %v1376_v27, %v1375_v26  ;;  %v1377_v46 = vmul.f32 %v2621_v24, %v2621_v24 }
 0x1d4   :  { %v1284_v39 = vpop.f32.mrf.mxu0 }
 0x1d5   :  { %v2633_v34 = vadd.f32 %v2516_v50, %v1283_v37  ;;  %v1285_v43 = vadd.f32 %v1284_v39, %v2514_v49  ;;  %1415 = vadd.xlane.f32.xlu0 %v1414_v32  ;;  %v1378_v47 = vmul.f32 %v2629_v31, %v2629_v31 }
 0x1d6   :  { %v1288_v36 = vpop.f32.mrf.mxu0 }
 0x1d7   :  { %v2641_v52 = vadd.f32 %v2518_v53, %v1285_v43  ;;  %v1289_v45 = vadd.f32 %v1288_v36, %v2520_v55  ;;  %v1417_v54 = vadd.f32 %v1378_v47, %v1377_v46  ;;  %v1379_v61 = vmul.f32 %v2633_v34, %v2633_v34 }
 0x1d8   :  { %v1290_v38 = vpop.f32.mrf.mxu0 }
 0x1d9   :  { %v2645_v60 = vadd.f32 %v2516_v50, %v1289_v45  ;;  %v1291_v49 = vadd.f32 %v1290_v38, %v2528_v62  ;;  %1418 = vadd.xlane.f32.xlu1 %v1417_v54  ;;  %v1380_v1 = vmul.f32 %v2641_v52, %v2641_v52 }
 0x1da   :  { %v1292_v3 = vpop.f32.mrf.mxu0 }
 0x1db   :  { %v2653_v4 = vadd.f32 %v2518_v53, %v1291_v49  ;;  %v1293_v55 = vadd.f32 %v1292_v3, %v2540_v9  ;;  %v1420_v6 = vadd.f32 %v1380_v1, %v1379_v61  ;;  %v1381_v41 = vmul.f32 %v2645_v60, %v2645_v60 }
 0x1dc   :  { %v1294_v8 = vpop.f32.mrf.mxu0 }
 0x1dd   :  { %v2657_v11 = vadd.f32 %v2516_v50, %v1293_v55  ;;  %v1295_v62 = vadd.f32 %v1294_v8, %v2552_v19  ;;  %1421 = vadd.xlane.f32.xlu0 %v1420_v6  ;;  %v1382_v14 = vmul.f32 %v2653_v4, %v2653_v4 }
 0x1de   :  { %v1298_v16 = vpop.f32.mrf.mxu1 }
 0x1df   :  { %v2665_v17 = vadd.f32 %v2518_v53, %v1295_v62  ;;  %v1299_v9 = vadd.f32 %v1298_v16, %v2564_v29  ;;  %v1423_v42 = vadd.f32 %v1382_v14, %v1381_v41  ;;  %v1383_v35 = vmul.f32 %v2657_v11, %v2657_v11 }
 0x1e0   :  { %v1300_v21 = vpop.f32.mrf.mxu1 }
 0x1e1   :  { %v2669_v23 = vadd.f32 %v2516_v50, %v1299_v9  ;;  %v1301_v19 = vadd.f32 %v1300_v21, %v2578_v48  ;;  %1424 = vadd.xlane.f32.xlu1 %v1423_v42  ;;  %v1384_v26 = vmul.f32 %v2665_v17, %v2665_v17 }
 0x1e2   :  { %v1302_v27 = vpop.f32.mrf.mxu1 }
 0x1e3   :  { %v2677_v28 = vadd.f32 %v2518_v53, %v1301_v19  ;;  %v1303_v29 = vadd.f32 %v1302_v27, %v2592_v0  ;;  %v1426_v37 = vadd.f32 %v1384_v26, %v1383_v35  ;;  %v1385_v43 = vmul.f32 %v2669_v23, %v2669_v23 }
 0x1e4   :  { %v1304_v32 = vpop.f32.mrf.mxu1 }
 0x1e5   :  { %v2681_v39 = vadd.f32 %v2516_v50, %v1303_v29  ;;  %v1305_v48 = vadd.f32 %v1304_v32, %v2606_v12  ;;  %1427 = vadd.xlane.f32.xlu0 %v1426_v37  ;;  %v1386_v46 = vmul.f32 %v2677_v28, %v2677_v28 }
 0x1e6   :  { %v1308_v47 = vpop.f32.mrf.mxu1 }
 0x1e7   :  { %v2689_v36 = vadd.f32 %v2518_v53, %v1305_v48  ;;  %v1309_v45 = vadd.f32 %v1308_v47, %v1035_v22  ;;  %v1429_v0 = vadd.f32 %v1386_v46, %v1385_v43  ;;  %v1387_v12 = vmul.f32 %v2681_v39, %v2681_v39 }
 0x1e8   :  { %v1310_v54 = vpop.f32.mrf.mxu1 }
 0x1e9   :  { %v2692_v38 = vadd.f32 %v2516_v50, %v1309_v45  ;;  %v1311_v49 = vadd.f32 %v1310_v54, %v1037_v33  ;;  %1430 = vadd.xlane.f32.xlu1 %v1429_v0  ;;  %v1388_v61 = vmul.f32 %v2689_v36, %v2689_v36 }
 0x1ea   :  { %v1312_v1 = vpop.f32.mrf.mxu1 }
 0x1eb   :  { %v2699_v3 = vadd.f32 %v2518_v53, %v1311_v49  ;;  %v1313_v55 = vadd.f32 %v1312_v1, %v1039_v57  ;;  %v1432_v6 = vadd.f32 %v1388_v61, %v1387_v12  ;;  %v1389_v33 = vmul.f32 %v2692_v38, %v2692_v38 }
 0x1ec   :  { %v1314_v22 = vpop.f32.mrf.mxu1 }
 0x1ed   :  { %v2702_v8 = vadd.f32 %v2516_v50, %v1313_v55  ;;  %v1315_v62 = vadd.f32 %v1314_v22, %v1041_v40  ;;  %1433 = vadd.xlane.f32.xlu0 %v1432_v6  ;;  %v1390_v41 = vmul.f32 %v2699_v3, %v2699_v3 }
 0x1ef   :  { %v2709_v14 = vadd.f32 %v2518_v53, %v1315_v62  ;;  %v1435_v16 = vadd.f32 %v1390_v41, %v1389_v33  ;;  %v1391_v57 = vmul.f32 %v2702_v8, %v2702_v8 }
 0x1f1   :  { %1436 = vadd.xlane.f32.xlu1 %v1435_v16  ;;  %v1392_v50 = vmul.f32 %v2709_v14, %v2709_v14 }
 0x1f3   :  { %v1438_v9 = vadd.f32 %v1392_v50, %v1391_v57 }
 0x1f5   :  { %1439 = vadd.xlane.f32.xlu0 %v1438_v9 }
 0x242   :  { %v1395_v40 = vpop.xlane.xlu0 %1394 }
 0x243   :  { %v1441_v42 = vmax.f32 %v1395_v40, 1e-24 }
 0x245   :  { %1944 = vrsqrt.f32 %v1441_v42 }
 0x246   :  { %v1398_v21 = vpop.xlane.xlu1 %1397 }
 0x247   :  { %v1442_v19 = vmax.f32 %v1398_v21, 1e-24 }
 0x249   :  { %1946 = vrsqrt.f32 %v1442_v19 }
 0x24a   :  { %v1401_v35 = vpop.xlane.xlu0 %1400 }
 0x24b   :  { %v1443_v26 = vmax.f32 %v1401_v35, 1e-24 }
 0x24d   :  { %1948 = vrsqrt.f32 %v1443_v26 }
 0x24e   :  { %v1404_v53 = vpop.xlane.xlu0 %1403 }
 0x24f   :  { %v1444_v27 = vmax.f32 %v1404_v53, 1e-24 }
 0x251   :  { %1950 = vrsqrt.f32 %v1444_v27 }
 0x252   :  { %v1945_v29 = vpop.eup %1944  ;;  %v1407_v37 = vpop.xlane.xlu1 %1406 }
 0x253   :  { %v1473_v32 = vmul.f32 %v1945_v29, %v2523_v56  ;;  %v1474_v48 = vmul.f32 %v1945_v29, %v2526_v59  ;;  %v1445_v43 = vmax.f32 %v1407_v37, 1e-24 }
 0x255   :  { %v1741_v46 = vpack.c.bf16 %v1474_v48, %v1473_v32  ;;  %1952 = vrsqrt.f32 %v1445_v43 }
 0x256   :  { %v1947_v47 = vpop.eup %1946  ;;  %v1410_v45 = vpop.xlane.xlu0 %1409 }
 0x257   :  { %1601 = vst [vmem:[%s2802_s7] sm:$0xff] %v1741_v46  ;;  %v1475_v0 = vmul.f32 %v1947_v47, %v2531_v63  ;;  %v1476_v54 = vmul.f32 %v1947_v47, %v2538_v5  ;;  %v1446_v49 = vmax.f32 %v1410_v45, 1e-24 }
 0x259   :  { %v1742_v12 = vpack.c.bf16 %v1476_v54, %v1475_v0  ;;  %1954 = vrsqrt.f32 %v1446_v49 }
 0x25a   :  { %v1949_v61 = vpop.eup %1948  ;;  %v1413_v56 = vpop.xlane.xlu1 %1412 }
 0x25b   :  { %1602 = vst [vmem:[%s2802_s7 + $0x8] sm:$0xff] %v1742_v12  ;;  %v1477_v59 = vmul.f32 %v1949_v61, %v2543_v10  ;;  %v1478_v1 = vmul.f32 %v1949_v61, %v2550_v15  ;;  %v1447_v55 = vmax.f32 %v1413_v56, 1e-24 }
 0x25d   :  { %v1743_v6 = vpack.c.bf16 %v1478_v1, %v1477_v59  ;;  %1956 = vrsqrt.f32 %v1447_v55 }
 0x25e   :  { %v1951_v22 = vpop.eup %1950  ;;  %v1416_v63 = vpop.xlane.xlu0 %1415 }
 0x25f   :  { %1603 = vst [vmem:[%s2802_s7 + $0x10] sm:$0xff] %v1743_v6  ;;  %v1479_v5 = vmul.f32 %v1951_v22, %v2555_v20  ;;  %v1480_v62 = vmul.f32 %v1951_v22, %v2562_v25  ;;  %v1448_v33 = vmax.f32 %v1416_v63, 1e-24 }
 0x261   :  { %v1744_v41 = vpack.c.bf16 %v1480_v62, %v1479_v5  ;;  %1958 = vrsqrt.f32 %v1448_v33 }
 0x262   :  { %v1953_v16 = vpop.eup %1952  ;;  %v1419_v10 = vpop.xlane.xlu1 %1418 }
 0x263   :  { %1604 = vst [vmem:[%s2802_s7 + $0x18] sm:$0xff] %v1744_v41  ;;  %v1481_v15 = vmul.f32 %v1953_v16, %v2567_v30  ;;  %v1482_v57 = vmul.f32 %v1953_v16, %v2575_v44  ;;  %v1449_v50 = vmax.f32 %v1419_v10, 1e-24 }
 0x265   :  { %v1745_v9 = vpack.c.bf16 %v1482_v57, %v1481_v15  ;;  %1960 = vrsqrt.f32 %v1449_v50 }
 0x266   :  { %v1955_v40 = vpop.eup %1954  ;;  %v1422_v20 = vpop.xlane.xlu0 %1421 }
 0x267   :  { %1605 = vst [vmem:[%s2802_s7 + $0x20] sm:$0xff] %v1745_v9  ;;  %v1483_v25 = vmul.f32 %v1955_v40, %v2581_v51  ;;  %v1484_v42 = vmul.f32 %v1955_v40, %v2589_v58  ;;  %v1450_v21 = vmax.f32 %v1422_v20, 1e-24 }
 0x269   :  { %v1746_v19 = vpack.c.bf16 %v1484_v42, %v1483_v25  ;;  %1962 = vrsqrt.f32 %v1450_v21 }
 0x26a   :  { %v1957_v35 = vpop.eup %1956  ;;  %v1425_v30 = vpop.xlane.xlu1 %1424 }
 0x26b   :  { %1606 = vst [vmem:[%s2802_s7 + $0x28] sm:$0xff] %v1746_v19  ;;  %v1485_v44 = vmul.f32 %v1957_v35, %v2595_v2  ;;  %v1486_v26 = vmul.f32 %v1957_v35, %v2603_v7  ;;  %v1451_v53 = vmax.f32 %v1425_v30, 1e-24 }
 0x26d   :  { %v1747_v27 = vpack.c.bf16 %v1486_v26, %v1485_v44  ;;  %1964 = vrsqrt.f32 %v1451_v53 }
 0x26e   :  { %v1959_v29 = vpop.eup %1958  ;;  %v1428_v51 = vpop.xlane.xlu0 %1427 }
 0x26f   :  { %1607 = vst [vmem:[%s2802_s7 + $0x30] sm:$0xff] %v1747_v27  ;;  %v1487_v58 = vmul.f32 %v1959_v29, %v2609_v13  ;;  %v1488_v37 = vmul.f32 %v1959_v29, %v2617_v18  ;;  %v1452_v32 = vmax.f32 %v1428_v51, 1e-24 }
 0x271   :  { %v1748_v48 = vpack.c.bf16 %v1488_v37, %v1487_v58  ;;  %1966 = vrsqrt.f32 %v1452_v32 }
 0x272   :  { %v1961_v43 = vpop.eup %1960  ;;  %v1431_v2 = vpop.xlane.xlu1 %1430 }
 0x273   :  { %1608 = vst [vmem:[%s2802_s7 + $0x38] sm:$0xff] %v1748_v48  ;;  %v1489_v7 = vmul.f32 %v1961_v43, %v2621_v24  ;;  %v1490_v46 = vmul.f32 %v1961_v43, %v2629_v31  ;;  %v1453_v47 = vmax.f32 %v1431_v2, 1e-24 }
 0x275   :  { %v1749_v45 = vpack.c.bf16 %v1490_v46, %v1489_v7  ;;  %1968 = vrsqrt.f32 %v1453_v47 }
 0x276   :  { %v1963_v0 = vpop.eup %1962  ;;  %v1434_v13 = vpop.xlane.xlu0 %1433 }
 0x277   :  { %1609 = vst [vmem:[%s2802_s7 + $0x40] sm:$0xff] %v1749_v45  ;;  %v1491_v18 = vmul.f32 %v1963_v0, %v2633_v34  ;;  %v1492_v54 = vmul.f32 %v1963_v0, %v2641_v52  ;;  %v1454_v49 = vmax.f32 %v1434_v13, 1e-24 }
 0x279   :  { %v1750_v12 = vpack.c.bf16 %v1492_v54, %v1491_v18  ;;  %1970 = vrsqrt.f32 %v1454_v49 }
 0x27a   :  { %v1965_v61 = vpop.eup %1964  ;;  %v1437_v24 = vpop.xlane.xlu1 %1436 }
 0x27b   :  { %1610 = vst [vmem:[%s2802_s7 + $0x48] sm:$0xff] %v1750_v12  ;;  %v1493_v31 = vmul.f32 %v1965_v61, %v2645_v60  ;;  %v1494_v56 = vmul.f32 %v1965_v61, %v2653_v4  ;;  %v1455_v59 = vmax.f32 %v1437_v24, 1e-24 }
 0x27d   :  { %v1751_v1 = vpack.c.bf16 %v1494_v56, %v1493_v31  ;;  %1972 = vrsqrt.f32 %v1455_v59 }
 0x27e   :  { %v1967_v55 = vpop.eup %1966  ;;  %v1440_v34 = vpop.xlane.xlu0 %1439 }
 0x27f   :  { %1611 = vst [vmem:[%s2802_s7 + $0x50] sm:$0xff] %v1751_v1  ;;  %v1495_v52 = vmul.f32 %v1967_v55, %v2657_v11  ;;  %v1496_v6 = vmul.f32 %v1967_v55, %v2665_v17  ;;  %v1456_v22 = vmax.f32 %v1440_v34, 1e-24 }
 0x281   :  { %v1752_v63 = vpack.c.bf16 %v1496_v6, %v1495_v52  ;;  %1974 = vrsqrt.f32 %v1456_v22 }
 0x282   :  { %v1969_v5 = vpop.eup %1968 }
 0x283   :  { %1612 = vst [vmem:[%s2802_s7 + $0x58] sm:$0xff] %v1752_v63  ;;  %v1497_v60 = vmul.f32 %v1969_v5, %v2669_v23  ;;  %v1498_v4 = vmul.f32 %v1969_v5, %v2677_v28 }
 0x285   :  { %v1753_v62 = vpack.c.bf16 %v1498_v4, %v1497_v60 }
 0x286   :  { %v1971_v33 = vpop.eup %1970 }
 0x287   :  { %1613 = vst [vmem:[%s2802_s7 + $0x60] sm:$0xff] %v1753_v62  ;;  %v1499_v11 = vmul.f32 %v1971_v33, %v2681_v39  ;;  %v1500_v17 = vmul.f32 %v1971_v33, %v2689_v36 }
 0x289   :  { %v1754_v41 = vpack.c.bf16 %v1500_v17, %v1499_v11 }
 0x28a   :  { %v1973_v16 = vpop.eup %1972 }
 0x28b   :  { %1614 = vst [vmem:[%s2802_s7 + $0x68] sm:$0xff] %v1754_v41  ;;  %v1501_v23 = vmul.f32 %v1973_v16, %v2692_v38  ;;  %v1502_v28 = vmul.f32 %v1973_v16, %v2699_v3 }
 0x28d   :  { %v1755_v10 = vpack.c.bf16 %v1502_v28, %v1501_v23 }
 0x28e   :  { %v1975_v15 = vpop.eup %1974 }
 0x28f   :  { %1615 = vst [vmem:[%s2802_s7 + $0x70] sm:$0xff] %v1755_v10  ;;  %v1503_v39 = vmul.f32 %v1975_v15, %v2702_v8  ;;  %v1504_v36 = vmul.f32 %v1975_v15, %v2709_v14 }
 0x291   :  { %v1756_v57 = vpack.c.bf16 %v1504_v36, %v1503_v39 }
 0x293   :  { %1616 = vst [vmem:[%s2802_s7 + $0x78] sm:$0xff] %v1756_v57 }

// kernel: mesh_autoencoder_forward.21
= control target key start
LH: loop header
LB: loop body
LE: loop exit
PB: predicated region body
PF: predicated region fallthrough
CT: control target
= control target key end

     0   :  { %v3515_v1 = vmov 0   ;;  %s5504_s1 = inlined_call_operand.vmem [shape: bf16[128,256], index: 1, kind: input, shape index: {}]   ;;  %s5505_s0 = inlined_call_operand.vmem [shape: bf16[128,128], index: 0, kind: input, shape index: {}]   ;;  %s5506_s5 = inlined_call_operand.vmem [shape: bf16[256,640], index: 5, kind: input, shape index: {}]   ;;  %s5507_s3 = inlined_call_operand.vmem [shape: f32[128,1], index: 3, kind: input, shape index: {}]   ;;  %s5508_s2 = inlined_call_operand.vmem [shape: bf16[128,256], index: 2, kind: input, shape index: {}]   ;;  %s5509_s4 = inlined_call_operand.vmem [shape: bf16[256,640], index: 4, kind: input, shape index: {}]   ;;  %s5510_s6 = inlined_call_operand.vmem [shape: f32[1,640], index: 6, kind: input, shape index: {}]   ;;  %s5511_s7 = inlined_call_operand.vmem [shape: f32[128,640], index: 7, kind: output, shape index: {}]  }
   0x1   :  { %v3203_v0 = vld [vmem:[%s5504_s1 + $0x74] ss:$8 sps:$4 sm:$0xff]   ;;  %287 = vmatprep.mubr.bf16.mxu0 %v3515_v1  ;;  %3201 = vset.pattern.permute.xlu0 %v3515_v1  ;;  %v3205_v2 = vld [vmem:[%s5504_s1 + $0x70] ss:$8 sps:$4 sm:$0xff]   ;;  %v3206_v3 = vld [vmem:[%s5504_s1 + $0x64] ss:$8 sps:$4 sm:$0xff]  }
   0x2   :  { %3202 = vset.pattern.permute.xlu1 %v3515_v1  ;;  %255 = vmatprep.subr.bf16.mxu0 %v3203_v0  ;;  %v3208_v4 = vld [vmem:[%s5504_s1 + $0x60] ss:$8 sps:$4 sm:$0xff]   ;;  %v3209_v5 = vld [vmem:[%s5504_s1 + $0x54] ss:$8 sps:$4 sm:$0xff]   ;;  %v3211_v6 = vld [vmem:[%s5504_s1 + $0x50] ss:$8 sps:$4 sm:$0xff]  }
   0x3   :  { %256 = vmatpush1.bf16.msra.mxu0 %v3205_v2  ;;  %v3212_v7 = vld [vmem:[%s5504_s1 + $0x44] ss:$8 sps:$4 sm:$0xff]   ;;  %v3214_v8 = vld [vmem:[%s5504_s1 + $0x40] ss:$8 sps:$4 sm:$0xff]   ;;  %v3215_v9 = vld [vmem:[%s5504_s1 + $0x34] ss:$8 sps:$4 sm:$0xff]  }
   0x4   :  { %257 = vmatprep.subr.bf16.mxu0 %v3206_v3  ;;  %v3217_v10 = vld [vmem:[%s5504_s1 + $0x30] ss:$8 sps:$4 sm:$0xff]   ;;  %v3218_v13 = vld [vmem:[%s5504_s1 + $0x24] ss:$8 sps:$4 sm:$0xff]   ;;  %v3233_v14 = vld [vmem:[%s5506_s5 + $0xf4] ss:$20 sps:$4 sm:$0xff]  }
   0x5   :  { %v3229_v11 = vld [vmem:[%s5506_s5 + $0x11c] ss:$20 sps:$4 sm:$0xff]   ;;  %v3231_v12 = vld [vmem:[%s5506_s5 + $0x118] ss:$20 sps:$4 sm:$0xff]   ;;  %v3220_v17 = vld [vmem:[%s5504_s1 + $0x20] ss:$8 sps:$4 sm:$0xff]  }
   0x6   :  { %1315 = vmatprep.subr.bf16.mxu1 %v3229_v11  ;;  %v3235_v15 = vld [vmem:[%s5506_s5 + $0xf0] ss:$20 sps:$4 sm:$0xff]   ;;  %v3236_v16 = vld [vmem:[%s5506_s5 + $0xcc] ss:$20 sps:$4 sm:$0xff]   ;;  %v3221_v18 = vld [vmem:[%s5504_s1 + $0x14] ss:$8 sps:$4 sm:$0xff]  }
   0x7   :  { %258 = vmatpush1.bf16.msra.mxu0 %v3208_v4  ;;  %1316 = vmatpush1.bf16.msra.mxu1 %v3231_v12  ;;  %v3238_v19 = vld [vmem:[%s5506_s5 + $0xc8] ss:$20 sps:$4 sm:$0xff]   ;;  %v3240_v20 = vld [vmem:[%s5506_s5 + $0xa4] ss:$20 sps:$4 sm:$0xff]   ;;  %v3242_v23 = vld [vmem:[%s5506_s5 + $0xa0] ss:$20 sps:$4 sm:$0xff]  }
   0x8   :  { %259 = vmatprep.subr.bf16.mxu0 %v3209_v5  ;;  %1317 = vmatprep.subr.bf16.mxu1 %v3233_v14  ;;  %v3223_v21 = vld [vmem:[%s5504_s1 + $0x10] ss:$8 sps:$4 sm:$0xff]   ;;  %v3224_v22 = vld [vmem:[%s5504_s1 + $0x4] ss:$8 sps:$4 sm:$0xff]   ;;  %v3226_v25 = vld [vmem:[%s5504_s1] ss:$8 sps:$4 sm:$0xff]  }
   0x9   :  { %v3243_v24 = vld [vmem:[%s5506_s5 + $0x7c] ss:$20 sps:$4 sm:$0xff]   ;;  %v467_v26 = vld [vmem:[%s5507_s3] sm:$0xff]  ;;  %v3245_v28 = vld [vmem:[%s5506_s5 + $0x78] ss:$20 sps:$4 sm:$0xff]  }
   0xa   :  { %v3227_v27 = vld [vmem:[%s5505_s0] sm:$0xff]   ;;  %v3247_v29 = vld [vmem:[%s5506_s5 + $0x54] ss:$20 sps:$4 sm:$0xff]   ;;  %485 = vperm.xlu0 %3201, %v467_v26   ;;  %v470_v34 = vld [vmem:[%s5507_s3 + $0x18] sm:$0xff] }
   0xb   :  { %260 = vmatpush1.bf16.msra.mxu0 %v3211_v6  ;;  %1318 = vmatpush1.bf16.msra.mxu1 %v3235_v15  ;;  %v468_v30 = vld [vmem:[%s5507_s3 + $0x8] sm:$0xff]  ;;  %v469_v31 = vld [vmem:[%s5507_s3 + $0x10] sm:$0xff]  ;;  %v471_v35 = vld [vmem:[%s5507_s3 + $0x20] sm:$0xff] }
   0xc   :  { %261 = vmatprep.subr.bf16.mxu0 %v3212_v7  ;;  %1319 = vmatprep.subr.bf16.mxu1 %v3236_v16  ;;  %v3249_v32 = vld [vmem:[%s5506_s5 + $0x50] ss:$20 sps:$4 sm:$0xff]   ;;  %v3250_v33 = vld [vmem:[%s5506_s5 + $0x2c] ss:$20 sps:$4 sm:$0xff]   ;;  %v3252_v36 = vld [vmem:[%s5506_s5 + $0x28] ss:$20 sps:$4 sm:$0xff]  }
   0xd   :  { %495 = vperm.xlu1 %3202, %v469_v31   ;;  %v3254_v37 = vld [vmem:[%s5506_s5 + $0x4] ss:$20 sps:$4 sm:$0xff]   ;;  %v472_v38 = vld [vmem:[%s5507_s3 + $0x28] sm:$0xff]  ;;  %v473_v40 = vld [vmem:[%s5507_s3 + $0x30] sm:$0xff] }
   0xe   :  { %490 = vperm.xlu0 %3201, %v468_v30   ;;  %v3228_v39 = vld [vmem:[%s5505_s0 + $0x8] sm:$0xff]   ;;  %v3256_v41 = vld [vmem:[%s5506_s5] ss:$20 sps:$4 sm:$0xff]   ;;  %v3257_v42 = vld [vmem:[%s5506_s5 + $0x25c] ss:$20 sps:$4 sm:$0xff]  }
   0xf   :  { %262 = vmatpush1.bf16.msra.mxu0 %v3214_v8  ;;  %1320 = vmatpush1.bf16.msra.mxu1 %v3238_v19  ;;  %v474_v43 = vld [vmem:[%s5507_s3 + $0x38] sm:$0xff]  ;;  %v475_v44 = vld [vmem:[%s5507_s3 + $0x40] sm:$0xff]  ;;  %v3232_v47 = vld [vmem:[%s5505_s0 + $0x10] sm:$0xff]  }
  0x10   :  { %263 = vmatprep.subr.bf16.mxu0 %v3215_v9  ;;  %1321 = vmatprep.subr.bf16.mxu1 %v3240_v20  ;;  %v3280_v45 = vld [vmem:[%s5506_s5 + $0x120] ss:$20 sps:$4 sm:$0xff]   ;;  %v3282_v46 = vld [vmem:[%s5506_s5 + $0x124] ss:$20 sps:$4 sm:$0xff]   ;;  %v476_v50 = vld [vmem:[%s5507_s3 + $0x48] sm:$0xff] }
  0x11   :  { %500 = vperm.xlu1 %3202, %v470_v34   ;;  %v3259_v48 = vld [vmem:[%s5506_s5 + $0x258] ss:$20 sps:$4 sm:$0xff]   ;;  %v3261_v49 = vld [vmem:[%s5506_s5 + $0x234] ss:$20 sps:$4 sm:$0xff]   ;;  %v3263_v52 = vld [vmem:[%s5506_s5 + $0x230] ss:$20 sps:$4 sm:$0xff]  }
  0x12   :  { %505 = vperm.xlu0 %3201, %v471_v35   ;;  %v477_v51 = vld [vmem:[%s5507_s3 + $0x50] sm:$0xff]  ;;  %v3264_v54 = vld [vmem:[%s5506_s5 + $0x20c] ss:$20 sps:$4 sm:$0xff]   ;;  %v478_v56 = vld [vmem:[%s5507_s3 + $0x58] sm:$0xff] }
  0x13   :  { %264 = vmatpush1.bf16.msra.mxu0 %v3217_v10  ;;  %1322 = vmatpush1.bf16.msra.mxu1 %v3242_v23  ;;  %v3288_v53 = vld [vmem:[%s5506_s5 + $0xfc] ss:$20 sps:$4 sm:$0xff]   ;;  %v3726_v55 = vld [vmem:[%s5508_s2 + $0x4] ss:$8 sps:$4 sm:$0xff]   ;;  %v3294_v60 = vld [vmem:[%s5506_s5 + $0xd4] ss:$20 sps:$4 sm:$0xff]  }
  0x14   :  { %265 = vmatprep.subr.bf16.mxu0 %v3218_v13  ;;  %1323 = vmatprep.subr.bf16.mxu1 %v3243_v24  ;;  %v479_v57 = vld [vmem:[%s5507_s3 + $0x60] sm:$0xff]  ;;  %v3286_v58 = vld [vmem:[%s5506_s5 + $0xf8] ss:$20 sps:$4 sm:$0xff]   ;;  %v3266_v59 = vld [vmem:[%s5506_s5 + $0x208] ss:$20 sps:$4 sm:$0xff]  }
  0x15   :  { %510 = vperm.xlu1 %3202, %v472_v38   ;;  %1347 = vmatprep.mubr.bf16.mxu1 %v3726_v55  ;;  %v3239_v61 = vld [vmem:[%s5505_s0 + $0x18] sm:$0xff]   ;;  %v480_v63 = vld [vmem:[%s5507_s3 + $0x68] sm:$0xff]  ;;  %v3270_v0 = vld [vmem:[%s5506_s5 + $0x1e0] ss:$20 sps:$4 sm:$0xff]  }
  0x16   :  { %515 = vperm.xlu0 %3201, %v473_v40   ;;  %v3268_v62 = vld [vmem:[%s5506_s5 + $0x1e4] ss:$20 sps:$4 sm:$0xff]   ;;  %v481_v2 = vld [vmem:[%s5507_s3 + $0x70] sm:$0xff]  ;;  %v3297_v6 = vld [vmem:[%s5506_s5 + $0xac] ss:$20 sps:$4 sm:$0xff]  }
  0x17   :  { %266 = vmatpush1.bf16.msra.mxu0 %v3220_v17  ;;  %1324 = vmatpush1.bf16.msra.mxu1 %v3245_v28  ;;  %v3271_v3 = vld [vmem:[%s5506_s5 + $0x1bc] ss:$20 sps:$4 sm:$0xff]   ;;  %v3273_v8 = vld [vmem:[%s5506_s5 + $0x1b8] ss:$20 sps:$4 sm:$0xff]   ;;  %v3246_v10 = vld [vmem:[%s5505_s0 + $0x20] sm:$0xff]  }
  0x18   :  { %267 = vmatprep.subr.bf16.mxu0 %v3221_v18  ;;  %1325 = vmatprep.subr.bf16.mxu1 %v3247_v29  ;;  %v3292_v4 = vld [vmem:[%s5506_s5 + $0xd0] ss:$20 sps:$4 sm:$0xff]   ;;  %v482_v5 = vld [vmem:[%s5507_s3 + $0x78] sm:$0xff]  ;;  %v3274_v11 = vld [vmem:[%s5506_s5 + $0x194] ss:$20 sps:$4 sm:$0xff]  }
  0x19   :  { %520 = vperm.xlu1 %3202, %v474_v43   ;;  %v3295_v7 = vld [vmem:[%s5506_s5 + $0xa8] ss:$20 sps:$4 sm:$0xff]   ;;  %v3303_v9 = vld [vmem:[%s5506_s5 + $0x84] ss:$20 sps:$4 sm:$0xff]   ;;  %v3301_v13 = vld [vmem:[%s5506_s5 + $0x80] ss:$20 sps:$4 sm:$0xff]  }
  0x1a   :  { %525 = vperm.xlu0 %3201, %v475_v44   ;;  %v3276_v12 = vld [vmem:[%s5506_s5 + $0x190] ss:$20 sps:$4 sm:$0xff]   ;;  %v3277_v15 = vld [vmem:[%s5506_s5 + $0x16c] ss:$20 sps:$4 sm:$0xff]   ;;  %v3279_v16 = vld [vmem:[%s5506_s5 + $0x168] ss:$20 sps:$4 sm:$0xff]  }
  0x1b   :  { %268 = vmatpush1.bf16.msra.mxu0 %v3223_v21  ;;  %1326 = vmatpush1.bf16.msra.mxu1 %v3249_v32  ;;  %v3306_v14 = vld [vmem:[%s5506_s5 + $0x5c] ss:$20 sps:$4 sm:$0xff]   ;;  %v3304_v17 = vld [vmem:[%s5506_s5 + $0x58] ss:$20 sps:$4 sm:$0xff]   ;;  %v3314_v18 = vld [vmem:[%s5506_s5 + $0x34] ss:$20 sps:$4 sm:$0xff]  }
  0x1c   :  { %269 = vmatprep.subr.bf16.mxu0 %v3224_v22  ;;  %1327 = vmatprep.subr.bf16.mxu1 %v3250_v33  ;;  %v3283_v19 = vld [vmem:[%s5506_s5 + $0x144] ss:$20 sps:$4 sm:$0xff]   ;;  %v3253_v20 = vld [vmem:[%s5505_s0 + $0x28] sm:$0xff]   ;;  %v3285_v22 = vld [vmem:[%s5506_s5 + $0x140] ss:$20 sps:$4 sm:$0xff]  }
  0x1d   :  { %530 = vperm.xlu1 %3202, %v476_v50   ;;  %v3312_v21 = vld [vmem:[%s5506_s5 + $0x30] ss:$20 sps:$4 sm:$0xff]   ;;  %v3317_v23 = vld [vmem:[%s5506_s5 + $0xc] ss:$20 sps:$4 sm:$0xff]   ;;  %v3836_v26 = vld [vmem:[%s5508_s2 + $0x14] ss:$8 sps:$4 sm:$0xff]  }
  0x1e   :  { %535 = vperm.xlu0 %3201, %v477_v51   ;;  %v3828_v24 = vld [vmem:[%s5508_s2] ss:$8 sps:$4 sm:$0xff]   ;;  %v3325_v30 = vld [vmem:[%s5506_s5 + $0x264] ss:$20 sps:$4 sm:$0xff]   ;;  %v3260_v31 = vld [vmem:[%s5505_s0 + $0x30] sm:$0xff]  }
  0x1f   :  { %270 = vmatpush1.bf16.msra.mxu0 %v3226_v25  ;;  %1328 = vmatpush1.bf16.msra.mxu1 %v3252_v36  ;;  %v3309_v25 = vld [vmem:[%s5506_s5 + $0x268] ss:$20 sps:$4 sm:$0xff]   ;;  %v3320_v29 = vld [vmem:[%s5506_s5 + $0x240] ss:$20 sps:$4 sm:$0xff]   ;;  %v3868_v35 = vld [vmem:[%s5508_s2 + $0x10] ss:$8 sps:$4 sm:$0xff]  }
  0x20   :  { %1329 = vmatprep.subr.bf16.mxu1 %v3254_v37  ;;  %1428 = vmatprep.subr.bf16.mxu0 %v3282_v46  ;;  %v3315_v28 = vld [vmem:[%s5506_s5 + $0x8] ss:$20 sps:$4 sm:$0xff]   ;;  %v3322_v32 = vld [vmem:[%s5506_s5 + $0x100] ss:$20 sps:$4 sm:$0xff]   ;;  %v3331_v36 = vld [vmem:[%s5506_s5 + $0x218] ss:$20 sps:$4 sm:$0xff]  }
  0x21   :  { %540 = vperm.xlu1 %3202, %v478_v56   ;;  %v3323_v33 = vld [vmem:[%s5506_s5 + $0x260] ss:$20 sps:$4 sm:$0xff]   ;;  %v3328_v34 = vld [vmem:[%s5506_s5 + $0x23c] ss:$20 sps:$4 sm:$0xff]   ;;  %v3876_v37 = vld [vmem:[%s5508_s2 + $0x24] ss:$8 sps:$4 sm:$0xff]  }
  0x22   :  { %288 = vmatmul.mubr.bf16.vlgmr.msra.gmra.mxu0 %v3227_v27  ;;  %545 = vperm.xlu0 %3201, %v479_v57   ;;  %v3311_v27 = vld [vmem:[%s5506_s5 + $0x128] ss:$20 sps:$4 sm:$0xff]   ;;  %v3326_v38 = vld [vmem:[%s5506_s5 + $0x238] ss:$20 sps:$4 sm:$0xff]   ;;  %v3344_v44 = vld [vmem:[%s5506_s5 + $0xb0] ss:$20 sps:$4 sm:$0xff]  }
  0x23   :  { %297 = vmatprep.mubr.bf16.mxu0 %v3515_v1  ;;  %1330 = vmatpush1.bf16.msra.mxu1 %v3256_v41  ;;  %v3336_v40 = vld [vmem:[%s5506_s5 + $0x214] ss:$20 sps:$4 sm:$0xff]   ;;  %v3267_v41 = vld [vmem:[%s5505_s0 + $0x38] sm:$0xff]   ;;  %v3339_v43 = vld [vmem:[%s5506_s5 + $0x1ec] ss:$20 sps:$4 sm:$0xff]  }
  0x24   :  { %1331 = vmatprep.subr.bf16.mxu1 %v3257_v42  ;;  %1429 = vmatpush1.bf16.msra.mxu0 %v3280_v45  ;;  %v3334_v42 = vld [vmem:[%s5506_s5 + $0x210] ss:$20 sps:$4 sm:$0xff]   ;;  %v3908_v45 = vld [vmem:[%s5508_s2 + $0x20] ss:$8 sps:$4 sm:$0xff]   ;;  %v3367_v57 = vld [vmem:[%s5506_s5 + $0x178] ss:$20 sps:$4 sm:$0xff]  }
  0x25   :  { %1430 = vmatprep.subr.bf16.mxu0 %v3288_v53  ;;  %550 = vperm.xlu1 %3202, %v480_v63   ;;  %v3353_v46 = vld [vmem:[%s5506_s5 + $0x1c8] ss:$20 sps:$4 sm:$0xff]   ;;  %v3359_v51 = vld [vmem:[%s5506_s5 + $0x1a0] ss:$20 sps:$4 sm:$0xff]   ;;  %v3945_v56 = vld [vmem:[%s5508_s2 + $0x30] ss:$8 sps:$4 sm:$0xff]  }
  0x26   :  { %555 = vperm.xlu0 %3201, %v481_v2   ;;  %v3355_v50 = vld [vmem:[%s5506_s5 + $0x88] ss:$20 sps:$4 sm:$0xff]   ;;  %v3356_v63 = vld [vmem:[%s5506_s5 + $0x170] ss:$20 sps:$4 sm:$0xff]  }
  0x27   :  { %1332 = vmatpush2.bf16.msra.mxu1 %v3259_v48  ;;  %v3337_v48 = vld [vmem:[%s5506_s5 + $0x1e8] ss:$20 sps:$4 sm:$0xff]   ;;  %v3370_v2 = vld [vmem:[%s5506_s5 + $0x10] ss:$20 sps:$4 sm:$0xff]  }
  0x28   :  { %1333 = vmatprep.subr.bf16.mxu1 %v3261_v49  ;;  %1431 = vmatpush1.bf16.msra.mxu0 %v3286_v58  ;;  %v3347_v49 = vld [vmem:[%s5506_s5 + $0x1c4] ss:$20 sps:$4 sm:$0xff]   ;;  %v3350_v53 = vld [vmem:[%s5506_s5 + $0x19c] ss:$20 sps:$4 sm:$0xff]  }
  0x29   :  { %1432 = vmatprep.subr.bf16.mxu0 %v3294_v60  ;;  %560 = vperm.xlu1 %3202, %v482_v5   ;;  %v3953_v58 = vld [vmem:[%s5508_s2 + $0x44] ss:$8 sps:$4 sm:$0xff]   ;;  %v3358_v60 = vld [vmem:[%s5506_s5 + $0x174] ss:$20 sps:$4 sm:$0xff]  }
  0x2a   :  { %298 = vmatmul.mubr.bf16.gmra.mxu0 %v3228_v39  ;;  %v3333_v39 = vld [vmem:[%s5506_s5 + $0xd8] ss:$20 sps:$4 sm:$0xff]   ;;  %v3989_v5 = vld [vmem:[%s5508_s2 + $0x54] ss:$8 sps:$4 sm:$0xff]  }
  0x2b   :  { %307 = vmatprep.mubr.bf16.mxu0 %v3515_v1  ;;  %1334 = vmatpush2.bf16.msra.mxu1 %v3263_v52  ;;  %v3345_v52 = vld [vmem:[%s5506_s5 + $0x1c0] ss:$20 sps:$4 sm:$0xff]  }
  0x2c   :  { %1335 = vmatprep.subr.bf16.mxu1 %v3264_v54  ;;  %1433 = vmatpush1.bf16.msra.mxu0 %v3292_v4  ;;  %v3360_v54 = vld [vmem:[%s5506_s5 + $0x60] ss:$20 sps:$4 sm:$0xff]   ;;  %v3376_v4 = vld [vmem:[%s5509_s4 + $0x124] ss:$20 sps:$4 sm:$0xff]  }
  0x2d   :  { %1434 = vmatprep.subr.bf16.mxu0 %v3297_v6  ;;  %v3361_v6 = vld [vmem:[%s5506_s5 + $0x148] ss:$20 sps:$4 sm:$0xff]  }
  0x2f   :  { %1336 = vmatpush2.bf16.msra.mxu1 %v3266_v59  ;;  %v3348_v59 = vld [vmem:[%s5506_s5 + $0x198] ss:$20 sps:$4 sm:$0xff]  }
  0x30   :  { %1337 = vmatprep.subr.bf16.mxu1 %v3268_v62  ;;  %1435 = vmatpush1.bf16.msra.mxu0 %v3295_v7  ;;  %v3369_v62 = vld [vmem:[%s5506_s5 + $0x150] ss:$20 sps:$4 sm:$0xff]  }
  0x31   :  { %1436 = vmatprep.subr.bf16.mxu0 %v3303_v9  ;;  %v3373_v7 = vld [vmem:[%s5509_s4 + $0x11c] ss:$20 sps:$4 sm:$0xff]   ;;  %v3379_v9 = vld [vmem:[%s5509_s4 + $0xf4] ss:$20 sps:$4 sm:$0xff]  }
  0x32   :  { %308 = vmatmul.mubr.bf16.gmra.mxu0 %v3232_v47  ;;  %v3916_v47 = vld [vmem:[%s5508_s2 + $0x34] ss:$8 sps:$4 sm:$0xff]  }
  0x33   :  { %317 = vmatprep.mubr.bf16.mxu0 %v3515_v1  ;;  %1338 = vmatpush2.bf16.msra.mxu1 %v3270_v0  ;;  %v3363_v0 = vld [vmem:[%s5506_s5 + $0x14c] ss:$20 sps:$4 sm:$0xff]  }
  0x34   :  { %1339 = vmatprep.subr.bf16.mxu1 %v3271_v3  ;;  %1437 = vmatpush1.bf16.msra.mxu0 %v3301_v13  ;;  %v3981_v3 = vld [vmem:[%s5508_s2 + $0x40] ss:$8 sps:$4 sm:$0xff]  }
  0x35   :  { %1438 = vmatprep.subr.bf16.mxu0 %v3306_v14  ;;  %v3385_v13 = vld [vmem:[%s5509_s4 + $0xcc] ss:$20 sps:$4 sm:$0xff]   ;;  %v3383_v14 = vld [vmem:[%s5509_s4 + $0xc8] ss:$20 sps:$4 sm:$0xff]  }
  0x37   :  { %1340 = vmatpush2.bf16.msra.mxu1 %v3273_v8  ;;  %v3371_v8 = vld [vmem:[%s5509_s4 + $0x118] ss:$20 sps:$4 sm:$0xff]  }
  0x38   :  { %1341 = vmatprep.subr.bf16.mxu1 %v3274_v11  ;;  %1439 = vmatpush1.bf16.msra.mxu0 %v3304_v17  ;;  %v4014_v11 = vld [vmem:[%s5508_s2 + $0x64] ss:$8 sps:$4 sm:$0xff]   ;;  %v4040_v17 = vld [vmem:[%s5508_s2 + $0x74] ss:$8 sps:$4 sm:$0xff]  }
  0x39   :  { %1440 = vmatprep.subr.bf16.mxu0 %v3314_v18  ;;  %v3389_v18 = vld [vmem:[%s5509_s4 + $0xa0] ss:$20 sps:$4 sm:$0xff]  }
  0x3a   :  { %318 = vmatmul.mubr.bf16.gmra.mxu0 %v3239_v61  ;;  %v3368_v61 = vld [vmem:[%s5506_s5 + $0x38] ss:$20 sps:$4 sm:$0xff]  }
  0x3b   :  { %327 = vmatprep.mubr.bf16.mxu0 %v3515_v1  ;;  %1342 = vmatpush2.bf16.msra.mxu1 %v3276_v12  ;;  %v3377_v12 = vld [vmem:[%s5509_s4 + $0xf0] ss:$20 sps:$4 sm:$0xff]  }
  0x3c   :  { %1343 = vmatprep.subr.bf16.mxu1 %v3277_v15  ;;  %1441 = vmatpush1.bf16.msra.mxu0 %v3312_v21  ;;  %v3391_v15 = vld [vmem:[%s5509_s4 + $0xa4] ss:$20 sps:$4 sm:$0xff]   ;;  %v3403_v21 = vld [vmem:[%s5509_s4 + $0x54] ss:$20 sps:$4 sm:$0xff]  }
  0x3d   :  { %1442 = vmatprep.subr.bf16.mxu0 %v3317_v23  ;;  %v3401_v23 = vld [vmem:[%s5509_s4 + $0x50] ss:$20 sps:$4 sm:$0xff]  }
  0x3f   :  { %1344 = vmatpush2.bf16.msra.mxu1 %v3279_v16  ;;  %v4034_v16 = vld [vmem:[%s5508_s2 + $0x60] ss:$8 sps:$4 sm:$0xff]  }
  0x40   :  { %1345 = vmatprep.subr.bf16.mxu1 %v3283_v19  ;;  %1443 = vmatpush1.bf16.msra.mxu0 %v3315_v28  ;;  %v3397_v19 = vld [vmem:[%s5509_s4 + $0x7c] ss:$20 sps:$4 sm:$0xff]   ;;  %v3415_v28 = vld [vmem:[%s5509_s4 + $0x4] ss:$20 sps:$4 sm:$0xff]  }
  0x41   :  { %1444 = vmatprep.subr.bf16.mxu0 %v3325_v30  ;;  %v3413_v30 = vld [vmem:[%s5509_s4] ss:$20 sps:$4 sm:$0xff]  }
  0x42   :  { %328 = vmatmul.mubr.bf16.gmra.mxu0 %v3246_v10  ;;  %v4008_v10 = vld [vmem:[%s5508_s2 + $0x50] ss:$8 sps:$4 sm:$0xff]  }
  0x43   :  { %337 = vmatprep.mubr.bf16.mxu0 %v3515_v1  ;;  %1346 = vmatpush2.bf16.msra.mxu1 %v3285_v22  ;;  %v4061_v22 = vld [vmem:[%s5508_s2 + $0x70] ss:$8 sps:$4 sm:$0xff]  }
  0x44   :  { %3056 = vmatprep.subr.bf16.mxu1 %v3309_v25  ;;  %1445 = vmatpush2.bf16.msra.mxu0 %v3323_v33  ;;  %v3409_v25 = vld [vmem:[%s5509_s4 + $0x2c] ss:$20 sps:$4 sm:$0xff]   ;;  %v3388_v33 = vld [vmem:[%s5509_s4 + $0xd4] ss:$20 sps:$4 sm:$0xff]  }
  0x45   :  { %1446 = vmatprep.subr.bf16.mxu0 %v3328_v34  ;;  %v3419_v34 = vld [vmem:[%s5509_s4 + $0x258] ss:$20 sps:$4 sm:$0xff]  }
  0x46   :  { %1348 = vmatmul.mubr.bf16.vlgmr.msra.gmra.mxu1 %v3828_v24 }
  0x47   :  { %1357 = vmatprep.mubr.bf16.mxu1 %v3836_v26  ;;  %3057 = vmatpush3.bf16.msra.mxu1 %v3311_v27  ;;  %v3407_v27 = vld [vmem:[%s5509_s4 + $0x28] ss:$20 sps:$4 sm:$0xff]  }
  0x48   :  { %3058 = vmatprep.subr.bf16.mxu1 %v3320_v29  ;;  %1447 = vmatpush2.bf16.msra.mxu0 %v3326_v38  ;;  %v3374_v29 = vld [vmem:[%s5509_s4 + $0x120] ss:$20 sps:$4 sm:$0xff]   ;;  %v3386_v38 = vld [vmem:[%s5509_s4 + $0xd0] ss:$20 sps:$4 sm:$0xff]  }
  0x49   :  { %1448 = vmatprep.subr.bf16.mxu0 %v3336_v40  ;;  %v3431_v40 = vld [vmem:[%s5509_s4 + $0x208] ss:$20 sps:$4 sm:$0xff]  }
  0x4a   :  { %338 = vmatmul.mubr.bf16.gmra.mxu0 %v3253_v20  ;;  %v3395_v20 = vld [vmem:[%s5509_s4 + $0x78] ss:$20 sps:$4 sm:$0xff]  }
  0x4b   :  { %347 = vmatprep.mubr.bf16.mxu0 %v3515_v1  ;;  %3059 = vmatpush3.bf16.msra.mxu1 %v3322_v32  ;;  %v3380_v32 = vld [vmem:[%s5509_s4 + $0xf8] ss:$20 sps:$4 sm:$0xff]  }
  0x4c   :  { %3060 = vmatprep.subr.bf16.mxu1 %v3331_v36  ;;  %1449 = vmatpush2.bf16.msra.mxu0 %v3334_v42  ;;  %v3427_v36 = vld [vmem:[%s5509_s4 + $0x234] ss:$20 sps:$4 sm:$0xff]  }
  0x4d   :  { %1450 = vmatprep.subr.bf16.mxu0 %v3339_v43  ;;  %v3437_v42 = vld [vmem:[%s5509_s4 + $0x1e0] ss:$20 sps:$4 sm:$0xff]   ;;  %v3406_v43 = vld [vmem:[%s5509_s4 + $0x5c] ss:$20 sps:$4 sm:$0xff]  }
  0x4e   :  { %1358 = vmatmul.mubr.bf16.gmra.mxu1 %v3868_v35 }
  0x4f   :  { %1367 = vmatprep.mubr.bf16.mxu1 %v3876_v37  ;;  %3061 = vmatpush3.bf16.msra.mxu1 %v3333_v39  ;;  %v3433_v39 = vld [vmem:[%s5509_s4 + $0x20c] ss:$20 sps:$4 sm:$0xff]  }
  0x50   :  { %1451 = vmatpush2.bf16.msra.mxu0 %v3337_v48  ;;  %v3404_v48 = vld [vmem:[%s5509_s4 + $0x58] ss:$20 sps:$4 sm:$0xff]  }
  0x51   :  { %1452 = vmatprep.subr.bf16.mxu0 %v3347_v49  ;;  %v3451_v49 = vld [vmem:[%s5509_s4 + $0x194] ss:$20 sps:$4 sm:$0xff]  }
  0x52   :  { %348 = vmatmul.mubr.bf16.gmra.mxu0 %v3260_v31  ;;  %v3421_v31 = vld [vmem:[%s5509_s4 + $0x25c] ss:$20 sps:$4 sm:$0xff]  }
  0x53   :  { %357 = vmatprep.mubr.bf16.mxu0 %v3515_v1  ;;  %v3342_v1 = vld [vmem:[%s5506_s5 + $0x1f0] ss:$20 sps:$4 sm:$0xff]  }
  0x54   :  { %3062 = vmatprep.subr.bf16.mxu1 %v3342_v1  ;;  %1453 = vmatpush2.bf16.msra.mxu0 %v3345_v52  ;;  %v3392_v1 = vld [vmem:[%s5509_s4 + $0xa8] ss:$20 sps:$4 sm:$0xff]   ;;  %v3457_v52 = vld [vmem:[%s5509_s4 + $0x16c] ss:$20 sps:$4 sm:$0xff]  }
  0x55   :  { %3063 = vmatpush3.bf16.msra.mxu1 %v3344_v44  ;;  %1454 = vmatprep.subr.bf16.mxu0 %v3350_v53  ;;  %v3445_v44 = vld [vmem:[%s5509_s4 + $0x1bc] ss:$20 sps:$4 sm:$0xff]  }
  0x56   :  { %3064 = vmatprep.subr.bf16.mxu1 %v3353_v46  ;;  %1368 = vmatmul.mubr.bf16.gmra.mxu1 %v3908_v45  ;;  %v3443_v46 = vld [vmem:[%s5509_s4 + $0x1b8] ss:$20 sps:$4 sm:$0xff]   ;;  %v3455_v53 = vld [vmem:[%s5509_s4 + $0x168] ss:$20 sps:$4 sm:$0xff]  }
  0x57   :  { %1377 = vmatprep.mubr.bf16.mxu1 %v3916_v47 }
  0x58   :  { %1455 = vmatpush2.bf16.msra.mxu0 %v3348_v59  ;;  %v3461_v59 = vld [vmem:[%s5509_s4 + $0x140] ss:$20 sps:$4 sm:$0xff]  }
  0x59   :  { %3065 = vmatpush3.bf16.msra.mxu1 %v3355_v50  ;;  %1456 = vmatprep.subr.bf16.mxu0 %v3358_v60  ;;  %v3449_v50 = vld [vmem:[%s5509_s4 + $0x190] ss:$20 sps:$4 sm:$0xff]  }
  0x5a   :  { %358 = vmatmul.mubr.bf16.gmra.mxu0 %v3267_v41  ;;  %3066 = vmatprep.subr.bf16.mxu1 %v3359_v51  ;;  %v3439_v41 = vld [vmem:[%s5509_s4 + $0x1e4] ss:$20 sps:$4 sm:$0xff]   ;;  %v3418_v51 = vld [vmem:[%s5509_s4 + $0xc] ss:$20 sps:$4 sm:$0xff]   ;;  %v3430_v60 = vld [vmem:[%s5509_s4 + $0x23c] ss:$20 sps:$4 sm:$0xff]  }
  0x5b   :  { %1460 = vmatprep.mubr.bf16.mxu0 %v3726_v55 }
  0x5c   :  { %1457 = vmatpush2.bf16.msra.mxu0 %v3356_v63  ;;  %v3436_v63 = vld [vmem:[%s5509_s4 + $0x214] ss:$20 sps:$4 sm:$0xff]  }
  0x5d   :  { %3067 = vmatpush3.bf16.msra.mxu1 %v3360_v54  ;;  %1458 = vmatprep.subr.bf16.mxu0 %v3363_v0  ;;  %v3416_v54 = vld [vmem:[%s5509_s4 + $0x8] ss:$20 sps:$4 sm:$0xff]   ;;  %v3434_v0 = vld [vmem:[%s5509_s4 + $0x210] ss:$20 sps:$4 sm:$0xff]  }
  0x5e   :  { %3068 = vmatprep.subr.bf16.mxu1 %v3367_v57  ;;  %1378 = vmatmul.mubr.bf16.gmra.mxu1 %v3945_v56  ;;  %v3463_v57 = vld [vmem:[%s5509_s4 + $0x144] ss:$20 sps:$4 sm:$0xff]  }
  0x5f   :  { %1387 = vmatprep.mubr.bf16.mxu1 %v3953_v58 }
  0x60   :  { %1459 = vmatpush2.bf16.msra.mxu0 %v3361_v6  ;;  %v3454_v6 = vld [vmem:[%s5509_s4 + $0x19c] ss:$20 sps:$4 sm:$0xff]  }
  0x61   :  { %3069 = vmatpush3.bf16.msra.mxu1 %v3368_v61  ;;  %2054 = vmatprep.subr.bf16.mxu0 %v3373_v7  ;;  %v3467_v61 = vld [vmem:[%s5509_s4 + $0x268] ss:$20 sps:$4 sm:$0xff]   ;;  %v3452_v7 = vld [vmem:[%s5509_s4 + $0x198] ss:$20 sps:$4 sm:$0xff]  }
  0x62   :  { %3070 = vmatprep.subr.bf16.mxu1 %v3369_v62  ;;  %v3428_v62 = vld [vmem:[%s5509_s4 + $0x238] ss:$20 sps:$4 sm:$0xff]  }
  0x63   :  { %1461 = vmatmul.mubr.bf16.vlgmr.msra.gmra.mxu0 %v3828_v24 }
  0x64   :  { %2055 = vmatpush1.bf16.msra.mxu0 %v3371_v8  ;;  %1470 = vmatprep.mubr.bf16.mxu0 %v3836_v26  ;;  %v3460_v8 = vld [vmem:[%s5509_s4 + $0x174] ss:$20 sps:$4 sm:$0xff]  }
  0x65   :  { %3071 = vmatpush3.bf16.msra.mxu1 %v3370_v2  ;;  %2056 = vmatprep.subr.bf16.mxu0 %v3379_v9  ;;  %v3442_v2 = vld [vmem:[%s5509_s4 + $0x1ec] ss:$20 sps:$4 sm:$0xff]   ;;  %v3458_v9 = vld [vmem:[%s5509_s4 + $0x170] ss:$20 sps:$4 sm:$0xff]  }
  0x66   :  { %2167 = vmatprep.subr.bf16.mxu1 %v3376_v4  ;;  %1388 = vmatmul.mubr.bf16.gmra.mxu1 %v3981_v3  ;;  %v3448_v4 = vld [vmem:[%s5509_s4 + $0x1c4] ss:$20 sps:$4 sm:$0xff]  }
  0x67   :  { %1397 = vmatprep.mubr.bf16.mxu1 %v3989_v5 }
  0x68   :  { %2057 = vmatpush1.bf16.msra.mxu0 %v3377_v12 }
  0x69   :  { %2058 = vmatprep.subr.bf16.mxu0 %v3385_v13 }
  0x6b   :  { %1471 = vmatmul.mubr.bf16.gmra.mxu0 %v3868_v35 }
  0x6c   :  { %2059 = vmatpush1.bf16.msra.mxu0 %v3383_v14  ;;  %1480 = vmatprep.mubr.bf16.mxu0 %v3876_v37 }
  0x6d   :  { %2060 = vmatprep.subr.bf16.mxu0 %v3391_v15 }
  0x6e   :  { %1398 = vmatmul.mubr.bf16.gmra.mxu1 %v4008_v10 }
  0x6f   :  { %1407 = vmatprep.mubr.bf16.mxu1 %v4014_v11 }
  0x70   :  { %2061 = vmatpush1.bf16.msra.mxu0 %v3389_v18 }
  0x71   :  { %2062 = vmatprep.subr.bf16.mxu0 %v3397_v19 }
  0x73   :  { %1481 = vmatmul.mubr.bf16.gmra.mxu0 %v3908_v45 }
  0x74   :  { %2063 = vmatpush1.bf16.msra.mxu0 %v3395_v20  ;;  %1490 = vmatprep.mubr.bf16.mxu0 %v3916_v47 }
  0x75   :  { %2064 = vmatprep.subr.bf16.mxu0 %v3403_v21 }
  0x76   :  { %1408 = vmatmul.mubr.bf16.gmra.mxu1 %v4034_v16 }
  0x77   :  { %1417 = vmatprep.mubr.bf16.mxu1 %v4040_v17 }
  0x78   :  { %2065 = vmatpush1.bf16.msra.mxu0 %v3401_v23 }
  0x79   :  { %2066 = vmatprep.subr.bf16.mxu0 %v3409_v25 }
  0x7b   :  { %1491 = vmatmul.mubr.bf16.gmra.mxu0 %v3945_v56 }
  0x7c   :  { %2067 = vmatpush1.bf16.msra.mxu0 %v3407_v27  ;;  %1500 = vmatprep.mubr.bf16.mxu0 %v3953_v58  ;;  %v3468_v27 = vld [vmem:[%s5509_s4 + $0x128] ss:$20 sps:$4 sm:$0xff]  }
  0x7d   :  { %2068 = vmatprep.subr.bf16.mxu0 %v3415_v28 }
  0x7e   :  { %1418 = vmatmul.mubr.bf16.gmra.mxu1 %v4061_v22 }
  0x7f   :  { %1573 = vmatprep.mubr.bf16.mxu1 %v3726_v55  ;;  %v3382_v55 = vld [vmem:[%s5509_s4 + $0xfc] ss:$20 sps:$4 sm:$0xff]  }
  0x80   :  { %2069 = vmatpush1.bf16.msra.mxu0 %v3413_v30  ;;  %v3469_v30 = vld [vmem:[%s5509_s4 + $0x240] ss:$20 sps:$4 sm:$0xff]  }
  0x81   :  { %2070 = vmatprep.subr.bf16.mxu0 %v3421_v31 }
  0x83   :  { %1501 = vmatmul.mubr.bf16.gmra.mxu0 %v3981_v3 }
  0x84   :  { %2071 = vmatpush2.bf16.msra.mxu0 %v3419_v34  ;;  %1510 = vmatprep.mubr.bf16.mxu0 %v3989_v5 }
  0x85   :  { %2072 = vmatprep.subr.bf16.mxu0 %v3427_v36  ;;  %v486_v12 = vpop.permute.xlu0 %485  ;;  %v3471_v36 = vld [vmem:[%s5509_s4 + $0x218] ss:$20 sps:$4 sm:$0xff]  }
  0x86   :  { %1574 = vmatmul.mubr.bf16.vlgmr.msra.gmra.mxu1 %v3828_v24  ;;  %v3425_v24 = vld [vmem:[%s5509_s4 + $0x230] ss:$20 sps:$4 sm:$0xff]  }
  0x87   :  { %2168 = vmatpush1.bf16.msra.mxu1 %v3374_v29  ;;  %1581 = vmatprep.mubr.bf16.mxu1 %v3836_v26  ;;  %v3394_v26 = vld [vmem:[%s5509_s4 + $0xac] ss:$20 sps:$4 sm:$0xff]  }
  0x88   :  { %2169 = vmatprep.subr.bf16.mxu1 %v3382_v55  ;;  %2073 = vmatpush2.bf16.msra.mxu0 %v3425_v24  ;;  %v496_v19 = vpop.permute.xlu1 %495 }
  0x89   :  { %2074 = vmatprep.subr.bf16.mxu0 %v3433_v39 }
  0x8b   :  { %2170 = vmatpush1.bf16.msra.mxu1 %v3380_v32  ;;  %1511 = vmatmul.mubr.bf16.gmra.mxu0 %v4008_v10  ;;  %v3470_v32 = vld [vmem:[%s5509_s4 + $0x100] ss:$20 sps:$4 sm:$0xff]  }
  0x8c   :  { %2171 = vmatprep.subr.bf16.mxu1 %v3388_v33  ;;  %2075 = vmatpush2.bf16.msra.mxu0 %v3431_v40  ;;  %v501_v31 = vpop.permute.xlu1 %500 }
  0x8d   :  { %1520 = vmatprep.mubr.bf16.mxu0 %v4014_v11  ;;  %2076 = vmatprep.subr.bf16.mxu0 %v3439_v41 }
  0x8e   :  { %1582 = vmatmul.mubr.bf16.gmra.mxu1 %v3868_v35  ;;  %v3400_v35 = vld [vmem:[%s5509_s4 + $0x84] ss:$20 sps:$4 sm:$0xff]  }
  0x8f   :  { %2172 = vmatpush1.bf16.msra.mxu1 %v3386_v38  ;;  %1589 = vmatprep.mubr.bf16.mxu1 %v3876_v37  ;;  %v3398_v37 = vld [vmem:[%s5509_s4 + $0x80] ss:$20 sps:$4 sm:$0xff]  }
  0x90   :  { %2173 = vmatprep.subr.bf16.mxu1 %v3394_v26  ;;  %2077 = vmatpush2.bf16.msra.mxu0 %v3437_v42  ;;  %v3473_v42 = vld [vmem:[%s5509_s4 + $0x1f0] ss:$20 sps:$4 sm:$0xff]  }
  0x91   :  { %2078 = vmatprep.subr.bf16.mxu0 %v3445_v44  ;;  %v3474_v44 = vld [vmem:[%s5509_s4 + $0xb0] ss:$20 sps:$4 sm:$0xff]  }
  0x93   :  { %2174 = vmatpush1.bf16.msra.mxu1 %v3392_v1  ;;  %1521 = vmatmul.mubr.bf16.gmra.mxu0 %v4034_v16  ;;  %v3472_v1 = vld [vmem:[%s5509_s4 + $0xd8] ss:$20 sps:$4 sm:$0xff]  }
  0x94   :  { %2175 = vmatprep.subr.bf16.mxu1 %v3400_v35  ;;  %2079 = vmatpush2.bf16.msra.mxu0 %v3443_v46 }
  0x95   :  { %1530 = vmatprep.mubr.bf16.mxu0 %v4040_v17  ;;  %2080 = vmatprep.subr.bf16.mxu0 %v3451_v49 }
  0x96   :  { %1590 = vmatmul.mubr.bf16.gmra.mxu1 %v3908_v45  ;;  %v3412_v45 = vld [vmem:[%s5509_s4 + $0x34] ss:$20 sps:$4 sm:$0xff]  }
  0x97   :  { %2176 = vmatpush1.bf16.msra.mxu1 %v3398_v37  ;;  %1597 = vmatprep.mubr.bf16.mxu1 %v3916_v47  ;;  %v3410_v47 = vld [vmem:[%s5509_s4 + $0x30] ss:$20 sps:$4 sm:$0xff]  }
  0x98   :  { %2177 = vmatprep.subr.bf16.mxu1 %v3406_v43  ;;  %2081 = vmatpush2.bf16.msra.mxu0 %v3449_v50  ;;  %v511_v43 = vpop.permute.xlu1 %510 }
  0x99   :  { %2082 = vmatprep.subr.bf16.mxu0 %v3457_v52 }
  0x9b   :  { %2178 = vmatpush1.bf16.msra.mxu1 %v3404_v48  ;;  %1531 = vmatmul.mubr.bf16.gmra.mxu0 %v4061_v22 }
  0x9c   :  { %2179 = vmatprep.subr.bf16.mxu1 %v3412_v45  ;;  %2083 = vmatpush2.bf16.msra.mxu0 %v3455_v53  ;;  %v3475_v45 = vld [vmem:[%s5509_s4 + $0x1c8] ss:$20 sps:$4 sm:$0xff]  }
  0x9d   :  { %2084 = vmatprep.subr.bf16.mxu0 %v3463_v57 }
  0x9e   :  { %1598 = vmatmul.mubr.bf16.gmra.mxu1 %v3945_v56  ;;  %v3424_v56 = vld [vmem:[%s5509_s4 + $0x264] ss:$20 sps:$4 sm:$0xff]  }
  0x9f   :  { %2180 = vmatpush1.bf16.msra.mxu1 %v3410_v47  ;;  %1605 = vmatprep.mubr.bf16.mxu1 %v3953_v58  ;;  %v3422_v58 = vld [vmem:[%s5509_s4 + $0x260] ss:$20 sps:$4 sm:$0xff]  }
  0xa0   :  { %2181 = vmatprep.subr.bf16.mxu1 %v3418_v51  ;;  %2085 = vmatpush2.bf16.msra.mxu0 %v3461_v59  ;;  %v3477_v59 = vld [vmem:[%s5509_s4 + $0x1a0] ss:$20 sps:$4 sm:$0xff]  }
  0xa1   :  { %3120 = vmatprep.subr.bf16.mxu0 %v3467_v61 }
  0xa3   :  { %2182 = vmatpush1.bf16.msra.mxu1 %v3416_v54  ;;  %v3476_v54 = vld [vmem:[%s5509_s4 + $0x88] ss:$20 sps:$4 sm:$0xff]  }
  0xa4   :  { %2183 = vmatprep.subr.bf16.mxu1 %v3424_v56 }
  0xa6   :  { %1606 = vmatmul.mubr.bf16.gmra.mxu1 %v3981_v3  ;;  %v3440_v3 = vld [vmem:[%s5509_s4 + $0x1e8] ss:$20 sps:$4 sm:$0xff]  }
  0xa7   :  { %2184 = vmatpush2.bf16.msra.mxu1 %v3422_v58  ;;  %1613 = vmatprep.mubr.bf16.mxu1 %v3989_v5  ;;  %v3446_v5 = vld [vmem:[%s5509_s4 + $0x1c0] ss:$20 sps:$4 sm:$0xff]  }
  0xa8   :  { %2185 = vmatprep.subr.bf16.mxu1 %v3430_v60  ;;  %v521_v60 = vpop.permute.xlu1 %520 }
  0xab   :  { %2186 = vmatpush2.bf16.msra.mxu1 %v3428_v62 }
  0xac   :  { %2187 = vmatprep.subr.bf16.mxu1 %v3436_v63 }
  0xae   :  { %1614 = vmatmul.mubr.bf16.gmra.mxu1 %v4008_v10  ;;  %v3466_v10 = vld [vmem:[%s5509_s4 + $0x14c] ss:$20 sps:$4 sm:$0xff]  }
  0xaf   :  { %2188 = vmatpush2.bf16.msra.mxu1 %v3434_v0  ;;  %1621 = vmatprep.mubr.bf16.mxu1 %v4014_v11  ;;  %v3464_v11 = vld [vmem:[%s5509_s4 + $0x148] ss:$20 sps:$4 sm:$0xff]  }
  0xb0   :  { %2189 = vmatprep.subr.bf16.mxu1 %v3442_v2  ;;  %v3479_v2 = vld [vmem:[%s5509_s4 + $0x178] ss:$20 sps:$4 sm:$0xff]  }
  0xb3   :  { %2190 = vmatpush2.bf16.msra.mxu1 %v3440_v3 }
  0xb4   :  { %2191 = vmatprep.subr.bf16.mxu1 %v3448_v4 }
  0xb6   :  { %1622 = vmatmul.mubr.bf16.gmra.mxu1 %v4034_v16  ;;  %v491_v16 = vpop.permute.xlu0 %490 }
  0xb7   :  { %2192 = vmatpush2.bf16.msra.mxu1 %v3446_v5  ;;  %1629 = vmatprep.mubr.bf16.mxu1 %v4040_v17 }
  0xb8   :  { %2193 = vmatprep.subr.bf16.mxu1 %v3454_v6 }
  0xba   :  { %v506_v46 = vpop.permute.xlu0 %505 }
  0xbb   :  { %2194 = vmatpush2.bf16.msra.mxu1 %v3452_v7 }
  0xbc   :  { %2195 = vmatprep.subr.bf16.mxu1 %v3460_v8  ;;  %v3480_v8 = vld [vmem:[%s5509_s4 + $0x38] ss:$20 sps:$4 sm:$0xff]  }
  0xbe   :  { %1630 = vmatmul.mubr.bf16.gmra.mxu1 %v4061_v22  ;;  %v516_v62 = vpop.permute.xlu0 %515 }
  0xbf   :  { %2196 = vmatpush2.bf16.msra.mxu1 %v3458_v9 }
  0xc0   :  { %2197 = vmatprep.subr.bf16.mxu1 %v3466_v10 }
  0xc3   :  { %2198 = vmatpush2.bf16.msra.mxu1 %v3464_v11  ;;  %v3481_v11 = vld [vmem:[%s5509_s4 + $0x150] ss:$20 sps:$4 sm:$0xff]  }
  0xc4   :  { %3184 = vmatprep.subr.bf16.mxu1 %v3467_v61  ;;  %v3478_v61 = vld [vmem:[%s5509_s4 + $0x60] ss:$20 sps:$4 sm:$0xff]  }
  0xe2   :  { %v289_v13 = vpop.f32.mrf.mxu0 }
  0xe3   :  { %v563_v23 = vmul.f32 %v486_v12, %v289_v13  ;;  %v531_v13 = vpop.permute.xlu1 %530 }
  0xe4   :  { %v291_v14 = vpop.f32.mrf.mxu0 }
  0xe5   :  { %v564_v20 = vmul.f32 %v486_v12, %v291_v14  ;;  %v3482_v14 = vld [vmem:[%s5509_s4 + $0x10] ss:$20 sps:$4 sm:$0xff]  }
  0xe6   :  { %v293_v15 = vpop.f32.mrf.mxu0 }
  0xe7   :  { %v565_v17 = vmul.f32 %v491_v16, %v293_v15  ;;  %v526_v15 = vpop.permute.xlu0 %525 }
  0xe8   :  { %v295_v18 = vpop.f32.mrf.mxu0 }
  0xe9   :  { %v566_v21 = vmul.f32 %v491_v16, %v295_v18  ;;  %v4254_v28 = vpack.c.bf16 %v565_v17, %v563_v23 }
  0xea   :  { %v299_v22 = vpop.f32.mrf.mxu0 }
  0xeb   :  { %v4249_v25 = vpack.c.bf16 %v566_v21, %v564_v20  ;;  %v567_v26 = vmul.f32 %v496_v19, %v299_v22 }
  0xec   :  { %v301_v29 = vpop.f32.mrf.mxu0 }
  0xed   :  { %2086 = vmatprep.mubr.bf16.mxu0 %v4249_v25  ;;  %2199 = vmatprep.mubr.bf16.mxu1 %v4249_v25  ;;  %v568_v24 = vmul.f32 %v496_v19, %v301_v29 }
  0xee   :  { %v303_v55 = vpop.f32.mrf.mxu0  ;;  %2087 = vmatmul.mubr.bf16.vlgmr.msra.gmra.mxu0 %v4254_v28  ;;  %2200 = vmatmul.mubr.bf16.vlgmr.msra.gmra.mxu1 %v4254_v28 }
  0xef   :  { %3121 = vmatpush3.bf16.msra.mxu0 %v3468_v27  ;;  %3192 = vmatpush3.bf16.msra.mxu1 %v3468_v27  ;;  %v569_v33 = vmul.f32 %v501_v31, %v303_v55 }
  0xf0   :  { %v305_v34 = vpop.f32.mrf.mxu0  ;;  %3122 = vmatprep.subr.bf16.mxu0 %v3469_v30  ;;  %3185 = vmatprep.subr.bf16.mxu1 %v3469_v30  ;;  %v541_v30 = vpop.permute.xlu1 %540 }
  0xf1   :  { %v570_v38 = vmul.f32 %v501_v31, %v305_v34  ;;  %v4274_v41 = vpack.c.bf16 %v569_v33, %v567_v26  ;;  %v536_v31 = vpop.permute.xlu0 %535 }
  0xf2   :  { %v309_v39 = vpop.f32.mrf.mxu0 }
  0xf3   :  { %v4269_v40 = vpack.c.bf16 %v570_v38, %v568_v24  ;;  %3123 = vmatpush3.bf16.msra.mxu0 %v3470_v32  ;;  %3193 = vmatpush3.bf16.msra.mxu1 %v3470_v32  ;;  %v571_v51 = vmul.f32 %v506_v46, %v309_v39 }
  0xf4   :  { %v311_v35 = vpop.f32.mrf.mxu0  ;;  %3124 = vmatprep.subr.bf16.mxu0 %v3471_v36  ;;  %3186 = vmatprep.subr.bf16.mxu1 %v3471_v36 }
  0xf5   :  { %2096 = vmatprep.mubr.bf16.mxu0 %v4269_v40  ;;  %2209 = vmatprep.mubr.bf16.mxu1 %v4269_v40  ;;  %v572_v50 = vmul.f32 %v506_v46, %v311_v35 }
  0xf6   :  { %v313_v37 = vpop.f32.mrf.mxu0  ;;  %2097 = vmatmul.mubr.bf16.gmra.mxu0 %v4274_v41  ;;  %2210 = vmatmul.mubr.bf16.gmra.mxu1 %v4274_v41 }
  0xf7   :  { %3125 = vmatpush3.bf16.msra.mxu0 %v3472_v1  ;;  %3194 = vmatpush3.bf16.msra.mxu1 %v3472_v1  ;;  %v573_v48 = vmul.f32 %v511_v43, %v313_v37 }
  0xf8   :  { %v315_v49 = vpop.f32.mrf.mxu0  ;;  %3126 = vmatprep.subr.bf16.mxu0 %v3473_v42  ;;  %3187 = vmatprep.subr.bf16.mxu1 %v3473_v42 }
  0xf9   :  { %v574_v47 = vmul.f32 %v511_v43, %v315_v49  ;;  %v4294_v57 = vpack.c.bf16 %v573_v48, %v571_v51  ;;  %v546_v48 = vpop.permute.xlu0 %545 }
  0xfa   :  { %v319_v52 = vpop.f32.mrf.mxu0 }
  0xfb   :  { %v4289_v53 = vpack.c.bf16 %v574_v47, %v572_v50  ;;  %3127 = vmatpush3.bf16.msra.mxu0 %v3474_v44  ;;  %3195 = vmatpush3.bf16.msra.mxu1 %v3474_v44  ;;  %v575_v5 = vmul.f32 %v516_v62, %v319_v52  ;;  %v551_v44 = vpop.permute.xlu1 %550 }
  0xfc   :  { %v321_v56 = vpop.f32.mrf.mxu0  ;;  %3128 = vmatprep.subr.bf16.mxu0 %v3475_v45  ;;  %3188 = vmatprep.subr.bf16.mxu1 %v3475_v45 }
  0xfd   :  { %2106 = vmatprep.mubr.bf16.mxu0 %v4289_v53  ;;  %2219 = vmatprep.mubr.bf16.mxu1 %v4289_v53  ;;  %v576_v3 = vmul.f32 %v516_v62, %v321_v56 }
  0xfe   :  { %v323_v58 = vpop.f32.mrf.mxu0  ;;  %2107 = vmatmul.mubr.bf16.gmra.mxu0 %v4294_v57  ;;  %2220 = vmatmul.mubr.bf16.gmra.mxu1 %v4294_v57 }
  0xff   :  { %3129 = vmatpush3.bf16.msra.mxu0 %v3476_v54  ;;  %3196 = vmatpush3.bf16.msra.mxu1 %v3476_v54  ;;  %v577_v63 = vmul.f32 %v521_v60, %v323_v58 }
 0x100   :  { %v325_v0 = vpop.f32.mrf.mxu0  ;;  %3130 = vmatprep.subr.bf16.mxu0 %v3477_v59  ;;  %3189 = vmatprep.subr.bf16.mxu1 %v3477_v59 }
 0x101   :  { %v578_v4 = vmul.f32 %v521_v60, %v325_v0  ;;  %v4314_v9 = vpack.c.bf16 %v577_v63, %v575_v5  ;;  %v561_v63 = vpop.permute.xlu1 %560 }
 0x102   :  { %v329_v6 = vpop.f32.mrf.mxu0 }
 0x103   :  { %v4309_v7 = vpack.c.bf16 %v578_v4, %v576_v3  ;;  %3131 = vmatpush3.bf16.msra.mxu0 %v3478_v61  ;;  %3197 = vmatpush3.bf16.msra.mxu1 %v3478_v61  ;;  %v579_v20 = vmul.f32 %v526_v15, %v329_v6 }
 0x104   :  { %v331_v10 = vpop.f32.mrf.mxu0  ;;  %3132 = vmatprep.subr.bf16.mxu0 %v3479_v2  ;;  %3190 = vmatprep.subr.bf16.mxu1 %v3479_v2  ;;  %v556_v2 = vpop.permute.xlu0 %555 }
 0x105   :  { %2116 = vmatprep.mubr.bf16.mxu0 %v4309_v7  ;;  %2229 = vmatprep.mubr.bf16.mxu1 %v4309_v7  ;;  %v580_v18 = vmul.f32 %v526_v15, %v331_v10 }
 0x106   :  { %v333_v12 = vpop.f32.mrf.mxu0  ;;  %2117 = vmatmul.mubr.bf16.gmra.mxu0 %v4314_v9  ;;  %2230 = vmatmul.mubr.bf16.gmra.mxu1 %v4314_v9  ;;  %v4334_v55 = vpop.f32.mrf.mxu1 }
 0x107   :  { %3133 = vmatpush3.bf16.msra.mxu0 %v3480_v8  ;;  %3198 = vmatpush3.bf16.msra.mxu1 %v3480_v8  ;;  %v581_v16 = vmul.f32 %v531_v13, %v333_v12 }
 0x108   :  { %v335_v17 = vpop.f32.mrf.mxu0  ;;  %3134 = vmatprep.subr.bf16.mxu0 %v3481_v11  ;;  %3191 = vmatprep.subr.bf16.mxu1 %v3481_v11  ;;  %v4336_v24 = vpop.f32.mrf.mxu1 }
 0x109   :  { %v582_v19 = vmul.f32 %v531_v13, %v335_v17  ;;  %v4328_v22 = vpack.c.bf16 %v581_v16, %v579_v20 }
 0x10a   :  { %v339_v21 = vpop.f32.mrf.mxu0  ;;  %v4340_v1 = vpop.f32.mrf.mxu1 }
 0x10b   :  { %v4326_v23 = vpack.c.bf16 %v582_v19, %v580_v18  ;;  %3135 = vmatpush3.bf16.msra.mxu0 %v3482_v14  ;;  %3199 = vmatpush3.bf16.msra.mxu1 %v3482_v14  ;;  %v583_v38 = vmul.f32 %v536_v31, %v339_v21 }
 0x10c   :  { %v341_v27 = vpop.f32.mrf.mxu0  ;;  %v4346_v37 = vpop.f32.mrf.mxu1 }
 0x10d   :  { %2126 = vmatprep.mubr.bf16.mxu0 %v4326_v23  ;;  %2239 = vmatprep.mubr.bf16.mxu1 %v4326_v23  ;;  %v584_v34 = vmul.f32 %v536_v31, %v341_v27 }
 0x10e   :  { %v343_v29 = vpop.f32.mrf.mxu0  ;;  %2127 = vmatmul.mubr.bf16.gmra.mxu0 %v4328_v22  ;;  %2240 = vmatmul.mubr.bf16.gmra.mxu1 %v4328_v22  ;;  %v4350_v46 = vpop.f32.mrf.mxu1 }
 0x10f   :  { %v585_v32 = vmul.f32 %v541_v30, %v343_v29 }
 0x110   :  { %v345_v33 = vpop.f32.mrf.mxu0  ;;  %v4352_v51 = vpop.f32.mrf.mxu1 }
 0x111   :  { %v586_v36 = vmul.f32 %v541_v30, %v345_v33  ;;  %v4342_v35 = vpack.c.bf16 %v585_v32, %v583_v38 }
 0x112   :  { %v349_v26 = vpop.f32.mrf.mxu0  ;;  %v4354_v59 = vpop.f32.mrf.mxu1 }
 0x113   :  { %v4338_v39 = vpack.c.bf16 %v586_v36, %v584_v34  ;;  %v587_v52 = vmul.f32 %v546_v48, %v349_v26 }
 0x114   :  { %v351_v42 = vpop.f32.mrf.mxu0  ;;  %v4356_v61 = vpop.f32.mrf.mxu1 }
 0x115   :  { %2136 = vmatprep.mubr.bf16.mxu0 %v4338_v39  ;;  %2249 = vmatprep.mubr.bf16.mxu1 %v4338_v39  ;;  %v588_v50 = vmul.f32 %v546_v48, %v351_v42 }
 0x116   :  { %v353_v43 = vpop.f32.mrf.mxu0  ;;  %2137 = vmatmul.mubr.bf16.gmra.mxu0 %v4342_v35  ;;  %2250 = vmatmul.mubr.bf16.gmra.mxu1 %v4342_v35  ;;  %v4358_v0 = vpop.f32.mrf.mxu1 }
 0x117   :  { %v589_v49 = vmul.f32 %v551_v44, %v353_v43 }
 0x118   :  { %v355_v45 = vpop.f32.mrf.mxu0  ;;  %v4360_v8 = vpop.f32.mrf.mxu1 }
 0x119   :  { %v590_v47 = vmul.f32 %v551_v44, %v355_v45  ;;  %v607_v58 = vpack.c.bf16 %v589_v49, %v587_v52 }
 0x11a   :  { %v359_v54 = vpop.f32.mrf.mxu0  ;;  %v4362_v12 = vpop.f32.mrf.mxu1 }
 0x11b   :  { %v608_v56 = vpack.c.bf16 %v590_v47, %v588_v50  ;;  %v591_v10 = vmul.f32 %v556_v2, %v359_v54 }
 0x11c   :  { %v361_v60 = vpop.f32.mrf.mxu0  ;;  %v4364_v14 = vpop.f32.mrf.mxu1 }
 0x11d   :  { %2146 = vmatprep.mubr.bf16.mxu0 %v608_v56  ;;  %2259 = vmatprep.mubr.bf16.mxu1 %v608_v56  ;;  %v592_v5 = vmul.f32 %v556_v2, %v361_v60 }
 0x11e   :  { %v363_v62 = vpop.f32.mrf.mxu0  ;;  %2147 = vmatmul.mubr.bf16.gmra.mxu0 %v607_v58  ;;  %2260 = vmatmul.mubr.bf16.gmra.mxu1 %v607_v58  ;;  %v4367_v15 = vpop.f32.mrf.mxu1 }
 0x11f   :  { %v593_v3 = vmul.f32 %v561_v63, %v363_v62  ;;  %5555 = vst [vmem:[#allocation3_spill] sm:$0xff] %v4367_v15 }
 0x120   :  { %v365_v4 = vpop.f32.mrf.mxu0  ;;  %v4369_v16 = vpop.f32.mrf.mxu1 }
 0x121   :  { %v594_v6 = vmul.f32 %v561_v63, %v365_v4  ;;  %v609_v13 = vpack.c.bf16 %v593_v3, %v591_v10  ;;  %5556 = vst [vmem:[#allocation4_spill] sm:$0xff] %v4369_v16 }
 0x122   :  { %v4371_v17 = vpop.f32.mrf.mxu1 }
 0x123   :  { %v610_v11 = vpack.c.bf16 %v594_v6, %v592_v5  ;;  %5557 = vst [vmem:[#allocation5_spill] sm:$0xff] %v4371_v17 }
 0x124   :  { %v4373_v18 = vpop.f32.mrf.mxu1 }
 0x125   :  { %2156 = vmatprep.mubr.bf16.mxu0 %v610_v11  ;;  %2269 = vmatprep.mubr.bf16.mxu1 %v610_v11  ;;  %5558 = vst [vmem:[#allocation6_spill] sm:$0xff] %v4373_v18 }
 0x126   :  { %2157 = vmatmul.mubr.bf16.gmra.mxu0 %v609_v13  ;;  %2270 = vmatmul.mubr.bf16.gmra.mxu1 %v609_v13  ;;  %v4377_v19 = vpop.f32.mrf.mxu1 }
 0x127   :  { %2312 = vmatprep.mubr.bf16.mxu0 %v4249_v25  ;;  %2360 = vmatprep.mubr.bf16.mxu1 %v608_v56  ;;  %5559 = vst [vmem:[#allocation7_spill] sm:$0xff] %v4377_v19  ;;  %v4381_v25 = vpop.f32.mrf.mxu0 }
 0x128   :  { %v4379_v20 = vpop.f32.mrf.mxu1 }
 0x129   :  { %5560 = vst [vmem:[#allocation8_spill] sm:$0xff] %v4379_v20  ;;  %v4385_v27 = vpop.f32.mrf.mxu0 }
 0x12a   :  { %v4383_v21 = vpop.f32.mrf.mxu1 }
 0x12b   :  { %5561 = vst [vmem:[#allocation9_spill] sm:$0xff] %v4383_v21 }
 0x12c   :  { %v4387_v29 = vpop.f32.mrf.mxu1 }
 0x12d   :  { %5562 = vst [vmem:[#allocation10_spill] sm:$0xff] %v4387_v29 }
 0x12e   :  { %2313 = vmatmul.mubr.bf16.vlgmr.msra.gmra.mxu0 %v4254_v28  ;;  %2361 = vmatmul.mubr.bf16.vlgmr.msra.gmra.mxu1 %v607_v58  ;;  %v4391_v28 = vpop.f32.mrf.mxu1 }
 0x12f   :  { %2320 = vmatprep.mubr.bf16.mxu0 %v4269_v40  ;;  %2368 = vmatprep.mubr.bf16.mxu1 %v610_v11  ;;  %5563 = vst [vmem:[#allocation11_spill] sm:$0xff] %v4391_v28  ;;  %v4393_v40 = vpop.f32.mrf.mxu0 }
 0x130   :  { %v4395_v30 = vpop.f32.mrf.mxu1 }
 0x131   :  { %5564 = vst [vmem:[#allocation12_spill] sm:$0xff] %v4395_v30  ;;  %v4399_v32 = vpop.f32.mrf.mxu0 }
 0x132   :  { %v4397_v31 = vpop.f32.mrf.mxu1 }
 0x133   :  { %5565 = vst [vmem:[#allocation13_spill] sm:$0xff] %v4397_v31  ;;  %v4407_v34 = vpop.f32.mrf.mxu0 }
 0x134   :  { %v4401_v33 = vpop.f32.mrf.mxu1 }
 0x135   :  { %5566 = vst [vmem:[#allocation14_spill] sm:$0xff] %v4401_v33  ;;  %v4413_v38 = vpop.f32.mrf.mxu0 }
 0x136   :  { %2321 = vmatmul.mubr.bf16.gmra.mxu0 %v4274_v41  ;;  %2369 = vmatmul.mubr.bf16.gmra.mxu1 %v609_v13  ;;  %v4405_v41 = vpop.f32.mrf.mxu1 }
 0x137   :  { %2328 = vmatprep.mubr.bf16.mxu0 %v4289_v53  ;;  %5567 = vst [vmem:[#allocation15_spill] sm:$0xff] %v4405_v41 }
 0x138   :  { %v4409_v53 = vpop.f32.mrf.mxu1 }
 0x13a   :  { %v4411_v36 = vpop.f32.mrf.mxu1 }
 0x13b   :  { %5568 = vst [vmem:[#allocation16_spill] sm:$0xff] %v4411_v36 }
 0x13c   :  { %v4415_v26 = vpop.f32.mrf.mxu1 }
 0x13d   :  { %5569 = vst [vmem:[#allocation17_spill] sm:$0xff] %v4415_v26 }
 0x13e   :  { %2329 = vmatmul.mubr.bf16.gmra.mxu0 %v4294_v57  ;;  %v4419_v42 = vpop.f32.mrf.mxu1  ;;  %v4421_v57 = vpop.f32.mrf.mxu0 }
 0x13f   :  { %2336 = vmatprep.mubr.bf16.mxu0 %v4309_v7  ;;  %5570 = vst [vmem:[#allocation18_spill] sm:$0xff] %v4419_v42 }
 0x140   :  { %v4423_v7 = vpop.f32.mrf.mxu1  ;;  %v4427_v44 = vpop.f32.mrf.mxu0 }
 0x141   :  { %5571 = vst [vmem:[#allocation19_spill] sm:$0xff] %v4423_v7 }
 0x142   :  { %v4425_v43 = vpop.f32.mrf.mxu1 }
 0x143   :  { %5572 = vst [vmem:[#allocation20_spill] sm:$0xff] %v4425_v43 }
 0x144   :  { %v4429_v48 = vpop.f32.mrf.mxu1 }
 0x145   :  { %5573 = vst [vmem:[#allocation21_spill] sm:$0xff] %v4429_v48 }
 0x146   :  { %2337 = vmatmul.mubr.bf16.gmra.mxu0 %v4314_v9  ;;  %v3072_v49 = vpop.f32.mrf.mxu1  ;;  %v4433_v9 = vpop.f32.mrf.mxu0 }
 0x147   :  { %2344 = vmatprep.mubr.bf16.mxu0 %v4326_v23 }
 0x148   :  { %v3073_v23 = vpop.f32.mrf.mxu1  ;;  %v4437_v47 = vpop.f32.mrf.mxu0 }
 0x149   :  { %v4435_v45 = vadd.f32 %v3073_v23, %v3072_v49 }
 0x14a   :  { %v3075_v50 = vpop.f32.mrf.mxu1  ;;  %v4442_v58 = vpop.f32.mrf.mxu0 }
 0x14b   :  { %5574 = vst [vmem:[#allocation22_spill] sm:$0xff] %v4435_v45 }
 0x14c   :  { %v3076_v52 = vpop.f32.mrf.mxu1  ;;  %v4446_v62 = vpop.f32.mrf.mxu0 }
 0x14d   :  { %v4440_v54 = vadd.f32 %v3076_v52, %v3075_v50 }
 0x14e   :  { %2345 = vmatmul.mubr.bf16.gmra.mxu0 %v4328_v22  ;;  %v3078_v56 = vpop.f32.mrf.mxu1  ;;  %v4450_v4 = vpop.f32.mrf.mxu0 }
 0x14f   :  { %2352 = vmatprep.mubr.bf16.mxu0 %v4338_v39  ;;  %5575 = vst [vmem:[#allocation23_spill] sm:$0xff] %v4440_v54  ;;  %5578 = vst [vmem:[#allocation26_spill] sm:$0xff] %v4450_v4 }
 0x150   :  { %v3079_v22 = vpop.f32.mrf.mxu1  ;;  %v4454_v10 = vpop.f32.mrf.mxu0 }
 0x151   :  { %v4444_v60 = vadd.f32 %v3079_v22, %v3078_v56  ;;  %5580 = vst [vmem:[#allocation28_spill] sm:$0xff] %v4454_v10  ;;  %v2377_v10 = vld [vmem:[%s5510_s6] sm:$0x1f] }
 0x152   :  { %v3081_v39 = vpop.f32.mrf.mxu1  ;;  %v4458_v23 = vpop.f32.mrf.mxu0 }
 0x153   :  { %5576 = vst [vmem:[#allocation24_spill] sm:$0xff] %v4444_v60  ;;  %5582 = vst [vmem:[#allocation30_spill] sm:$0xff] %v4458_v23 }
 0x154   :  { %v3082_v63 = vpop.f32.mrf.mxu1  ;;  %v4462_v22 = vpop.f32.mrf.mxu0 }
 0x155   :  { %v4448_v2 = vadd.f32 %v3082_v63, %v3081_v39  ;;  %5584 = vst [vmem:[#allocation32_spill] sm:$0xff] %v4462_v22 }
 0x156   :  { %2353 = vmatmul.mubr.bf16.gmra.mxu0 %v4342_v35  ;;  %v3084_v3 = vpop.f32.mrf.mxu1 }
 0x157   :  { %5577 = vst [vmem:[#allocation25_spill] sm:$0xff] %v4448_v2 }
 0x158   :  { %v3085_v5 = vpop.f32.mrf.mxu1 }
 0x159   :  { %v4452_v6 = vadd.f32 %v3085_v5, %v3084_v3  ;;  %v4466_v5 = vpop.f32.mrf.mxu0 }
 0x15a   :  { %v3087_v35 = vpop.f32.mrf.mxu1  ;;  %5586 = vst [vmem:[#allocation34_spill] sm:$0xff] %v4466_v5 }
 0x15b   :  { %5579 = vst [vmem:[#allocation27_spill] sm:$0xff] %v4452_v6 }
 0x15c   :  { %v3088_v11 = vpop.f32.mrf.mxu1 }
 0x15d   :  { %v4456_v13 = vadd.f32 %v3088_v11, %v3087_v35  ;;  %v4470_v11 = vpop.f32.mrf.mxu0 }
 0x15e   :  { %v3090_v49 = vpop.f32.mrf.mxu1  ;;  %5588 = vst [vmem:[#allocation36_spill] sm:$0xff] %v4470_v11 }
 0x15f   :  { %5581 = vst [vmem:[#allocation29_spill] sm:$0xff] %v4456_v13 }
 0x160   :  { %v3091_v50 = vpop.f32.mrf.mxu1 }
 0x161   :  { %v4460_v52 = vadd.f32 %v3091_v50, %v3090_v49  ;;  %v4474_v50 = vpop.f32.mrf.mxu0 }
 0x162   :  { %v3093_v56 = vpop.f32.mrf.mxu1  ;;  %5590 = vst [vmem:[#allocation38_spill] sm:$0xff] %v4474_v50 }
 0x163   :  { %5583 = vst [vmem:[#allocation31_spill] sm:$0xff] %v4460_v52 }
 0x164   :  { %v3094_v39 = vpop.f32.mrf.mxu1 }
 0x165   :  { %v4464_v63 = vadd.f32 %v3094_v39, %v3093_v56  ;;  %v4478_v39 = vpop.f32.mrf.mxu0 }
 0x166   :  { %v3096_v3 = vpop.f32.mrf.mxu1  ;;  %5592 = vst [vmem:[#allocation40_spill] sm:$0xff] %v4478_v39 }
 0x167   :  { %5585 = vst [vmem:[#allocation33_spill] sm:$0xff] %v4464_v63 }
 0x168   :  { %v3097_v43 = vpop.f32.mrf.mxu1 }
 0x169   :  { %v4468_v48 = vadd.f32 %v3097_v43, %v3096_v3  ;;  %v4482_v3 = vpop.f32.mrf.mxu0 }
 0x16a   :  { %v3099_v35 = vpop.f32.mrf.mxu1  ;;  %5594 = vst [vmem:[#allocation42_spill] sm:$0xff] %v4482_v3 }
 0x16b   :  { %5587 = vst [vmem:[#allocation35_spill] sm:$0xff] %v4468_v48 }
 0x16c   :  { %v3100_v42 = vpop.f32.mrf.mxu1 }
 0x16d   :  { %v4472_v7 = vadd.f32 %v3100_v42, %v3099_v35  ;;  %v4486_v35 = vpop.f32.mrf.mxu0 }
 0x16e   :  { %v3102_v49 = vpop.f32.mrf.mxu1  ;;  %5596 = vst [vmem:[#allocation44_spill] sm:$0xff] %v4486_v35 }
 0x16f   :  { %5589 = vst [vmem:[#allocation37_spill] sm:$0xff] %v4472_v7 }
 0x170   :  { %v3103_v33 = vpop.f32.mrf.mxu1 }
 0x171   :  { %v4476_v52 = vadd.f32 %v3103_v33, %v3102_v49  ;;  %v4490_v49 = vpop.f32.mrf.mxu0 }
 0x172   :  { %v3105_v56 = vpop.f32.mrf.mxu1  ;;  %5598 = vst [vmem:[#allocation46_spill] sm:$0xff] %v4490_v49 }
 0x173   :  { %5591 = vst [vmem:[#allocation39_spill] sm:$0xff] %v4476_v52 }
 0x174   :  { %v3106_v63 = vpop.f32.mrf.mxu1 }
 0x175   :  { %v4480_v31 = vadd.f32 %v3106_v63, %v3105_v56  ;;  %v4494_v56 = vpop.f32.mrf.mxu0 }
 0x176   :  { %v3108_v43 = vpop.f32.mrf.mxu1  ;;  %5600 = vst [vmem:[#allocation48_spill] sm:$0xff] %v4494_v56 }
 0x177   :  { %5593 = vst [vmem:[#allocation41_spill] sm:$0xff] %v4480_v31 }
 0x178   :  { %v3109_v48 = vpop.f32.mrf.mxu1 }
 0x179   :  { %v4484_v13 = vadd.f32 %v3109_v48, %v3108_v43  ;;  %v4498_v48 = vpop.f32.mrf.mxu0 }
 0x17a   :  { %v3111_v42 = vpop.f32.mrf.mxu1  ;;  %5602 = vst [vmem:[#allocation50_spill] sm:$0xff] %v4498_v48 }
 0x17b   :  { %5595 = vst [vmem:[#allocation43_spill] sm:$0xff] %v4484_v13  ;;  %v4500_v43 = vpop.f32.mrf.mxu0  ;;  %v2379_v13 = vlaneseq }
 0x17c   :  { %v3112_v7 = vpop.f32.mrf.mxu1  ;;  %5603 = vst [vmem:[#allocation51_spill] sm:$0xff] %v4500_v43 }
 0x17d   :  { %v4488_v30 = vadd.f32 %v3112_v7, %v3111_v42  ;;  %v4502_v35 = vpop.f32.mrf.mxu0  ;;  %v2380_v23 = vshrl.u32 %v2379_v13, 7 }
 0x17e   :  { %v3114_v33 = vpop.f32.mrf.mxu1  ;;  %5604 = vst [vmem:[#allocation52_spill] sm:$0xff] %v4502_v35 }
 0x17f   :  { %5597 = vst [vmem:[#allocation45_spill] sm:$0xff] %v4488_v30  ;;  %v4504_v7 = vpop.f32.mrf.mxu0  ;;  %v2385_v43 = vsub.s32 1, %v2380_v23  ;;  %v2381_v26 = vsub.s32 0, %v2380_v23 }
 0x180   :  { %v3115_v52 = vpop.f32.mrf.mxu1  ;;  %5605 = vst [vmem:[#allocation53_spill] sm:$0xff] %v4504_v7 }
 0x181   :  { %v4492_v28 = vadd.f32 %v3115_v52, %v3114_v33  ;;  %v4506_v42 = vpop.f32.mrf.mxu0 }
 0x182   :  { %v3117_v63 = vpop.f32.mrf.mxu1  ;;  %5606 = vst [vmem:[#allocation54_spill] sm:$0xff] %v4506_v42 }
 0x183   :  { %5599 = vst [vmem:[#allocation47_spill] sm:$0xff] %v4492_v28  ;;  %v4508_v49 = vpop.f32.mrf.mxu0 }
 0x184   :  { %v3118_v31 = vpop.f32.mrf.mxu1  ;;  %5607 = vst [vmem:[#allocation55_spill] sm:$0xff] %v4508_v49 }
 0x185   :  { %v4496_v3 = vadd.f32 %v3118_v31, %v3117_v63  ;;  %v4510_v52 = vpop.f32.mrf.mxu0 }
 0x186   :  { %5608 = vst [vmem:[#allocation56_spill] sm:$0xff] %v4510_v52 }
 0x187   :  { %5601 = vst [vmem:[#allocation49_spill] sm:$0xff] %v4496_v3  ;;  %v4512_v33 = vpop.f32.mrf.mxu0 }
 0x188   :  { %5609 = vst [vmem:[#allocation57_spill] sm:$0xff] %v4512_v33 }
 0x1ae   :  { %v2088_v28 = vpop.f32.mrf.mxu0  ;;  %v2201_v56 = vpop.f32.mrf.mxu1 }
 0x1b0   :  { %v2090_v31 = vpop.f32.mrf.mxu0  ;;  %v2203_v63 = vpop.f32.mrf.mxu1 }
 0x1b1   :  { %v2091_v13 = vadd.f32 %v2090_v31, %v4336_v24 }
 0x1b2   :  { %v2092_v3 = vpop.f32.mrf.mxu0  ;;  %v2205_v39 = vpop.f32.mrf.mxu1 }
 0x1b3   :  { %v2093_v31 = vadd.f32 %v2092_v3, %v4340_v1 }
 0x1b4   :  { %v2094_v6 = vpop.f32.mrf.mxu0  ;;  %v4514_v50 = vpop.f32.mrf.mxu1 }
 0x1b6   :  { %v2098_v29 = vpop.f32.mrf.mxu0  ;;  %v4516_v21 = vpop.f32.mrf.mxu1 }
 0x1b8   :  { %v2100_v2 = vpop.f32.mrf.mxu0  ;;  %v4518_v42 = vpop.f32.mrf.mxu1 }
 0x1ba   :  { %v4520_v49 = vpop.f32.mrf.mxu0  ;;  %v4522_v52 = vpop.f32.mrf.mxu1 }
 0x1bc   :  { %v2104_v33 = vpop.f32.mrf.mxu0  ;;  %v4524_v11 = vpop.f32.mrf.mxu1 }
 0x1be   :  { %v4526_v60 = vpop.f32.mrf.mxu0  ;;  %v4528_v20 = vpop.f32.mrf.mxu1 }
 0x1c0   :  { %v4530_v5 = vpop.f32.mrf.mxu0  ;;  %v4532_v19 = vpop.f32.mrf.mxu1 }
 0x1c2   :  { %v4534_v30 = vpop.f32.mrf.mxu0  ;;  %v4536_v54 = vpop.f32.mrf.mxu1 }
 0x1c4   :  { %v4538_v45 = vpop.f32.mrf.mxu0  ;;  %v4540_v22 = vpop.f32.mrf.mxu1 }
 0x1c5   :  { %5610 = vst [vmem:[#allocation58_spill] sm:$0xff] %v4540_v22 }
 0x1c6   :  { %v4542_v7 = vpop.f32.mrf.mxu0  ;;  %v4544_v18 = vpop.f32.mrf.mxu1 }
 0x1c7   :  { %5611 = vst [vmem:[#allocation59_spill] sm:$0xff] %v4542_v7  ;;  %5612 = vst [vmem:[#allocation60_spill] sm:$0xff] %v4544_v18  ;;  %v2389_v18 = vsub.s32 2, %v2380_v23  ;;  %v2095_v7 = vadd.f32 %v2094_v6, %v4346_v37 }
 0x1c8   :  { %v4546_v17 = vpop.f32.mrf.mxu0  ;;  %v4548_v35 = vpop.f32.mrf.mxu1 }
 0x1c9   :  { %5613 = vst [vmem:[#allocation61_spill] sm:$0xff] %v4546_v17  ;;  %5614 = vst [vmem:[#allocation62_spill] sm:$0xff] %v4548_v35  ;;  %v4562_v17 = vrot.slane %v2377_v10, %v2385_v43  ;;  %v4577_v22 = vrot.slane %v2377_v10, %v2389_v18  ;;  %v2393_v43 = vsub.s32 3, %v2380_v23  ;;  %v2099_v18 = vadd.f32 %v2098_v29, %v4350_v46 }
 0x1ca   :  { %v4550_v36 = vpop.f32.mrf.mxu0  ;;  %v4552_v48 = vpop.f32.mrf.mxu1  ;;  %v2206_v46 = vadd.f32 %v2205_v39, %v4393_v40  ;;  %v2212_v39 = vadd.f32 %v4516_v21, %v4407_v34 }
 0x1cb   :  { %5615 = vst [vmem:[#allocation63_spill] sm:$0xff] %v4550_v36  ;;  %5616 = vst [vmem:[#allocation64_spill] sm:$0xff] %v4552_v48  ;;  %v2089_v48 = vadd.f32 %v2088_v28, %v4334_v55  ;;  %v4569_v36 = vrot.slane %v2377_v10, %v2381_v26  ;;  %v4580_v24 = vadd.f32 %v4562_v17, %v2091_v13  ;;  %v2397_v13 = vsub.s32 4, %v2380_v23 }
 0x1cc   :  { %v4557_v16 = vpop.f32.mrf.mxu0  ;;  %v4559_v4 = vpop.f32.mrf.mxu1  ;;  %v2101_v55 = vadd.f32 %v2100_v2, %v4352_v51  ;;  %v4592_v6 = vadd.f32 %v4562_v17, %v2095_v7  ;;  %v2204_v2 = vadd.f32 %v2203_v63, %v4385_v27  ;;  %v4605_v3 = vrot.slane %v2377_v10, %v2393_v43 }
 0x1cd   :  { %5617 = vst [vmem:[#allocation65_spill] sm:$0xff] %v4557_v16  ;;  %5618 = vst [vmem:[#allocation66_spill] sm:$0xff] %v4559_v4  ;;  %v2202_v4 = vadd.f32 %v2201_v56, %v4381_v25  ;;  %v4589_v37 = vadd.f32 %v4569_v36, %v2089_v48  ;;  %v2485_v51 = vmul.f32 %v4580_v24, %v4580_v24 }
 0x1ce   :  { %v4564_v35 = vpop.f32.mrf.mxu0  ;;  %v4566_v41 = vpop.f32.mrf.mxu1  ;;  %5619 = vst [vmem:[#allocation67_spill] sm:$0xff] %v4580_v24  ;;  %5621 = vst [vmem:[#allocation69_spill] sm:$0xff] %v4592_v6  ;;  %v4608_v48 = vadd.f32 %v4569_v36, %v2093_v31  ;;  %v4612_v29 = vadd.f32 %v4562_v17, %v2101_v55  ;;  %v2208_v27 = vadd.f32 %v4514_v50, %v4399_v32 }
 0x1cf   :  { %5620 = vst [vmem:[#allocation68_spill] sm:$0xff] %v4589_v37  ;;  %v4600_v1 = vadd.f32 %v4577_v22, %v2202_v4  ;;  %v2484_v4 = vmul.f32 %v4589_v37, %v4589_v37  ;;  %v2105_v63 = vadd.f32 %v2104_v33, %v4356_v61  ;;  %v2490_v43 = vmul.f32 %v4592_v6, %v4592_v6 }
 0x1d0   :  { %v4572_v15 = vpop.f32.mrf.mxu0  ;;  %v4574_v16 = vpop.f32.mrf.mxu1  ;;  %5623 = vst [vmem:[#allocation71_spill] sm:$0xff] %v4608_v48  ;;  %5624 = vst [vmem:[#allocation72_spill] sm:$0xff] %v4612_v29  ;;  %v4626_v40 = vadd.f32 %v4569_v36, %v2099_v18  ;;  %v4634_v24 = vrot.slane %v2377_v10, %v2397_v13  ;;  %v4639_v61 = vadd.f32 %v4605_v3, %v2204_v2 }
 0x1d1   :  { %5622 = vst [vmem:[#allocation70_spill] sm:$0xff] %v4600_v1  ;;  %v2486_v32 = vmul.f32 %v4600_v1, %v4600_v1  ;;  %v2564_v50 = vadd.f32 %v2485_v51, %v2484_v4  ;;  %v2103_v33 = vadd.f32 %v4520_v49, %v4354_v59  ;;  %v2489_v18 = vmul.f32 %v4608_v48, %v4608_v48  ;;  %v5653_v48 = vld [vmem:[#allocation62_spill] sm:$0xff] }
 0x1d2   :  { %v4584_v28 = vpop.f32.mrf.mxu0  ;;  %v4586_v26 = vpop.f32.mrf.mxu1  ;;  %5625 = vst [vmem:[#allocation73_spill] sm:$0xff] %v4626_v40  ;;  %5626 = vst [vmem:[#allocation74_spill] sm:$0xff] %v4639_v61  ;;  %v4646_v21 = vadd.f32 %v4577_v22, %v2206_v46  ;;  %v2495_v34 = vmul.f32 %v4612_v29, %v4612_v29  ;;  %v2214_v10 = vadd.f32 %v4518_v42, %v4413_v38  ;;  %v5675_v1 = vld [vmem:[#allocation63_spill] sm:$0xff]  ;;  %v5677_v37 = vld [vmem:[#allocation64_spill] sm:$0xff] }
 0x1d3   :  { %v4657_v2 = vadd.f32 %v4605_v3, %v2208_v27  ;;  %v2216_v59 = vadd.f32 %v4522_v52, %v4421_v57  ;;  %v4662_v49 = vadd.f32 %v4562_v17, %v2105_v63  ;;  %v2111_v46 = vadd.f32 %v4530_v5, %v4360_v8 }
 0x1d4   :  { %v4595_v25 = vpop.f32.mrf.mxu0  ;;  %v4597_v56 = vpop.f32.mrf.mxu1  ;;  %5627 = vst [vmem:[#allocation75_spill] sm:$0xff] %v4646_v21  ;;  %v2570_v4 = vadd.f32 %v2490_v43, %v2489_v18  ;;  %v2494_v38 = vmul.f32 %v4626_v40, %v4626_v40  ;;  %v4669_v42 = vadd.f32 %v4577_v22, %v2212_v39  ;;  %v2218_v27 = vadd.f32 %v4524_v11, %v4427_v44 }
 0x1d5   :  { %5628 = vst [vmem:[#allocation76_spill] sm:$0xff] %v4657_v2  ;;  %5629 = vst [vmem:[#allocation77_spill] sm:$0xff] %v4662_v49  ;;  %v2487_v57 = vmul.f32 %v4639_v61, %v4639_v61  ;;  %v4680_v52 = vadd.f32 %v4569_v36, %v2103_v33  ;;  %v2109_v8 = vadd.f32 %v4526_v60, %v4358_v0  ;;  %v5655_v61 = vld [vmem:[#allocation17_spill] sm:$0xff] }
 0x1d6   :  { %v4614_v7 = vpop.f32.mrf.mxu0  ;;  %v4616_v23 = vpop.f32.mrf.mxu1  ;;  %5630 = vst [vmem:[#allocation78_spill] sm:$0xff] %v4669_v42  ;;  %v2565_v5 = vadd.f32 %v2564_v50, %v2486_v32  ;;  %v2491_v63 = vmul.f32 %v4646_v21, %v4646_v21  ;;  %v2576_v43 = vadd.f32 %v2495_v34, %v2494_v38  ;;  %v4687_v44 = vadd.f32 %v4605_v3, %v2214_v10  ;;  %v5652_v21 = vld [vmem:[#allocation28_spill] sm:$0xff] }
 0x1d7   :  { %5631 = vst [vmem:[#allocation79_spill] sm:$0xff] %v4680_v52  ;;  %v2222_v11 = vadd.f32 %v4528_v20, %v4433_v9  ;;  %v2492_v33 = vmul.f32 %v4657_v2, %v4657_v2  ;;  %v4694_v40 = vadd.f32 %v4577_v22, %v2216_v59  ;;  %v2500_v0 = vmul.f32 %v4662_v49, %v4662_v49  ;;  %v5651_v2 = vld [vmem:[#allocation61_spill] sm:$0xff] }
 0x1d8   :  { %v4630_v31 = vpop.f32.mrf.mxu0  ;;  %v4632_v55 = vpop.f32.mrf.mxu1  ;;  %5632 = vst [vmem:[#allocation80_spill] sm:$0xff] %v4687_v44  ;;  %v4699_v60 = vadd.f32 %v4562_v17, %v2111_v46  ;;  %v2496_v32 = vmul.f32 %v4669_v42, %v4669_v42  ;;  %v4704_v50 = vadd.f32 %v4605_v3, %v2218_v27  ;;  %v2224_v20 = vadd.f32 %v4532_v19, %v4437_v47 }
 0x1d9   :  { %5633 = vst [vmem:[#allocation81_spill] sm:$0xff] %v4694_v40  ;;  %v2571_v10 = vadd.f32 %v2570_v4, %v2491_v63  ;;  %v2499_v59 = vmul.f32 %v4680_v52, %v4680_v52  ;;  %v4713_v38 = vadd.f32 %v4569_v36, %v2109_v8  ;;  %v2115_v46 = vadd.f32 %v4538_v45, %v4364_v14 }
 0x1da   :  { %v4652_v13 = vpop.f32.mrf.mxu0  ;;  %v4654_v51 = vpop.f32.mrf.mxu1  ;;  %5634 = vst [vmem:[#allocation82_spill] sm:$0xff] %v4699_v60  ;;  %5635 = vst [vmem:[#allocation83_spill] sm:$0xff] %v4704_v50  ;;  %v4717_v49 = vadd.f32 %v2565_v5, %v2487_v57  ;;  %v2497_v27 = vmul.f32 %v4687_v44, %v4687_v44  ;;  %v4722_v19 = vadd.f32 %v4577_v22, %v2222_v11 }
 0x1db   :  { %5636 = vst [vmem:[#allocation84_spill] sm:$0xff] %v4713_v38  ;;  %v2113_v47 = vadd.f32 %v4534_v30, %v4362_v12  ;;  %v2577_v52 = vadd.f32 %v2576_v43, %v2496_v32  ;;  %v2501_v8 = vmul.f32 %v4694_v40, %v4694_v40  ;;  %v2582_v42 = vadd.f32 %v2500_v0, %v2499_v59  ;;  %v5641_v59 = vld [vmem:[#allocation3_spill] sm:$0xff] }
 0x1dc   :  { %v4673_v29 = vpop.f32.mrf.mxu0  ;;  %v4675_v6 = vpop.f32.mrf.mxu1  ;;  %5637 = vst [vmem:[#allocation85_spill] sm:$0xff] %v4722_v19  ;;  %v2505_v14 = vmul.f32 %v4699_v60, %v4699_v60  ;;  %v2226_v45 = vadd.f32 %v4536_v54, %v4442_v58  ;;  %v2502_v57 = vmul.f32 %v4704_v50, %v4704_v50  ;;  %v4735_v5 = vadd.f32 %v4605_v3, %v2224_v20  ;;  %v5640_v54 = vld [vmem:[#allocation58_spill] sm:$0xff]  ;;  %v5642_v60 = vld [vmem:[#allocation59_spill] sm:$0xff] }
 0x1dd   :  { %v4740_v11 = vadd.f32 %v2571_v10, %v2492_v33  ;;  %v2504_v0 = vmul.f32 %v4713_v38, %v4713_v38  ;;  %v4745_v32 = vadd.f32 %v4562_v17, %v2115_v46  ;;  %v2228_v58 = vadd.f32 %v5640_v54, %v4446_v62  ;;  %v5644_v33 = vld [vmem:[#allocation15_spill] sm:$0xff]  ;;  %v5648_v54 = vld [vmem:[#allocation26_spill] sm:$0xff] }
 0x1de   :  { %v2148_v39 = vpop.f32.mrf.mxu0  ;;  %v2261_v18 = vpop.f32.mrf.mxu1  ;;  %5638 = vst [vmem:[#allocation86_spill] sm:$0xff] %v4735_v5  ;;  %v2119_v20 = vadd.f32 %v5642_v60, %v5641_v59  ;;  %v4761_v46 = vadd.f32 %v2577_v52, %v2497_v27  ;;  %v4764_v62 = vadd.f32 %v4577_v22, %v2226_v45  ;;  %v5649_v60 = vld [vmem:[#allocation60_spill] sm:$0xff]  ;;  %v2583_v44 = vadd.f32 %v2582_v42, %v2501_v8 }
 0x1df   :  { %5639 = vst [vmem:[#allocation87_spill] sm:$0xff] %v4745_v32  ;;  %v2149_v10 = vadd.f32 %v2148_v39, %v5644_v33  ;;  %v2588_v40 = vadd.f32 %v2505_v14, %v2504_v0  ;;  %v2232_v59 = vadd.f32 %v5649_v60, %v5648_v54  ;;  %v2234_v39 = vadd.f32 %v5653_v48, %v5652_v21 }
 0x1e0   :  { %v2150_v9 = vpop.f32.mrf.mxu0  ;;  %v4708_v34 = vpop.f32.mrf.mxu1  ;;  %5647 = vst [vmem:[#allocation15_spill] sm:$0xff] %v4764_v62  ;;  %v2507_v45 = vmul.f32 %v4735_v5, %v4735_v5  ;;  %v2510_v42 = vmul.f32 %v4745_v32, %v4745_v32  ;;  %v4788_v48 = vadd.f32 %v4569_v36, %v2119_v20  ;;  %v4806_v60 = vadd.f32 %v2583_v44, %v2502_v57  ;;  %v5670_v57 = vld [vmem:[#allocation51_spill] sm:$0xff] }
 0x1e1   :  { %v2151_v12 = vadd.f32 %v2150_v9, %v4409_v53  ;;  %v2506_v53 = vmul.f32 %v4722_v19, %v4722_v19  ;;  %v4754_v9 = vadd.f32 %v4569_v36, %v2113_v47  ;;  %v5650_v19 = vld [vmem:[#allocation4_spill] sm:$0xff]  ;;  %v4804_v20 = vadd.f32 %v4577_v22, %v2232_v59 }
 0x1e2   :  { %v2152_v4 = vpop.f32.mrf.mxu0  ;;  %v2265_v63 = vpop.f32.mrf.mxu1  ;;  %v2121_v47 = vadd.f32 %v5651_v2, %v5650_v19  ;;  %v4785_v2 = vadd.f32 %v4605_v3, %v2228_v58  ;;  %5658 = vst [vmem:[#allocation61_spill] sm:$0xff] %v4788_v48  ;;  %v5660_v19 = vld [vmem:[#allocation50_spill] sm:$0xff]  ;;  %v2511_v58 = vmul.f32 %v4764_v62, %v4764_v62  ;;  %v2514_v44 = vmul.f32 %v4788_v48, %v4788_v48  ;;  %v5674_v48 = vld [vmem:[#allocation5_spill] sm:$0xff] }
 0x1e3   :  { %5643 = vst [vmem:[#allocation58_spill] sm:$0xff] %v4754_v9  ;;  %v4773_v33 = vadd.f32 %v4562_v17, %v2151_v12  ;;  %v2509_v21 = vmul.f32 %v4754_v9, %v4754_v9  ;;  %v2262_v8 = vadd.f32 %v2261_v18, %v5660_v19  ;;  %v5661_v12 = vld [vmem:[#allocation16_spill] sm:$0xff]  ;;  %5664 = vst [vmem:[#allocation50_spill] sm:$0xff] %v4804_v20 }
 0x1e4   :  { %v2154_v30 = vpop.f32.mrf.mxu0  ;;  %v4738_v43 = vpop.f32.mrf.mxu1  ;;  %5657 = vst [vmem:[#allocation4_spill] sm:$0xff] %v4785_v2  ;;  %v2589_v32 = vadd.f32 %v2588_v40, %v2506_v53  ;;  %v4812_v18 = vadd.f32 %v4605_v3, %v2234_v39  ;;  %v4825_v40 = vmul.f32 %v4785_v2, %v4785_v2  ;;  %v2264_v53 = vadd.f32 %v4708_v34, %v5670_v57  ;;  %v5676_v57 = vld [vmem:[#allocation30_spill] sm:$0xff] }
 0x1e5   :  { %5654 = vst [vmem:[#allocation26_spill] sm:$0xff] %v4773_v33  ;;  %v2155_v52 = vadd.f32 %v2154_v30, %v5655_v61  ;;  %v4793_v61 = vadd.f32 %v4569_v36, %v2149_v10  ;;  %v2153_v30 = vadd.f32 %v2152_v4, %v5661_v12  ;;  %v4809_v10 = vadd.f32 %v4562_v17, %v2121_v47 }
 0x1e6   :  { %v4757_v50 = vpop.f32.mrf.mxu0  ;;  %v4759_v38 = vpop.f32.mrf.mxu1  ;;  %5666 = vst [vmem:[#allocation88_spill] sm:$0xff] %v4812_v18  ;;  %v2545_v4 = vmul.f32 %v4773_v33, %v4773_v33  ;;  %v2594_v59 = vadd.f32 %v2510_v42, %v2509_v21  ;;  %v4834_v39 = vadd.f32 %v4577_v22, %v2262_v8  ;;  %v5673_v42 = vld [vmem:[#allocation52_spill] sm:$0xff]  ;;  %v4842_v5 = vmul.f32 %v4804_v20, %v4804_v20 }
 0x1e7   :  { %5645 = vst [vmem:[#allocation3_spill] sm:$0xff] %v4757_v50  ;;  %5646 = vst [vmem:[#allocation59_spill] sm:$0xff] %v4759_v38  ;;  %v4817_v19 = vadd.f32 %v4562_v17, %v2155_v52  ;;  %v2544_v47 = vmul.f32 %v4793_v61, %v4793_v61  ;;  %v4837_v52 = vadd.f32 %v4569_v36, %v2153_v30 }
 0x1e8   :  { %v4776_v27 = vpop.f32.mrf.mxu0  ;;  %v4778_v14 = vpop.f32.mrf.mxu1  ;;  %5659 = vst [vmem:[#allocation28_spill] sm:$0xff] %v4793_v61  ;;  %5665 = vst [vmem:[#allocation16_spill] sm:$0xff] %v4809_v10  ;;  %v2266_v21 = vadd.f32 %v2265_v63, %v5673_v42  ;;  %v2123_v34 = vadd.f32 %v5675_v1, %v5674_v48  ;;  %v2236_v33 = vadd.f32 %v5677_v37, %v5676_v57  ;;  %v5679_v1 = vld [vmem:[#allocation65_spill] sm:$0xff] }
 0x1e9   :  { %5656 = vst [vmem:[#allocation60_spill] sm:$0xff] %v4778_v14  ;;  %5667 = vst [vmem:[#allocation89_spill] sm:$0xff] %v4817_v19  ;;  %v4848_v61 = vadd.f32 %v2589_v32, %v2507_v45  ;;  %v2515_v8 = vmul.f32 %v4809_v10, %v4809_v10  ;;  %v4854_v63 = vmul.f32 %v4812_v18, %v4812_v18 }
 0x1ea   :  { %v4797_v0 = vpop.f32.mrf.mxu0  ;;  %v4799_v54 = vpop.f32.mrf.mxu1  ;;  %5671 = vst [vmem:[#allocation51_spill] sm:$0xff] %v4834_v39  ;;  %5672 = vst [vmem:[#allocation92_spill] sm:$0xff] %v4837_v52  ;;  %v2636_v30 = vadd.f32 %v2545_v4, %v2544_v47  ;;  %v2550_v42 = vmul.f32 %v4817_v19, %v4817_v19  ;;  %v4861_v37 = vadd.f32 %v4605_v3, %v2264_v53  ;;  %v5680_v47 = vld [vmem:[#allocation53_spill] sm:$0xff]  ;;  %v5681_v53 = vld [vmem:[#allocation32_spill] sm:$0xff] }
 0x1eb   :  { %5662 = vst [vmem:[#allocation62_spill] sm:$0xff] %v4797_v0  ;;  %5663 = vst [vmem:[#allocation17_spill] sm:$0xff] %v4799_v54  ;;  %v5678_v54 = vld [vmem:[#allocation6_spill] sm:$0xff]  ;;  %v2546_v57 = vmul.f32 %v4834_v39, %v4834_v39  ;;  %v2549_v18 = vmul.f32 %v4837_v52, %v4837_v52  ;;  %v4868_v4 = vadd.f32 %v4577_v22, %v2266_v21 }
 0x1ec   :  { %v4819_v12 = vpop.f32.mrf.mxu0  ;;  %v4821_v62 = vpop.f32.mrf.mxu1  ;;  %v2125_v48 = vadd.f32 %v5679_v1, %v5678_v54  ;;  %v2268_v10 = vadd.f32 %v4738_v43, %v5680_v47  ;;  %v4873_v54 = vadd.f32 %v4569_v36, %v2123_v34  ;;  %v5684_v1 = vld [vmem:[#allocation43_spill] sm:$0xff]  ;;  %v4880_v52 = vadd.f32 %v4577_v22, %v2236_v33 }
 0x1ed   :  { %5668 = vst [vmem:[#allocation90_spill] sm:$0xff] %v4819_v12  ;;  %5669 = vst [vmem:[#allocation91_spill] sm:$0xff] %v4821_v62  ;;  %v2642_v21 = vadd.f32 %v2550_v42, %v2549_v18  ;;  %v2637_v38 = vadd.f32 %v2636_v30, %v2546_v57  ;;  %v2595_v43 = vadd.f32 %v2594_v59, %v2511_v58  ;;  %v5685_v58 = vld [vmem:[#allocation23_spill] sm:$0xff]  ;;  %v5686_v42 = vld [vmem:[#allocation45_spill] sm:$0xff] }
 0x1ee   :  { %v3136_v9 = vpop.f32.mrf.mxu0  ;;  %v3172_v2 = vpop.f32.mrf.mxu1  ;;  %v2551_v33 = vmul.f32 %v4868_v4, %v4868_v4  ;;  %v4893_v18 = vadd.f32 %v4605_v3, %v2268_v10 }
 0x1f0   :  { %v3137_v20 = vpop.f32.mrf.mxu0  ;;  %v3173_v62 = vpop.f32.mrf.mxu1 }
 0x1f1   :  { %v3138_v32 = vadd.f32 %v3137_v20, %v3136_v9  ;;  %v3174_v45 = vadd.f32 %v3173_v62, %v3172_v2  ;;  %v5682_v9 = vld [vmem:[#allocation66_spill] sm:$0xff] }
 0x1f2   :  { %v3139_v19 = vpop.f32.mrf.mxu0  ;;  %v3175_v14 = vpop.f32.mrf.mxu1  ;;  %v2238_v62 = vadd.f32 %v5682_v9, %v5681_v53  ;;  %v5683_v2 = vld [vmem:[#allocation22_spill] sm:$0xff]  ;;  %v2600_v9 = vadd.f32 %v2515_v8, %v2514_v44  ;;  %v2643_v44 = vadd.f32 %v2642_v21, %v2551_v33  ;;  %v5687_v8 = vld [vmem:[#allocation7_spill] sm:$0xff]  ;;  %v5689_v21 = vld [vmem:[#allocation8_spill] sm:$0xff] }
 0x1f3   :  { %v2315_v20 = vadd.f32 %v3138_v32, %v5683_v2  ;;  %v2363_v39 = vadd.f32 %v3174_v45, %v5684_v1  ;;  %v2547_v32 = vmul.f32 %v4861_v37, %v4861_v37  ;;  %v5688_v1 = vld [vmem:[#allocation34_spill] sm:$0xff] }
 0x1f4   :  { %v3140_v0 = vpop.f32.mrf.mxu0  ;;  %v3176_v12 = vpop.f32.mrf.mxu1 }
 0x1f5   :  { %v4883_v47 = vadd.f32 %v4634_v24, %v2315_v20  ;;  %v4886_v34 = vadd.f32 %v4634_v24, %v2363_v39  ;;  %v3141_v50 = vadd.f32 %v3140_v0, %v3139_v19  ;;  %v3177_v53 = vadd.f32 %v3176_v12, %v3175_v14 }
 0x1f6   :  { %v3142_v30 = vpop.f32.mrf.mxu0  ;;  %v4902_v0 = vadd.f32 %v4562_v17, %v2125_v48  ;;  %v4905_v19 = vadd.f32 %v4605_v3, %v2238_v62  ;;  %v2638_v10 = vadd.f32 %v2637_v38, %v2547_v32  ;;  %v2242_v48 = vadd.f32 %v4566_v41, %v5688_v1  ;;  %v5690_v32 = vld [vmem:[#allocation24_spill] sm:$0xff] }
 0x1f7   :  { %v2318_v59 = vadd.f32 %v3141_v50, %v5685_v58  ;;  %v2366_v45 = vadd.f32 %v3177_v53, %v5686_v42  ;;  %v2548_v39 = vmul.f32 %v4886_v34, %v4886_v34  ;;  %v2488_v14 = vmul.f32 %v4883_v47, %v4883_v47 }
 0x1f8   :  { %v3143_v12 = vpop.f32.mrf.mxu0  ;;  %v2129_v50 = vadd.f32 %v4564_v35, %v5687_v8  ;;  %v2552_v62 = vmul.f32 %v4893_v18, %v4893_v18  ;;  %v2131_v35 = vadd.f32 %v4572_v15, %v5689_v21  ;;  %v2519_v41 = vmul.f32 %v4873_v54, %v4873_v54  ;;  %v5691_v8 = vld [vmem:[#allocation36_spill] sm:$0xff] }
 0x1f9   :  { %v4910_v57 = vadd.f32 %v4634_v24, %v2318_v59  ;;  %v4913_v2 = vadd.f32 %v4634_v24, %v2366_v45  ;;  %v3144_v20 = vadd.f32 %v3143_v12, %v3142_v30  ;;  %v2639_v58 = vadd.f32 %v2638_v10, %v2548_v39 }
 0x1fa   :  { %v3145_v53 = vpop.f32.mrf.mxu0  ;;  %v2567_v38 = vadd.f32 %v4717_v49, %v2488_v14  ;;  %v2521_v42 = vmul.f32 %v4880_v52, %v4880_v52  ;;  %v2644_v45 = vadd.f32 %v2643_v44, %v2552_v62  ;;  %v2520_v15 = vmul.f32 %v4902_v0, %v4902_v0 }
 0x1fb   :  { %v2323_v33 = vadd.f32 %v3144_v20, %v5690_v32  ;;  %v2493_v59 = vmul.f32 %v4910_v57, %v4910_v57  ;;  %v2553_v30 = vmul.f32 %v4913_v2, %v4913_v2  ;;  %2640 = vadd.xlane.f32.xlu1 %v2639_v58  ;;  %v4937_v12 = vadd.f32 %v2595_v43, %v4825_v40  ;;  %v5693_v43 = vld [vmem:[#allocation9_spill] sm:$0xff]  ;;  %v5694_v32 = vld [vmem:[#allocation10_spill] sm:$0xff] }
 0x1fc   :  { %2568 = vadd.xlane.f32.xlu0 %v2567_v38  ;;  %v3146_v49 = vpop.f32.mrf.mxu0  ;;  %v4940_v10 = vadd.f32 %v4569_v36, %v2129_v50  ;;  %v2244_v20 = vadd.f32 %v4574_v16, %v5691_v8  ;;  %v4946_v62 = vadd.f32 %v4577_v22, %v2242_v48  ;;  %v4949_v38 = vadd.f32 %v4562_v17, %v2131_v35 }
 0x1fd   :  { %v4934_v39 = vadd.f32 %v4634_v24, %v2323_v33  ;;  %v3147_v14 = vadd.f32 %v3146_v49, %v3145_v53  ;;  %v2573_v58 = vadd.f32 %v4740_v11, %v2493_v59  ;;  %v2645_v44 = vadd.f32 %v2644_v45, %v2553_v30  ;;  %v5692_v53 = vld [vmem:[#allocation25_spill] sm:$0xff]  ;;  %v5695_v45 = vld [vmem:[#allocation38_spill] sm:$0xff] }
 0x1fe   :  { %v3148_v1 = vpop.f32.mrf.mxu0  ;;  %v2133_v50 = vadd.f32 %v4584_v28, %v5693_v43  ;;  %v2135_v16 = vadd.f32 %v4595_v25, %v5694_v32  ;;  %v2601_v48 = vadd.f32 %v2600_v9, %v4842_v5  ;;  %v2522_v35 = vmul.f32 %v4905_v19, %v4905_v19 }
 0x1ff   :  { %v2326_v21 = vadd.f32 %v3147_v14, %v5692_v53  ;;  %v2498_v40 = vmul.f32 %v4934_v39, %v4934_v39  ;;  %2574 = vadd.xlane.f32.xlu1 %v2573_v58  ;;  %v2606_v49 = vadd.f32 %v2520_v15, %v2519_v41  ;;  %v2524_v28 = vmul.f32 %v4940_v10, %v4940_v10 }
 0x200   :  { %2646 = vadd.xlane.f32.xlu0 %v2645_v44  ;;  %v3149_v11 = vpop.f32.mrf.mxu0  ;;  %v4968_v25 = vadd.f32 %v4605_v3, %v2244_v20  ;;  %v2246_v14 = vadd.f32 %v4586_v26, %v5695_v45  ;;  %v2526_v9 = vmul.f32 %v4946_v62, %v4946_v62  ;;  %v2525_v8 = vmul.f32 %v4949_v38, %v4949_v38  ;;  %v5697_v20 = vld [vmem:[#allocation40_spill] sm:$0xff]  ;;  %v5701_v45 = vld [vmem:[#allocation29_spill] sm:$0xff] }
 0x201   :  { %v4962_v33 = vadd.f32 %v4634_v24, %v2326_v21  ;;  %v3150_v59 = vadd.f32 %v3149_v11, %v3148_v1  ;;  %v2579_v30 = vadd.f32 %v4761_v46, %v2498_v40  ;;  %v5696_v1 = vld [vmem:[#allocation27_spill] sm:$0xff]  ;;  %v4980_v41 = vadd.f32 %v4569_v36, %v2133_v50 }
 0x202   :  { %v3151_v5 = vpop.f32.mrf.mxu0  ;;  %v4983_v15 = vadd.f32 %v4562_v17, %v2135_v16  ;;  %v2248_v26 = vadd.f32 %v4597_v56, %v5697_v20  ;;  %v2602_v53 = vadd.f32 %v2601_v48, %v4854_v63  ;;  %v5698_v21 = vld [vmem:[#allocation11_spill] sm:$0xff]  ;;  %v2527_v16 = vmul.f32 %v4968_v25, %v4968_v25  ;;  %v5699_v56 = vld [vmem:[#allocation42_spill] sm:$0xff] }
 0x203   :  { %v2331_v58 = vadd.f32 %v3150_v59, %v5696_v1  ;;  %v2503_v46 = vmul.f32 %v4962_v33, %v4962_v33  ;;  %v2139_v40 = vadd.f32 %v4614_v7, %v5698_v21  ;;  %v4997_v11 = vadd.f32 %v4577_v22, %v2246_v14 }
 0x204   :  { %2580 = vadd.xlane.f32.xlu0 %v2579_v30  ;;  %v3152_v44 = vpop.f32.mrf.mxu0  ;;  %v2252_v59 = vadd.f32 %v4616_v23, %v5699_v56  ;;  %v5700_v30 = vld [vmem:[#allocation12_spill] sm:$0xff]  ;;  %v2612_v7 = vadd.f32 %v2525_v8, %v2524_v28  ;;  %v2530_v14 = vmul.f32 %v4983_v15, %v4983_v15  ;;  %v5708_v56 = vld [vmem:[#allocation31_spill] sm:$0xff] }
 0x205   :  { %v4991_v43 = vadd.f32 %v4634_v24, %v2331_v58  ;;  %v3153_v32 = vadd.f32 %v3152_v44, %v3151_v5  ;;  %v2585_v50 = vadd.f32 %v4806_v60, %v2503_v46  ;;  %v2141_v63 = vadd.f32 %v4630_v31, %v5700_v30  ;;  %v5703_v23 = vld [vmem:[#allocation44_spill] sm:$0xff] }
 0x206   :  { %v3154_v48 = vpop.f32.mrf.mxu0  ;;  %v2607_v60 = vadd.f32 %v2606_v49, %v2521_v42  ;;  %v2529_v58 = vmul.f32 %v4980_v41, %v4980_v41  ;;  %v5011_v46 = vadd.f32 %v4605_v3, %v2248_v26  ;;  %v2254_v31 = vadd.f32 %v4632_v55, %v5703_v23  ;;  %v5707_v55 = vld [vmem:[#allocation13_spill] sm:$0xff] }
 0x207   :  { %v2334_v1 = vadd.f32 %v3153_v32, %v5701_v45  ;;  %v2508_v5 = vmul.f32 %v4991_v43, %v4991_v43  ;;  %v5016_v8 = vadd.f32 %v4569_v36, %v2139_v40  ;;  %v2531_v44 = vmul.f32 %v4997_v11, %v4997_v11  ;;  %v3178_v40 = vpop.f32.mrf.mxu1 }
 0x208   :  { %5702 = vst [vmem:[#allocation52_spill] sm:$0xff] %v5011_v46  ;;  %2586 = vadd.xlane.f32.xlu0 %v2585_v50  ;;  %v3155_v28 = vpop.f32.mrf.mxu0  ;;  %v5025_v26 = vadd.f32 %v4577_v22, %v2252_v59  ;;  %v5028_v21 = vadd.f32 %v4562_v17, %v2141_v63  ;;  %v2143_v32 = vadd.f32 %v4652_v13, %v5707_v55  ;;  %v5713_v55 = vld [vmem:[#allocation19_spill] sm:$0xff] }
 0x209   :  { %5704 = vst [vmem:[#allocation5_spill] sm:$0xff] %v5016_v8  ;;  %v5019_v20 = vadd.f32 %v4634_v24, %v2334_v1  ;;  %v3156_v42 = vadd.f32 %v3155_v28, %v3154_v48  ;;  %v2591_v49 = vadd.f32 %v4848_v61, %v2508_v5  ;;  %v2608_v48 = vadd.f32 %v2607_v60, %v2522_v35  ;;  %v5710_v5 = vld [vmem:[#allocation46_spill] sm:$0xff] }
 0x20a   :  { %5705 = vst [vmem:[#allocation63_spill] sm:$0xff] %v5025_v26  ;;  %5706 = vst [vmem:[#allocation30_spill] sm:$0xff] %v5028_v21  ;;  %v3157_v50 = vpop.f32.mrf.mxu0  ;;  %v2613_v45 = vadd.f32 %v2612_v7, %v2526_v9  ;;  %v2618_v1 = vadd.f32 %v2530_v14, %v2529_v58  ;;  %v2532_v59 = vmul.f32 %v5011_v46, %v5011_v46  ;;  %v3179_v14 = vpop.f32.mrf.mxu1 }
 0x20b   :  { %v2339_v30 = vadd.f32 %v3156_v42, %v5708_v56  ;;  %2592 = vadd.xlane.f32.xlu1 %v2591_v49  ;;  %v2513_v61 = vmul.f32 %v5019_v20, %v5019_v20  ;;  %v5038_v63 = vadd.f32 %v4605_v3, %v2254_v31  ;;  %v2256_v13 = vadd.f32 %v4654_v51, %v5710_v5  ;;  %v5712_v51 = vld [vmem:[#allocation14_spill] sm:$0xff]  ;;  %v5714_v56 = vld [vmem:[#allocation33_spill] sm:$0xff] }
 0x20c   :  { %v3158_v23 = vpop.f32.mrf.mxu0  ;;  %v2534_v28 = vmul.f32 %v5016_v8, %v5016_v8  ;;  %v5050_v9 = vmul.f32 %v5025_v26, %v5025_v26  ;;  %v2535_v7 = vmul.f32 %v5028_v21, %v5028_v21  ;;  %v5055_v60 = vadd.f32 %v4569_v36, %v2143_v32  ;;  %v5718_v26 = vld [vmem:[#allocation3_spill] sm:$0xff]  ;;  %v5720_v21 = vld [vmem:[#allocation54_spill] sm:$0xff] }
 0x20d   :  { %5709 = vst [vmem:[#allocation64_spill] sm:$0xff] %v5038_v63  ;;  %v5045_v42 = vadd.f32 %v4634_v24, %v2339_v30  ;;  %v3159_v49 = vadd.f32 %v3158_v23, %v3157_v50  ;;  %v2597_v35 = vadd.f32 %v4937_v12, %v2513_v61  ;;  %v2145_v58 = vadd.f32 %v4673_v29, %v5712_v51  ;;  %v5716_v29 = vld [vmem:[#allocation48_spill] sm:$0xff]  ;;  %v5717_v51 = vld [vmem:[#allocation18_spill] sm:$0xff]  ;;  %v5721_v8 = vld [vmem:[#allocation59_spill] sm:$0xff] }
 0x20e   :  { %5711 = vst [vmem:[#allocation6_spill] sm:$0xff] %v5055_v60  ;;  %v3160_v31 = vpop.f32.mrf.mxu0  ;;  %v2161_v50 = vadd.f32 %v4776_v27, %v5713_v55  ;;  %v2614_v61 = vadd.f32 %v2613_v45, %v2527_v16  ;;  %v5066_v5 = vmul.f32 %v5038_v63, %v5038_v63  ;;  %v5069_v32 = vadd.f32 %v4577_v22, %v2256_v13 }
 0x20f   :  { %v2342_v12 = vadd.f32 %v3159_v49, %v5714_v56  ;;  %2598 = vadd.xlane.f32.xlu0 %v2597_v35  ;;  %v2518_v30 = vmul.f32 %v5045_v42, %v5045_v42  ;;  %v2258_v23 = vadd.f32 %v4675_v6, %v5716_v29  ;;  %v2159_v27 = vadd.f32 %v5718_v26, %v5717_v51  ;;  %v3181_v29 = vpop.f32.mrf.mxu1  ;;  %v5724_v51 = vld [vmem:[#allocation90_spill] sm:$0xff] }
 0x210   :  { %5715 = vst [vmem:[#allocation65_spill] sm:$0xff] %v5069_v32  ;;  %v3161_v55 = vpop.f32.mrf.mxu0  ;;  %v2619_v16 = vadd.f32 %v2618_v1, %v2531_v44  ;;  %v2624_v45 = vadd.f32 %v2535_v7, %v2534_v28  ;;  %v2539_v63 = vmul.f32 %v5055_v60, %v5055_v60  ;;  %v5081_v13 = vadd.f32 %v4562_v17, %v2145_v58 }
 0x211   :  { %v5076_v49 = vadd.f32 %v4634_v24, %v2342_v12  ;;  %v3162_v35 = vadd.f32 %v3161_v55, %v3160_v31  ;;  %v2603_v56 = vadd.f32 %v2602_v53, %v2518_v30  ;;  %v2272_v6 = vadd.f32 %v5721_v8, %v5720_v21  ;;  %v5723_v12 = vld [vmem:[#allocation21_spill] sm:$0xff]  ;;  %v5725_v53 = vld [vmem:[#allocation35_spill] sm:$0xff]  ;;  %v5727_v8 = vld [vmem:[#allocation20_spill] sm:$0xff] }
 0x212   :  { %5719 = vst [vmem:[#allocation53_spill] sm:$0xff] %v5081_v13  ;;  %v3163_v46 = vpop.f32.mrf.mxu0  ;;  %v5086_v26 = vadd.f32 %v4562_v17, %v2161_v50  ;;  %v2165_v31 = vadd.f32 %v5724_v51, %v5723_v12  ;;  %v2541_v28 = vmul.f32 %v5069_v32, %v5069_v32  ;;  %v5096_v7 = vadd.f32 %v4569_v36, %v2159_v27  ;;  %v5728_v21 = vld [vmem:[#allocation62_spill] sm:$0xff]  ;;  %v5729_v27 = vld [vmem:[#allocation55_spill] sm:$0xff]  ;;  %v5730_v32 = vld [vmem:[#allocation60_spill] sm:$0xff] }
 0x213   :  { %v2347_v44 = vadd.f32 %v3162_v35, %v5725_v53  ;;  %2604 = vadd.xlane.f32.xlu1 %v2603_v56  ;;  %v2523_v1 = vmul.f32 %v5076_v49, %v5076_v49  ;;  %v2163_v58 = vadd.f32 %v5728_v21, %v5727_v8  ;;  %v3180_v50 = vadd.f32 %v3179_v14, %v3178_v40  ;;  %v3182_v8 = vpop.f32.mrf.mxu1  ;;  %v5732_v21 = vld [vmem:[#allocation56_spill] sm:$0xff] }
 0x214   :  { %5722 = vst [vmem:[#allocation32_spill] sm:$0xff] %v5086_v26  ;;  %5726 = vst [vmem:[#allocation66_spill] sm:$0xff] %v5096_v7  ;;  %v3164_v30 = vpop.f32.mrf.mxu0  ;;  %v5101_v55 = vadd.f32 %v4605_v3, %v2258_v23  ;;  %v2540_v51 = vmul.f32 %v5081_v13, %v5081_v13  ;;  %v5109_v53 = vadd.f32 %v4577_v22, %v2272_v6 }
 0x215   :  { %v5104_v35 = vadd.f32 %v4634_v24, %v2347_v44  ;;  %v3165_v56 = vadd.f32 %v3164_v30, %v3163_v46  ;;  %v2609_v12 = vadd.f32 %v2608_v48, %v2523_v1  ;;  %v2274_v60 = vadd.f32 %v5730_v32, %v5729_v27  ;;  %v5731_v46 = vld [vmem:[#allocation37_spill] sm:$0xff]  ;;  %v5734_v30 = vld [vmem:[#allocation47_spill] sm:$0xff] }
 0x216   :  { %v3166_v40 = vpop.f32.mrf.mxu0  ;;  %v2620_v14 = vadd.f32 %v2619_v16, %v2532_v59  ;;  %v2555_v23 = vmul.f32 %v5086_v26, %v5086_v26  ;;  %v5116_v44 = vadd.f32 %v4562_v17, %v2165_v31  ;;  %v2554_v6 = vmul.f32 %v5096_v7, %v5096_v7  ;;  %v5733_v59 = vld [vmem:[#allocation17_spill] sm:$0xff] }
 0x217   :  { %v2350_v48 = vadd.f32 %v3165_v56, %v5731_v46  ;;  %2610 = vadd.xlane.f32.xlu0 %v2609_v12  ;;  %v2528_v1 = vmul.f32 %v5104_v35, %v5104_v35  ;;  %v5124_v32 = vadd.f32 %v4569_v36, %v2163_v58  ;;  %v2276_v16 = vadd.f32 %v5733_v59, %v5732_v21 }
 0x218   :  { %v2371_v27 = vadd.f32 %v3180_v50, %v5734_v30  ;;  %v3167_v26 = vpop.f32.mrf.mxu0  ;;  %v3183_v17 = vadd.f32 %v3182_v8, %v3181_v29  ;;  %v2630_v46 = vadd.f32 %v2540_v51, %v2539_v63  ;;  %v2556_v13 = vmul.f32 %v5109_v53, %v5109_v53  ;;  %v5735_v29 = vld [vmem:[#allocation39_spill] sm:$0xff] }
 0x219   :  { %v5130_v31 = vadd.f32 %v4634_v24, %v2350_v48  ;;  %v3168_v56 = vadd.f32 %v3167_v26, %v3166_v40  ;;  %v2615_v12 = vadd.f32 %v2614_v61, %v2528_v1  ;;  %v5135_v7 = vadd.f32 %v4605_v3, %v2274_v60  ;;  %v5736_v60 = vld [vmem:[#allocation57_spill] sm:$0xff]  ;;  %v5737_v51 = vld [vmem:[#allocation91_spill] sm:$0xff] }
 0x21a   :  { %v3169_v36 = vpop.f32.mrf.mxu0  ;;  %v2625_v58 = vadd.f32 %v2624_v45, %v5050_v9  ;;  %v2648_v21 = vadd.f32 %v2555_v23, %v2554_v6  ;;  %v2560_v50 = vmul.f32 %v5116_v44, %v5116_v44  ;;  %v2559_v63 = vmul.f32 %v5124_v32, %v5124_v32  ;;  %v5738_v23 = vld [vmem:[#allocation49_spill] sm:$0xff] }
 0x21b   :  { %v2355_v8 = vadd.f32 %v3168_v56, %v5735_v29  ;;  %2616 = vadd.xlane.f32.xlu1 %v2615_v12  ;;  %v2533_v61 = vmul.f32 %v5130_v31, %v5130_v31  ;;  %v5146_v26 = vadd.f32 %v4577_v22, %v2276_v16  ;;  %v2278_v40 = vadd.f32 %v5737_v51, %v5736_v60  ;;  %v5739_v22 = vld [vmem:[#allocation41_spill] sm:$0xff] }
 0x21c   :  { %v5151_v9 = vadd.f32 %v4634_v24, %v2371_v27  ;;  %v3170_v45 = vpop.f32.mrf.mxu0  ;;  %v2374_v48 = vadd.f32 %v3183_v17, %v5738_v23  ;;  %v2626_v30 = vadd.f32 %v2625_v58, %v5066_v5  ;;  %v2631_v56 = vadd.f32 %v2630_v46, %v2541_v28 }
 0x21d   :  { %v5155_v1 = vadd.f32 %v4634_v24, %v2355_v8  ;;  %v3171_v6 = vadd.f32 %v3170_v45, %v3169_v36  ;;  %v2621_v59 = vadd.f32 %v2620_v14, %v2533_v61  ;;  %v2654_v12 = vadd.f32 %v2560_v50, %v2559_v63 }
 0x21e   :  { %v2649_v27 = vadd.f32 %v2648_v21, %v2556_v13  ;;  %v2542_v60 = vmul.f32 %v5101_v55, %v5101_v55  ;;  %v2557_v17 = vmul.f32 %v5135_v7, %v5135_v7  ;;  %v2561_v14 = vmul.f32 %v5146_v26, %v5146_v26 }
 0x21f   :  { %v2358_v16 = vadd.f32 %v3171_v6, %v5739_v22  ;;  %2622 = vadd.xlane.f32.xlu0 %v2621_v59  ;;  %v2538_v29 = vmul.f32 %v5155_v1, %v5155_v1  ;;  %v5168_v5 = vadd.f32 %v4605_v3, %v2278_v40  ;;  %v5171_v28 = vadd.f32 %v4634_v24, %v2374_v48 }
 0x220   :  { %v2558_v13 = vmul.f32 %v5151_v9, %v5151_v9  ;;  %v2632_v21 = vadd.f32 %v2631_v56, %v2542_v60  ;;  %v2650_v50 = vadd.f32 %v2649_v27, %v2557_v17  ;;  %v2655_v8 = vadd.f32 %v2654_v12, %v2561_v14 }
 0x221   :  { %v5174_v46 = vadd.f32 %v4634_v24, %v2358_v16  ;;  %v2627_v36 = vadd.f32 %v2626_v30, %v2538_v29  ;;  %v2562_v3 = vmul.f32 %v5168_v5, %v5168_v5  ;;  %v2563_v24 = vmul.f32 %v5171_v28, %v5171_v28 }
 0x222   :  { %v2651_v63 = vadd.f32 %v2650_v50, %v2558_v13  ;;  %v5740_v13 = vld [vmem:[#allocation28_spill] sm:$0xff] }
 0x223   :  { %2628 = vadd.xlane.f32.xlu1 %v2627_v36  ;;  %v2543_v58 = vmul.f32 %v5174_v46, %v5174_v46  ;;  %v2656_v51 = vadd.f32 %v2655_v8, %v2562_v3  ;;  %v5742_v8 = vld [vmem:[#allocation51_spill] sm:$0xff] }
 0x225   :  { %v2633_v61 = vadd.f32 %v2632_v21, %v2543_v58  ;;  %v2657_v40 = vadd.f32 %v2656_v51, %v2563_v24  ;;  %v5741_v21 = vld [vmem:[#allocation26_spill] sm:$0xff]  ;;  %v5743_v24 = vld [vmem:[#allocation68_spill] sm:$0xff] }
 0x227   :  { %2634 = vadd.xlane.f32.xlu0 %v2633_v61  ;;  %2652 = vadd.xlane.f32.xlu1 %v2651_v63 }
 0x22b   :  { %2658 = vadd.xlane.f32.xlu0 %v2657_v40  ;;  %v5744_v40 = vld [vmem:[#allocation67_spill] sm:$0xff] }
 0x284   :  { %v2641_v45 = vpop.xlane.xlu1 %2640 }
 0x285   :  { %v2569_v23 = vpop.xlane.xlu0 %2568  ;;  %v2672_v48 = vmax.f32 %v2641_v45, 1e-24 }
 0x286   :  { %v2660_v6 = vmax.f32 %v2569_v23, 1e-24  ;;  %v5745_v23 = vld [vmem:[#allocation70_spill] sm:$0xff] }
 0x287   :  { %3483 = vrsqrt.f32 %v2672_v48 }
 0x288   :  { %3485 = vrsqrt.f32 %v2660_v6  ;;  %v2575_v59 = vpop.xlane.xlu1 %2574 }
 0x289   :  { %v2647_v30 = vpop.xlane.xlu0 %2646  ;;  %v2661_v56 = vmax.f32 %v2575_v59, 1e-24 }
 0x28a   :  { %v2673_v12 = vmax.f32 %v2647_v30, 1e-24 }
 0x28b   :  { %3487 = vrsqrt.f32 %v2661_v56 }
 0x28c   :  { %3489 = vrsqrt.f32 %v2673_v12  ;;  %v5747_v12 = vld [vmem:[#allocation71_spill] sm:$0xff] }
 0x28d   :  { %v2581_v22 = vpop.xlane.xlu0 %2580 }
 0x28e   :  { %v2662_v16 = vmax.f32 %v2581_v22, 1e-24 }
 0x290   :  { %3491 = vrsqrt.f32 %v2662_v16  ;;  %v5748_v16 = vld [vmem:[#allocation69_spill] sm:$0xff] }
 0x291   :  { %v2587_v29 = vpop.xlane.xlu0 %2586 }
 0x292   :  { %v2663_v27 = vmax.f32 %v2587_v29, 1e-24 }
 0x294   :  { %3493 = vrsqrt.f32 %v2663_v27  ;;  %v2593_v60 = vpop.xlane.xlu1 %2592  ;;  %v3484_v17 = vpop.eup %3483  ;;  %v5749_v27 = vld [vmem:[#allocation75_spill] sm:$0xff] }
 0x295   :  { %v2664_v14 = vmax.f32 %v2593_v60, 1e-24  ;;  %v3486_v36 = vpop.eup %3485  ;;  %v2752_v58 = vmul.f32 %v3484_v17, %v5740_v13  ;;  %v2753_v50 = vmul.f32 %v3484_v17, %v5741_v21  ;;  %v2754_v3 = vmul.f32 %v3484_v17, %v5742_v8  ;;  %v5751_v13 = vld [vmem:[#allocation92_spill] sm:$0xff]  ;;  %v5752_v21 = vld [vmem:[#allocation89_spill] sm:$0xff] }
 0x296   :  { %v2755_v61 = vmul.f32 %v3484_v17, %v4861_v37  ;;  %v2756_v63 = vmul.f32 %v3484_v17, %v4886_v34  ;;  %v2692_v51 = vmul.f32 %v3486_v36, %v5743_v24  ;;  %v2693_v45 = vmul.f32 %v3486_v36, %v5744_v40  ;;  %v5746_v37 = vld [vmem:[#allocation74_spill] sm:$0xff]  ;;  %v5750_v17 = vld [vmem:[#allocation76_spill] sm:$0xff] }
 0x297   :  { %v2694_v48 = vmul.f32 %v3486_v36, %v5745_v23  ;;  %2832 = vst [vmem:[%s5511_s7 + $0x1e0] sm:$0xff] %v2752_v58  ;;  %2833 = vst [vmem:[%s5511_s7 + $0x1e8] sm:$0xff] %v2753_v50  ;;  %v2695_v34 = vmul.f32 %v3486_v36, %v5746_v37  ;;  %v2696_v6 = vmul.f32 %v3486_v36, %v4883_v47  ;;  %3495 = vrsqrt.f32 %v2664_v14  ;;  %v5754_v24 = vld [vmem:[#allocation72_spill] sm:$0xff]  ;;  %v5755_v40 = vld [vmem:[#allocation78_spill] sm:$0xff] }
 0x298   :  { %2834 = vst [vmem:[%s5511_s7 + $0x1f0] sm:$0xff] %v2754_v3  ;;  %2835 = vst [vmem:[%s5511_s7 + $0x1f8] sm:$0xff] %v2755_v61  ;;  %v2599_v59 = vpop.xlane.xlu0 %2598  ;;  %v3488_v30 = vpop.eup %3487  ;;  %v5756_v23 = vld [vmem:[#allocation80_spill] sm:$0xff] }
 0x299   :  { %2836 = vst [vmem:[%s5511_s7 + $0x200] sm:$0xff] %v2756_v63  ;;  %2772 = vst [vmem:[%s5511_s7] sm:$0xff] %v2692_v51  ;;  %v2665_v47 = vmax.f32 %v2599_v59, 1e-24  ;;  %v3490_v56 = vpop.eup %3489  ;;  %v2697_v22 = vmul.f32 %v3488_v30, %v5747_v12  ;;  %v2698_v29 = vmul.f32 %v3488_v30, %v5748_v16  ;;  %v2699_v60 = vmul.f32 %v3488_v30, %v5749_v27  ;;  %v5757_v59 = vld [vmem:[#allocation79_spill] sm:$0xff]  ;;  %v5759_v12 = vld [vmem:[#allocation81_spill] sm:$0xff] }
 0x29a   :  { %2773 = vst [vmem:[%s5511_s7 + $0x8] sm:$0xff] %v2693_v45  ;;  %2774 = vst [vmem:[%s5511_s7 + $0x10] sm:$0xff] %v2694_v48  ;;  %v2700_v14 = vmul.f32 %v3488_v30, %v5750_v17  ;;  %v2701_v36 = vmul.f32 %v3488_v30, %v4910_v57  ;;  %v2757_v58 = vmul.f32 %v3490_v56, %v5751_v13  ;;  %v5760_v16 = vld [vmem:[#allocation83_spill] sm:$0xff]  ;;  %v5762_v13 = vld [vmem:[#allocation82_spill] sm:$0xff] }
 0x29b   :  { %2775 = vst [vmem:[%s5511_s7 + $0x18] sm:$0xff] %v2695_v34  ;;  %2776 = vst [vmem:[%s5511_s7 + $0x20] sm:$0xff] %v2696_v6  ;;  %v2758_v50 = vmul.f32 %v3490_v56, %v5752_v21  ;;  %v2759_v8 = vmul.f32 %v3490_v56, %v4868_v4  ;;  %v2760_v57 = vmul.f32 %v3490_v56, %v4893_v18  ;;  %3497 = vrsqrt.f32 %v2665_v47  ;;  %v5758_v47 = vld [vmem:[#allocation77_spill] sm:$0xff] }
 0x29c   :  { %2777 = vst [vmem:[%s5511_s7 + $0x28] sm:$0xff] %v2697_v22  ;;  %2778 = vst [vmem:[%s5511_s7 + $0x30] sm:$0xff] %v2698_v29  ;;  %v2761_v4 = vmul.f32 %v3490_v56, %v4913_v2  ;;  %v2605_v3 = vpop.xlane.xlu1 %2604  ;;  %v5753_v2 = vld [vmem:[#allocation73_spill] sm:$0xff] }
 0x29d   :  { %2779 = vst [vmem:[%s5511_s7 + $0x38] sm:$0xff] %v2699_v60  ;;  %2780 = vst [vmem:[%s5511_s7 + $0x40] sm:$0xff] %v2700_v14  ;;  %v3492_v61 = vpop.eup %3491  ;;  %v2666_v18 = vmax.f32 %v2605_v3, 1e-24  ;;  %v5761_v14 = vld [vmem:[#allocation84_spill] sm:$0xff]  ;;  %v5763_v21 = vld [vmem:[#allocation85_spill] sm:$0xff] }
 0x29e   :  { %2781 = vst [vmem:[%s5511_s7 + $0x48] sm:$0xff] %v2701_v36  ;;  %2837 = vst [vmem:[%s5511_s7 + $0x208] sm:$0xff] %v2757_v58  ;;  %v2702_v63 = vmul.f32 %v3492_v61, %v5753_v2  ;;  %v2703_v51 = vmul.f32 %v3492_v61, %v5754_v24  ;;  %v2704_v45 = vmul.f32 %v3492_v61, %v5755_v40 }
 0x29f   :  { %2838 = vst [vmem:[%s5511_s7 + $0x210] sm:$0xff] %v2758_v50  ;;  %2839 = vst [vmem:[%s5511_s7 + $0x218] sm:$0xff] %v2759_v8  ;;  %v2705_v48 = vmul.f32 %v3492_v61, %v5756_v23  ;;  %v2706_v37 = vmul.f32 %v3492_v61, %v4934_v39  ;;  %3499 = vrsqrt.f32 %v2666_v18  ;;  %v5764_v8 = vld [vmem:[#allocation86_spill] sm:$0xff] }
 0x2a0   :  { %2840 = vst [vmem:[%s5511_s7 + $0x220] sm:$0xff] %v2760_v57  ;;  %2841 = vst [vmem:[%s5511_s7 + $0x228] sm:$0xff] %v2761_v4  ;;  %v2611_v34 = vpop.xlane.xlu0 %2610  ;;  %v5765_v18 = vld [vmem:[#allocation58_spill] sm:$0xff] }
 0x2a1   :  { %2782 = vst [vmem:[%s5511_s7 + $0x50] sm:$0xff] %v2702_v63  ;;  %2783 = vst [vmem:[%s5511_s7 + $0x58] sm:$0xff] %v2703_v51  ;;  %v3494_v6 = vpop.eup %3493  ;;  %v2667_v39 = vmax.f32 %v2611_v34, 1e-24  ;;  %v5766_v63 = vld [vmem:[#allocation87_spill] sm:$0xff] }
 0x2a2   :  { %2784 = vst [vmem:[%s5511_s7 + $0x60] sm:$0xff] %v2704_v45  ;;  %2785 = vst [vmem:[%s5511_s7 + $0x68] sm:$0xff] %v2705_v48  ;;  %v2707_v30 = vmul.f32 %v3494_v6, %v5757_v59  ;;  %v2708_v56 = vmul.f32 %v3494_v6, %v5758_v47  ;;  %v2709_v22 = vmul.f32 %v3494_v6, %v5759_v12  ;;  %v5767_v51 = vld [vmem:[#allocation15_spill] sm:$0xff]  ;;  %v5768_v45 = vld [vmem:[#allocation4_spill] sm:$0xff] }
 0x2a3   :  { %2786 = vst [vmem:[%s5511_s7 + $0x70] sm:$0xff] %v2706_v37  ;;  %v2710_v29 = vmul.f32 %v3494_v6, %v5760_v16  ;;  %v2711_v27 = vmul.f32 %v3494_v6, %v4962_v33  ;;  %3501 = vrsqrt.f32 %v2667_v39  ;;  %v5770_v39 = vld [vmem:[#allocation16_spill] sm:$0xff] }
 0x2a4   :  { %2787 = vst [vmem:[%s5511_s7 + $0x78] sm:$0xff] %v2707_v30  ;;  %2788 = vst [vmem:[%s5511_s7 + $0x80] sm:$0xff] %v2708_v56  ;;  %v2617_v60 = vpop.xlane.xlu1 %2616  ;;  %v3496_v17 = vpop.eup %3495  ;;  %v5771_v30 = vld [vmem:[#allocation50_spill] sm:$0xff]  ;;  %v5772_v56 = vld [vmem:[#allocation88_spill] sm:$0xff] }
 0x2a5   :  { %2789 = vst [vmem:[%s5511_s7 + $0x88] sm:$0xff] %v2709_v22  ;;  %2790 = vst [vmem:[%s5511_s7 + $0x90] sm:$0xff] %v2710_v29  ;;  %v2668_v33 = vmax.f32 %v2617_v60, 1e-24  ;;  %v2712_v36 = vmul.f32 %v3496_v17, %v5761_v14  ;;  %v2713_v58 = vmul.f32 %v3496_v17, %v5762_v13  ;;  %v2714_v50 = vmul.f32 %v3496_v17, %v5763_v21 }
 0x2a6   :  { %2791 = vst [vmem:[%s5511_s7 + $0x98] sm:$0xff] %v2711_v27  ;;  %v2715_v57 = vmul.f32 %v3496_v17, %v5764_v8  ;;  %v2716_v4 = vmul.f32 %v3496_v17, %v4991_v43 }
 0x2a7   :  { %3503 = vrsqrt.f32 %v2668_v33  ;;  %2792 = vst [vmem:[%s5511_s7 + $0xa0] sm:$0xff] %v2712_v36  ;;  %2793 = vst [vmem:[%s5511_s7 + $0xa8] sm:$0xff] %v2713_v58 }
 0x2a8   :  { %2794 = vst [vmem:[%s5511_s7 + $0xb0] sm:$0xff] %v2714_v50  ;;  %2795 = vst [vmem:[%s5511_s7 + $0xb8] sm:$0xff] %v2715_v57  ;;  %v2623_v3 = vpop.xlane.xlu0 %2622  ;;  %v3498_v61 = vpop.eup %3497 }
 0x2a9   :  { %2796 = vst [vmem:[%s5511_s7 + $0xc0] sm:$0xff] %v2716_v4  ;;  %v2669_v43 = vmax.f32 %v2623_v3, 1e-24  ;;  %v2717_v2 = vmul.f32 %v3498_v61, %v5765_v18  ;;  %v2718_v24 = vmul.f32 %v3498_v61, %v5766_v63  ;;  %v2719_v40 = vmul.f32 %v3498_v61, %v5767_v51  ;;  %v5777_v18 = vld [vmem:[#allocation64_spill] sm:$0xff] }
 0x2aa   :  { %v2720_v23 = vmul.f32 %v3498_v61, %v5768_v45  ;;  %v2721_v48 = vmul.f32 %v3498_v61, %v5019_v20  ;;  %v5769_v20 = vld [vmem:[#allocation61_spill] sm:$0xff]  ;;  %v5776_v61 = vld [vmem:[#allocation63_spill] sm:$0xff] }
 0x2ab   :  { %3505 = vrsqrt.f32 %v2669_v43  ;;  %2797 = vst [vmem:[%s5511_s7 + $0xc8] sm:$0xff] %v2717_v2  ;;  %2798 = vst [vmem:[%s5511_s7 + $0xd0] sm:$0xff] %v2718_v24 }
 0x2ac   :  { %v3500_v37 = vpop.eup %3499  ;;  %2799 = vst [vmem:[%s5511_s7 + $0xd8] sm:$0xff] %v2719_v40  ;;  %2800 = vst [vmem:[%s5511_s7 + $0xe0] sm:$0xff] %v2720_v23  ;;  %v2629_v34 = vpop.xlane.xlu1 %2628  ;;  %v5779_v40 = vld [vmem:[#allocation53_spill] sm:$0xff] }
 0x2ad   :  { %2801 = vst [vmem:[%s5511_s7 + $0xe8] sm:$0xff] %v2721_v48  ;;  %v2722_v6 = vmul.f32 %v3500_v37, %v5769_v20  ;;  %v2723_v59 = vmul.f32 %v3500_v37, %v5770_v39  ;;  %v2724_v47 = vmul.f32 %v3500_v37, %v5771_v30  ;;  %v2725_v12 = vmul.f32 %v3500_v37, %v5772_v56  ;;  %v5780_v23 = vld [vmem:[#allocation65_spill] sm:$0xff]  ;;  %v5782_v39 = vld [vmem:[#allocation32_spill] sm:$0xff] }
 0x2ae   :  { %v2726_v22 = vmul.f32 %v3500_v37, %v5045_v42  ;;  %v2670_v16 = vmax.f32 %v2629_v34, 1e-24 }
 0x2af   :  { %2802 = vst [vmem:[%s5511_s7 + $0xf0] sm:$0xff] %v2722_v6  ;;  %2803 = vst [vmem:[%s5511_s7 + $0xf8] sm:$0xff] %v2723_v59 }
 0x2b0   :  { %2804 = vst [vmem:[%s5511_s7 + $0x100] sm:$0xff] %v2724_v47  ;;  %2805 = vst [vmem:[%s5511_s7 + $0x108] sm:$0xff] %v2725_v12  ;;  %v3502_v29 = vpop.eup %3501  ;;  %3507 = vrsqrt.f32 %v2670_v16  ;;  %v2635_v42 = vpop.xlane.xlu0 %2634 }
 0x2b1   :  { %2806 = vst [vmem:[%s5511_s7 + $0x110] sm:$0xff] %v2726_v22  ;;  %v2653_v27 = vpop.xlane.xlu1 %2652  ;;  %v2727_v60 = vmul.f32 %v3502_v29, %v4873_v54  ;;  %v2728_v17 = vmul.f32 %v3502_v29, %v4902_v0  ;;  %v2729_v33 = vmul.f32 %v3502_v29, %v4880_v52  ;;  %v2730_v14 = vmul.f32 %v3502_v29, %v4905_v19 }
 0x2b2   :  { %v2731_v36 = vmul.f32 %v3502_v29, %v5076_v49  ;;  %v2671_v13 = vmax.f32 %v2635_v42, 1e-24  ;;  %v2674_v58 = vmax.f32 %v2653_v27, 1e-24 }
 0x2b3   :  { %2807 = vst [vmem:[%s5511_s7 + $0x118] sm:$0xff] %v2727_v60  ;;  %2808 = vst [vmem:[%s5511_s7 + $0x120] sm:$0xff] %v2728_v17 }
 0x2b4   :  { %2809 = vst [vmem:[%s5511_s7 + $0x128] sm:$0xff] %v2729_v33  ;;  %2810 = vst [vmem:[%s5511_s7 + $0x130] sm:$0xff] %v2730_v14  ;;  %v3504_v52 = vpop.eup %3503  ;;  %3509 = vrsqrt.f32 %v2671_v13  ;;  %v2659_v54 = vpop.xlane.xlu0 %2658 }
 0x2b5   :  { %2811 = vst [vmem:[%s5511_s7 + $0x138] sm:$0xff] %v2731_v36  ;;  %v2732_v0 = vmul.f32 %v3504_v52, %v4940_v10  ;;  %v2733_v19 = vmul.f32 %v3504_v52, %v4949_v38  ;;  %v2734_v49 = vmul.f32 %v3504_v52, %v4946_v62  ;;  %v2735_v21 = vmul.f32 %v3504_v52, %v4968_v25 }
 0x2b6   :  { %v2736_v50 = vmul.f32 %v3504_v52, %v5104_v35  ;;  %3511 = vrsqrt.f32 %v2674_v58  ;;  %v2675_v8 = vmax.f32 %v2659_v54, 1e-24  ;;  %v5773_v35 = vld [vmem:[#allocation52_spill] sm:$0xff] }
 0x2b7   :  { %2812 = vst [vmem:[%s5511_s7 + $0x140] sm:$0xff] %v2732_v0  ;;  %2813 = vst [vmem:[%s5511_s7 + $0x148] sm:$0xff] %v2733_v19 }
 0x2b8   :  { %2814 = vst [vmem:[%s5511_s7 + $0x150] sm:$0xff] %v2734_v49  ;;  %2815 = vst [vmem:[%s5511_s7 + $0x158] sm:$0xff] %v2735_v21  ;;  %v3506_v10 = vpop.eup %3505  ;;  %3513 = vrsqrt.f32 %v2675_v8 }
 0x2b9   :  { %2816 = vst [vmem:[%s5511_s7 + $0x160] sm:$0xff] %v2736_v50  ;;  %v2737_v62 = vmul.f32 %v3506_v10, %v4980_v41  ;;  %v2738_v38 = vmul.f32 %v3506_v10, %v4983_v15  ;;  %v2739_v25 = vmul.f32 %v3506_v10, %v4997_v11  ;;  %v2740_v57 = vmul.f32 %v3506_v10, %v5773_v35  ;;  %v5774_v15 = vld [vmem:[#allocation5_spill] sm:$0xff] }
 0x2ba   :  { %v2741_v4 = vmul.f32 %v3506_v10, %v5130_v31  ;;  %v5775_v31 = vld [vmem:[#allocation30_spill] sm:$0xff] }
 0x2bb   :  { %2817 = vst [vmem:[%s5511_s7 + $0x168] sm:$0xff] %v2737_v62  ;;  %2818 = vst [vmem:[%s5511_s7 + $0x170] sm:$0xff] %v2738_v38 }
 0x2bc   :  { %2819 = vst [vmem:[%s5511_s7 + $0x178] sm:$0xff] %v2739_v25  ;;  %2820 = vst [vmem:[%s5511_s7 + $0x180] sm:$0xff] %v2740_v57 }
 0x2bd   :  { %2821 = vst [vmem:[%s5511_s7 + $0x188] sm:$0xff] %v2741_v4  ;;  %v3508_v41 = vpop.eup %3507 }
 0x2be   :  { %v2742_v11 = vmul.f32 %v3508_v41, %v5774_v15  ;;  %v2743_v3 = vmul.f32 %v3508_v41, %v5775_v31  ;;  %v2744_v43 = vmul.f32 %v3508_v41, %v5776_v61  ;;  %v2745_v2 = vmul.f32 %v3508_v41, %v5777_v18 }
 0x2bf   :  { %v2746_v63 = vmul.f32 %v3508_v41, %v5155_v1  ;;  %v5778_v1 = vld [vmem:[#allocation6_spill] sm:$0xff] }
 0x2c0   :  { %2822 = vst [vmem:[%s5511_s7 + $0x190] sm:$0xff] %v2742_v11  ;;  %2823 = vst [vmem:[%s5511_s7 + $0x198] sm:$0xff] %v2743_v3 }
 0x2c1   :  { %2824 = vst [vmem:[%s5511_s7 + $0x1a0] sm:$0xff] %v2744_v43  ;;  %2825 = vst [vmem:[%s5511_s7 + $0x1a8] sm:$0xff] %v2745_v2  ;;  %v3510_v24 = vpop.eup %3509 }
 0x2c2   :  { %2826 = vst [vmem:[%s5511_s7 + $0x1b0] sm:$0xff] %v2746_v63  ;;  %v2747_v51 = vmul.f32 %v3510_v24, %v5778_v1  ;;  %v2748_v45 = vmul.f32 %v3510_v24, %v5779_v40  ;;  %v2749_v48 = vmul.f32 %v3510_v24, %v5780_v23  ;;  %v2750_v37 = vmul.f32 %v3510_v24, %v5101_v55  ;;  %v5781_v55 = vld [vmem:[#allocation66_spill] sm:$0xff] }
 0x2c3   :  { %v3512_v34 = vpop.eup %3511  ;;  %v2751_v20 = vmul.f32 %v3510_v24, %v5174_v46 }
 0x2c4   :  { %2827 = vst [vmem:[%s5511_s7 + $0x1b8] sm:$0xff] %v2747_v51  ;;  %2828 = vst [vmem:[%s5511_s7 + $0x1c0] sm:$0xff] %v2748_v45  ;;  %v2762_v6 = vmul.f32 %v3512_v34, %v5781_v55  ;;  %v2763_v46 = vmul.f32 %v3512_v34, %v5782_v39  ;;  %v2764_v59 = vmul.f32 %v3512_v34, %v5109_v53 }
 0x2c5   :  { %2829 = vst [vmem:[%s5511_s7 + $0x1c8] sm:$0xff] %v2749_v48  ;;  %2830 = vst [vmem:[%s5511_s7 + $0x1d0] sm:$0xff] %v2750_v37  ;;  %v2765_v30 = vmul.f32 %v3512_v34, %v5135_v7  ;;  %v3514_v47 = vpop.eup %3513  ;;  %v2766_v56 = vmul.f32 %v3512_v34, %v5151_v9 }
 0x2c6   :  { %2831 = vst [vmem:[%s5511_s7 + $0x1d8] sm:$0xff] %v2751_v20  ;;  %2842 = vst [vmem:[%s5511_s7 + $0x230] sm:$0xff] %v2762_v6  ;;  %v2767_v7 = vmul.f32 %v3514_v47, %v5124_v32  ;;  %v2768_v53 = vmul.f32 %v3514_v47, %v5116_v44  ;;  %v2769_v9 = vmul.f32 %v3514_v47, %v5146_v26 }
 0x2c7   :  { %2843 = vst [vmem:[%s5511_s7 + $0x238] sm:$0xff] %v2763_v46  ;;  %2844 = vst [vmem:[%s5511_s7 + $0x240] sm:$0xff] %v2764_v59  ;;  %v2770_v12 = vmul.f32 %v3514_v47, %v5168_v5  ;;  %v2771_v22 = vmul.f32 %v3514_v47, %v5171_v28 }
 0x2c8   :  { %2845 = vst [vmem:[%s5511_s7 + $0x248] sm:$0xff] %v2765_v30  ;;  %2846 = vst [vmem:[%s5511_s7 + $0x250] sm:$0xff] %v2766_v56 }
 0x2c9   :  { %2847 = vst [vmem:[%s5511_s7 + $0x258] sm:$0xff] %v2767_v7  ;;  %2848 = vst [vmem:[%s5511_s7 + $0x260] sm:$0xff] %v2768_v53 }
 0x2ca   :  { %2849 = vst [vmem:[%s5511_s7 + $0x268] sm:$0xff] %v2769_v9  ;;  %2850 = vst [vmem:[%s5511_s7 + $0x270] sm:$0xff] %v2770_v12 }
 0x2cb   :  { %2851 = vst [vmem:[%s5511_s7 + $0x278] sm:$0xff] %v2771_v22 }

</bundles_post_ra>
